<compile_context>
chip_gen: v7x
topology: tpu7x:2x2x1
jax: 0.10.0
libtpu: 0.0.40
codegen_flags: <defaults>
</compile_context>

<pallas_src>
import functools

import jax
import jax.numpy as jnp
from jax import lax
from jax.experimental import pallas as pl
from jax.experimental.pallas import tpu as pltpu

NEG_SLOPE = 0.1   # LeakyReLU slope of the BasicBlock
BN_EPS = 1e-5     # PyTorch BatchNorm2d default eps

_VMEM_IMG_BUDGET = 20 << 20   # per-step image footprint budget (safe on v7x)


# ----------------------------------------------------------------------------
# Shared BN folding (used by the Pallas wrapper and the JAX reference so the
# bf16 rounding points match exactly).
# ----------------------------------------------------------------------------
def _fold_bn(p, prefix):
    inv = 1.0 / jnp.sqrt(p[prefix + "_var"].astype(jnp.float32) + BN_EPS)
    scale = p[prefix + "_gamma"].astype(jnp.float32) * inv
    bias = (p[prefix + "_beta"].astype(jnp.float32)
            - p[prefix + "_mean"].astype(jnp.float32) * scale)
    return scale, bias


def _pick_batch_block(n, hw, per_image_bytes, target_m=512):
    """Largest useful divisor of n: enough images for M = B*Ho*Wo >= target_m,
    shrunk if the per-step VMEM estimate would blow the budget."""
    divisors = [b for b in range(1, n + 1) if n % b == 0]
    want = max(1, -(-target_m // hw))           # ceil(target_m / hw)
    cands = [b for b in divisors if b >= want]
    b = min(cands) if cands else max(divisors)
    while b > 1 and per_image_bytes * b > _VMEM_IMG_BUDGET:
        smaller = [d for d in divisors if d < b]
        b = max(smaller) if smaller else 1
    return b


def _const_spec(shape, index_map, single_buffer):
    """BlockSpec for a grid-invariant operand; single-buffered when supported."""
    if single_buffer and hasattr(pl, "Buffered"):
        try:
            return pl.BlockSpec(shape, index_map, pipeline_mode=pl.Buffered(1))
        except TypeError:
            pass
    return pl.BlockSpec(shape, index_map)


# ----------------------------------------------------------------------------
# Fused BasicBlock Pallas kernel:
#   BN1+LeakyReLU -> conv1(3x3, stride) -> BN2+LeakyReLU -> conv2(3x3)
#   -> (+ identity / fused 1x1 strided shortcut)
# ----------------------------------------------------------------------------
def _make_block_kernel(*, Hc, Wc, Cin, Cout, stride, B, equal_in_out, apply_bn1,
                       lane_fold):
    s = stride
    Ho, Wo = Hc, Wc                   # 3x3, pad 1, stride folded -> same extent
    QQ = s * s
    M = B * Ho * Wo

    def kernel(*refs):
        if equal_in_out:
            (x_ref, s1_ref, b1_ref, w1_ref, s2_ref, b2_ref, w2_ref,
             o_ref, ppad_ref, pad2_ref) = refs
            ws_ref = None
        else:
            (x_ref, s1_ref, b1_ref, w1_ref, s2_ref, b2_ref, w2_ref, ws_ref,
             o_ref, ppad_ref, pad2_ref) = refs

        f32 = jnp.float32

        # ---- zero ONLY the halo frame (interior is fully overwritten below);
        #      done every step so it is correct under megacore scratch-per-core.
        zr1 = jnp.zeros((QQ, B, 1, Wc + 2, Cin), ppad_ref.dtype)
        zc1 = jnp.zeros((QQ, B, Hc, 1, Cin), ppad_ref.dtype)
        ppad_ref[:, :, 0:1, :, :] = zr1
        ppad_ref[:, :, Hc + 1:Hc + 2, :, :] = zr1
        ppad_ref[:, :, 1:1 + Hc, 0:1, :] = zc1
        ppad_ref[:, :, 1:1 + Hc, Wc + 1:Wc + 2, :] = zc1

        # ---- BN1 + LeakyReLU prologue, one vectorized pass over the whole
        #      (QQ, B, Hc, Wc, Cin) block; cast to MXU dtype at the scratch
        #      write.  (Skipped when the reference discards bn1:
        #      not equal_in_out and not activate_before_residual.)
        xa = x_ref[...].astype(f32)
        if apply_bn1:
            y = xa * s1_ref[0] + b1_ref[0]
            xa = jnp.where(y >= 0, y, NEG_SLOPE * y)
        ppad_ref[:, :, 1:1 + Hc, 1:1 + Wc, :] = xa.astype(ppad_ref.dtype)

        # ---- conv1 (3x3, stride s): nine tap matmuls accumulated in f32.
        #      Tap (ky, kx) of the strided conv is a contiguous slice of parity
        #      slab (py, px) = ((ky-1) % s, (kx-1) % s); no im2col col concat.
        acc = None
        for ky in range(3):
            dy = ky - 1
            py, oy = dy % s, 1 + dy // s
            for kx in range(3):
                dx = kx - 1
                px, ox = dx % s, 1 + dx // s
                q = py * s + px
                tap = ppad_ref[q, :, oy:oy + Ho, ox:ox + Wo, :].reshape(M, Cin)
                d = jnp.dot(tap, w1_ref[ky * 3 + kx], preferred_element_type=f32)
                acc = d if acc is None else acc + d

        # ---- BN2 + LeakyReLU (f32, VPU); cast to MXU dtype at the scratch write
        y2 = acc * s2_ref[0] + b2_ref[0]
        h2 = jnp.where(y2 >= 0, y2, NEG_SLOPE * y2)
        # TODO(synk): dropout > 0 would be inserted here (default p=0.0 => identity).

        zr2 = jnp.zeros((B, 1, Wo + 2, Cout), pad2_ref.dtype)
        zc2 = jnp.zeros((B, Ho, 1, Cout), pad2_ref.dtype)
        pad2_ref[:, 0:1, :, :] = zr2
        pad2_ref[:, Ho + 1:Ho + 2, :, :] = zr2
        pad2_ref[:, 1:1 + Ho, 0:1, :] = zc2
        pad2_ref[:, 1:1 + Ho, Wo + 1:Wo + 2, :] = zc2
        pad2_ref[:, 1:1 + Ho, 1:1 + Wo, :] = (
            h2.reshape(B, Ho, Wo, Cout).astype(pad2_ref.dtype))

        # ---- conv2 (3x3, stride 1): nine tap matmuls accumulated in f32
        out = None
        for ky in range(3):
            for kx in range(3):
                tap = pad2_ref[:, ky:ky + Ho, kx:kx + Wo, :].reshape(M, Cout)
                d = jnp.dot(tap, w2_ref[ky * 3 + kx], preferred_element_type=f32)
                out = d if out is None else out + d

        # ---- residual: identity, or fused 1x1 strided shortcut conv.  The
        #      shortcut input (raw x, or bn1 activation when abr) is exactly the
        #      interior of parity slab 0.
        if equal_in_out:
            res = x_ref[0].astype(f32).reshape(M, Cout)
        else:
            r = ppad_ref[0, :, 1:1 + Ho, 1:1 + Wo, :].reshape(M, Cin)
            res = jnp.dot(r, ws_ref[...], preferred_element_type=f32)
        out = out + res

        # ---- store: lane-dense (B, Ho, Wo*Cout) slab when Cout < 128
        if lane_fold:
            o_ref[...] = out.reshape(B, Ho, Wo * Cout).astype(o_ref.dtype)
        else:
            o_ref[...] = out.reshape(B, Ho, Wo, Cout).astype(o_ref.dtype)

    return kernel


def basic_block_pallas(x, p, stride, activate_before_residual, *,
                       mxu_dtype=jnp.bfloat16, lane_fold=True,
                       single_buffer_consts=True):
    """One fused pre-activation BasicBlock.  x: (N, H, W, Cin) f32 NHWC."""
    N, H, W, Cin = x.shape
    Cout = p["conv2_w"].shape[-1]
    equal = (Cin == Cout)
    s = int(stride)
    if s > 1:
        assert not equal, "WRN BasicBlock: stride > 1 implies a channel change"
        assert H % s == 0 and W % s == 0
    apply_bn1 = equal or activate_before_residual
    Hc, Wc = H // s, W // s
    Ho, Wo = Hc, Wc
    QQ = s * s

    # Space-to-batch into stride-parity slabs, laid out (QQ, N, Hc, Wc, Cin) so
    # every strided-conv tap is a contiguous VMEM slice (trivial for s == 1).
    if s == 1:
        xs = x[None]
    else:
        xs = jnp.stack([x[:, py::s, px::s, :]
                        for py in range(s) for px in range(s)], axis=0)

    # Fold BN into per-channel scale/bias (f32 math; bf16 only at the MXU).
    if apply_bn1:
        s1, b1 = _fold_bn(p, "bn1")
    else:
        s1, b1 = jnp.ones((Cin,), jnp.float32), jnp.zeros((Cin,), jnp.float32)
    s2, b2 = _fold_bn(p, "bn2")
    s1, b1 = s1.reshape(1, Cin), b1.reshape(1, Cin)
    s2, b2 = s2.reshape(1, Cout), b2.reshape(1, Cout)

    # Per-tap weight layout: (9, Cin, Cout) / (9, Cout, Cout).
    w1 = p["conv1_w"].reshape(9, Cin, Cout).astype(mxu_dtype)
    w2 = p["conv2_w"].reshape(9, Cout, Cout).astype(mxu_dtype)

    # ---- batch blocking + explicit VMEM budget
    itemsize = jnp.dtype(mxu_dtype).itemsize
    per_img = (QQ * Hc * Wc * Cin * 4 * 2                       # x block (x2 buf)
               + Ho * Wo * Cout * 4 * 2                         # out block (x2 buf)
               + QQ * (Hc + 2) * (Wc + 2) * Cin * itemsize      # ppad scratch
               + (Ho + 2) * (Wo + 2) * Cout * itemsize          # pad2 scratch
               + 4 * Ho * Wo * Cout * 4)                        # live f32 temps
    B = _pick_batch_block(N, Ho * Wo, per_img)
    grid = (N // B,)

    w_bytes = (9 * Cin * Cout + 9 * Cout * Cout
               + (0 if equal else Cin * Cout)) * itemsize
    w_bytes *= 1 if single_buffer_consts else 2
    est = per_img * B + w_bytes
    vmem_limit = int(min(max(2 * est + (8 << 20), 32 << 20), 48 << 20))

    c2 = lambda n: (0, 0)
    c3 = lambda n: (0, 0, 0)
    args = [xs, s1, b1, w1, s2, b2, w2]
    in_specs = [
        pl.BlockSpec((QQ, B, Hc, Wc, Cin), lambda n: (0, n, 0, 0, 0)),
        _const_spec((1, Cin), c2, single_buffer_consts),
        _const_spec((1, Cin), c2, single_buffer_consts),
        _const_spec((9, Cin, Cout), c3, single_buffer_consts),
        _const_spec((1, Cout), c2, single_buffer_consts),
        _const_spec((1, Cout), c2, single_buffer_consts),
        _const_spec((9, Cout, Cout), c3, single_buffer_consts),
    ]
    if not equal:
        ws = p["convs_w"].reshape(Cin, Cout).astype(mxu_dtype)
        args.append(ws)
        in_specs.append(_const_spec((Cin, Cout), c2, single_buffer_consts))

    fold = bool(lane_fold) and (Cout % 128 != 0)
    if fold:
        out_shape = jax.ShapeDtypeStruct((N, Ho, Wo * Cout), x.dtype)
        out_spec = pl.BlockSpec((B, Ho, Wo * Cout), lambda n: (n, 0, 0))
    else:
        out_shape = jax.ShapeDtypeStruct((N, Ho, Wo, Cout), x.dtype)
        out_spec = pl.BlockSpec((B, Ho, Wo, Cout), lambda n: (n, 0, 0, 0))

    kernel = _make_block_kernel(
        Hc=Hc, Wc=Wc, Cin=Cin, Cout=Cout, stride=s, B=B,
        equal_in_out=equal, apply_bn1=apply_bn1, lane_fold=fold)

    y = pl.pallas_call(
        kernel,
        out_shape=out_shape,
        grid=grid,
        in_specs=in_specs,
        out_specs=out_spec,
        scratch_shapes=[
            pltpu.VMEM((QQ, B, Hc + 2, Wc + 2, Cin), mxu_dtype),  # padded conv1 in
            pltpu.VMEM((B, Ho + 2, Wo + 2, Cout), mxu_dtype),     # padded conv2 in
        ],
        compiler_params=pltpu.CompilerParams(
            dimension_semantics=("parallel",),
            vmem_limit_bytes=vmem_limit),
    )(*args)
    if fold:
        y = y.reshape(N, Ho, Wo, Cout)
    return y


# ----------------------------------------------------------------------------
# NetworkBlock forward (Pallas) + pure-JAX reference with matching rounding
# ----------------------------------------------------------------------------
@functools.partial(jax.jit, static_argnames=(
    "stride", "activate_before_residual", "mxu_dtype", "lane_fold",
    "single_buffer_consts"))
def network_block_forward_nchw(x_nchw, params, *, stride, activate_before_residual,
                               mxu_dtype=jnp.bfloat16, lane_fold=True,
                               single_buffer_consts=True):
    x = jnp.transpose(x_nchw, (0, 2, 3, 1))           # NCHW -> NHWC
    for i, p in enumerate(params):
        s = stride if i == 0 else 1
        x = basic_block_pallas(x, p, s, activate_before_residual,
                               mxu_dtype=mxu_dtype, lane_fold=lane_fold,
                               single_buffer_consts=single_buffer_consts)
    return jnp.transpose(x, (0, 3, 1, 2))             # NHWC -> NCHW


def _bn_lrelu_ref(x, p, prefix):
    scale, bias = _fold_bn(p, prefix)
    y = x * scale + bias
    return jnp.where(y >= 0, y, NEG_SLOPE * y)


def _conv_ref(x, w, stride, padding, mxu_dtype):
    return lax.conv_general_dilated(
        x.astype(mxu_dtype), w.astype(mxu_dtype), (stride, stride),
        [(padding, padding), (padding, padding)],
        dimension_numbers=("NHWC", "HWIO", "NHWC"),
        preferred_element_type=jnp.float32)


def basic_block_ref(x, p, stride, activate_before_residual, mxu_dtype):
    cin, cout = x.shape[-1], p["conv2_w"].shape[-1]
    equal = (cin == cout)
    if (not equal) and activate_before_residual:
        x = _bn_lrelu_ref(x, p, "bn1")
        conv1_in = x
    elif equal:
        conv1_in = _bn_lrelu_ref(x, p, "bn1")
    else:
        conv1_in = x   # reference computes bn1 but discards it (value-equivalent skip)
    h = _conv_ref(conv1_in, p["conv1_w"], stride, 1, mxu_dtype)
    h = _bn_lrelu_ref(h, p, "bn2")
    h = _conv_ref(h, p["conv2_w"], 1, 1, mxu_dtype)
    shortcut = x if equal else _conv_ref(x, p["convs_w"], stride, 0, mxu_dtype)
    return (h + shortcut).astype(x.dtype)


@functools.partial(jax.jit, static_argnames=("stride", "activate_before_residual",
                                             "mxu_dtype"))
def network_block_ref_nchw(x_nchw, params, *, stride, activate_before_residual,
                           mxu_dtype=jnp.bfloat16):
    x = jnp.transpose(x_nchw, (0, 2, 3, 1))
    for i, p in enumerate(params):
        s = stride if i == 0 else 1
        x = basic_block_ref(x, p, s, activate_before_residual, mxu_dtype)
    return jnp.transpose(x, (0, 3, 1, 2))


# ----------------------------------------------------------------------------
# Deterministic parameter init (same shapes NetworkBlock.__init__ creates)
# ----------------------------------------------------------------------------
def init_network_block_params(key, num_layers, in_planes, out_planes):
    params = []
    for i in range(int(num_layers)):
        inp = in_planes if i == 0 else out_planes
        key, *ks = jax.random.split(key, 12)
        p = {
            "bn1_gamma": 1.0 + 0.1 * jax.random.normal(ks[0], (inp,), jnp.float32),
            "bn1_beta": 0.1 * jax.random.normal(ks[1], (inp,), jnp.float32),
            "bn1_mean": 0.1 * jax.random.normal(ks[2], (inp,), jnp.float32),
            "bn1_var": jax.random.uniform(ks[3], (inp,), jnp.float32, 0.5, 1.5),
            "conv1_w": jax.random.normal(ks[4], (3, 3, inp, out_planes), jnp.float32)
            * (2.0 / (9 * inp)) ** 0.5,
            "bn2_gamma": 1.0 + 0.1 * jax.random.normal(ks[5], (out_planes,), jnp.float32),
            "bn2_beta": 0.1 * jax.random.normal(ks[6], (out_planes,), jnp.float32),
            "bn2_mean": 0.1 * jax.random.normal(ks[7], (out_planes,), jnp.float32),
            "bn2_var": jax.random.uniform(ks[8], (out_planes,), jnp.float32, 0.5, 1.5),
            "conv2_w": jax.random.normal(ks[9], (3, 3, out_planes, out_planes),
                                         jnp.float32) * (2.0 / (9 * out_planes)) ** 0.5,
        }
        if inp != out_planes:
            p["convs_w"] = jax.random.normal(ks[10], (1, 1, inp, out_planes),
                                             jnp.float32) * (2.0 / inp) ** 0.5
        params.append(p)
    return params


# ----------------------------------------------------------------------------
if __name__ == "__main__":
    # NetworkBlock(num_layers=2, in_planes=8, out_planes=16, block=BasicBlock,
    #              stride=2, dropout=0.0, activate_before_residual=True)
    N, C_IN, H, W = 2, 8, 16, 16
    C_OUT, NUM_LAYERS, STRIDE = 16, 2, 2

    key = jax.random.PRNGKey(0)
    kx, kp1, kp2 = jax.random.split(key, 3)
    x_nchw = jax.random.normal(kx, (N, C_IN, H, W), jnp.float32)

    configs = [
        # (name, params, stride, activate_before_residual)
        ("stride2_abr", init_network_block_params(kp1, NUM_LAYERS, C_IN, C_OUT), STRIDE, True),
        ("stride1_noabr", init_network_block_params(kp2, 1, C_IN, C_OUT), 1, False),
    ]
    checks = [(jnp.float32, 2e-4, 2e-4),    # exact-semantics path
              (jnp.bfloat16, 6e-3, 6e-3)]   # bf16-MXU fast path (ref rounding points)

    def run_all(lane_fold, single_buffer_consts):
        for name, prm, stride, abr in configs:
            for mxu_dtype, rtol, atol in checks:
                y = network_block_forward_nchw(
                    x_nchw, prm, stride=stride, activate_before_residual=abr,
                    mxu_dtype=mxu_dtype, lane_fold=lane_fold,
                    single_buffer_consts=single_buffer_consts)
                y_ref = network_block_ref_nchw(
                    x_nchw, prm, stride=stride, activate_before_residual=abr,
                    mxu_dtype=mxu_dtype)
                y = jax.block_until_ready(y)
                y_ref = jax.block_until_ready(y_ref)
                assert y.shape == y_ref.shape, (name, y.shape, y_ref.shape)
                if not jnp.allclose(y, y_ref, rtol=rtol, atol=atol):
                    err = float(jnp.max(jnp.abs(y - y_ref)))
                    raise AssertionError(
                        f"{name} mxu={jnp.dtype(mxu_dtype).name}: mismatch vs JAX "
                        f"reference, max abs err {err:.3e}")

    try:
        run_all(lane_fold=True, single_buffer_consts=True)
    except AssertionError:
        raise
    except Exception:
        # Conservative fallback for environments where pl.Buffered(1) or the
        # lane-dense output fold does not lower; numerics are unaffected.
        run_all(lane_fold=False, single_buffer_consts=False)

    print("KERNEL_OK")
</pallas_src>

<mosaic_0001>
module attributes {stable_mosaic.version = 11 : i64} {
  func.func @kernel(%arg0: i32, %arg1: memref<4x2x8x8x8xf32, #tpu.memory_space<vmem>>, %arg2: memref<1x8xf32, #tpu.memory_space<vmem>>, %arg3: memref<1x8xf32, #tpu.memory_space<vmem>>, %arg4: memref<9x8x16xf32, #tpu.memory_space<vmem>>, %arg5: memref<1x16xf32, #tpu.memory_space<vmem>>, %arg6: memref<1x16xf32, #tpu.memory_space<vmem>>, %arg7: memref<9x16x16xf32, #tpu.memory_space<vmem>>, %arg8: memref<8x16xf32, #tpu.memory_space<vmem>>, %arg9: memref<2x8x128xf32, #tpu.memory_space<vmem>>, %arg10: memref<4x2x10x10x8xf32, #tpu.memory_space<vmem>>, %arg11: memref<2x10x10x16xf32, #tpu.memory_space<vmem>>) attributes {dimension_semantics = [#tpu.dimension_semantics<parallel>], iteration_bounds = array<i64: 1>, scalar_prefetch = 0 : i64, scratch_operands = 2 : i64, tpu.core_type = #tpu.core_type<tc>, window_params = [{transform_indices = @transform_0, window_bounds = array<i64: 4, 2, 8, 8, 8>}, {pipeline_mode = #tpu.pipeline_mode<synchronous>, transform_indices = @transform_1, window_bounds = array<i64: 1, 8>}, {pipeline_mode = #tpu.pipeline_mode<synchronous>, transform_indices = @transform_2, window_bounds = array<i64: 1, 8>}, {pipeline_mode = #tpu.pipeline_mode<synchronous>, transform_indices = @transform_3, window_bounds = array<i64: 9, 8, 16>}, {pipeline_mode = #tpu.pipeline_mode<synchronous>, transform_indices = @transform_4, window_bounds = array<i64: 1, 16>}, {pipeline_mode = #tpu.pipeline_mode<synchronous>, transform_indices = @transform_5, window_bounds = array<i64: 1, 16>}, {pipeline_mode = #tpu.pipeline_mode<synchronous>, transform_indices = @transform_6, window_bounds = array<i64: 9, 16, 16>}, {pipeline_mode = #tpu.pipeline_mode<synchronous>, transform_indices = @transform_7, window_bounds = array<i64: 8, 16>}, {transform_indices = @transform_8, window_bounds = array<i64: 2, 8, 128>}]} {
    %cst = arith.constant 0.000000e+00 : f32
    %0 = vector.broadcast %cst : f32 to vector<4x2x1x10x8xf32>
    %cst_0 = arith.constant 0.000000e+00 : f32
    %1 = vector.broadcast %cst_0 : f32 to vector<4x2x8x1x8xf32>
    %c0 = arith.constant 0 : index
    %c0_1 = arith.constant 0 : index
    %c0_2 = arith.constant 0 : index
    %c0_3 = arith.constant 0 : index
    %c0_4 = arith.constant 0 : index
    %2 = vector.load %arg10[%c0, %c0_1, %c0_2, %c0_3, %c0_4] : memref<4x2x10x10x8xf32, #tpu.memory_space<vmem>>, vector<4x2x1x10x8xf32>
    tpu.vector_store %arg10[%c0, %c0_1, %c0_2, %c0_3, %c0_4], %0 {strides = array<i32>} : memref<4x2x10x10x8xf32, #tpu.memory_space<vmem>>, vector<4x2x1x10x8xf32>,
    %c0_5 = arith.constant 0 : index
    %c0_6 = arith.constant 0 : index
    %c9 = arith.constant 9 : index
    %c0_7 = arith.constant 0 : index
    %c0_8 = arith.constant 0 : index
    %3 = vector.load %arg10[%c0_5, %c0_6, %c9, %c0_7, %c0_8] : memref<4x2x10x10x8xf32, #tpu.memory_space<vmem>>, vector<4x2x1x10x8xf32>
    tpu.vector_store %arg10[%c0_5, %c0_6, %c9, %c0_7, %c0_8], %0 {strides = array<i32>} : memref<4x2x10x10x8xf32, #tpu.memory_space<vmem>>, vector<4x2x1x10x8xf32>,
    %c0_9 = arith.constant 0 : index
    %c0_10 = arith.constant 0 : index
    %c1 = arith.constant 1 : index
    %c0_11 = arith.constant 0 : index
    %c0_12 = arith.constant 0 : index
    %4 = vector.load %arg10[%c0_9, %c0_10, %c1, %c0_11, %c0_12] : memref<4x2x10x10x8xf32, #tpu.memory_space<vmem>>, vector<4x2x8x1x8xf32>
    tpu.vector_store %arg10[%c0_9, %c0_10, %c1, %c0_11, %c0_12], %1 {strides = array<i32>} : memref<4x2x10x10x8xf32, #tpu.memory_space<vmem>>, vector<4x2x8x1x8xf32>,
    %c0_13 = arith.constant 0 : index
    %c0_14 = arith.constant 0 : index
    %c1_15 = arith.constant 1 : index
    %c9_16 = arith.constant 9 : index
    %c0_17 = arith.constant 0 : index
    %5 = vector.load %arg10[%c0_13, %c0_14, %c1_15, %c9_16, %c0_17] : memref<4x2x10x10x8xf32, #tpu.memory_space<vmem>>, vector<4x2x8x1x8xf32>
    tpu.vector_store %arg10[%c0_13, %c0_14, %c1_15, %c9_16, %c0_17], %1 {strides = array<i32>} : memref<4x2x10x10x8xf32, #tpu.memory_space<vmem>>, vector<4x2x8x1x8xf32>,
    %c0_18 = arith.constant 0 : index
    %c0_19 = arith.constant 0 : index
    %c0_20 = arith.constant 0 : index
    %c0_21 = arith.constant 0 : index
    %c0_22 = arith.constant 0 : index
    %6 = vector.load %arg1[%c0_18, %c0_19, %c0_20, %c0_21, %c0_22] : memref<4x2x8x8x8xf32, #tpu.memory_space<vmem>>, vector<4x2x8x8x8xf32>
    %c0_23 = arith.constant 0 : index
    %c0_24 = arith.constant 0 : index
    %7 = vector.load %arg2[%c0_23, %c0_24] : memref<1x8xf32, #tpu.memory_space<vmem>>, vector<1x8xf32>
    %8 = vector.shape_cast %7 : vector<1x8xf32> to vector<8xf32>
    %9 = vector.shape_cast %8 : vector<8xf32> to vector<1x1x1x1x8xf32>
    %10 = vector.broadcast %9 : vector<1x1x1x1x8xf32> to vector<4x2x8x8x8xf32>
    %11 = arith.mulf %6, %10 : vector<4x2x8x8x8xf32>
    %c0_25 = arith.constant 0 : index
    %c0_26 = arith.constant 0 : index
    %12 = vector.load %arg3[%c0_25, %c0_26] : memref<1x8xf32, #tpu.memory_space<vmem>>, vector<1x8xf32>
    %13 = vector.shape_cast %12 : vector<1x8xf32> to vector<8xf32>
    %14 = vector.shape_cast %13 : vector<8xf32> to vector<1x1x1x1x8xf32>
    %15 = vector.broadcast %14 : vector<1x1x1x1x8xf32> to vector<4x2x8x8x8xf32>
    %16 = arith.addf %11, %15 : vector<4x2x8x8x8xf32>
    %cst_27 = arith.constant 0.000000e+00 : f32
    %17 = vector.broadcast %cst_27 : f32 to vector<4x2x8x8x8xf32>
    %18 = arith.cmpf oge, %16, %17 : vector<4x2x8x8x8xf32>
    %cst_28 = arith.constant 1.000000e-01 : f32
    %19 = vector.broadcast %cst_28 : f32 to vector<4x2x8x8x8xf32>
    %20 = arith.mulf %19, %16 : vector<4x2x8x8x8xf32>
    %21 = arith.select %18, %16, %20 : vector<4x2x8x8x8xi1>, vector<4x2x8x8x8xf32>
    %c0_29 = arith.constant 0 : index
    %c0_30 = arith.constant 0 : index
    %c1_31 = arith.constant 1 : index
    %c1_32 = arith.constant 1 : index
    %c0_33 = arith.constant 0 : index
    %22 = vector.load %arg10[%c0_29, %c0_30, %c1_31, %c1_32, %c0_33] : memref<4x2x10x10x8xf32, #tpu.memory_space<vmem>>, vector<4x2x8x8x8xf32>
    tpu.vector_store %arg10[%c0_29, %c0_30, %c1_31, %c1_32, %c0_33], %21 {strides = array<i32>} : memref<4x2x10x10x8xf32, #tpu.memory_space<vmem>>, vector<4x2x8x8x8xf32>,
    %c3 = arith.constant 3 : index
    %c0_34 = arith.constant 0 : index
    %c0_35 = arith.constant 0 : index
    %c0_36 = arith.constant 0 : index
    %c0_37 = arith.constant 0 : index
    %23 = vector.load %arg10[%c3, %c0_34, %c0_35, %c0_36, %c0_37] : memref<4x2x10x10x8xf32, #tpu.memory_space<vmem>>, vector<1x2x8x8x8xf32>
    %24 = vector.shape_cast %23 : vector<1x2x8x8x8xf32> to vector<2x8x8x8xf32>
    %25 = vector.shape_cast %24 : vector<2x8x8x8xf32> to vector<128x8xf32>
    %c0_38 = arith.constant 0 : index
    %c0_39 = arith.constant 0 : index
    %c0_40 = arith.constant 0 : index
    %26 = vector.load %arg4[%c0_38, %c0_39, %c0_40] : memref<9x8x16xf32, #tpu.memory_space<vmem>>, vector<1x8x16xf32>
    %27 = vector.shape_cast %26 : vector<1x8x16xf32> to vector<8x16xf32>
    %cst_41 = arith.constant dense<0.000000e+00> : vector<128x16xf32>
    %28 = tpu.matmul %25, %27, %cst_41 {dimension_numbers = #tpu.dot_dimension_numbers<[1], [0], [0], [1], [0, 0, 1, 1], [], []>} : vector<128x8xf32>, vector<8x16xf32>, vector<128x16xf32> -> vector<128x16xf32>
    %c2 = arith.constant 2 : index
    %c0_42 = arith.constant 0 : index
    %c0_43 = arith.constant 0 : index
    %c1_44 = arith.constant 1 : index
    %c0_45 = arith.constant 0 : index
    %29 = vector.load %arg10[%c2, %c0_42, %c0_43, %c1_44, %c0_45] : memref<4x2x10x10x8xf32, #tpu.memory_space<vmem>>, vector<1x2x8x8x8xf32>
    %30 = vector.shape_cast %29 : vector<1x2x8x8x8xf32> to vector<2x8x8x8xf32>
    %31 = vector.shape_cast %30 : vector<2x8x8x8xf32> to vector<128x8xf32>
    %c1_46 = arith.constant 1 : index
    %c0_47 = arith.constant 0 : index
    %c0_48 = arith.constant 0 : index
    %32 = vector.load %arg4[%c1_46, %c0_47, %c0_48] : memref<9x8x16xf32, #tpu.memory_space<vmem>>, vector<1x8x16xf32>
    %33 = vector.shape_cast %32 : vector<1x8x16xf32> to vector<8x16xf32>
    %cst_49 = arith.constant dense<0.000000e+00> : vector<128x16xf32>
    %34 = tpu.matmul %31, %33, %cst_49 {dimension_numbers = #tpu.dot_dimension_numbers<[1], [0], [0], [1], [0, 0, 1, 1], [], []>} : vector<128x8xf32>, vector<8x16xf32>, vector<128x16xf32> -> vector<128x16xf32>
    %35 = arith.addf %28, %34 : vector<128x16xf32>
    %c3_50 = arith.constant 3 : index
    %c0_51 = arith.constant 0 : index
    %c0_52 = arith.constant 0 : index
    %c1_53 = arith.constant 1 : index
    %c0_54 = arith.constant 0 : index
    %36 = vector.load %arg10[%c3_50, %c0_51, %c0_52, %c1_53, %c0_54] : memref<4x2x10x10x8xf32, #tpu.memory_space<vmem>>, vector<1x2x8x8x8xf32>
    %37 = vector.shape_cast %36 : vector<1x2x8x8x8xf32> to vector<2x8x8x8xf32>
    %38 = vector.shape_cast %37 : vector<2x8x8x8xf32> to vector<128x8xf32>
    %c2_55 = arith.constant 2 : index
    %c0_56 = arith.constant 0 : index
    %c0_57 = arith.constant 0 : index
    %39 = vector.load %arg4[%c2_55, %c0_56, %c0_57] : memref<9x8x16xf32, #tpu.memory_space<vmem>>, vector<1x8x16xf32>
    %40 = vector.shape_cast %39 : vector<1x8x16xf32> to vector<8x16xf32>
    %cst_58 = arith.constant dense<0.000000e+00> : vector<128x16xf32>
    %41 = tpu.matmul %38, %40, %cst_58 {dimension_numbers = #tpu.dot_dimension_numbers<[1], [0], [0], [1], [0, 0, 1, 1], [], []>} : vector<128x8xf32>, vector<8x16xf32>, vector<128x16xf32> -> vector<128x16xf32>
    %42 = arith.addf %35, %41 : vector<128x16xf32>
    %c1_59 = arith.constant 1 : index
    %c0_60 = arith.constant 0 : index
    %c1_61 = arith.constant 1 : index
    %c0_62 = arith.constant 0 : index
    %c0_63 = arith.constant 0 : index
    %43 = vector.load %arg10[%c1_59, %c0_60, %c1_61, %c0_62, %c0_63] : memref<4x2x10x10x8xf32, #tpu.memory_space<vmem>>, vector<1x2x8x8x8xf32>
    %44 = vector.shape_cast %43 : vector<1x2x8x8x8xf32> to vector<2x8x8x8xf32>
    %45 = vector.shape_cast %44 : vector<2x8x8x8xf32> to vector<128x8xf32>
    %c3_64 = arith.constant 3 : index
    %c0_65 = arith.constant 0 : index
    %c0_66 = arith.constant 0 : index
    %46 = vector.load %arg4[%c3_64, %c0_65, %c0_66] : memref<9x8x16xf32, #tpu.memory_space<vmem>>, vector<1x8x16xf32>
    %47 = vector.shape_cast %46 : vector<1x8x16xf32> to vector<8x16xf32>
    %cst_67 = arith.constant dense<0.000000e+00> : vector<128x16xf32>
    %48 = tpu.matmul %45, %47, %cst_67 {dimension_numbers = #tpu.dot_dimension_numbers<[1], [0], [0], [1], [0, 0, 1, 1], [], []>} : vector<128x8xf32>, vector<8x16xf32>, vector<128x16xf32> -> vector<128x16xf32>
    %49 = arith.addf %42, %48 : vector<128x16xf32>
    %c0_68 = arith.constant 0 : index
    %c0_69 = arith.constant 0 : index
    %c1_70 = arith.constant 1 : index
    %c1_71 = arith.constant 1 : index
    %c0_72 = arith.constant 0 : index
    %50 = vector.load %arg10[%c0_68, %c0_69, %c1_70, %c1_71, %c0_72] : memref<4x2x10x10x8xf32, #tpu.memory_space<vmem>>, vector<1x2x8x8x8xf32>
    %51 = vector.shape_cast %50 : vector<1x2x8x8x8xf32> to vector<2x8x8x8xf32>
    %52 = vector.shape_cast %51 : vector<2x8x8x8xf32> to vector<128x8xf32>
    %c4 = arith.constant 4 : index
    %c0_73 = arith.constant 0 : index
    %c0_74 = arith.constant 0 : index
    %53 = vector.load %arg4[%c4, %c0_73, %c0_74] : memref<9x8x16xf32, #tpu.memory_space<vmem>>, vector<1x8x16xf32>
    %54 = vector.shape_cast %53 : vector<1x8x16xf32> to vector<8x16xf32>
    %cst_75 = arith.constant dense<0.000000e+00> : vector<128x16xf32>
    %55 = tpu.matmul %52, %54, %cst_75 {dimension_numbers = #tpu.dot_dimension_numbers<[1], [0], [0], [1], [0, 0, 1, 1], [], []>} : vector<128x8xf32>, vector<8x16xf32>, vector<128x16xf32> -> vector<128x16xf32>
    %56 = arith.addf %49, %55 : vector<128x16xf32>
    %c1_76 = arith.constant 1 : index
    %c0_77 = arith.constant 0 : index
    %c1_78 = arith.constant 1 : index
    %c1_79 = arith.constant 1 : index
    %c0_80 = arith.constant 0 : index
    %57 = vector.load %arg10[%c1_76, %c0_77, %c1_78, %c1_79, %c0_80] : memref<4x2x10x10x8xf32, #tpu.memory_space<vmem>>, vector<1x2x8x8x8xf32>
    %58 = vector.shape_cast %57 : vector<1x2x8x8x8xf32> to vector<2x8x8x8xf32>
    %59 = vector.shape_cast %58 : vector<2x8x8x8xf32> to vector<128x8xf32>
    %c5 = arith.constant 5 : index
    %c0_81 = arith.constant 0 : index
    %c0_82 = arith.constant 0 : index
    %60 = vector.load %arg4[%c5, %c0_81, %c0_82] : memref<9x8x16xf32, #tpu.memory_space<vmem>>, vector<1x8x16xf32>
    %61 = vector.shape_cast %60 : vector<1x8x16xf32> to vector<8x16xf32>
    %cst_83 = arith.constant dense<0.000000e+00> : vector<128x16xf32>
    %62 = tpu.matmul %59, %61, %cst_83 {dimension_numbers = #tpu.dot_dimension_numbers<[1], [0], [0], [1], [0, 0, 1, 1], [], []>} : vector<128x8xf32>, vector<8x16xf32>, vector<128x16xf32> -> vector<128x16xf32>
    %63 = arith.addf %56, %62 : vector<128x16xf32>
    %c3_84 = arith.constant 3 : index
    %c0_85 = arith.constant 0 : index
    %c1_86 = arith.constant 1 : index
    %c0_87 = arith.constant 0 : index
    %c0_88 = arith.constant 0 : index
    %64 = vector.load %arg10[%c3_84, %c0_85, %c1_86, %c0_87, %c0_88] : memref<4x2x10x10x8xf32, #tpu.memory_space<vmem>>, vector<1x2x8x8x8xf32>
    %65 = vector.shape_cast %64 : vector<1x2x8x8x8xf32> to vector<2x8x8x8xf32>
    %66 = vector.shape_cast %65 : vector<2x8x8x8xf32> to vector<128x8xf32>
    %c6 = arith.constant 6 : index
    %c0_89 = arith.constant 0 : index
    %c0_90 = arith.constant 0 : index
    %67 = vector.load %arg4[%c6, %c0_89, %c0_90] : memref<9x8x16xf32, #tpu.memory_space<vmem>>, vector<1x8x16xf32>
    %68 = vector.shape_cast %67 : vector<1x8x16xf32> to vector<8x16xf32>
    %cst_91 = arith.constant dense<0.000000e+00> : vector<128x16xf32>
    %69 = tpu.matmul %66, %68, %cst_91 {dimension_numbers = #tpu.dot_dimension_numbers<[1], [0], [0], [1], [0, 0, 1, 1], [], []>} : vector<128x8xf32>, vector<8x16xf32>, vector<128x16xf32> -> vector<128x16xf32>
    %70 = arith.addf %63, %69 : vector<128x16xf32>
    %c2_92 = arith.constant 2 : index
    %c0_93 = arith.constant 0 : index
    %c1_94 = arith.constant 1 : index
    %c1_95 = arith.constant 1 : index
    %c0_96 = arith.constant 0 : index
    %71 = vector.load %arg10[%c2_92, %c0_93, %c1_94, %c1_95, %c0_96] : memref<4x2x10x10x8xf32, #tpu.memory_space<vmem>>, vector<1x2x8x8x8xf32>
    %72 = vector.shape_cast %71 : vector<1x2x8x8x8xf32> to vector<2x8x8x8xf32>
    %73 = vector.shape_cast %72 : vector<2x8x8x8xf32> to vector<128x8xf32>
    %c7 = arith.constant 7 : index
    %c0_97 = arith.constant 0 : index
    %c0_98 = arith.constant 0 : index
    %74 = vector.load %arg4[%c7, %c0_97, %c0_98] : memref<9x8x16xf32, #tpu.memory_space<vmem>>, vector<1x8x16xf32>
    %75 = vector.shape_cast %74 : vector<1x8x16xf32> to vector<8x16xf32>
    %cst_99 = arith.constant dense<0.000000e+00> : vector<128x16xf32>
    %76 = tpu.matmul %73, %75, %cst_99 {dimension_numbers = #tpu.dot_dimension_numbers<[1], [0], [0], [1], [0, 0, 1, 1], [], []>} : vector<128x8xf32>, vector<8x16xf32>, vector<128x16xf32> -> vector<128x16xf32>
    %77 = arith.addf %70, %76 : vector<128x16xf32>
    %c3_100 = arith.constant 3 : index
    %c0_101 = arith.constant 0 : index
    %c1_102 = arith.constant 1 : index
    %c1_103 = arith.constant 1 : index
    %c0_104 = arith.constant 0 : index
    %78 = vector.load %arg10[%c3_100, %c0_101, %c1_102, %c1_103, %c0_104] : memref<4x2x10x10x8xf32, #tpu.memory_space<vmem>>, vector<1x2x8x8x8xf32>
    %79 = vector.shape_cast %78 : vector<1x2x8x8x8xf32> to vector<2x8x8x8xf32>
    %80 = vector.shape_cast %79 : vector<2x8x8x8xf32> to vector<128x8xf32>
    %c8 = arith.constant 8 : index
    %c0_105 = arith.constant 0 : index
    %c0_106 = arith.constant 0 : index
    %81 = vector.load %arg4[%c8, %c0_105, %c0_106] : memref<9x8x16xf32, #tpu.memory_space<vmem>>, vector<1x8x16xf32>
    %82 = vector.shape_cast %81 : vector<1x8x16xf32> to vector<8x16xf32>
    %cst_107 = arith.constant dense<0.000000e+00> : vector<128x16xf32>
    %83 = tpu.matmul %80, %82, %cst_107 {dimension_numbers = #tpu.dot_dimension_numbers<[1], [0], [0], [1], [0, 0, 1, 1], [], []>} : vector<128x8xf32>, vector<8x16xf32>, vector<128x16xf32> -> vector<128x16xf32>
    %84 = arith.addf %77, %83 : vector<128x16xf32>
    %c0_108 = arith.constant 0 : index
    %c0_109 = arith.constant 0 : index
    %85 = vector.load %arg5[%c0_108, %c0_109] : memref<1x16xf32, #tpu.memory_space<vmem>>, vector<1x16xf32>
    %86 = vector.shape_cast %85 : vector<1x16xf32> to vector<16xf32>
    %87 = vector.shape_cast %86 : vector<16xf32> to vector<1x16xf32>
    %88 = vector.broadcast %87 : vector<1x16xf32> to vector<128x16xf32>
    %89 = arith.mulf %84, %88 : vector<128x16xf32>
    %c0_110 = arith.constant 0 : index
    %c0_111 = arith.constant 0 : index
    %90 = vector.load %arg6[%c0_110, %c0_111] : memref<1x16xf32, #tpu.memory_space<vmem>>, vector<1x16xf32>
    %91 = vector.shape_cast %90 : vector<1x16xf32> to vector<16xf32>
    %92 = vector.shape_cast %91 : vector<16xf32> to vector<1x16xf32>
    %93 = vector.broadcast %92 : vector<1x16xf32> to vector<128x16xf32>
    %94 = arith.addf %89, %93 : vector<128x16xf32>
    %cst_112 = arith.constant 0.000000e+00 : f32
    %95 = vector.broadcast %cst_112 : f32 to vector<128x16xf32>
    %96 = arith.cmpf oge, %94, %95 : vector<128x16xf32>
    %cst_113 = arith.constant 1.000000e-01 : f32
    %97 = vector.broadcast %cst_113 : f32 to vector<128x16xf32>
    %98 = arith.mulf %97, %94 : vector<128x16xf32>
    %99 = arith.select %96, %94, %98 : vector<128x16xi1>, vector<128x16xf32>
    %cst_114 = arith.constant 0.000000e+00 : f32
    %100 = vector.broadcast %cst_114 : f32 to vector<2x1x10x16xf32>
    %cst_115 = arith.constant 0.000000e+00 : f32
    %101 = vector.broadcast %cst_115 : f32 to vector<2x8x1x16xf32>
    %c0_116 = arith.constant 0 : index
    %c0_117 = arith.constant 0 : index
    %c0_118 = arith.constant 0 : index
    %c0_119 = arith.constant 0 : index
    %102 = vector.load %arg11[%c0_116, %c0_117, %c0_118, %c0_119] : memref<2x10x10x16xf32, #tpu.memory_space<vmem>>, vector<2x1x10x16xf32>
    tpu.vector_store %arg11[%c0_116, %c0_117, %c0_118, %c0_119], %100 {strides = array<i32>} : memref<2x10x10x16xf32, #tpu.memory_space<vmem>>, vector<2x1x10x16xf32>,
    %c0_120 = arith.constant 0 : index
    %c9_121 = arith.constant 9 : index
    %c0_122 = arith.constant 0 : index
    %c0_123 = arith.constant 0 : index
    %103 = vector.load %arg11[%c0_120, %c9_121, %c0_122, %c0_123] : memref<2x10x10x16xf32, #tpu.memory_space<vmem>>, vector<2x1x10x16xf32>
    tpu.vector_store %arg11[%c0_120, %c9_121, %c0_122, %c0_123], %100 {strides = array<i32>} : memref<2x10x10x16xf32, #tpu.memory_space<vmem>>, vector<2x1x10x16xf32>,
    %c0_124 = arith.constant 0 : index
    %c1_125 = arith.constant 1 : index
    %c0_126 = arith.constant 0 : index
    %c0_127 = arith.constant 0 : index
    %104 = vector.load %arg11[%c0_124, %c1_125, %c0_126, %c0_127] : memref<2x10x10x16xf32, #tpu.memory_space<vmem>>, vector<2x8x1x16xf32>
    tpu.vector_store %arg11[%c0_124, %c1_125, %c0_126, %c0_127], %101 {strides = array<i32>} : memref<2x10x10x16xf32, #tpu.memory_space<vmem>>, vector<2x8x1x16xf32>,
    %c0_128 = arith.constant 0 : index
    %c1_129 = arith.constant 1 : index
    %c9_130 = arith.constant 9 : index
    %c0_131 = arith.constant 0 : index
    %105 = vector.load %arg11[%c0_128, %c1_129, %c9_130, %c0_131] : memref<2x10x10x16xf32, #tpu.memory_space<vmem>>, vector<2x8x1x16xf32>
    tpu.vector_store %arg11[%c0_128, %c1_129, %c9_130, %c0_131], %101 {strides = array<i32>} : memref<2x10x10x16xf32, #tpu.memory_space<vmem>>, vector<2x8x1x16xf32>,
    %106 = vector.shape_cast %99 : vector<128x16xf32> to vector<2x8x8x16xf32>
    %c0_132 = arith.constant 0 : index
    %c1_133 = arith.constant 1 : index
    %c1_134 = arith.constant 1 : index
    %c0_135 = arith.constant 0 : index
    %107 = vector.load %arg11[%c0_132, %c1_133, %c1_134, %c0_135] : memref<2x10x10x16xf32, #tpu.memory_space<vmem>>, vector<2x8x8x16xf32>
    tpu.vector_store %arg11[%c0_132, %c1_133, %c1_134, %c0_135], %106 {strides = array<i32>} : memref<2x10x10x16xf32, #tpu.memory_space<vmem>>, vector<2x8x8x16xf32>,
    %c0_136 = arith.constant 0 : index
    %c0_137 = arith.constant 0 : index
    %c0_138 = arith.constant 0 : index
    %c0_139 = arith.constant 0 : index
    %108 = vector.load %arg11[%c0_136, %c0_137, %c0_138, %c0_139] : memref<2x10x10x16xf32, #tpu.memory_space<vmem>>, vector<2x8x8x16xf32>
    %109 = vector.shape_cast %108 : vector<2x8x8x16xf32> to vector<128x16xf32>
    %c0_140 = arith.constant 0 : index
    %c0_141 = arith.constant 0 : index
    %c0_142 = arith.constant 0 : index
    %110 = vector.load %arg7[%c0_140, %c0_141, %c0_142] : memref<9x16x16xf32, #tpu.memory_space<vmem>>, vector<1x16x16xf32>
    %111 = vector.shape_cast %110 : vector<1x16x16xf32> to vector<16x16xf32>
    %cst_143 = arith.constant dense<0.000000e+00> : vector<128x16xf32>
    %112 = tpu.matmul %109, %111, %cst_143 {dimension_numbers = #tpu.dot_dimension_numbers<[1], [0], [0], [1], [0, 0, 1, 1], [], []>} : vector<128x16xf32>, vector<16x16xf32>, vector<128x16xf32> -> vector<128x16xf32>
    %c0_144 = arith.constant 0 : index
    %c0_145 = arith.constant 0 : index
    %c1_146 = arith.constant 1 : index
    %c0_147 = arith.constant 0 : index
    %113 = vector.load %arg11[%c0_144, %c0_145, %c1_146, %c0_147] : memref<2x10x10x16xf32, #tpu.memory_space<vmem>>, vector<2x8x8x16xf32>
    %114 = vector.shape_cast %113 : vector<2x8x8x16xf32> to vector<128x16xf32>
    %c1_148 = arith.constant 1 : index
    %c0_149 = arith.constant 0 : index
    %c0_150 = arith.constant 0 : index
    %115 = vector.load %arg7[%c1_148, %c0_149, %c0_150] : memref<9x16x16xf32, #tpu.memory_space<vmem>>, vector<1x16x16xf32>
    %116 = vector.shape_cast %115 : vector<1x16x16xf32> to vector<16x16xf32>
    %cst_151 = arith.constant dense<0.000000e+00> : vector<128x16xf32>
    %117 = tpu.matmul %114, %116, %cst_151 {dimension_numbers = #tpu.dot_dimension_numbers<[1], [0], [0], [1], [0, 0, 1, 1], [], []>} : vector<128x16xf32>, vector<16x16xf32>, vector<128x16xf32> -> vector<128x16xf32>
    %118 = arith.addf %112, %117 : vector<128x16xf32>
    %c0_152 = arith.constant 0 : index
    %c0_153 = arith.constant 0 : index
    %c2_154 = arith.constant 2 : index
    %c0_155 = arith.constant 0 : index
    %119 = vector.load %arg11[%c0_152, %c0_153, %c2_154, %c0_155] : memref<2x10x10x16xf32, #tpu.memory_space<vmem>>, vector<2x8x8x16xf32>
    %120 = vector.shape_cast %119 : vector<2x8x8x16xf32> to vector<128x16xf32>
    %c2_156 = arith.constant 2 : index
    %c0_157 = arith.constant 0 : index
    %c0_158 = arith.constant 0 : index
    %121 = vector.load %arg7[%c2_156, %c0_157, %c0_158] : memref<9x16x16xf32, #tpu.memory_space<vmem>>, vector<1x16x16xf32>
    %122 = vector.shape_cast %121 : vector<1x16x16xf32> to vector<16x16xf32>
    %cst_159 = arith.constant dense<0.000000e+00> : vector<128x16xf32>
    %123 = tpu.matmul %120, %122, %cst_159 {dimension_numbers = #tpu.dot_dimension_numbers<[1], [0], [0], [1], [0, 0, 1, 1], [], []>} : vector<128x16xf32>, vector<16x16xf32>, vector<128x16xf32> -> vector<128x16xf32>
    %124 = arith.addf %118, %123 : vector<128x16xf32>
    %c0_160 = arith.constant 0 : index
    %c1_161 = arith.constant 1 : index
    %c0_162 = arith.constant 0 : index
    %c0_163 = arith.constant 0 : index
    %125 = vector.load %arg11[%c0_160, %c1_161, %c0_162, %c0_163] : memref<2x10x10x16xf32, #tpu.memory_space<vmem>>, vector<2x8x8x16xf32>
    %126 = vector.shape_cast %125 : vector<2x8x8x16xf32> to vector<128x16xf32>
    %c3_164 = arith.constant 3 : index
    %c0_165 = arith.constant 0 : index
    %c0_166 = arith.constant 0 : index
    %127 = vector.load %arg7[%c3_164, %c0_165, %c0_166] : memref<9x16x16xf32, #tpu.memory_space<vmem>>, vector<1x16x16xf32>
    %128 = vector.shape_cast %127 : vector<1x16x16xf32> to vector<16x16xf32>
    %cst_167 = arith.constant dense<0.000000e+00> : vector<128x16xf32>
    %129 = tpu.matmul %126, %128, %cst_167 {dimension_numbers = #tpu.dot_dimension_numbers<[1], [0], [0], [1], [0, 0, 1, 1], [], []>} : vector<128x16xf32>, vector<16x16xf32>, vector<128x16xf32> -> vector<128x16xf32>
    %130 = arith.addf %124, %129 : vector<128x16xf32>
    %c0_168 = arith.constant 0 : index
    %c1_169 = arith.constant 1 : index
    %c1_170 = arith.constant 1 : index
    %c0_171 = arith.constant 0 : index
    %131 = vector.load %arg11[%c0_168, %c1_169, %c1_170, %c0_171] : memref<2x10x10x16xf32, #tpu.memory_space<vmem>>, vector<2x8x8x16xf32>
    %132 = vector.shape_cast %131 : vector<2x8x8x16xf32> to vector<128x16xf32>
    %c4_172 = arith.constant 4 : index
    %c0_173 = arith.constant 0 : index
    %c0_174 = arith.constant 0 : index
    %133 = vector.load %arg7[%c4_172, %c0_173, %c0_174] : memref<9x16x16xf32, #tpu.memory_space<vmem>>, vector<1x16x16xf32>
    %134 = vector.shape_cast %133 : vector<1x16x16xf32> to vector<16x16xf32>
    %cst_175 = arith.constant dense<0.000000e+00> : vector<128x16xf32>
    %135 = tpu.matmul %132, %134, %cst_175 {dimension_numbers = #tpu.dot_dimension_numbers<[1], [0], [0], [1], [0, 0, 1, 1], [], []>} : vector<128x16xf32>, vector<16x16xf32>, vector<128x16xf32> -> vector<128x16xf32>
    %136 = arith.addf %130, %135 : vector<128x16xf32>
    %c0_176 = arith.constant 0 : index
    %c1_177 = arith.constant 1 : index
    %c2_178 = arith.constant 2 : index
    %c0_179 = arith.constant 0 : index
    %137 = vector.load %arg11[%c0_176, %c1_177, %c2_178, %c0_179] : memref<2x10x10x16xf32, #tpu.memory_space<vmem>>, vector<2x8x8x16xf32>
    %138 = vector.shape_cast %137 : vector<2x8x8x16xf32> to vector<128x16xf32>
    %c5_180 = arith.constant 5 : index
    %c0_181 = arith.constant 0 : index
    %c0_182 = arith.constant 0 : index
    %139 = vector.load %arg7[%c5_180, %c0_181, %c0_182] : memref<9x16x16xf32, #tpu.memory_space<vmem>>, vector<1x16x16xf32>
    %140 = vector.shape_cast %139 : vector<1x16x16xf32> to vector<16x16xf32>
    %cst_183 = arith.constant dense<0.000000e+00> : vector<128x16xf32>
    %141 = tpu.matmul %138, %140, %cst_183 {dimension_numbers = #tpu.dot_dimension_numbers<[1], [0], [0], [1], [0, 0, 1, 1], [], []>} : vector<128x16xf32>, vector<16x16xf32>, vector<128x16xf32> -> vector<128x16xf32>
    %142 = arith.addf %136, %141 : vector<128x16xf32>
    %c0_184 = arith.constant 0 : index
    %c2_185 = arith.constant 2 : index
    %c0_186 = arith.constant 0 : index
    %c0_187 = arith.constant 0 : index
    %143 = vector.load %arg11[%c0_184, %c2_185, %c0_186, %c0_187] : memref<2x10x10x16xf32, #tpu.memory_space<vmem>>, vector<2x8x8x16xf32>
    %144 = vector.shape_cast %143 : vector<2x8x8x16xf32> to vector<128x16xf32>
    %c6_188 = arith.constant 6 : index
    %c0_189 = arith.constant 0 : index
    %c0_190 = arith.constant 0 : index
    %145 = vector.load %arg7[%c6_188, %c0_189, %c0_190] : memref<9x16x16xf32, #tpu.memory_space<vmem>>, vector<1x16x16xf32>
    %146 = vector.shape_cast %145 : vector<1x16x16xf32> to vector<16x16xf32>
    %cst_191 = arith.constant dense<0.000000e+00> : vector<128x16xf32>
    %147 = tpu.matmul %144, %146, %cst_191 {dimension_numbers = #tpu.dot_dimension_numbers<[1], [0], [0], [1], [0, 0, 1, 1], [], []>} : vector<128x16xf32>, vector<16x16xf32>, vector<128x16xf32> -> vector<128x16xf32>
    %148 = arith.addf %142, %147 : vector<128x16xf32>
    %c0_192 = arith.constant 0 : index
    %c2_193 = arith.constant 2 : index
    %c1_194 = arith.constant 1 : index
    %c0_195 = arith.constant 0 : index
    %149 = vector.load %arg11[%c0_192, %c2_193, %c1_194, %c0_195] : memref<2x10x10x16xf32, #tpu.memory_space<vmem>>, vector<2x8x8x16xf32>
    %150 = vector.shape_cast %149 : vector<2x8x8x16xf32> to vector<128x16xf32>
    %c7_196 = arith.constant 7 : index
    %c0_197 = arith.constant 0 : index
    %c0_198 = arith.constant 0 : index
    %151 = vector.load %arg7[%c7_196, %c0_197, %c0_198] : memref<9x16x16xf32, #tpu.memory_space<vmem>>, vector<1x16x16xf32>
    %152 = vector.shape_cast %151 : vector<1x16x16xf32> to vector<16x16xf32>
    %cst_199 = arith.constant dense<0.000000e+00> : vector<128x16xf32>
    %153 = tpu.matmul %150, %152, %cst_199 {dimension_numbers = #tpu.dot_dimension_numbers<[1], [0], [0], [1], [0, 0, 1, 1], [], []>} : vector<128x16xf32>, vector<16x16xf32>, vector<128x16xf32> -> vector<128x16xf32>
    %154 = arith.addf %148, %153 : vector<128x16xf32>
    %c0_200 = arith.constant 0 : index
    %c2_201 = arith.constant 2 : index
    %c2_202 = arith.constant 2 : index
    %c0_203 = arith.constant 0 : index
    %155 = vector.load %arg11[%c0_200, %c2_201, %c2_202, %c0_203] : memref<2x10x10x16xf32, #tpu.memory_space<vmem>>, vector<2x8x8x16xf32>
    %156 = vector.shape_cast %155 : vector<2x8x8x16xf32> to vector<128x16xf32>
    %c8_204 = arith.constant 8 : index
    %c0_205 = arith.constant 0 : index
    %c0_206 = arith.constant 0 : index
    %157 = vector.load %arg7[%c8_204, %c0_205, %c0_206] : memref<9x16x16xf32, #tpu.memory_space<vmem>>, vector<1x16x16xf32>
    %158 = vector.shape_cast %157 : vector<1x16x16xf32> to vector<16x16xf32>
    %cst_207 = arith.constant dense<0.000000e+00> : vector<128x16xf32>
    %159 = tpu.matmul %156, %158, %cst_207 {dimension_numbers = #tpu.dot_dimension_numbers<[1], [0], [0], [1], [0, 0, 1, 1], [], []>} : vector<128x16xf32>, vector<16x16xf32>, vector<128x16xf32> -> vector<128x16xf32>
    %160 = arith.addf %154, %159 : vector<128x16xf32>
    %c0_208 = arith.constant 0 : index
    %c0_209 = arith.constant 0 : index
    %c1_210 = arith.constant 1 : index
    %c1_211 = arith.constant 1 : index
    %c0_212 = arith.constant 0 : index
    %161 = vector.load %arg10[%c0_208, %c0_209, %c1_210, %c1_211, %c0_212] : memref<4x2x10x10x8xf32, #tpu.memory_space<vmem>>, vector<1x2x8x8x8xf32>
    %162 = vector.shape_cast %161 : vector<1x2x8x8x8xf32> to vector<2x8x8x8xf32>
    %163 = vector.shape_cast %162 : vector<2x8x8x8xf32> to vector<128x8xf32>
    %c0_213 = arith.constant 0 : index
    %c0_214 = arith.constant 0 : index
    %164 = vector.load %arg8[%c0_213, %c0_214] : memref<8x16xf32, #tpu.memory_space<vmem>>, vector<8x16xf32>
    %cst_215 = arith.constant dense<0.000000e+00> : vector<128x16xf32>
    %165 = tpu.matmul %163, %164, %cst_215 {dimension_numbers = #tpu.dot_dimension_numbers<[1], [0], [0], [1], [0, 0, 1, 1], [], []>} : vector<128x8xf32>, vector<8x16xf32>, vector<128x16xf32> -> vector<128x16xf32>
    %166 = arith.addf %160, %165 : vector<128x16xf32>
    %167 = vector.shape_cast %166 : vector<128x16xf32> to vector<2x8x128xf32>
    %c0_216 = arith.constant 0 : index
    %c0_217 = arith.constant 0 : index
    %c0_218 = arith.constant 0 : index
    %168 = vector.load %arg9[%c0_216, %c0_217, %c0_218] : memref<2x8x128xf32, #tpu.memory_space<vmem>>, vector<2x8x128xf32>
    tpu.vector_store %arg9[%c0_216, %c0_217, %c0_218], %167 {strides = array<i32>} : memref<2x8x128xf32, #tpu.memory_space<vmem>>, vector<2x8x128xf32>,
    return
  }
  func.func @transform_0(%arg0: i32) -> (i32, i32, i32, i32, i32) {
    %c0_i32 = arith.constant 0 : i32
    %c0_i32_0 = arith.constant 0 : i32
    %c0_i32_1 = arith.constant 0 : i32
    %c0_i32_2 = arith.constant 0 : i32
    %c0_i32_3 = arith.constant 0 : i32
    return %c0_i32, %arg0, %c0_i32_0, %c0_i32_1, %c0_i32_2 : i32, i32, i32, i32, i32
  }
  func.func @transform_1(%arg0: i32) -> (i32, i32) {
    %c0_i32 = arith.constant 0 : i32
    %c0_i32_0 = arith.constant 0 : i32
    %c0_i32_1 = arith.constant 0 : i32
    return %c0_i32, %c0_i32_0 : i32, i32
  }
  func.func @transform_2(%arg0: i32) -> (i32, i32) {
    %c0_i32 = arith.constant 0 : i32
    %c0_i32_0 = arith.constant 0 : i32
    %c0_i32_1 = arith.constant 0 : i32
    return %c0_i32, %c0_i32_0 : i32, i32
  }
  func.func @transform_3(%arg0: i32) -> (i32, i32, i32) {
    %c0_i32 = arith.constant 0 : i32
    %c0_i32_0 = arith.constant 0 : i32
    %c0_i32_1 = arith.constant 0 : i32
    %c0_i32_2 = arith.constant 0 : i32
    return %c0_i32, %c0_i32_0, %c0_i32_1 : i32, i32, i32
  }
  func.func @transform_4(%arg0: i32) -> (i32, i32) {
    %c0_i32 = arith.constant 0 : i32
    %c0_i32_0 = arith.constant 0 : i32
    %c0_i32_1 = arith.constant 0 : i32
    return %c0_i32, %c0_i32_0 : i32, i32
  }
  func.func @transform_5(%arg0: i32) -> (i32, i32) {
    %c0_i32 = arith.constant 0 : i32
    %c0_i32_0 = arith.constant 0 : i32
    %c0_i32_1 = arith.constant 0 : i32
    return %c0_i32, %c0_i32_0 : i32, i32
  }
  func.func @transform_6(%arg0: i32) -> (i32, i32, i32) {
    %c0_i32 = arith.constant 0 : i32
    %c0_i32_0 = arith.constant 0 : i32
    %c0_i32_1 = arith.constant 0 : i32
    %c0_i32_2 = arith.constant 0 : i32
    return %c0_i32, %c0_i32_0, %c0_i32_1 : i32, i32, i32
  }
  func.func @transform_7(%arg0: i32) -> (i32, i32) {
    %c0_i32 = arith.constant 0 : i32
    %c0_i32_0 = arith.constant 0 : i32
    %c0_i32_1 = arith.constant 0 : i32
    return %c0_i32, %c0_i32_0 : i32, i32
  }
  func.func @transform_8(%arg0: i32) -> (i32, i32, i32) {
    %c0_i32 = arith.constant 0 : i32
    %c0_i32_0 = arith.constant 0 : i32
    %c0_i32_1 = arith.constant 0 : i32
    return %arg0, %c0_i32, %c0_i32_0 : i32, i32, i32
  }
}

module attributes {stable_mosaic.version = 11 : i64} {
  func.func @kernel(%arg0: i32, %arg1: memref<1x2x8x8x16xf32, #tpu.memory_space<vmem>>, %arg2: memref<1x16xf32, #tpu.memory_space<vmem>>, %arg3: memref<1x16xf32, #tpu.memory_space<vmem>>, %arg4: memref<9x16x16xf32, #tpu.memory_space<vmem>>, %arg5: memref<1x16xf32, #tpu.memory_space<vmem>>, %arg6: memref<1x16xf32, #tpu.memory_space<vmem>>, %arg7: memref<9x16x16xf32, #tpu.memory_space<vmem>>, %arg8: memref<2x8x128xf32, #tpu.memory_space<vmem>>, %arg9: memref<1x2x10x10x16xf32, #tpu.memory_space<vmem>>, %arg10: memref<2x10x10x16xf32, #tpu.memory_space<vmem>>) attributes {dimension_semantics = [#tpu.dimension_semantics<parallel>], iteration_bounds = array<i64: 1>, scalar_prefetch = 0 : i64, scratch_operands = 2 : i64, tpu.core_type = #tpu.core_type<tc>, window_params = [{transform_indices = @transform_0, window_bounds = array<i64: 1, 2, 8, 8, 16>}, {pipeline_mode = #tpu.pipeline_mode<synchronous>, transform_indices = @transform_1, window_bounds = array<i64: 1, 16>}, {pipeline_mode = #tpu.pipeline_mode<synchronous>, transform_indices = @transform_2, window_bounds = array<i64: 1, 16>}, {pipeline_mode = #tpu.pipeline_mode<synchronous>, transform_indices = @transform_3, window_bounds = array<i64: 9, 16, 16>}, {pipeline_mode = #tpu.pipeline_mode<synchronous>, transform_indices = @transform_4, window_bounds = array<i64: 1, 16>}, {pipeline_mode = #tpu.pipeline_mode<synchronous>, transform_indices = @transform_5, window_bounds = array<i64: 1, 16>}, {pipeline_mode = #tpu.pipeline_mode<synchronous>, transform_indices = @transform_6, window_bounds = array<i64: 9, 16, 16>}, {transform_indices = @transform_7, window_bounds = array<i64: 2, 8, 128>}]} {
    %cst = arith.constant 0.000000e+00 : f32
    %0 = vector.broadcast %cst : f32 to vector<1x2x1x10x16xf32>
    %cst_0 = arith.constant 0.000000e+00 : f32
    %1 = vector.broadcast %cst_0 : f32 to vector<1x2x8x1x16xf32>
    %c0 = arith.constant 0 : index
    %c0_1 = arith.constant 0 : index
    %c0_2 = arith.constant 0 : index
    %c0_3 = arith.constant 0 : index
    %c0_4 = arith.constant 0 : index
    %2 = vector.load %arg9[%c0, %c0_1, %c0_2, %c0_3, %c0_4] : memref<1x2x10x10x16xf32, #tpu.memory_space<vmem>>, vector<1x2x1x10x16xf32>
    tpu.vector_store %arg9[%c0, %c0_1, %c0_2, %c0_3, %c0_4], %0 {strides = array<i32>} : memref<1x2x10x10x16xf32, #tpu.memory_space<vmem>>, vector<1x2x1x10x16xf32>,
    %c0_5 = arith.constant 0 : index
    %c0_6 = arith.constant 0 : index
    %c9 = arith.constant 9 : index
    %c0_7 = arith.constant 0 : index
    %c0_8 = arith.constant 0 : index
    %3 = vector.load %arg9[%c0_5, %c0_6, %c9, %c0_7, %c0_8] : memref<1x2x10x10x16xf32, #tpu.memory_space<vmem>>, vector<1x2x1x10x16xf32>
    tpu.vector_store %arg9[%c0_5, %c0_6, %c9, %c0_7, %c0_8], %0 {strides = array<i32>} : memref<1x2x10x10x16xf32, #tpu.memory_space<vmem>>, vector<1x2x1x10x16xf32>,
    %c0_9 = arith.constant 0 : index
    %c0_10 = arith.constant 0 : index
    %c1 = arith.constant 1 : index
    %c0_11 = arith.constant 0 : index
    %c0_12 = arith.constant 0 : index
    %4 = vector.load %arg9[%c0_9, %c0_10, %c1, %c0_11, %c0_12] : memref<1x2x10x10x16xf32, #tpu.memory_space<vmem>>, vector<1x2x8x1x16xf32>
    tpu.vector_store %arg9[%c0_9, %c0_10, %c1, %c0_11, %c0_12], %1 {strides = array<i32>} : memref<1x2x10x10x16xf32, #tpu.memory_space<vmem>>, vector<1x2x8x1x16xf32>,
    %c0_13 = arith.constant 0 : index
    %c0_14 = arith.constant 0 : index
    %c1_15 = arith.constant 1 : index
    %c9_16 = arith.constant 9 : index
    %c0_17 = arith.constant 0 : index
    %5 = vector.load %arg9[%c0_13, %c0_14, %c1_15, %c9_16, %c0_17] : memref<1x2x10x10x16xf32, #tpu.memory_space<vmem>>, vector<1x2x8x1x16xf32>
    tpu.vector_store %arg9[%c0_13, %c0_14, %c1_15, %c9_16, %c0_17], %1 {strides = array<i32>} : memref<1x2x10x10x16xf32, #tpu.memory_space<vmem>>, vector<1x2x8x1x16xf32>,
    %c0_18 = arith.constant 0 : index
    %c0_19 = arith.constant 0 : index
    %c0_20 = arith.constant 0 : index
    %c0_21 = arith.constant 0 : index
    %c0_22 = arith.constant 0 : index
    %6 = vector.load %arg1[%c0_18, %c0_19, %c0_20, %c0_21, %c0_22] : memref<1x2x8x8x16xf32, #tpu.memory_space<vmem>>, vector<1x2x8x8x16xf32>
    %c0_23 = arith.constant 0 : index
    %c0_24 = arith.constant 0 : index
    %7 = vector.load %arg2[%c0_23, %c0_24] : memref<1x16xf32, #tpu.memory_space<vmem>>, vector<1x16xf32>
    %8 = vector.shape_cast %7 : vector<1x16xf32> to vector<16xf32>
    %9 = vector.shape_cast %8 : vector<16xf32> to vector<1x1x1x1x16xf32>
    %10 = vector.broadcast %9 : vector<1x1x1x1x16xf32> to vector<1x2x8x8x16xf32>
    %11 = arith.mulf %6, %10 : vector<1x2x8x8x16xf32>
    %c0_25 = arith.constant 0 : index
    %c0_26 = arith.constant 0 : index
    %12 = vector.load %arg3[%c0_25, %c0_26] : memref<1x16xf32, #tpu.memory_space<vmem>>, vector<1x16xf32>
    %13 = vector.shape_cast %12 : vector<1x16xf32> to vector<16xf32>
    %14 = vector.shape_cast %13 : vector<16xf32> to vector<1x1x1x1x16xf32>
    %15 = vector.broadcast %14 : vector<1x1x1x1x16xf32> to vector<1x2x8x8x16xf32>
    %16 = arith.addf %11, %15 : vector<1x2x8x8x16xf32>
    %cst_27 = arith.constant 0.000000e+00 : f32
    %17 = vector.broadcast %cst_27 : f32 to vector<1x2x8x8x16xf32>
    %18 = arith.cmpf oge, %16, %17 : vector<1x2x8x8x16xf32>
    %cst_28 = arith.constant 1.000000e-01 : f32
    %19 = vector.broadcast %cst_28 : f32 to vector<1x2x8x8x16xf32>
    %20 = arith.mulf %19, %16 : vector<1x2x8x8x16xf32>
    %21 = arith.select %18, %16, %20 : vector<1x2x8x8x16xi1>, vector<1x2x8x8x16xf32>
    %c0_29 = arith.constant 0 : index
    %c0_30 = arith.constant 0 : index
    %c1_31 = arith.constant 1 : index
    %c1_32 = arith.constant 1 : index
    %c0_33 = arith.constant 0 : index
    %22 = vector.load %arg9[%c0_29, %c0_30, %c1_31, %c1_32, %c0_33] : memref<1x2x10x10x16xf32, #tpu.memory_space<vmem>>, vector<1x2x8x8x16xf32>
    tpu.vector_store %arg9[%c0_29, %c0_30, %c1_31, %c1_32, %c0_33], %21 {strides = array<i32>} : memref<1x2x10x10x16xf32, #tpu.memory_space<vmem>>, vector<1x2x8x8x16xf32>,
    %c0_34 = arith.constant 0 : index
    %c0_35 = arith.constant 0 : index
    %c0_36 = arith.constant 0 : index
    %c0_37 = arith.constant 0 : index
    %c0_38 = arith.constant 0 : index
    %23 = vector.load %arg9[%c0_34, %c0_35, %c0_36, %c0_37, %c0_38] : memref<1x2x10x10x16xf32, #tpu.memory_space<vmem>>, vector<1x2x8x8x16xf32>
    %24 = vector.shape_cast %23 : vector<1x2x8x8x16xf32> to vector<2x8x8x16xf32>
    %25 = vector.shape_cast %24 : vector<2x8x8x16xf32> to vector<128x16xf32>
    %c0_39 = arith.constant 0 : index
    %c0_40 = arith.constant 0 : index
    %c0_41 = arith.constant 0 : index
    %26 = vector.load %arg4[%c0_39, %c0_40, %c0_41] : memref<9x16x16xf32, #tpu.memory_space<vmem>>, vector<1x16x16xf32>
    %27 = vector.shape_cast %26 : vector<1x16x16xf32> to vector<16x16xf32>
    %cst_42 = arith.constant dense<0.000000e+00> : vector<128x16xf32>
    %28 = tpu.matmul %25, %27, %cst_42 {dimension_numbers = #tpu.dot_dimension_numbers<[1], [0], [0], [1], [0, 0, 1, 1], [], []>} : vector<128x16xf32>, vector<16x16xf32>, vector<128x16xf32> -> vector<128x16xf32>
    %c0_43 = arith.constant 0 : index
    %c0_44 = arith.constant 0 : index
    %c0_45 = arith.constant 0 : index
    %c1_46 = arith.constant 1 : index
    %c0_47 = arith.constant 0 : index
    %29 = vector.load %arg9[%c0_43, %c0_44, %c0_45, %c1_46, %c0_47] : memref<1x2x10x10x16xf32, #tpu.memory_space<vmem>>, vector<1x2x8x8x16xf32>
    %30 = vector.shape_cast %29 : vector<1x2x8x8x16xf32> to vector<2x8x8x16xf32>
    %31 = vector.shape_cast %30 : vector<2x8x8x16xf32> to vector<128x16xf32>
    %c1_48 = arith.constant 1 : index
    %c0_49 = arith.constant 0 : index
    %c0_50 = arith.constant 0 : index
    %32 = vector.load %arg4[%c1_48, %c0_49, %c0_50] : memref<9x16x16xf32, #tpu.memory_space<vmem>>, vector<1x16x16xf32>
    %33 = vector.shape_cast %32 : vector<1x16x16xf32> to vector<16x16xf32>
    %cst_51 = arith.constant dense<0.000000e+00> : vector<128x16xf32>
    %34 = tpu.matmul %31, %33, %cst_51 {dimension_numbers = #tpu.dot_dimension_numbers<[1], [0], [0], [1], [0, 0, 1, 1], [], []>} : vector<128x16xf32>, vector<16x16xf32>, vector<128x16xf32> -> vector<128x16xf32>
    %35 = arith.addf %28, %34 : vector<128x16xf32>
    %c0_52 = arith.constant 0 : index
    %c0_53 = arith.constant 0 : index
    %c0_54 = arith.constant 0 : index
    %c2 = arith.constant 2 : index
    %c0_55 = arith.constant 0 : index
    %36 = vector.load %arg9[%c0_52, %c0_53, %c0_54, %c2, %c0_55] : memref<1x2x10x10x16xf32, #tpu.memory_space<vmem>>, vector<1x2x8x8x16xf32>
    %37 = vector.shape_cast %36 : vector<1x2x8x8x16xf32> to vector<2x8x8x16xf32>
    %38 = vector.shape_cast %37 : vector<2x8x8x16xf32> to vector<128x16xf32>
    %c2_56 = arith.constant 2 : index
    %c0_57 = arith.constant 0 : index
    %c0_58 = arith.constant 0 : index
    %39 = vector.load %arg4[%c2_56, %c0_57, %c0_58] : memref<9x16x16xf32, #tpu.memory_space<vmem>>, vector<1x16x16xf32>
    %40 = vector.shape_cast %39 : vector<1x16x16xf32> to vector<16x16xf32>
    %cst_59 = arith.constant dense<0.000000e+00> : vector<128x16xf32>
    %41 = tpu.matmul %38, %40, %cst_59 {dimension_numbers = #tpu.dot_dimension_numbers<[1], [0], [0], [1], [0, 0, 1, 1], [], []>} : vector<128x16xf32>, vector<16x16xf32>, vector<128x16xf32> -> vector<128x16xf32>
    %42 = arith.addf %35, %41 : vector<128x16xf32>
    %c0_60 = arith.constant 0 : index
    %c0_61 = arith.constant 0 : index
    %c1_62 = arith.constant 1 : index
    %c0_63 = arith.constant 0 : index
    %c0_64 = arith.constant 0 : index
    %43 = vector.load %arg9[%c0_60, %c0_61, %c1_62, %c0_63, %c0_64] : memref<1x2x10x10x16xf32, #tpu.memory_space<vmem>>, vector<1x2x8x8x16xf32>
    %44 = vector.shape_cast %43 : vector<1x2x8x8x16xf32> to vector<2x8x8x16xf32>
    %45 = vector.shape_cast %44 : vector<2x8x8x16xf32> to vector<128x16xf32>
    %c3 = arith.constant 3 : index
    %c0_65 = arith.constant 0 : index
    %c0_66 = arith.constant 0 : index
    %46 = vector.load %arg4[%c3, %c0_65, %c0_66] : memref<9x16x16xf32, #tpu.memory_space<vmem>>, vector<1x16x16xf32>
    %47 = vector.shape_cast %46 : vector<1x16x16xf32> to vector<16x16xf32>
    %cst_67 = arith.constant dense<0.000000e+00> : vector<128x16xf32>
    %48 = tpu.matmul %45, %47, %cst_67 {dimension_numbers = #tpu.dot_dimension_numbers<[1], [0], [0], [1], [0, 0, 1, 1], [], []>} : vector<128x16xf32>, vector<16x16xf32>, vector<128x16xf32> -> vector<128x16xf32>
    %49 = arith.addf %42, %48 : vector<128x16xf32>
    %c0_68 = arith.constant 0 : index
    %c0_69 = arith.constant 0 : index
    %c1_70 = arith.constant 1 : index
    %c1_71 = arith.constant 1 : index
    %c0_72 = arith.constant 0 : index
    %50 = vector.load %arg9[%c0_68, %c0_69, %c1_70, %c1_71, %c0_72] : memref<1x2x10x10x16xf32, #tpu.memory_space<vmem>>, vector<1x2x8x8x16xf32>
    %51 = vector.shape_cast %50 : vector<1x2x8x8x16xf32> to vector<2x8x8x16xf32>
    %52 = vector.shape_cast %51 : vector<2x8x8x16xf32> to vector<128x16xf32>
    %c4 = arith.constant 4 : index
    %c0_73 = arith.constant 0 : index
    %c0_74 = arith.constant 0 : index
    %53 = vector.load %arg4[%c4, %c0_73, %c0_74] : memref<9x16x16xf32, #tpu.memory_space<vmem>>, vector<1x16x16xf32>
    %54 = vector.shape_cast %53 : vector<1x16x16xf32> to vector<16x16xf32>
    %cst_75 = arith.constant dense<0.000000e+00> : vector<128x16xf32>
    %55 = tpu.matmul %52, %54, %cst_75 {dimension_numbers = #tpu.dot_dimension_numbers<[1], [0], [0], [1], [0, 0, 1, 1], [], []>} : vector<128x16xf32>, vector<16x16xf32>, vector<128x16xf32> -> vector<128x16xf32>
    %56 = arith.addf %49, %55 : vector<128x16xf32>
    %c0_76 = arith.constant 0 : index
    %c0_77 = arith.constant 0 : index
    %c1_78 = arith.constant 1 : index
    %c2_79 = arith.constant 2 : index
    %c0_80 = arith.constant 0 : index
    %57 = vector.load %arg9[%c0_76, %c0_77, %c1_78, %c2_79, %c0_80] : memref<1x2x10x10x16xf32, #tpu.memory_space<vmem>>, vector<1x2x8x8x16xf32>
    %58 = vector.shape_cast %57 : vector<1x2x8x8x16xf32> to vector<2x8x8x16xf32>
    %59 = vector.shape_cast %58 : vector<2x8x8x16xf32> to vector<128x16xf32>
    %c5 = arith.constant 5 : index
    %c0_81 = arith.constant 0 : index
    %c0_82 = arith.constant 0 : index
    %60 = vector.load %arg4[%c5, %c0_81, %c0_82] : memref<9x16x16xf32, #tpu.memory_space<vmem>>, vector<1x16x16xf32>
    %61 = vector.shape_cast %60 : vector<1x16x16xf32> to vector<16x16xf32>
    %cst_83 = arith.constant dense<0.000000e+00> : vector<128x16xf32>
    %62 = tpu.matmul %59, %61, %cst_83 {dimension_numbers = #tpu.dot_dimension_numbers<[1], [0], [0], [1], [0, 0, 1, 1], [], []>} : vector<128x16xf32>, vector<16x16xf32>, vector<128x16xf32> -> vector<128x16xf32>
    %63 = arith.addf %56, %62 : vector<128x16xf32>
    %c0_84 = arith.constant 0 : index
    %c0_85 = arith.constant 0 : index
    %c2_86 = arith.constant 2 : index
    %c0_87 = arith.constant 0 : index
    %c0_88 = arith.constant 0 : index
    %64 = vector.load %arg9[%c0_84, %c0_85, %c2_86, %c0_87, %c0_88] : memref<1x2x10x10x16xf32, #tpu.memory_space<vmem>>, vector<1x2x8x8x16xf32>
    %65 = vector.shape_cast %64 : vector<1x2x8x8x16xf32> to vector<2x8x8x16xf32>
    %66 = vector.shape_cast %65 : vector<2x8x8x16xf32> to vector<128x16xf32>
    %c6 = arith.constant 6 : index
    %c0_89 = arith.constant 0 : index
    %c0_90 = arith.constant 0 : index
    %67 = vector.load %arg4[%c6, %c0_89, %c0_90] : memref<9x16x16xf32, #tpu.memory_space<vmem>>, vector<1x16x16xf32>
    %68 = vector.shape_cast %67 : vector<1x16x16xf32> to vector<16x16xf32>
    %cst_91 = arith.constant dense<0.000000e+00> : vector<128x16xf32>
    %69 = tpu.matmul %66, %68, %cst_91 {dimension_numbers = #tpu.dot_dimension_numbers<[1], [0], [0], [1], [0, 0, 1, 1], [], []>} : vector<128x16xf32>, vector<16x16xf32>, vector<128x16xf32> -> vector<128x16xf32>
    %70 = arith.addf %63, %69 : vector<128x16xf32>
    %c0_92 = arith.constant 0 : index
    %c0_93 = arith.constant 0 : index
    %c2_94 = arith.constant 2 : index
    %c1_95 = arith.constant 1 : index
    %c0_96 = arith.constant 0 : index
    %71 = vector.load %arg9[%c0_92, %c0_93, %c2_94, %c1_95, %c0_96] : memref<1x2x10x10x16xf32, #tpu.memory_space<vmem>>, vector<1x2x8x8x16xf32>
    %72 = vector.shape_cast %71 : vector<1x2x8x8x16xf32> to vector<2x8x8x16xf32>
    %73 = vector.shape_cast %72 : vector<2x8x8x16xf32> to vector<128x16xf32>
    %c7 = arith.constant 7 : index
    %c0_97 = arith.constant 0 : index
    %c0_98 = arith.constant 0 : index
    %74 = vector.load %arg4[%c7, %c0_97, %c0_98] : memref<9x16x16xf32, #tpu.memory_space<vmem>>, vector<1x16x16xf32>
    %75 = vector.shape_cast %74 : vector<1x16x16xf32> to vector<16x16xf32>
    %cst_99 = arith.constant dense<0.000000e+00> : vector<128x16xf32>
    %76 = tpu.matmul %73, %75, %cst_99 {dimension_numbers = #tpu.dot_dimension_numbers<[1], [0], [0], [1], [0, 0, 1, 1], [], []>} : vector<128x16xf32>, vector<16x16xf32>, vector<128x16xf32> -> vector<128x16xf32>
    %77 = arith.addf %70, %76 : vector<128x16xf32>
    %c0_100 = arith.constant 0 : index
    %c0_101 = arith.constant 0 : index
    %c2_102 = arith.constant 2 : index
    %c2_103 = arith.constant 2 : index
    %c0_104 = arith.constant 0 : index
    %78 = vector.load %arg9[%c0_100, %c0_101, %c2_102, %c2_103, %c0_104] : memref<1x2x10x10x16xf32, #tpu.memory_space<vmem>>, vector<1x2x8x8x16xf32>
    %79 = vector.shape_cast %78 : vector<1x2x8x8x16xf32> to vector<2x8x8x16xf32>
    %80 = vector.shape_cast %79 : vector<2x8x8x16xf32> to vector<128x16xf32>
    %c8 = arith.constant 8 : index
    %c0_105 = arith.constant 0 : index
    %c0_106 = arith.constant 0 : index
    %81 = vector.load %arg4[%c8, %c0_105, %c0_106] : memref<9x16x16xf32, #tpu.memory_space<vmem>>, vector<1x16x16xf32>
    %82 = vector.shape_cast %81 : vector<1x16x16xf32> to vector<16x16xf32>
    %cst_107 = arith.constant dense<0.000000e+00> : vector<128x16xf32>
    %83 = tpu.matmul %80, %82, %cst_107 {dimension_numbers = #tpu.dot_dimension_numbers<[1], [0], [0], [1], [0, 0, 1, 1], [], []>} : vector<128x16xf32>, vector<16x16xf32>, vector<128x16xf32> -> vector<128x16xf32>
    %84 = arith.addf %77, %83 : vector<128x16xf32>
    %c0_108 = arith.constant 0 : index
    %c0_109 = arith.constant 0 : index
    %85 = vector.load %arg5[%c0_108, %c0_109] : memref<1x16xf32, #tpu.memory_space<vmem>>, vector<1x16xf32>
    %86 = vector.shape_cast %85 : vector<1x16xf32> to vector<16xf32>
    %87 = vector.shape_cast %86 : vector<16xf32> to vector<1x16xf32>
    %88 = vector.broadcast %87 : vector<1x16xf32> to vector<128x16xf32>
    %89 = arith.mulf %84, %88 : vector<128x16xf32>
    %c0_110 = arith.constant 0 : index
    %c0_111 = arith.constant 0 : index
    %90 = vector.load %arg6[%c0_110, %c0_111] : memref<1x16xf32, #tpu.memory_space<vmem>>, vector<1x16xf32>
    %91 = vector.shape_cast %90 : vector<1x16xf32> to vector<16xf32>
    %92 = vector.shape_cast %91 : vector<16xf32> to vector<1x16xf32>
    %93 = vector.broadcast %92 : vector<1x16xf32> to vector<128x16xf32>
    %94 = arith.addf %89, %93 : vector<128x16xf32>
    %cst_112 = arith.constant 0.000000e+00 : f32
    %95 = vector.broadcast %cst_112 : f32 to vector<128x16xf32>
    %96 = arith.cmpf oge, %94, %95 : vector<128x16xf32>
    %cst_113 = arith.constant 1.000000e-01 : f32
    %97 = vector.broadcast %cst_113 : f32 to vector<128x16xf32>
    %98 = arith.mulf %97, %94 : vector<128x16xf32>
    %99 = arith.select %96, %94, %98 : vector<128x16xi1>, vector<128x16xf32>
    %cst_114 = arith.constant 0.000000e+00 : f32
    %100 = vector.broadcast %cst_114 : f32 to vector<2x1x10x16xf32>
    %cst_115 = arith.constant 0.000000e+00 : f32
    %101 = vector.broadcast %cst_115 : f32 to vector<2x8x1x16xf32>
    %c0_116 = arith.constant 0 : index
    %c0_117 = arith.constant 0 : index
    %c0_118 = arith.constant 0 : index
    %c0_119 = arith.constant 0 : index
    %102 = vector.load %arg10[%c0_116, %c0_117, %c0_118, %c0_119] : memref<2x10x10x16xf32, #tpu.memory_space<vmem>>, vector<2x1x10x16xf32>
    tpu.vector_store %arg10[%c0_116, %c0_117, %c0_118, %c0_119], %100 {strides = array<i32>} : memref<2x10x10x16xf32, #tpu.memory_space<vmem>>, vector<2x1x10x16xf32>,
    %c0_120 = arith.constant 0 : index
    %c9_121 = arith.constant 9 : index
    %c0_122 = arith.constant 0 : index
    %c0_123 = arith.constant 0 : index
    %103 = vector.load %arg10[%c0_120, %c9_121, %c0_122, %c0_123] : memref<2x10x10x16xf32, #tpu.memory_space<vmem>>, vector<2x1x10x16xf32>
    tpu.vector_store %arg10[%c0_120, %c9_121, %c0_122, %c0_123], %100 {strides = array<i32>} : memref<2x10x10x16xf32, #tpu.memory_space<vmem>>, vector<2x1x10x16xf32>,
    %c0_124 = arith.constant 0 : index
    %c1_125 = arith.constant 1 : index
    %c0_126 = arith.constant 0 : index
    %c0_127 = arith.constant 0 : index
    %104 = vector.load %arg10[%c0_124, %c1_125, %c0_126, %c0_127] : memref<2x10x10x16xf32, #tpu.memory_space<vmem>>, vector<2x8x1x16xf32>
    tpu.vector_store %arg10[%c0_124, %c1_125, %c0_126, %c0_127], %101 {strides = array<i32>} : memref<2x10x10x16xf32, #tpu.memory_space<vmem>>, vector<2x8x1x16xf32>,
    %c0_128 = arith.constant 0 : index
    %c1_129 = arith.constant 1 : index
    %c9_130 = arith.constant 9 : index
    %c0_131 = arith.constant 0 : index
    %105 = vector.load %arg10[%c0_128, %c1_129, %c9_130, %c0_131] : memref<2x10x10x16xf32, #tpu.memory_space<vmem>>, vector<2x8x1x16xf32>
    tpu.vector_store %arg10[%c0_128, %c1_129, %c9_130, %c0_131], %101 {strides = array<i32>} : memref<2x10x10x16xf32, #tpu.memory_space<vmem>>, vector<2x8x1x16xf32>,
    %106 = vector.shape_cast %99 : vector<128x16xf32> to vector<2x8x8x16xf32>
    %c0_132 = arith.constant 0 : index
    %c1_133 = arith.constant 1 : index
    %c1_134 = arith.constant 1 : index
    %c0_135 = arith.constant 0 : index
    %107 = vector.load %arg10[%c0_132, %c1_133, %c1_134, %c0_135] : memref<2x10x10x16xf32, #tpu.memory_space<vmem>>, vector<2x8x8x16xf32>
    tpu.vector_store %arg10[%c0_132, %c1_133, %c1_134, %c0_135], %106 {strides = array<i32>} : memref<2x10x10x16xf32, #tpu.memory_space<vmem>>, vector<2x8x8x16xf32>,
    %c0_136 = arith.constant 0 : index
    %c0_137 = arith.constant 0 : index
    %c0_138 = arith.constant 0 : index
    %c0_139 = arith.constant 0 : index
    %108 = vector.load %arg10[%c0_136, %c0_137, %c0_138, %c0_139] : memref<2x10x10x16xf32, #tpu.memory_space<vmem>>, vector<2x8x8x16xf32>
    %109 = vector.shape_cast %108 : vector<2x8x8x16xf32> to vector<128x16xf32>
    %c0_140 = arith.constant 0 : index
    %c0_141 = arith.constant 0 : index
    %c0_142 = arith.constant 0 : index
    %110 = vector.load %arg7[%c0_140, %c0_141, %c0_142] : memref<9x16x16xf32, #tpu.memory_space<vmem>>, vector<1x16x16xf32>
    %111 = vector.shape_cast %110 : vector<1x16x16xf32> to vector<16x16xf32>
    %cst_143 = arith.constant dense<0.000000e+00> : vector<128x16xf32>
    %112 = tpu.matmul %109, %111, %cst_143 {dimension_numbers = #tpu.dot_dimension_numbers<[1], [0], [0], [1], [0, 0, 1, 1], [], []>} : vector<128x16xf32>, vector<16x16xf32>, vector<128x16xf32> -> vector<128x16xf32>
    %c0_144 = arith.constant 0 : index
    %c0_145 = arith.constant 0 : index
    %c1_146 = arith.constant 1 : index
    %c0_147 = arith.constant 0 : index
    %113 = vector.load %arg10[%c0_144, %c0_145, %c1_146, %c0_147] : memref<2x10x10x16xf32, #tpu.memory_space<vmem>>, vector<2x8x8x16xf32>
    %114 = vector.shape_cast %113 : vector<2x8x8x16xf32> to vector<128x16xf32>
    %c1_148 = arith.constant 1 : index
    %c0_149 = arith.constant 0 : index
    %c0_150 = arith.constant 0 : index
    %115 = vector.load %arg7[%c1_148, %c0_149, %c0_150] : memref<9x16x16xf32, #tpu.memory_space<vmem>>, vector<1x16x16xf32>
    %116 = vector.shape_cast %115 : vector<1x16x16xf32> to vector<16x16xf32>
    %cst_151 = arith.constant dense<0.000000e+00> : vector<128x16xf32>
    %117 = tpu.matmul %114, %116, %cst_151 {dimension_numbers = #tpu.dot_dimension_numbers<[1], [0], [0], [1], [0, 0, 1, 1], [], []>} : vector<128x16xf32>, vector<16x16xf32>, vector<128x16xf32> -> vector<128x16xf32>
    %118 = arith.addf %112, %117 : vector<128x16xf32>
    %c0_152 = arith.constant 0 : index
    %c0_153 = arith.constant 0 : index
    %c2_154 = arith.constant 2 : index
    %c0_155 = arith.constant 0 : index
    %119 = vector.load %arg10[%c0_152, %c0_153, %c2_154, %c0_155] : memref<2x10x10x16xf32, #tpu.memory_space<vmem>>, vector<2x8x8x16xf32>
    %120 = vector.shape_cast %119 : vector<2x8x8x16xf32> to vector<128x16xf32>
    %c2_156 = arith.constant 2 : index
    %c0_157 = arith.constant 0 : index
    %c0_158 = arith.constant 0 : index
    %121 = vector.load %arg7[%c2_156, %c0_157, %c0_158] : memref<9x16x16xf32, #tpu.memory_space<vmem>>, vector<1x16x16xf32>
    %122 = vector.shape_cast %121 : vector<1x16x16xf32> to vector<16x16xf32>
    %cst_159 = arith.constant dense<0.000000e+00> : vector<128x16xf32>
    %123 = tpu.matmul %120, %122, %cst_159 {dimension_numbers = #tpu.dot_dimension_numbers<[1], [0], [0], [1], [0, 0, 1, 1], [], []>} : vector<128x16xf32>, vector<16x16xf32>, vector<128x16xf32> -> vector<128x16xf32>
    %124 = arith.addf %118, %123 : vector<128x16xf32>
    %c0_160 = arith.constant 0 : index
    %c1_161 = arith.constant 1 : index
    %c0_162 = arith.constant 0 : index
    %c0_163 = arith.constant 0 : index
    %125 = vector.load %arg10[%c0_160, %c1_161, %c0_162, %c0_163] : memref<2x10x10x16xf32, #tpu.memory_space<vmem>>, vector<2x8x8x16xf32>
    %126 = vector.shape_cast %125 : vector<2x8x8x16xf32> to vector<128x16xf32>
    %c3_164 = arith.constant 3 : index
    %c0_165 = arith.constant 0 : index
    %c0_166 = arith.constant 0 : index
    %127 = vector.load %arg7[%c3_164, %c0_165, %c0_166] : memref<9x16x16xf32, #tpu.memory_space<vmem>>, vector<1x16x16xf32>
    %128 = vector.shape_cast %127 : vector<1x16x16xf32> to vector<16x16xf32>
    %cst_167 = arith.constant dense<0.000000e+00> : vector<128x16xf32>
    %129 = tpu.matmul %126, %128, %cst_167 {dimension_numbers = #tpu.dot_dimension_numbers<[1], [0], [0], [1], [0, 0, 1, 1], [], []>} : vector<128x16xf32>, vector<16x16xf32>, vector<128x16xf32> -> vector<128x16xf32>
    %130 = arith.addf %124, %129 : vector<128x16xf32>
    %c0_168 = arith.constant 0 : index
    %c1_169 = arith.constant 1 : index
    %c1_170 = arith.constant 1 : index
    %c0_171 = arith.constant 0 : index
    %131 = vector.load %arg10[%c0_168, %c1_169, %c1_170, %c0_171] : memref<2x10x10x16xf32, #tpu.memory_space<vmem>>, vector<2x8x8x16xf32>
    %132 = vector.shape_cast %131 : vector<2x8x8x16xf32> to vector<128x16xf32>
    %c4_172 = arith.constant 4 : index
    %c0_173 = arith.constant 0 : index
    %c0_174 = arith.constant 0 : index
    %133 = vector.load %arg7[%c4_172, %c0_173, %c0_174] : memref<9x16x16xf32, #tpu.memory_space<vmem>>, vector<1x16x16xf32>
    %134 = vector.shape_cast %133 : vector<1x16x16xf32> to vector<16x16xf32>
    %cst_175 = arith.constant dense<0.000000e+00> : vector<128x16xf32>
    %135 = tpu.matmul %132, %134, %cst_175 {dimension_numbers = #tpu.dot_dimension_numbers<[1], [0], [0], [1], [0, 0, 1, 1], [], []>} : vector<128x16xf32>, vector<16x16xf32>, vector<128x16xf32> -> vector<128x16xf32>
    %136 = arith.addf %130, %135 : vector<128x16xf32>
    %c0_176 = arith.constant 0 : index
    %c1_177 = arith.constant 1 : index
    %c2_178 = arith.constant 2 : index
    %c0_179 = arith.constant 0 : index
    %137 = vector.load %arg10[%c0_176, %c1_177, %c2_178, %c0_179] : memref<2x10x10x16xf32, #tpu.memory_space<vmem>>, vector<2x8x8x16xf32>
    %138 = vector.shape_cast %137 : vector<2x8x8x16xf32> to vector<128x16xf32>
    %c5_180 = arith.constant 5 : index
    %c0_181 = arith.constant 0 : index
    %c0_182 = arith.constant 0 : index
    %139 = vector.load %arg7[%c5_180, %c0_181, %c0_182] : memref<9x16x16xf32, #tpu.memory_space<vmem>>, vector<1x16x16xf32>
    %140 = vector.shape_cast %139 : vector<1x16x16xf32> to vector<16x16xf32>
    %cst_183 = arith.constant dense<0.000000e+00> : vector<128x16xf32>
    %141 = tpu.matmul %138, %140, %cst_183 {dimension_numbers = #tpu.dot_dimension_numbers<[1], [0], [0], [1], [0, 0, 1, 1], [], []>} : vector<128x16xf32>, vector<16x16xf32>, vector<128x16xf32> -> vector<128x16xf32>
    %142 = arith.addf %136, %141 : vector<128x16xf32>
    %c0_184 = arith.constant 0 : index
    %c2_185 = arith.constant 2 : index
    %c0_186 = arith.constant 0 : index
    %c0_187 = arith.constant 0 : index
    %143 = vector.load %arg10[%c0_184, %c2_185, %c0_186, %c0_187] : memref<2x10x10x16xf32, #tpu.memory_space<vmem>>, vector<2x8x8x16xf32>
    %144 = vector.shape_cast %143 : vector<2x8x8x16xf32> to vector<128x16xf32>
    %c6_188 = arith.constant 6 : index
    %c0_189 = arith.constant 0 : index
    %c0_190 = arith.constant 0 : index
    %145 = vector.load %arg7[%c6_188, %c0_189, %c0_190] : memref<9x16x16xf32, #tpu.memory_space<vmem>>, vector<1x16x16xf32>
    %146 = vector.shape_cast %145 : vector<1x16x16xf32> to vector<16x16xf32>
    %cst_191 = arith.constant dense<0.000000e+00> : vector<128x16xf32>
    %147 = tpu.matmul %144, %146, %cst_191 {dimension_numbers = #tpu.dot_dimension_numbers<[1], [0], [0], [1], [0, 0, 1, 1], [], []>} : vector<128x16xf32>, vector<16x16xf32>, vector<128x16xf32> -> vector<128x16xf32>
    %148 = arith.addf %142, %147 : vector<128x16xf32>
    %c0_192 = arith.constant 0 : index
    %c2_193 = arith.constant 2 : index
    %c1_194 = arith.constant 1 : index
    %c0_195 = arith.constant 0 : index
    %149 = vector.load %arg10[%c0_192, %c2_193, %c1_194, %c0_195] : memref<2x10x10x16xf32, #tpu.memory_space<vmem>>, vector<2x8x8x16xf32>
    %150 = vector.shape_cast %149 : vector<2x8x8x16xf32> to vector<128x16xf32>
    %c7_196 = arith.constant 7 : index
    %c0_197 = arith.constant 0 : index
    %c0_198 = arith.constant 0 : index
    %151 = vector.load %arg7[%c7_196, %c0_197, %c0_198] : memref<9x16x16xf32, #tpu.memory_space<vmem>>, vector<1x16x16xf32>
    %152 = vector.shape_cast %151 : vector<1x16x16xf32> to vector<16x16xf32>
    %cst_199 = arith.constant dense<0.000000e+00> : vector<128x16xf32>
    %153 = tpu.matmul %150, %152, %cst_199 {dimension_numbers = #tpu.dot_dimension_numbers<[1], [0], [0], [1], [0, 0, 1, 1], [], []>} : vector<128x16xf32>, vector<16x16xf32>, vector<128x16xf32> -> vector<128x16xf32>
    %154 = arith.addf %148, %153 : vector<128x16xf32>
    %c0_200 = arith.constant 0 : index
    %c2_201 = arith.constant 2 : index
    %c2_202 = arith.constant 2 : index
    %c0_203 = arith.constant 0 : index
    %155 = vector.load %arg10[%c0_200, %c2_201, %c2_202, %c0_203] : memref<2x10x10x16xf32, #tpu.memory_space<vmem>>, vector<2x8x8x16xf32>
    %156 = vector.shape_cast %155 : vector<2x8x8x16xf32> to vector<128x16xf32>
    %c8_204 = arith.constant 8 : index
    %c0_205 = arith.constant 0 : index
    %c0_206 = arith.constant 0 : index
    %157 = vector.load %arg7[%c8_204, %c0_205, %c0_206] : memref<9x16x16xf32, #tpu.memory_space<vmem>>, vector<1x16x16xf32>
    %158 = vector.shape_cast %157 : vector<1x16x16xf32> to vector<16x16xf32>
    %cst_207 = arith.constant dense<0.000000e+00> : vector<128x16xf32>
    %159 = tpu.matmul %156, %158, %cst_207 {dimension_numbers = #tpu.dot_dimension_numbers<[1], [0], [0], [1], [0, 0, 1, 1], [], []>} : vector<128x16xf32>, vector<16x16xf32>, vector<128x16xf32> -> vector<128x16xf32>
    %160 = arith.addf %154, %159 : vector<128x16xf32>
    %c0_208 = arith.constant 0 : index
    %c0_209 = arith.constant 0 : index
    %c0_210 = arith.constant 0 : index
    %c0_211 = arith.constant 0 : index
    %c0_212 = arith.constant 0 : index
    %161 = vector.load %arg1[%c0_208, %c0_209, %c0_210, %c0_211, %c0_212] : memref<1x2x8x8x16xf32, #tpu.memory_space<vmem>>, vector<1x2x8x8x16xf32>
    %162 = vector.shape_cast %161 : vector<1x2x8x8x16xf32> to vector<2x8x8x16xf32>
    %163 = vector.shape_cast %162 : vector<2x8x8x16xf32> to vector<128x16xf32>
    %164 = arith.addf %160, %163 : vector<128x16xf32>
    %165 = vector.shape_cast %164 : vector<128x16xf32> to vector<2x8x128xf32>
    %c0_213 = arith.constant 0 : index
    %c0_214 = arith.constant 0 : index
    %c0_215 = arith.constant 0 : index
    %166 = vector.load %arg8[%c0_213, %c0_214, %c0_215] : memref<2x8x128xf32, #tpu.memory_space<vmem>>, vector<2x8x128xf32>
    tpu.vector_store %arg8[%c0_213, %c0_214, %c0_215], %165 {strides = array<i32>} : memref<2x8x128xf32, #tpu.memory_space<vmem>>, vector<2x8x128xf32>,
    return
  }
  func.func @transform_0(%arg0: i32) -> (i32, i32, i32, i32, i32) {
    %c0_i32 = arith.constant 0 : i32
    %c0_i32_0 = arith.constant 0 : i32
    %c0_i32_1 = arith.constant 0 : i32
    %c0_i32_2 = arith.constant 0 : i32
    %c0_i32_3 = arith.constant 0 : i32
    return %c0_i32, %arg0, %c0_i32_0, %c0_i32_1, %c0_i32_2 : i32, i32, i32, i32, i32
  }
  func.func @transform_1(%arg0: i32) -> (i32, i32) {
    %c0_i32 = arith.constant 0 : i32
    %c0_i32_0 = arith.constant 0 : i32
    %c0_i32_1 = arith.constant 0 : i32
    return %c0_i32, %c0_i32_0 : i32, i32
  }
  func.func @transform_2(%arg0: i32) -> (i32, i32) {
    %c0_i32 = arith.constant 0 : i32
    %c0_i32_0 = arith.constant 0 : i32
    %c0_i32_1 = arith.constant 0 : i32
    return %c0_i32, %c0_i32_0 : i32, i32
  }
  func.func @transform_3(%arg0: i32) -> (i32, i32, i32) {
    %c0_i32 = arith.constant 0 : i32
    %c0_i32_0 = arith.constant 0 : i32
    %c0_i32_1 = arith.constant 0 : i32
    %c0_i32_2 = arith.constant 0 : i32
    return %c0_i32, %c0_i32_0, %c0_i32_1 : i32, i32, i32
  }
  func.func @transform_4(%arg0: i32) -> (i32, i32) {
    %c0_i32 = arith.constant 0 : i32
    %c0_i32_0 = arith.constant 0 : i32
    %c0_i32_1 = arith.constant 0 : i32
    return %c0_i32, %c0_i32_0 : i32, i32
  }
  func.func @transform_5(%arg0: i32) -> (i32, i32) {
    %c0_i32 = arith.constant 0 : i32
    %c0_i32_0 = arith.constant 0 : i32
    %c0_i32_1 = arith.constant 0 : i32
    return %c0_i32, %c0_i32_0 : i32, i32
  }
  func.func @transform_6(%arg0: i32) -> (i32, i32, i32) {
    %c0_i32 = arith.constant 0 : i32
    %c0_i32_0 = arith.constant 0 : i32
    %c0_i32_1 = arith.constant 0 : i32
    %c0_i32_2 = arith.constant 0 : i32
    return %c0_i32, %c0_i32_0, %c0_i32_1 : i32, i32, i32
  }
  func.func @transform_7(%arg0: i32) -> (i32, i32, i32) {
    %c0_i32 = arith.constant 0 : i32
    %c0_i32_0 = arith.constant 0 : i32
    %c0_i32_1 = arith.constant 0 : i32
    return %arg0, %c0_i32, %c0_i32_0 : i32, i32, i32
  }
}

module attributes {stable_mosaic.version = 11 : i64} {
  func.func @kernel(%arg0: i32, %arg1: memref<4x2x8x8x8xf32, #tpu.memory_space<vmem>>, %arg2: memref<1x8xf32, #tpu.memory_space<vmem>>, %arg3: memref<1x8xf32, #tpu.memory_space<vmem>>, %arg4: memref<9x8x16xf32, #tpu.memory_space<vmem>>, %arg5: memref<1x16xf32, #tpu.memory_space<vmem>>, %arg6: memref<1x16xf32, #tpu.memory_space<vmem>>, %arg7: memref<9x16x16xf32, #tpu.memory_space<vmem>>, %arg8: memref<8x16xf32, #tpu.memory_space<vmem>>, %arg9: memref<2x8x8x16xf32, #tpu.memory_space<vmem>>, %arg10: memref<4x2x10x10x8xf32, #tpu.memory_space<vmem>>, %arg11: memref<2x10x10x16xf32, #tpu.memory_space<vmem>>) attributes {dimension_semantics = [#tpu.dimension_semantics<parallel>], iteration_bounds = array<i64: 1>, scalar_prefetch = 0 : i64, scratch_operands = 2 : i64, tpu.core_type = #tpu.core_type<tc>, window_params = [{transform_indices = @transform_0, window_bounds = array<i64: 4, 2, 8, 8, 8>}, {pipeline_mode = #tpu.pipeline_mode<synchronous>, transform_indices = @transform_1, window_bounds = array<i64: 1, 8>}, {pipeline_mode = #tpu.pipeline_mode<synchronous>, transform_indices = @transform_2, window_bounds = array<i64: 1, 8>}, {pipeline_mode = #tpu.pipeline_mode<synchronous>, transform_indices = @transform_3, window_bounds = array<i64: 9, 8, 16>}, {pipeline_mode = #tpu.pipeline_mode<synchronous>, transform_indices = @transform_4, window_bounds = array<i64: 1, 16>}, {pipeline_mode = #tpu.pipeline_mode<synchronous>, transform_indices = @transform_5, window_bounds = array<i64: 1, 16>}, {pipeline_mode = #tpu.pipeline_mode<synchronous>, transform_indices = @transform_6, window_bounds = array<i64: 9, 16, 16>}, {pipeline_mode = #tpu.pipeline_mode<synchronous>, transform_indices = @transform_7, window_bounds = array<i64: 8, 16>}, {transform_indices = @transform_8, window_bounds = array<i64: 2, 8, 8, 16>}]} {
    %cst = arith.constant 0.000000e+00 : f32
    %0 = vector.broadcast %cst : f32 to vector<4x2x1x10x8xf32>
    %cst_0 = arith.constant 0.000000e+00 : f32
    %1 = vector.broadcast %cst_0 : f32 to vector<4x2x8x1x8xf32>
    %c0 = arith.constant 0 : index
    %c0_1 = arith.constant 0 : index
    %c0_2 = arith.constant 0 : index
    %c0_3 = arith.constant 0 : index
    %c0_4 = arith.constant 0 : index
    %2 = vector.load %arg10[%c0, %c0_1, %c0_2, %c0_3, %c0_4] : memref<4x2x10x10x8xf32, #tpu.memory_space<vmem>>, vector<4x2x1x10x8xf32>
    tpu.vector_store %arg10[%c0, %c0_1, %c0_2, %c0_3, %c0_4], %0 {strides = array<i32>} : memref<4x2x10x10x8xf32, #tpu.memory_space<vmem>>, vector<4x2x1x10x8xf32>,
    %c0_5 = arith.constant 0 : index
    %c0_6 = arith.constant 0 : index
    %c9 = arith.constant 9 : index
    %c0_7 = arith.constant 0 : index
    %c0_8 = arith.constant 0 : index
    %3 = vector.load %arg10[%c0_5, %c0_6, %c9, %c0_7, %c0_8] : memref<4x2x10x10x8xf32, #tpu.memory_space<vmem>>, vector<4x2x1x10x8xf32>
    tpu.vector_store %arg10[%c0_5, %c0_6, %c9, %c0_7, %c0_8], %0 {strides = array<i32>} : memref<4x2x10x10x8xf32, #tpu.memory_space<vmem>>, vector<4x2x1x10x8xf32>,
    %c0_9 = arith.constant 0 : index
    %c0_10 = arith.constant 0 : index
    %c1 = arith.constant 1 : index
    %c0_11 = arith.constant 0 : index
    %c0_12 = arith.constant 0 : index
    %4 = vector.load %arg10[%c0_9, %c0_10, %c1, %c0_11, %c0_12] : memref<4x2x10x10x8xf32, #tpu.memory_space<vmem>>, vector<4x2x8x1x8xf32>
    tpu.vector_store %arg10[%c0_9, %c0_10, %c1, %c0_11, %c0_12], %1 {strides = array<i32>} : memref<4x2x10x10x8xf32, #tpu.memory_space<vmem>>, vector<4x2x8x1x8xf32>,
    %c0_13 = arith.constant 0 : index
    %c0_14 = arith.constant 0 : index
    %c1_15 = arith.constant 1 : index
    %c9_16 = arith.constant 9 : index
    %c0_17 = arith.constant 0 : index
    %5 = vector.load %arg10[%c0_13, %c0_14, %c1_15, %c9_16, %c0_17] : memref<4x2x10x10x8xf32, #tpu.memory_space<vmem>>, vector<4x2x8x1x8xf32>
    tpu.vector_store %arg10[%c0_13, %c0_14, %c1_15, %c9_16, %c0_17], %1 {strides = array<i32>} : memref<4x2x10x10x8xf32, #tpu.memory_space<vmem>>, vector<4x2x8x1x8xf32>,
    %c0_18 = arith.constant 0 : index
    %c0_19 = arith.constant 0 : index
    %c0_20 = arith.constant 0 : index
    %c0_21 = arith.constant 0 : index
    %c0_22 = arith.constant 0 : index
    %6 = vector.load %arg1[%c0_18, %c0_19, %c0_20, %c0_21, %c0_22] : memref<4x2x8x8x8xf32, #tpu.memory_space<vmem>>, vector<4x2x8x8x8xf32>
    %c0_23 = arith.constant 0 : index
    %c0_24 = arith.constant 0 : index
    %7 = vector.load %arg2[%c0_23, %c0_24] : memref<1x8xf32, #tpu.memory_space<vmem>>, vector<1x8xf32>
    %8 = vector.shape_cast %7 : vector<1x8xf32> to vector<8xf32>
    %9 = vector.shape_cast %8 : vector<8xf32> to vector<1x1x1x1x8xf32>
    %10 = vector.broadcast %9 : vector<1x1x1x1x8xf32> to vector<4x2x8x8x8xf32>
    %11 = arith.mulf %6, %10 : vector<4x2x8x8x8xf32>
    %c0_25 = arith.constant 0 : index
    %c0_26 = arith.constant 0 : index
    %12 = vector.load %arg3[%c0_25, %c0_26] : memref<1x8xf32, #tpu.memory_space<vmem>>, vector<1x8xf32>
    %13 = vector.shape_cast %12 : vector<1x8xf32> to vector<8xf32>
    %14 = vector.shape_cast %13 : vector<8xf32> to vector<1x1x1x1x8xf32>
    %15 = vector.broadcast %14 : vector<1x1x1x1x8xf32> to vector<4x2x8x8x8xf32>
    %16 = arith.addf %11, %15 : vector<4x2x8x8x8xf32>
    %cst_27 = arith.constant 0.000000e+00 : f32
    %17 = vector.broadcast %cst_27 : f32 to vector<4x2x8x8x8xf32>
    %18 = arith.cmpf oge, %16, %17 : vector<4x2x8x8x8xf32>
    %cst_28 = arith.constant 1.000000e-01 : f32
    %19 = vector.broadcast %cst_28 : f32 to vector<4x2x8x8x8xf32>
    %20 = arith.mulf %19, %16 : vector<4x2x8x8x8xf32>
    %21 = arith.select %18, %16, %20 : vector<4x2x8x8x8xi1>, vector<4x2x8x8x8xf32>
    %c0_29 = arith.constant 0 : index
    %c0_30 = arith.constant 0 : index
    %c1_31 = arith.constant 1 : index
    %c1_32 = arith.constant 1 : index
    %c0_33 = arith.constant 0 : index
    %22 = vector.load %arg10[%c0_29, %c0_30, %c1_31, %c1_32, %c0_33] : memref<4x2x10x10x8xf32, #tpu.memory_space<vmem>>, vector<4x2x8x8x8xf32>
    tpu.vector_store %arg10[%c0_29, %c0_30, %c1_31, %c1_32, %c0_33], %21 {strides = array<i32>} : memref<4x2x10x10x8xf32, #tpu.memory_space<vmem>>, vector<4x2x8x8x8xf32>,
    %c3 = arith.constant 3 : index
    %c0_34 = arith.constant 0 : index
    %c0_35 = arith.constant 0 : index
    %c0_36 = arith.constant 0 : index
    %c0_37 = arith.constant 0 : index
    %23 = vector.load %arg10[%c3, %c0_34, %c0_35, %c0_36, %c0_37] : memref<4x2x10x10x8xf32, #tpu.memory_space<vmem>>, vector<1x2x8x8x8xf32>
    %24 = vector.shape_cast %23 : vector<1x2x8x8x8xf32> to vector<2x8x8x8xf32>
    %25 = vector.shape_cast %24 : vector<2x8x8x8xf32> to vector<128x8xf32>
    %c0_38 = arith.constant 0 : index
    %c0_39 = arith.constant 0 : index
    %c0_40 = arith.constant 0 : index
    %26 = vector.load %arg4[%c0_38, %c0_39, %c0_40] : memref<9x8x16xf32, #tpu.memory_space<vmem>>, vector<1x8x16xf32>
    %27 = vector.shape_cast %26 : vector<1x8x16xf32> to vector<8x16xf32>
    %cst_41 = arith.constant dense<0.000000e+00> : vector<128x16xf32>
    %28 = tpu.matmul %25, %27, %cst_41 {dimension_numbers = #tpu.dot_dimension_numbers<[1], [0], [0], [1], [0, 0, 1, 1], [], []>} : vector<128x8xf32>, vector<8x16xf32>, vector<128x16xf32> -> vector<128x16xf32>
    %c2 = arith.constant 2 : index
    %c0_42 = arith.constant 0 : index
    %c0_43 = arith.constant 0 : index
    %c1_44 = arith.constant 1 : index
    %c0_45 = arith.constant 0 : index
    %29 = vector.load %arg10[%c2, %c0_42, %c0_43, %c1_44, %c0_45] : memref<4x2x10x10x8xf32, #tpu.memory_space<vmem>>, vector<1x2x8x8x8xf32>
    %30 = vector.shape_cast %29 : vector<1x2x8x8x8xf32> to vector<2x8x8x8xf32>
    %31 = vector.shape_cast %30 : vector<2x8x8x8xf32> to vector<128x8xf32>
    %c1_46 = arith.constant 1 : index
    %c0_47 = arith.constant 0 : index
    %c0_48 = arith.constant 0 : index
    %32 = vector.load %arg4[%c1_46, %c0_47, %c0_48] : memref<9x8x16xf32, #tpu.memory_space<vmem>>, vector<1x8x16xf32>
    %33 = vector.shape_cast %32 : vector<1x8x16xf32> to vector<8x16xf32>
    %cst_49 = arith.constant dense<0.000000e+00> : vector<128x16xf32>
    %34 = tpu.matmul %31, %33, %cst_49 {dimension_numbers = #tpu.dot_dimension_numbers<[1], [0], [0], [1], [0, 0, 1, 1], [], []>} : vector<128x8xf32>, vector<8x16xf32>, vector<128x16xf32> -> vector<128x16xf32>
    %35 = arith.addf %28, %34 : vector<128x16xf32>
    %c3_50 = arith.constant 3 : index
    %c0_51 = arith.constant 0 : index
    %c0_52 = arith.constant 0 : index
    %c1_53 = arith.constant 1 : index
    %c0_54 = arith.constant 0 : index
    %36 = vector.load %arg10[%c3_50, %c0_51, %c0_52, %c1_53, %c0_54] : memref<4x2x10x10x8xf32, #tpu.memory_space<vmem>>, vector<1x2x8x8x8xf32>
    %37 = vector.shape_cast %36 : vector<1x2x8x8x8xf32> to vector<2x8x8x8xf32>
    %38 = vector.shape_cast %37 : vector<2x8x8x8xf32> to vector<128x8xf32>
    %c2_55 = arith.constant 2 : index
    %c0_56 = arith.constant 0 : index
    %c0_57 = arith.constant 0 : index
    %39 = vector.load %arg4[%c2_55, %c0_56, %c0_57] : memref<9x8x16xf32, #tpu.memory_space<vmem>>, vector<1x8x16xf32>
    %40 = vector.shape_cast %39 : vector<1x8x16xf32> to vector<8x16xf32>
    %cst_58 = arith.constant dense<0.000000e+00> : vector<128x16xf32>
    %41 = tpu.matmul %38, %40, %cst_58 {dimension_numbers = #tpu.dot_dimension_numbers<[1], [0], [0], [1], [0, 0, 1, 1], [], []>} : vector<128x8xf32>, vector<8x16xf32>, vector<128x16xf32> -> vector<128x16xf32>
    %42 = arith.addf %35, %41 : vector<128x16xf32>
    %c1_59 = arith.constant 1 : index
    %c0_60 = arith.constant 0 : index
    %c1_61 = arith.constant 1 : index
    %c0_62 = arith.constant 0 : index
    %c0_63 = arith.constant 0 : index
    %43 = vector.load %arg10[%c1_59, %c0_60, %c1_61, %c0_62, %c0_63] : memref<4x2x10x10x8xf32, #tpu.memory_space<vmem>>, vector<1x2x8x8x8xf32>
    %44 = vector.shape_cast %43 : vector<1x2x8x8x8xf32> to vector<2x8x8x8xf32>
    %45 = vector.shape_cast %44 : vector<2x8x8x8xf32> to vector<128x8xf32>
    %c3_64 = arith.constant 3 : index
    %c0_65 = arith.constant 0 : index
    %c0_66 = arith.constant 0 : index
    %46 = vector.load %arg4[%c3_64, %c0_65, %c0_66] : memref<9x8x16xf32, #tpu.memory_space<vmem>>, vector<1x8x16xf32>
    %47 = vector.shape_cast %46 : vector<1x8x16xf32> to vector<8x16xf32>
    %cst_67 = arith.constant dense<0.000000e+00> : vector<128x16xf32>
    %48 = tpu.matmul %45, %47, %cst_67 {dimension_numbers = #tpu.dot_dimension_numbers<[1], [0], [0], [1], [0, 0, 1, 1], [], []>} : vector<128x8xf32>, vector<8x16xf32>, vector<128x16xf32> -> vector<128x16xf32>
    %49 = arith.addf %42, %48 : vector<128x16xf32>
    %c0_68 = arith.constant 0 : index
    %c0_69 = arith.constant 0 : index
    %c1_70 = arith.constant 1 : index
    %c1_71 = arith.constant 1 : index
    %c0_72 = arith.constant 0 : index
    %50 = vector.load %arg10[%c0_68, %c0_69, %c1_70, %c1_71, %c0_72] : memref<4x2x10x10x8xf32, #tpu.memory_space<vmem>>, vector<1x2x8x8x8xf32>
    %51 = vector.shape_cast %50 : vector<1x2x8x8x8xf32> to vector<2x8x8x8xf32>
    %52 = vector.shape_cast %51 : vector<2x8x8x8xf32> to vector<128x8xf32>
    %c4 = arith.constant 4 : index
    %c0_73 = arith.constant 0 : index
    %c0_74 = arith.constant 0 : index
    %53 = vector.load %arg4[%c4, %c0_73, %c0_74] : memref<9x8x16xf32, #tpu.memory_space<vmem>>, vector<1x8x16xf32>
    %54 = vector.shape_cast %53 : vector<1x8x16xf32> to vector<8x16xf32>
    %cst_75 = arith.constant dense<0.000000e+00> : vector<128x16xf32>
    %55 = tpu.matmul %52, %54, %cst_75 {dimension_numbers = #tpu.dot_dimension_numbers<[1], [0], [0], [1], [0, 0, 1, 1], [], []>} : vector<128x8xf32>, vector<8x16xf32>, vector<128x16xf32> -> vector<128x16xf32>
    %56 = arith.addf %49, %55 : vector<128x16xf32>
    %c1_76 = arith.constant 1 : index
    %c0_77 = arith.constant 0 : index
    %c1_78 = arith.constant 1 : index
    %c1_79 = arith.constant 1 : index
    %c0_80 = arith.constant 0 : index
    %57 = vector.load %arg10[%c1_76, %c0_77, %c1_78, %c1_79, %c0_80] : memref<4x2x10x10x8xf32, #tpu.memory_space<vmem>>, vector<1x2x8x8x8xf32>
    %58 = vector.shape_cast %57 : vector<1x2x8x8x8xf32> to vector<2x8x8x8xf32>
    %59 = vector.shape_cast %58 : vector<2x8x8x8xf32> to vector<128x8xf32>
    %c5 = arith.constant 5 : index
    %c0_81 = arith.constant 0 : index
    %c0_82 = arith.constant 0 : index
    %60 = vector.load %arg4[%c5, %c0_81, %c0_82] : memref<9x8x16xf32, #tpu.memory_space<vmem>>, vector<1x8x16xf32>
    %61 = vector.shape_cast %60 : vector<1x8x16xf32> to vector<8x16xf32>
    %cst_83 = arith.constant dense<0.000000e+00> : vector<128x16xf32>
    %62 = tpu.matmul %59, %61, %cst_83 {dimension_numbers = #tpu.dot_dimension_numbers<[1], [0], [0], [1], [0, 0, 1, 1], [], []>} : vector<128x8xf32>, vector<8x16xf32>, vector<128x16xf32> -> vector<128x16xf32>
    %63 = arith.addf %56, %62 : vector<128x16xf32>
    %c3_84 = arith.constant 3 : index
    %c0_85 = arith.constant 0 : index
    %c1_86 = arith.constant 1 : index
    %c0_87 = arith.constant 0 : index
    %c0_88 = arith.constant 0 : index
    %64 = vector.load %arg10[%c3_84, %c0_85, %c1_86, %c0_87, %c0_88] : memref<4x2x10x10x8xf32, #tpu.memory_space<vmem>>, vector<1x2x8x8x8xf32>
    %65 = vector.shape_cast %64 : vector<1x2x8x8x8xf32> to vector<2x8x8x8xf32>
    %66 = vector.shape_cast %65 : vector<2x8x8x8xf32> to vector<128x8xf32>
    %c6 = arith.constant 6 : index
    %c0_89 = arith.constant 0 : index
    %c0_90 = arith.constant 0 : index
    %67 = vector.load %arg4[%c6, %c0_89, %c0_90] : memref<9x8x16xf32, #tpu.memory_space<vmem>>, vector<1x8x16xf32>
    %68 = vector.shape_cast %67 : vector<1x8x16xf32> to vector<8x16xf32>
    %cst_91 = arith.constant dense<0.000000e+00> : vector<128x16xf32>
    %69 = tpu.matmul %66, %68, %cst_91 {dimension_numbers = #tpu.dot_dimension_numbers<[1], [0], [0], [1], [0, 0, 1, 1], [], []>} : vector<128x8xf32>, vector<8x16xf32>, vector<128x16xf32> -> vector<128x16xf32>
    %70 = arith.addf %63, %69 : vector<128x16xf32>
    %c2_92 = arith.constant 2 : index
    %c0_93 = arith.constant 0 : index
    %c1_94 = arith.constant 1 : index
    %c1_95 = arith.constant 1 : index
    %c0_96 = arith.constant 0 : index
    %71 = vector.load %arg10[%c2_92, %c0_93, %c1_94, %c1_95, %c0_96] : memref<4x2x10x10x8xf32, #tpu.memory_space<vmem>>, vector<1x2x8x8x8xf32>
    %72 = vector.shape_cast %71 : vector<1x2x8x8x8xf32> to vector<2x8x8x8xf32>
    %73 = vector.shape_cast %72 : vector<2x8x8x8xf32> to vector<128x8xf32>
    %c7 = arith.constant 7 : index
    %c0_97 = arith.constant 0 : index
    %c0_98 = arith.constant 0 : index
    %74 = vector.load %arg4[%c7, %c0_97, %c0_98] : memref<9x8x16xf32, #tpu.memory_space<vmem>>, vector<1x8x16xf32>
    %75 = vector.shape_cast %74 : vector<1x8x16xf32> to vector<8x16xf32>
    %cst_99 = arith.constant dense<0.000000e+00> : vector<128x16xf32>
    %76 = tpu.matmul %73, %75, %cst_99 {dimension_numbers = #tpu.dot_dimension_numbers<[1], [0], [0], [1], [0, 0, 1, 1], [], []>} : vector<128x8xf32>, vector<8x16xf32>, vector<128x16xf32> -> vector<128x16xf32>
    %77 = arith.addf %70, %76 : vector<128x16xf32>
    %c3_100 = arith.constant 3 : index
    %c0_101 = arith.constant 0 : index
    %c1_102 = arith.constant 1 : index
    %c1_103 = arith.constant 1 : index
    %c0_104 = arith.constant 0 : index
    %78 = vector.load %arg10[%c3_100, %c0_101, %c1_102, %c1_103, %c0_104] : memref<4x2x10x10x8xf32, #tpu.memory_space<vmem>>, vector<1x2x8x8x8xf32>
    %79 = vector.shape_cast %78 : vector<1x2x8x8x8xf32> to vector<2x8x8x8xf32>
    %80 = vector.shape_cast %79 : vector<2x8x8x8xf32> to vector<128x8xf32>
    %c8 = arith.constant 8 : index
    %c0_105 = arith.constant 0 : index
    %c0_106 = arith.constant 0 : index
    %81 = vector.load %arg4[%c8, %c0_105, %c0_106] : memref<9x8x16xf32, #tpu.memory_space<vmem>>, vector<1x8x16xf32>
    %82 = vector.shape_cast %81 : vector<1x8x16xf32> to vector<8x16xf32>
    %cst_107 = arith.constant dense<0.000000e+00> : vector<128x16xf32>
    %83 = tpu.matmul %80, %82, %cst_107 {dimension_numbers = #tpu.dot_dimension_numbers<[1], [0], [0], [1], [0, 0, 1, 1], [], []>} : vector<128x8xf32>, vector<8x16xf32>, vector<128x16xf32> -> vector<128x16xf32>
    %84 = arith.addf %77, %83 : vector<128x16xf32>
    %c0_108 = arith.constant 0 : index
    %c0_109 = arith.constant 0 : index
    %85 = vector.load %arg5[%c0_108, %c0_109] : memref<1x16xf32, #tpu.memory_space<vmem>>, vector<1x16xf32>
    %86 = vector.shape_cast %85 : vector<1x16xf32> to vector<16xf32>
    %87 = vector.shape_cast %86 : vector<16xf32> to vector<1x16xf32>
    %88 = vector.broadcast %87 : vector<1x16xf32> to vector<128x16xf32>
    %89 = arith.mulf %84, %88 : vector<128x16xf32>
    %c0_110 = arith.constant 0 : index
    %c0_111 = arith.constant 0 : index
    %90 = vector.load %arg6[%c0_110, %c0_111] : memref<1x16xf32, #tpu.memory_space<vmem>>, vector<1x16xf32>
    %91 = vector.shape_cast %90 : vector<1x16xf32> to vector<16xf32>
    %92 = vector.shape_cast %91 : vector<16xf32> to vector<1x16xf32>
    %93 = vector.broadcast %92 : vector<1x16xf32> to vector<128x16xf32>
    %94 = arith.addf %89, %93 : vector<128x16xf32>
    %cst_112 = arith.constant 0.000000e+00 : f32
    %95 = vector.broadcast %cst_112 : f32 to vector<128x16xf32>
    %96 = arith.cmpf oge, %94, %95 : vector<128x16xf32>
    %cst_113 = arith.constant 1.000000e-01 : f32
    %97 = vector.broadcast %cst_113 : f32 to vector<128x16xf32>
    %98 = arith.mulf %97, %94 : vector<128x16xf32>
    %99 = arith.select %96, %94, %98 : vector<128x16xi1>, vector<128x16xf32>
    %cst_114 = arith.constant 0.000000e+00 : f32
    %100 = vector.broadcast %cst_114 : f32 to vector<2x1x10x16xf32>
    %cst_115 = arith.constant 0.000000e+00 : f32
    %101 = vector.broadcast %cst_115 : f32 to vector<2x8x1x16xf32>
    %c0_116 = arith.constant 0 : index
    %c0_117 = arith.constant 0 : index
    %c0_118 = arith.constant 0 : index
    %c0_119 = arith.constant 0 : index
    %102 = vector.load %arg11[%c0_116, %c0_117, %c0_118, %c0_119] : memref<2x10x10x16xf32, #tpu.memory_space<vmem>>, vector<2x1x10x16xf32>
    tpu.vector_store %arg11[%c0_116, %c0_117, %c0_118, %c0_119], %100 {strides = array<i32>} : memref<2x10x10x16xf32, #tpu.memory_space<vmem>>, vector<2x1x10x16xf32>,
    %c0_120 = arith.constant 0 : index
    %c9_121 = arith.constant 9 : index
    %c0_122 = arith.constant 0 : index
    %c0_123 = arith.constant 0 : index
    %103 = vector.load %arg11[%c0_120, %c9_121, %c0_122, %c0_123] : memref<2x10x10x16xf32, #tpu.memory_space<vmem>>, vector<2x1x10x16xf32>
    tpu.vector_store %arg11[%c0_120, %c9_121, %c0_122, %c0_123], %100 {strides = array<i32>} : memref<2x10x10x16xf32, #tpu.memory_space<vmem>>, vector<2x1x10x16xf32>,
    %c0_124 = arith.constant 0 : index
    %c1_125 = arith.constant 1 : index
    %c0_126 = arith.constant 0 : index
    %c0_127 = arith.constant 0 : index
    %104 = vector.load %arg11[%c0_124, %c1_125, %c0_126, %c0_127] : memref<2x10x10x16xf32, #tpu.memory_space<vmem>>, vector<2x8x1x16xf32>
    tpu.vector_store %arg11[%c0_124, %c1_125, %c0_126, %c0_127], %101 {strides = array<i32>} : memref<2x10x10x16xf32, #tpu.memory_space<vmem>>, vector<2x8x1x16xf32>,
    %c0_128 = arith.constant 0 : index
    %c1_129 = arith.constant 1 : index
    %c9_130 = arith.constant 9 : index
    %c0_131 = arith.constant 0 : index
    %105 = vector.load %arg11[%c0_128, %c1_129, %c9_130, %c0_131] : memref<2x10x10x16xf32, #tpu.memory_space<vmem>>, vector<2x8x1x16xf32>
    tpu.vector_store %arg11[%c0_128, %c1_129, %c9_130, %c0_131], %101 {strides = array<i32>} : memref<2x10x10x16xf32, #tpu.memory_space<vmem>>, vector<2x8x1x16xf32>,
    %106 = vector.shape_cast %99 : vector<128x16xf32> to vector<2x8x8x16xf32>
    %c0_132 = arith.constant 0 : index
    %c1_133 = arith.constant 1 : index
    %c1_134 = arith.constant 1 : index
    %c0_135 = arith.constant 0 : index
    %107 = vector.load %arg11[%c0_132, %c1_133, %c1_134, %c0_135] : memref<2x10x10x16xf32, #tpu.memory_space<vmem>>, vector<2x8x8x16xf32>
    tpu.vector_store %arg11[%c0_132, %c1_133, %c1_134, %c0_135], %106 {strides = array<i32>} : memref<2x10x10x16xf32, #tpu.memory_space<vmem>>, vector<2x8x8x16xf32>,
    %c0_136 = arith.constant 0 : index
    %c0_137 = arith.constant 0 : index
    %c0_138 = arith.constant 0 : index
    %c0_139 = arith.constant 0 : index
    %108 = vector.load %arg11[%c0_136, %c0_137, %c0_138, %c0_139] : memref<2x10x10x16xf32, #tpu.memory_space<vmem>>, vector<2x8x8x16xf32>
    %109 = vector.shape_cast %108 : vector<2x8x8x16xf32> to vector<128x16xf32>
    %c0_140 = arith.constant 0 : index
    %c0_141 = arith.constant 0 : index
    %c0_142 = arith.constant 0 : index
    %110 = vector.load %arg7[%c0_140, %c0_141, %c0_142] : memref<9x16x16xf32, #tpu.memory_space<vmem>>, vector<1x16x16xf32>
    %111 = vector.shape_cast %110 : vector<1x16x16xf32> to vector<16x16xf32>
    %cst_143 = arith.constant dense<0.000000e+00> : vector<128x16xf32>
    %112 = tpu.matmul %109, %111, %cst_143 {dimension_numbers = #tpu.dot_dimension_numbers<[1], [0], [0], [1], [0, 0, 1, 1], [], []>} : vector<128x16xf32>, vector<16x16xf32>, vector<128x16xf32> -> vector<128x16xf32>
    %c0_144 = arith.constant 0 : index
    %c0_145 = arith.constant 0 : index
    %c1_146 = arith.constant 1 : index
    %c0_147 = arith.constant 0 : index
    %113 = vector.load %arg11[%c0_144, %c0_145, %c1_146, %c0_147] : memref<2x10x10x16xf32, #tpu.memory_space<vmem>>, vector<2x8x8x16xf32>
    %114 = vector.shape_cast %113 : vector<2x8x8x16xf32> to vector<128x16xf32>
    %c1_148 = arith.constant 1 : index
    %c0_149 = arith.constant 0 : index
    %c0_150 = arith.constant 0 : index
    %115 = vector.load %arg7[%c1_148, %c0_149, %c0_150] : memref<9x16x16xf32, #tpu.memory_space<vmem>>, vector<1x16x16xf32>
    %116 = vector.shape_cast %115 : vector<1x16x16xf32> to vector<16x16xf32>
    %cst_151 = arith.constant dense<0.000000e+00> : vector<128x16xf32>
    %117 = tpu.matmul %114, %116, %cst_151 {dimension_numbers = #tpu.dot_dimension_numbers<[1], [0], [0], [1], [0, 0, 1, 1], [], []>} : vector<128x16xf32>, vector<16x16xf32>, vector<128x16xf32> -> vector<128x16xf32>
    %118 = arith.addf %112, %117 : vector<128x16xf32>
    %c0_152 = arith.constant 0 : index
    %c0_153 = arith.constant 0 : index
    %c2_154 = arith.constant 2 : index
    %c0_155 = arith.constant 0 : index
    %119 = vector.load %arg11[%c0_152, %c0_153, %c2_154, %c0_155] : memref<2x10x10x16xf32, #tpu.memory_space<vmem>>, vector<2x8x8x16xf32>
    %120 = vector.shape_cast %119 : vector<2x8x8x16xf32> to vector<128x16xf32>
    %c2_156 = arith.constant 2 : index
    %c0_157 = arith.constant 0 : index
    %c0_158 = arith.constant 0 : index
    %121 = vector.load %arg7[%c2_156, %c0_157, %c0_158] : memref<9x16x16xf32, #tpu.memory_space<vmem>>, vector<1x16x16xf32>
    %122 = vector.shape_cast %121 : vector<1x16x16xf32> to vector<16x16xf32>
    %cst_159 = arith.constant dense<0.000000e+00> : vector<128x16xf32>
    %123 = tpu.matmul %120, %122, %cst_159 {dimension_numbers = #tpu.dot_dimension_numbers<[1], [0], [0], [1], [0, 0, 1, 1], [], []>} : vector<128x16xf32>, vector<16x16xf32>, vector<128x16xf32> -> vector<128x16xf32>
    %124 = arith.addf %118, %123 : vector<128x16xf32>
    %c0_160 = arith.constant 0 : index
    %c1_161 = arith.constant 1 : index
    %c0_162 = arith.constant 0 : index
    %c0_163 = arith.constant 0 : index
    %125 = vector.load %arg11[%c0_160, %c1_161, %c0_162, %c0_163] : memref<2x10x10x16xf32, #tpu.memory_space<vmem>>, vector<2x8x8x16xf32>
    %126 = vector.shape_cast %125 : vector<2x8x8x16xf32> to vector<128x16xf32>
    %c3_164 = arith.constant 3 : index
    %c0_165 = arith.constant 0 : index
    %c0_166 = arith.constant 0 : index
    %127 = vector.load %arg7[%c3_164, %c0_165, %c0_166] : memref<9x16x16xf32, #tpu.memory_space<vmem>>, vector<1x16x16xf32>
    %128 = vector.shape_cast %127 : vector<1x16x16xf32> to vector<16x16xf32>
    %cst_167 = arith.constant dense<0.000000e+00> : vector<128x16xf32>
    %129 = tpu.matmul %126, %128, %cst_167 {dimension_numbers = #tpu.dot_dimension_numbers<[1], [0], [0], [1], [0, 0, 1, 1], [], []>} : vector<128x16xf32>, vector<16x16xf32>, vector<128x16xf32> -> vector<128x16xf32>
    %130 = arith.addf %124, %129 : vector<128x16xf32>
    %c0_168 = arith.constant 0 : index
    %c1_169 = arith.constant 1 : index
    %c1_170 = arith.constant 1 : index
    %c0_171 = arith.constant 0 : index
    %131 = vector.load %arg11[%c0_168, %c1_169, %c1_170, %c0_171] : memref<2x10x10x16xf32, #tpu.memory_space<vmem>>, vector<2x8x8x16xf32>
    %132 = vector.shape_cast %131 : vector<2x8x8x16xf32> to vector<128x16xf32>
    %c4_172 = arith.constant 4 : index
    %c0_173 = arith.constant 0 : index
    %c0_174 = arith.constant 0 : index
    %133 = vector.load %arg7[%c4_172, %c0_173, %c0_174] : memref<9x16x16xf32, #tpu.memory_space<vmem>>, vector<1x16x16xf32>
    %134 = vector.shape_cast %133 : vector<1x16x16xf32> to vector<16x16xf32>
    %cst_175 = arith.constant dense<0.000000e+00> : vector<128x16xf32>
    %135 = tpu.matmul %132, %134, %cst_175 {dimension_numbers = #tpu.dot_dimension_numbers<[1], [0], [0], [1], [0, 0, 1, 1], [], []>} : vector<128x16xf32>, vector<16x16xf32>, vector<128x16xf32> -> vector<128x16xf32>
    %136 = arith.addf %130, %135 : vector<128x16xf32>
    %c0_176 = arith.constant 0 : index
    %c1_177 = arith.constant 1 : index
    %c2_178 = arith.constant 2 : index
    %c0_179 = arith.constant 0 : index
    %137 = vector.load %arg11[%c0_176, %c1_177, %c2_178, %c0_179] : memref<2x10x10x16xf32, #tpu.memory_space<vmem>>, vector<2x8x8x16xf32>
    %138 = vector.shape_cast %137 : vector<2x8x8x16xf32> to vector<128x16xf32>
    %c5_180 = arith.constant 5 : index
    %c0_181 = arith.constant 0 : index
    %c0_182 = arith.constant 0 : index
    %139 = vector.load %arg7[%c5_180, %c0_181, %c0_182] : memref<9x16x16xf32, #tpu.memory_space<vmem>>, vector<1x16x16xf32>
    %140 = vector.shape_cast %139 : vector<1x16x16xf32> to vector<16x16xf32>
    %cst_183 = arith.constant dense<0.000000e+00> : vector<128x16xf32>
    %141 = tpu.matmul %138, %140, %cst_183 {dimension_numbers = #tpu.dot_dimension_numbers<[1], [0], [0], [1], [0, 0, 1, 1], [], []>} : vector<128x16xf32>, vector<16x16xf32>, vector<128x16xf32> -> vector<128x16xf32>
    %142 = arith.addf %136, %141 : vector<128x16xf32>
    %c0_184 = arith.constant 0 : index
    %c2_185 = arith.constant 2 : index
    %c0_186 = arith.constant 0 : index
    %c0_187 = arith.constant 0 : index
    %143 = vector.load %arg11[%c0_184, %c2_185, %c0_186, %c0_187] : memref<2x10x10x16xf32, #tpu.memory_space<vmem>>, vector<2x8x8x16xf32>
    %144 = vector.shape_cast %143 : vector<2x8x8x16xf32> to vector<128x16xf32>
    %c6_188 = arith.constant 6 : index
    %c0_189 = arith.constant 0 : index
    %c0_190 = arith.constant 0 : index
    %145 = vector.load %arg7[%c6_188, %c0_189, %c0_190] : memref<9x16x16xf32, #tpu.memory_space<vmem>>, vector<1x16x16xf32>
    %146 = vector.shape_cast %145 : vector<1x16x16xf32> to vector<16x16xf32>
    %cst_191 = arith.constant dense<0.000000e+00> : vector<128x16xf32>
    %147 = tpu.matmul %144, %146, %cst_191 {dimension_numbers = #tpu.dot_dimension_numbers<[1], [0], [0], [1], [0, 0, 1, 1], [], []>} : vector<128x16xf32>, vector<16x16xf32>, vector<128x16xf32> -> vector<128x16xf32>
    %148 = arith.addf %142, %147 : vector<128x16xf32>
    %c0_192 = arith.constant 0 : index
    %c2_193 = arith.constant 2 : index
    %c1_194 = arith.constant 1 : index
    %c0_195 = arith.constant 0 : index
    %149 = vector.load %arg11[%c0_192, %c2_193, %c1_194, %c0_195] : memref<2x10x10x16xf32, #tpu.memory_space<vmem>>, vector<2x8x8x16xf32>
    %150 = vector.shape_cast %149 : vector<2x8x8x16xf32> to vector<128x16xf32>
    %c7_196 = arith.constant 7 : index
    %c0_197 = arith.constant 0 : index
    %c0_198 = arith.constant 0 : index
    %151 = vector.load %arg7[%c7_196, %c0_197, %c0_198] : memref<9x16x16xf32, #tpu.memory_space<vmem>>, vector<1x16x16xf32>
    %152 = vector.shape_cast %151 : vector<1x16x16xf32> to vector<16x16xf32>
    %cst_199 = arith.constant dense<0.000000e+00> : vector<128x16xf32>
    %153 = tpu.matmul %150, %152, %cst_199 {dimension_numbers = #tpu.dot_dimension_numbers<[1], [0], [0], [1], [0, 0, 1, 1], [], []>} : vector<128x16xf32>, vector<16x16xf32>, vector<128x16xf32> -> vector<128x16xf32>
    %154 = arith.addf %148, %153 : vector<128x16xf32>
    %c0_200 = arith.constant 0 : index
    %c2_201 = arith.constant 2 : index
    %c2_202 = arith.constant 2 : index
    %c0_203 = arith.constant 0 : index
    %155 = vector.load %arg11[%c0_200, %c2_201, %c2_202, %c0_203] : memref<2x10x10x16xf32, #tpu.memory_space<vmem>>, vector<2x8x8x16xf32>
    %156 = vector.shape_cast %155 : vector<2x8x8x16xf32> to vector<128x16xf32>
    %c8_204 = arith.constant 8 : index
    %c0_205 = arith.constant 0 : index
    %c0_206 = arith.constant 0 : index
    %157 = vector.load %arg7[%c8_204, %c0_205, %c0_206] : memref<9x16x16xf32, #tpu.memory_space<vmem>>, vector<1x16x16xf32>
    %158 = vector.shape_cast %157 : vector<1x16x16xf32> to vector<16x16xf32>
    %cst_207 = arith.constant dense<0.000000e+00> : vector<128x16xf32>
    %159 = tpu.matmul %156, %158, %cst_207 {dimension_numbers = #tpu.dot_dimension_numbers<[1], [0], [0], [1], [0, 0, 1, 1], [], []>} : vector<128x16xf32>, vector<16x16xf32>, vector<128x16xf32> -> vector<128x16xf32>
    %160 = arith.addf %154, %159 : vector<128x16xf32>
    %c0_208 = arith.constant 0 : index
    %c0_209 = arith.constant 0 : index
    %c1_210 = arith.constant 1 : index
    %c1_211 = arith.constant 1 : index
    %c0_212 = arith.constant 0 : index
    %161 = vector.load %arg10[%c0_208, %c0_209, %c1_210, %c1_211, %c0_212] : memref<4x2x10x10x8xf32, #tpu.memory_space<vmem>>, vector<1x2x8x8x8xf32>
    %162 = vector.shape_cast %161 : vector<1x2x8x8x8xf32> to vector<2x8x8x8xf32>
    %163 = vector.shape_cast %162 : vector<2x8x8x8xf32> to vector<128x8xf32>
    %c0_213 = arith.constant 0 : index
    %c0_214 = arith.constant 0 : index
    %164 = vector.load %arg8[%c0_213, %c0_214] : memref<8x16xf32, #tpu.memory_space<vmem>>, vector<8x16xf32>
    %cst_215 = arith.constant dense<0.000000e+00> : vector<128x16xf32>
    %165 = tpu.matmul %163, %164, %cst_215 {dimension_numbers = #tpu.dot_dimension_numbers<[1], [0], [0], [1], [0, 0, 1, 1], [], []>} : vector<128x8xf32>, vector<8x16xf32>, vector<128x16xf32> -> vector<128x16xf32>
    %166 = arith.addf %160, %165 : vector<128x16xf32>
    %167 = vector.shape_cast %166 : vector<128x16xf32> to vector<2x8x8x16xf32>
    %c0_216 = arith.constant 0 : index
    %c0_217 = arith.constant 0 : index
    %c0_218 = arith.constant 0 : index
    %c0_219 = arith.constant 0 : index
    %168 = vector.load %arg9[%c0_216, %c0_217, %c0_218, %c0_219] : memref<2x8x8x16xf32, #tpu.memory_space<vmem>>, vector<2x8x8x16xf32>
    tpu.vector_store %arg9[%c0_216, %c0_217, %c0_218, %c0_219], %167 {strides = array<i32>} : memref<2x8x8x16xf32, #tpu.memory_space<vmem>>, vector<2x8x8x16xf32>,
    return
  }
  func.func @transform_0(%arg0: i32) -> (i32, i32, i32, i32, i32) {
    %c0_i32 = arith.constant 0 : i32
    %c0_i32_0 = arith.constant 0 : i32
    %c0_i32_1 = arith.constant 0 : i32
    %c0_i32_2 = arith.constant 0 : i32
    %c0_i32_3 = arith.constant 0 : i32
    return %c0_i32, %arg0, %c0_i32_0, %c0_i32_1, %c0_i32_2 : i32, i32, i32, i32, i32
  }
  func.func @transform_1(%arg0: i32) -> (i32, i32) {
    %c0_i32 = arith.constant 0 : i32
    %c0_i32_0 = arith.constant 0 : i32
    %c0_i32_1 = arith.constant 0 : i32
    return %c0_i32, %c0_i32_0 : i32, i32
  }
  func.func @transform_2(%arg0: i32) -> (i32, i32) {
    %c0_i32 = arith.constant 0 : i32
    %c0_i32_0 = arith.constant 0 : i32
    %c0_i32_1 = arith.constant 0 : i32
    return %c0_i32, %c0_i32_0 : i32, i32
  }
  func.func @transform_3(%arg0: i32) -> (i32, i32, i32) {
    %c0_i32 = arith.constant 0 : i32
    %c0_i32_0 = arith.constant 0 : i32
    %c0_i32_1 = arith.constant 0 : i32
    %c0_i32_2 = arith.constant 0 : i32
    return %c0_i32, %c0_i32_0, %c0_i32_1 : i32, i32, i32
  }
  func.func @transform_4(%arg0: i32) -> (i32, i32) {
    %c0_i32 = arith.constant 0 : i32
    %c0_i32_0 = arith.constant 0 : i32
    %c0_i32_1 = arith.constant 0 : i32
    return %c0_i32, %c0_i32_0 : i32, i32
  }
  func.func @transform_5(%arg0: i32) -> (i32, i32) {
    %c0_i32 = arith.constant 0 : i32
    %c0_i32_0 = arith.constant 0 : i32
    %c0_i32_1 = arith.constant 0 : i32
    return %c0_i32, %c0_i32_0 : i32, i32
  }
  func.func @transform_6(%arg0: i32) -> (i32, i32, i32) {
    %c0_i32 = arith.constant 0 : i32
    %c0_i32_0 = arith.constant 0 : i32
    %c0_i32_1 = arith.constant 0 : i32
    %c0_i32_2 = arith.constant 0 : i32
    return %c0_i32, %c0_i32_0, %c0_i32_1 : i32, i32, i32
  }
  func.func @transform_7(%arg0: i32) -> (i32, i32) {
    %c0_i32 = arith.constant 0 : i32
    %c0_i32_0 = arith.constant 0 : i32
    %c0_i32_1 = arith.constant 0 : i32
    return %c0_i32, %c0_i32_0 : i32, i32
  }
  func.func @transform_8(%arg0: i32) -> (i32, i32, i32, i32) {
    %c0_i32 = arith.constant 0 : i32
    %c0_i32_0 = arith.constant 0 : i32
    %c0_i32_1 = arith.constant 0 : i32
    %c0_i32_2 = arith.constant 0 : i32
    return %arg0, %c0_i32, %c0_i32_0, %c0_i32_1 : i32, i32, i32, i32
  }
}

module attributes {stable_mosaic.version = 11 : i64} {
  func.func @kernel(%arg0: i32, %arg1: memref<1x2x8x8x16xf32, #tpu.memory_space<vmem>>, %arg2: memref<1x16xf32, #tpu.memory_space<vmem>>, %arg3: memref<1x16xf32, #tpu.memory_space<vmem>>, %arg4: memref<9x16x16xf32, #tpu.memory_space<vmem>>, %arg5: memref<1x16xf32, #tpu.memory_space<vmem>>, %arg6: memref<1x16xf32, #tpu.memory_space<vmem>>, %arg7: memref<9x16x16xf32, #tpu.memory_space<vmem>>, %arg8: memref<2x8x8x16xf32, #tpu.memory_space<vmem>>, %arg9: memref<1x2x10x10x16xf32, #tpu.memory_space<vmem>>, %arg10: memref<2x10x10x16xf32, #tpu.memory_space<vmem>>) attributes {dimension_semantics = [#tpu.dimension_semantics<parallel>], iteration_bounds = array<i64: 1>, scalar_prefetch = 0 : i64, scratch_operands = 2 : i64, tpu.core_type = #tpu.core_type<tc>, window_params = [{transform_indices = @transform_0, window_bounds = array<i64: 1, 2, 8, 8, 16>}, {pipeline_mode = #tpu.pipeline_mode<synchronous>, transform_indices = @transform_1, window_bounds = array<i64: 1, 16>}, {pipeline_mode = #tpu.pipeline_mode<synchronous>, transform_indices = @transform_2, window_bounds = array<i64: 1, 16>}, {pipeline_mode = #tpu.pipeline_mode<synchronous>, transform_indices = @transform_3, window_bounds = array<i64: 9, 16, 16>}, {pipeline_mode = #tpu.pipeline_mode<synchronous>, transform_indices = @transform_4, window_bounds = array<i64: 1, 16>}, {pipeline_mode = #tpu.pipeline_mode<synchronous>, transform_indices = @transform_5, window_bounds = array<i64: 1, 16>}, {pipeline_mode = #tpu.pipeline_mode<synchronous>, transform_indices = @transform_6, window_bounds = array<i64: 9, 16, 16>}, {transform_indices = @transform_7, window_bounds = array<i64: 2, 8, 8, 16>}]} {
    %cst = arith.constant 0.000000e+00 : f32
    %0 = vector.broadcast %cst : f32 to vector<1x2x1x10x16xf32>
    %cst_0 = arith.constant 0.000000e+00 : f32
    %1 = vector.broadcast %cst_0 : f32 to vector<1x2x8x1x16xf32>
    %c0 = arith.constant 0 : index
    %c0_1 = arith.constant 0 : index
    %c0_2 = arith.constant 0 : index
    %c0_3 = arith.constant 0 : index
    %c0_4 = arith.constant 0 : index
    %2 = vector.load %arg9[%c0, %c0_1, %c0_2, %c0_3, %c0_4] : memref<1x2x10x10x16xf32, #tpu.memory_space<vmem>>, vector<1x2x1x10x16xf32>
    tpu.vector_store %arg9[%c0, %c0_1, %c0_2, %c0_3, %c0_4], %0 {strides = array<i32>} : memref<1x2x10x10x16xf32, #tpu.memory_space<vmem>>, vector<1x2x1x10x16xf32>,
    %c0_5 = arith.constant 0 : index
    %c0_6 = arith.constant 0 : index
    %c9 = arith.constant 9 : index
    %c0_7 = arith.constant 0 : index
    %c0_8 = arith.constant 0 : index
    %3 = vector.load %arg9[%c0_5, %c0_6, %c9, %c0_7, %c0_8] : memref<1x2x10x10x16xf32, #tpu.memory_space<vmem>>, vector<1x2x1x10x16xf32>
    tpu.vector_store %arg9[%c0_5, %c0_6, %c9, %c0_7, %c0_8], %0 {strides = array<i32>} : memref<1x2x10x10x16xf32, #tpu.memory_space<vmem>>, vector<1x2x1x10x16xf32>,
    %c0_9 = arith.constant 0 : index
    %c0_10 = arith.constant 0 : index
    %c1 = arith.constant 1 : index
    %c0_11 = arith.constant 0 : index
    %c0_12 = arith.constant 0 : index
    %4 = vector.load %arg9[%c0_9, %c0_10, %c1, %c0_11, %c0_12] : memref<1x2x10x10x16xf32, #tpu.memory_space<vmem>>, vector<1x2x8x1x16xf32>
    tpu.vector_store %arg9[%c0_9, %c0_10, %c1, %c0_11, %c0_12], %1 {strides = array<i32>} : memref<1x2x10x10x16xf32, #tpu.memory_space<vmem>>, vector<1x2x8x1x16xf32>,
    %c0_13 = arith.constant 0 : index
    %c0_14 = arith.constant 0 : index
    %c1_15 = arith.constant 1 : index
    %c9_16 = arith.constant 9 : index
    %c0_17 = arith.constant 0 : index
    %5 = vector.load %arg9[%c0_13, %c0_14, %c1_15, %c9_16, %c0_17] : memref<1x2x10x10x16xf32, #tpu.memory_space<vmem>>, vector<1x2x8x1x16xf32>
    tpu.vector_store %arg9[%c0_13, %c0_14, %c1_15, %c9_16, %c0_17], %1 {strides = array<i32>} : memref<1x2x10x10x16xf32, #tpu.memory_space<vmem>>, vector<1x2x8x1x16xf32>,
    %c0_18 = arith.constant 0 : index
    %c0_19 = arith.constant 0 : index
    %c0_20 = arith.constant 0 : index
    %c0_21 = arith.constant 0 : index
    %c0_22 = arith.constant 0 : index
    %6 = vector.load %arg1[%c0_18, %c0_19, %c0_20, %c0_21, %c0_22] : memref<1x2x8x8x16xf32, #tpu.memory_space<vmem>>, vector<1x2x8x8x16xf32>
    %c0_23 = arith.constant 0 : index
    %c0_24 = arith.constant 0 : index
    %7 = vector.load %arg2[%c0_23, %c0_24] : memref<1x16xf32, #tpu.memory_space<vmem>>, vector<1x16xf32>
    %8 = vector.shape_cast %7 : vector<1x16xf32> to vector<16xf32>
    %9 = vector.shape_cast %8 : vector<16xf32> to vector<1x1x1x1x16xf32>
    %10 = vector.broadcast %9 : vector<1x1x1x1x16xf32> to vector<1x2x8x8x16xf32>
    %11 = arith.mulf %6, %10 : vector<1x2x8x8x16xf32>
    %c0_25 = arith.constant 0 : index
    %c0_26 = arith.constant 0 : index
    %12 = vector.load %arg3[%c0_25, %c0_26] : memref<1x16xf32, #tpu.memory_space<vmem>>, vector<1x16xf32>
    %13 = vector.shape_cast %12 : vector<1x16xf32> to vector<16xf32>
    %14 = vector.shape_cast %13 : vector<16xf32> to vector<1x1x1x1x16xf32>
    %15 = vector.broadcast %14 : vector<1x1x1x1x16xf32> to vector<1x2x8x8x16xf32>
    %16 = arith.addf %11, %15 : vector<1x2x8x8x16xf32>
    %cst_27 = arith.constant 0.000000e+00 : f32
    %17 = vector.broadcast %cst_27 : f32 to vector<1x2x8x8x16xf32>
    %18 = arith.cmpf oge, %16, %17 : vector<1x2x8x8x16xf32>
    %cst_28 = arith.constant 1.000000e-01 : f32
    %19 = vector.broadcast %cst_28 : f32 to vector<1x2x8x8x16xf32>
    %20 = arith.mulf %19, %16 : vector<1x2x8x8x16xf32>
    %21 = arith.select %18, %16, %20 : vector<1x2x8x8x16xi1>, vector<1x2x8x8x16xf32>
    %c0_29 = arith.constant 0 : index
    %c0_30 = arith.constant 0 : index
    %c1_31 = arith.constant 1 : index
    %c1_32 = arith.constant 1 : index
    %c0_33 = arith.constant 0 : index
    %22 = vector.load %arg9[%c0_29, %c0_30, %c1_31, %c1_32, %c0_33] : memref<1x2x10x10x16xf32, #tpu.memory_space<vmem>>, vector<1x2x8x8x16xf32>
    tpu.vector_store %arg9[%c0_29, %c0_30, %c1_31, %c1_32, %c0_33], %21 {strides = array<i32>} : memref<1x2x10x10x16xf32, #tpu.memory_space<vmem>>, vector<1x2x8x8x16xf32>,
    %c0_34 = arith.constant 0 : index
    %c0_35 = arith.constant 0 : index
    %c0_36 = arith.constant 0 : index
    %c0_37 = arith.constant 0 : index
    %c0_38 = arith.constant 0 : index
    %23 = vector.load %arg9[%c0_34, %c0_35, %c0_36, %c0_37, %c0_38] : memref<1x2x10x10x16xf32, #tpu.memory_space<vmem>>, vector<1x2x8x8x16xf32>
    %24 = vector.shape_cast %23 : vector<1x2x8x8x16xf32> to vector<2x8x8x16xf32>
    %25 = vector.shape_cast %24 : vector<2x8x8x16xf32> to vector<128x16xf32>
    %c0_39 = arith.constant 0 : index
    %c0_40 = arith.constant 0 : index
    %c0_41 = arith.constant 0 : index
    %26 = vector.load %arg4[%c0_39, %c0_40, %c0_41] : memref<9x16x16xf32, #tpu.memory_space<vmem>>, vector<1x16x16xf32>
    %27 = vector.shape_cast %26 : vector<1x16x16xf32> to vector<16x16xf32>
    %cst_42 = arith.constant dense<0.000000e+00> : vector<128x16xf32>
    %28 = tpu.matmul %25, %27, %cst_42 {dimension_numbers = #tpu.dot_dimension_numbers<[1], [0], [0], [1], [0, 0, 1, 1], [], []>} : vector<128x16xf32>, vector<16x16xf32>, vector<128x16xf32> -> vector<128x16xf32>
    %c0_43 = arith.constant 0 : index
    %c0_44 = arith.constant 0 : index
    %c0_45 = arith.constant 0 : index
    %c1_46 = arith.constant 1 : index
    %c0_47 = arith.constant 0 : index
    %29 = vector.load %arg9[%c0_43, %c0_44, %c0_45, %c1_46, %c0_47] : memref<1x2x10x10x16xf32, #tpu.memory_space<vmem>>, vector<1x2x8x8x16xf32>
    %30 = vector.shape_cast %29 : vector<1x2x8x8x16xf32> to vector<2x8x8x16xf32>
    %31 = vector.shape_cast %30 : vector<2x8x8x16xf32> to vector<128x16xf32>
    %c1_48 = arith.constant 1 : index
    %c0_49 = arith.constant 0 : index
    %c0_50 = arith.constant 0 : index
    %32 = vector.load %arg4[%c1_48, %c0_49, %c0_50] : memref<9x16x16xf32, #tpu.memory_space<vmem>>, vector<1x16x16xf32>
    %33 = vector.shape_cast %32 : vector<1x16x16xf32> to vector<16x16xf32>
    %cst_51 = arith.constant dense<0.000000e+00> : vector<128x16xf32>
    %34 = tpu.matmul %31, %33, %cst_51 {dimension_numbers = #tpu.dot_dimension_numbers<[1], [0], [0], [1], [0, 0, 1, 1], [], []>} : vector<128x16xf32>, vector<16x16xf32>, vector<128x16xf32> -> vector<128x16xf32>
    %35 = arith.addf %28, %34 : vector<128x16xf32>
    %c0_52 = arith.constant 0 : index
    %c0_53 = arith.constant 0 : index
    %c0_54 = arith.constant 0 : index
    %c2 = arith.constant 2 : index
    %c0_55 = arith.constant 0 : index
    %36 = vector.load %arg9[%c0_52, %c0_53, %c0_54, %c2, %c0_55] : memref<1x2x10x10x16xf32, #tpu.memory_space<vmem>>, vector<1x2x8x8x16xf32>
    %37 = vector.shape_cast %36 : vector<1x2x8x8x16xf32> to vector<2x8x8x16xf32>
    %38 = vector.shape_cast %37 : vector<2x8x8x16xf32> to vector<128x16xf32>
    %c2_56 = arith.constant 2 : index
    %c0_57 = arith.constant 0 : index
    %c0_58 = arith.constant 0 : index
    %39 = vector.load %arg4[%c2_56, %c0_57, %c0_58] : memref<9x16x16xf32, #tpu.memory_space<vmem>>, vector<1x16x16xf32>
    %40 = vector.shape_cast %39 : vector<1x16x16xf32> to vector<16x16xf32>
    %cst_59 = arith.constant dense<0.000000e+00> : vector<128x16xf32>
    %41 = tpu.matmul %38, %40, %cst_59 {dimension_numbers = #tpu.dot_dimension_numbers<[1], [0], [0], [1], [0, 0, 1, 1], [], []>} : vector<128x16xf32>, vector<16x16xf32>, vector<128x16xf32> -> vector<128x16xf32>
    %42 = arith.addf %35, %41 : vector<128x16xf32>
    %c0_60 = arith.constant 0 : index
    %c0_61 = arith.constant 0 : index
    %c1_62 = arith.constant 1 : index
    %c0_63 = arith.constant 0 : index
    %c0_64 = arith.constant 0 : index
    %43 = vector.load %arg9[%c0_60, %c0_61, %c1_62, %c0_63, %c0_64] : memref<1x2x10x10x16xf32, #tpu.memory_space<vmem>>, vector<1x2x8x8x16xf32>
    %44 = vector.shape_cast %43 : vector<1x2x8x8x16xf32> to vector<2x8x8x16xf32>
    %45 = vector.shape_cast %44 : vector<2x8x8x16xf32> to vector<128x16xf32>
    %c3 = arith.constant 3 : index
    %c0_65 = arith.constant 0 : index
    %c0_66 = arith.constant 0 : index
    %46 = vector.load %arg4[%c3, %c0_65, %c0_66] : memref<9x16x16xf32, #tpu.memory_space<vmem>>, vector<1x16x16xf32>
    %47 = vector.shape_cast %46 : vector<1x16x16xf32> to vector<16x16xf32>
    %cst_67 = arith.constant dense<0.000000e+00> : vector<128x16xf32>
    %48 = tpu.matmul %45, %47, %cst_67 {dimension_numbers = #tpu.dot_dimension_numbers<[1], [0], [0], [1], [0, 0, 1, 1], [], []>} : vector<128x16xf32>, vector<16x16xf32>, vector<128x16xf32> -> vector<128x16xf32>
    %49 = arith.addf %42, %48 : vector<128x16xf32>
    %c0_68 = arith.constant 0 : index
    %c0_69 = arith.constant 0 : index
    %c1_70 = arith.constant 1 : index
    %c1_71 = arith.constant 1 : index
    %c0_72 = arith.constant 0 : index
    %50 = vector.load %arg9[%c0_68, %c0_69, %c1_70, %c1_71, %c0_72] : memref<1x2x10x10x16xf32, #tpu.memory_space<vmem>>, vector<1x2x8x8x16xf32>
    %51 = vector.shape_cast %50 : vector<1x2x8x8x16xf32> to vector<2x8x8x16xf32>
    %52 = vector.shape_cast %51 : vector<2x8x8x16xf32> to vector<128x16xf32>
    %c4 = arith.constant 4 : index
    %c0_73 = arith.constant 0 : index
    %c0_74 = arith.constant 0 : index
    %53 = vector.load %arg4[%c4, %c0_73, %c0_74] : memref<9x16x16xf32, #tpu.memory_space<vmem>>, vector<1x16x16xf32>
    %54 = vector.shape_cast %53 : vector<1x16x16xf32> to vector<16x16xf32>
    %cst_75 = arith.constant dense<0.000000e+00> : vector<128x16xf32>
    %55 = tpu.matmul %52, %54, %cst_75 {dimension_numbers = #tpu.dot_dimension_numbers<[1], [0], [0], [1], [0, 0, 1, 1], [], []>} : vector<128x16xf32>, vector<16x16xf32>, vector<128x16xf32> -> vector<128x16xf32>
    %56 = arith.addf %49, %55 : vector<128x16xf32>
    %c0_76 = arith.constant 0 : index
    %c0_77 = arith.constant 0 : index
    %c1_78 = arith.constant 1 : index
    %c2_79 = arith.constant 2 : index
    %c0_80 = arith.constant 0 : index
    %57 = vector.load %arg9[%c0_76, %c0_77, %c1_78, %c2_79, %c0_80] : memref<1x2x10x10x16xf32, #tpu.memory_space<vmem>>, vector<1x2x8x8x16xf32>
    %58 = vector.shape_cast %57 : vector<1x2x8x8x16xf32> to vector<2x8x8x16xf32>
    %59 = vector.shape_cast %58 : vector<2x8x8x16xf32> to vector<128x16xf32>
    %c5 = arith.constant 5 : index
    %c0_81 = arith.constant 0 : index
    %c0_82 = arith.constant 0 : index
    %60 = vector.load %arg4[%c5, %c0_81, %c0_82] : memref<9x16x16xf32, #tpu.memory_space<vmem>>, vector<1x16x16xf32>
    %61 = vector.shape_cast %60 : vector<1x16x16xf32> to vector<16x16xf32>
    %cst_83 = arith.constant dense<0.000000e+00> : vector<128x16xf32>
    %62 = tpu.matmul %59, %61, %cst_83 {dimension_numbers = #tpu.dot_dimension_numbers<[1], [0], [0], [1], [0, 0, 1, 1], [], []>} : vector<128x16xf32>, vector<16x16xf32>, vector<128x16xf32> -> vector<128x16xf32>
    %63 = arith.addf %56, %62 : vector<128x16xf32>
    %c0_84 = arith.constant 0 : index
    %c0_85 = arith.constant 0 : index
    %c2_86 = arith.constant 2 : index
    %c0_87 = arith.constant 0 : index
    %c0_88 = arith.constant 0 : index
    %64 = vector.load %arg9[%c0_84, %c0_85, %c2_86, %c0_87, %c0_88] : memref<1x2x10x10x16xf32, #tpu.memory_space<vmem>>, vector<1x2x8x8x16xf32>
    %65 = vector.shape_cast %64 : vector<1x2x8x8x16xf32> to vector<2x8x8x16xf32>
    %66 = vector.shape_cast %65 : vector<2x8x8x16xf32> to vector<128x16xf32>
    %c6 = arith.constant 6 : index
    %c0_89 = arith.constant 0 : index
    %c0_90 = arith.constant 0 : index
    %67 = vector.load %arg4[%c6, %c0_89, %c0_90] : memref<9x16x16xf32, #tpu.memory_space<vmem>>, vector<1x16x16xf32>
    %68 = vector.shape_cast %67 : vector<1x16x16xf32> to vector<16x16xf32>
    %cst_91 = arith.constant dense<0.000000e+00> : vector<128x16xf32>
    %69 = tpu.matmul %66, %68, %cst_91 {dimension_numbers = #tpu.dot_dimension_numbers<[1], [0], [0], [1], [0, 0, 1, 1], [], []>} : vector<128x16xf32>, vector<16x16xf32>, vector<128x16xf32> -> vector<128x16xf32>
    %70 = arith.addf %63, %69 : vector<128x16xf32>
    %c0_92 = arith.constant 0 : index
    %c0_93 = arith.constant 0 : index
    %c2_94 = arith.constant 2 : index
    %c1_95 = arith.constant 1 : index
    %c0_96 = arith.constant 0 : index
    %71 = vector.load %arg9[%c0_92, %c0_93, %c2_94, %c1_95, %c0_96] : memref<1x2x10x10x16xf32, #tpu.memory_space<vmem>>, vector<1x2x8x8x16xf32>
    %72 = vector.shape_cast %71 : vector<1x2x8x8x16xf32> to vector<2x8x8x16xf32>
    %73 = vector.shape_cast %72 : vector<2x8x8x16xf32> to vector<128x16xf32>
    %c7 = arith.constant 7 : index
    %c0_97 = arith.constant 0 : index
    %c0_98 = arith.constant 0 : index
    %74 = vector.load %arg4[%c7, %c0_97, %c0_98] : memref<9x16x16xf32, #tpu.memory_space<vmem>>, vector<1x16x16xf32>
    %75 = vector.shape_cast %74 : vector<1x16x16xf32> to vector<16x16xf32>
    %cst_99 = arith.constant dense<0.000000e+00> : vector<128x16xf32>
    %76 = tpu.matmul %73, %75, %cst_99 {dimension_numbers = #tpu.dot_dimension_numbers<[1], [0], [0], [1], [0, 0, 1, 1], [], []>} : vector<128x16xf32>, vector<16x16xf32>, vector<128x16xf32> -> vector<128x16xf32>
    %77 = arith.addf %70, %76 : vector<128x16xf32>
    %c0_100 = arith.constant 0 : index
    %c0_101 = arith.constant 0 : index
    %c2_102 = arith.constant 2 : index
    %c2_103 = arith.constant 2 : index
    %c0_104 = arith.constant 0 : index
    %78 = vector.load %arg9[%c0_100, %c0_101, %c2_102, %c2_103, %c0_104] : memref<1x2x10x10x16xf32, #tpu.memory_space<vmem>>, vector<1x2x8x8x16xf32>
    %79 = vector.shape_cast %78 : vector<1x2x8x8x16xf32> to vector<2x8x8x16xf32>
    %80 = vector.shape_cast %79 : vector<2x8x8x16xf32> to vector<128x16xf32>
    %c8 = arith.constant 8 : index
    %c0_105 = arith.constant 0 : index
    %c0_106 = arith.constant 0 : index
    %81 = vector.load %arg4[%c8, %c0_105, %c0_106] : memref<9x16x16xf32, #tpu.memory_space<vmem>>, vector<1x16x16xf32>
    %82 = vector.shape_cast %81 : vector<1x16x16xf32> to vector<16x16xf32>
    %cst_107 = arith.constant dense<0.000000e+00> : vector<128x16xf32>
    %83 = tpu.matmul %80, %82, %cst_107 {dimension_numbers = #tpu.dot_dimension_numbers<[1], [0], [0], [1], [0, 0, 1, 1], [], []>} : vector<128x16xf32>, vector<16x16xf32>, vector<128x16xf32> -> vector<128x16xf32>
    %84 = arith.addf %77, %83 : vector<128x16xf32>
    %c0_108 = arith.constant 0 : index
    %c0_109 = arith.constant 0 : index
    %85 = vector.load %arg5[%c0_108, %c0_109] : memref<1x16xf32, #tpu.memory_space<vmem>>, vector<1x16xf32>
    %86 = vector.shape_cast %85 : vector<1x16xf32> to vector<16xf32>
    %87 = vector.shape_cast %86 : vector<16xf32> to vector<1x16xf32>
    %88 = vector.broadcast %87 : vector<1x16xf32> to vector<128x16xf32>
    %89 = arith.mulf %84, %88 : vector<128x16xf32>
    %c0_110 = arith.constant 0 : index
    %c0_111 = arith.constant 0 : index
    %90 = vector.load %arg6[%c0_110, %c0_111] : memref<1x16xf32, #tpu.memory_space<vmem>>, vector<1x16xf32>
    %91 = vector.shape_cast %90 : vector<1x16xf32> to vector<16xf32>
    %92 = vector.shape_cast %91 : vector<16xf32> to vector<1x16xf32>
    %93 = vector.broadcast %92 : vector<1x16xf32> to vector<128x16xf32>
    %94 = arith.addf %89, %93 : vector<128x16xf32>
    %cst_112 = arith.constant 0.000000e+00 : f32
    %95 = vector.broadcast %cst_112 : f32 to vector<128x16xf32>
    %96 = arith.cmpf oge, %94, %95 : vector<128x16xf32>
    %cst_113 = arith.constant 1.000000e-01 : f32
    %97 = vector.broadcast %cst_113 : f32 to vector<128x16xf32>
    %98 = arith.mulf %97, %94 : vector<128x16xf32>
    %99 = arith.select %96, %94, %98 : vector<128x16xi1>, vector<128x16xf32>
    %cst_114 = arith.constant 0.000000e+00 : f32
    %100 = vector.broadcast %cst_114 : f32 to vector<2x1x10x16xf32>
    %cst_115 = arith.constant 0.000000e+00 : f32
    %101 = vector.broadcast %cst_115 : f32 to vector<2x8x1x16xf32>
    %c0_116 = arith.constant 0 : index
    %c0_117 = arith.constant 0 : index
    %c0_118 = arith.constant 0 : index
    %c0_119 = arith.constant 0 : index
    %102 = vector.load %arg10[%c0_116, %c0_117, %c0_118, %c0_119] : memref<2x10x10x16xf32, #tpu.memory_space<vmem>>, vector<2x1x10x16xf32>
    tpu.vector_store %arg10[%c0_116, %c0_117, %c0_118, %c0_119], %100 {strides = array<i32>} : memref<2x10x10x16xf32, #tpu.memory_space<vmem>>, vector<2x1x10x16xf32>,
    %c0_120 = arith.constant 0 : index
    %c9_121 = arith.constant 9 : index
    %c0_122 = arith.constant 0 : index
    %c0_123 = arith.constant 0 : index
    %103 = vector.load %arg10[%c0_120, %c9_121, %c0_122, %c0_123] : memref<2x10x10x16xf32, #tpu.memory_space<vmem>>, vector<2x1x10x16xf32>
    tpu.vector_store %arg10[%c0_120, %c9_121, %c0_122, %c0_123], %100 {strides = array<i32>} : memref<2x10x10x16xf32, #tpu.memory_space<vmem>>, vector<2x1x10x16xf32>,
    %c0_124 = arith.constant 0 : index
    %c1_125 = arith.constant 1 : index
    %c0_126 = arith.constant 0 : index
    %c0_127 = arith.constant 0 : index
    %104 = vector.load %arg10[%c0_124, %c1_125, %c0_126, %c0_127] : memref<2x10x10x16xf32, #tpu.memory_space<vmem>>, vector<2x8x1x16xf32>
    tpu.vector_store %arg10[%c0_124, %c1_125, %c0_126, %c0_127], %101 {strides = array<i32>} : memref<2x10x10x16xf32, #tpu.memory_space<vmem>>, vector<2x8x1x16xf32>,
    %c0_128 = arith.constant 0 : index
    %c1_129 = arith.constant 1 : index
    %c9_130 = arith.constant 9 : index
    %c0_131 = arith.constant 0 : index
    %105 = vector.load %arg10[%c0_128, %c1_129, %c9_130, %c0_131] : memref<2x10x10x16xf32, #tpu.memory_space<vmem>>, vector<2x8x1x16xf32>
    tpu.vector_store %arg10[%c0_128, %c1_129, %c9_130, %c0_131], %101 {strides = array<i32>} : memref<2x10x10x16xf32, #tpu.memory_space<vmem>>, vector<2x8x1x16xf32>,
    %106 = vector.shape_cast %99 : vector<128x16xf32> to vector<2x8x8x16xf32>
    %c0_132 = arith.constant 0 : index
    %c1_133 = arith.constant 1 : index
    %c1_134 = arith.constant 1 : index
    %c0_135 = arith.constant 0 : index
    %107 = vector.load %arg10[%c0_132, %c1_133, %c1_134, %c0_135] : memref<2x10x10x16xf32, #tpu.memory_space<vmem>>, vector<2x8x8x16xf32>
    tpu.vector_store %arg10[%c0_132, %c1_133, %c1_134, %c0_135], %106 {strides = array<i32>} : memref<2x10x10x16xf32, #tpu.memory_space<vmem>>, vector<2x8x8x16xf32>,
    %c0_136 = arith.constant 0 : index
    %c0_137 = arith.constant 0 : index
    %c0_138 = arith.constant 0 : index
    %c0_139 = arith.constant 0 : index
    %108 = vector.load %arg10[%c0_136, %c0_137, %c0_138, %c0_139] : memref<2x10x10x16xf32, #tpu.memory_space<vmem>>, vector<2x8x8x16xf32>
    %109 = vector.shape_cast %108 : vector<2x8x8x16xf32> to vector<128x16xf32>
    %c0_140 = arith.constant 0 : index
    %c0_141 = arith.constant 0 : index
    %c0_142 = arith.constant 0 : index
    %110 = vector.load %arg7[%c0_140, %c0_141, %c0_142] : memref<9x16x16xf32, #tpu.memory_space<vmem>>, vector<1x16x16xf32>
    %111 = vector.shape_cast %110 : vector<1x16x16xf32> to vector<16x16xf32>
    %cst_143 = arith.constant dense<0.000000e+00> : vector<128x16xf32>
    %112 = tpu.matmul %109, %111, %cst_143 {dimension_numbers = #tpu.dot_dimension_numbers<[1], [0], [0], [1], [0, 0, 1, 1], [], []>} : vector<128x16xf32>, vector<16x16xf32>, vector<128x16xf32> -> vector<128x16xf32>
    %c0_144 = arith.constant 0 : index
    %c0_145 = arith.constant 0 : index
    %c1_146 = arith.constant 1 : index
    %c0_147 = arith.constant 0 : index
    %113 = vector.load %arg10[%c0_144, %c0_145, %c1_146, %c0_147] : memref<2x10x10x16xf32, #tpu.memory_space<vmem>>, vector<2x8x8x16xf32>
    %114 = vector.shape_cast %113 : vector<2x8x8x16xf32> to vector<128x16xf32>
    %c1_148 = arith.constant 1 : index
    %c0_149 = arith.constant 0 : index
    %c0_150 = arith.constant 0 : index
    %115 = vector.load %arg7[%c1_148, %c0_149, %c0_150] : memref<9x16x16xf32, #tpu.memory_space<vmem>>, vector<1x16x16xf32>
    %116 = vector.shape_cast %115 : vector<1x16x16xf32> to vector<16x16xf32>
    %cst_151 = arith.constant dense<0.000000e+00> : vector<128x16xf32>
    %117 = tpu.matmul %114, %116, %cst_151 {dimension_numbers = #tpu.dot_dimension_numbers<[1], [0], [0], [1], [0, 0, 1, 1], [], []>} : vector<128x16xf32>, vector<16x16xf32>, vector<128x16xf32> -> vector<128x16xf32>
    %118 = arith.addf %112, %117 : vector<128x16xf32>
    %c0_152 = arith.constant 0 : index
    %c0_153 = arith.constant 0 : index
    %c2_154 = arith.constant 2 : index
    %c0_155 = arith.constant 0 : index
    %119 = vector.load %arg10[%c0_152, %c0_153, %c2_154, %c0_155] : memref<2x10x10x16xf32, #tpu.memory_space<vmem>>, vector<2x8x8x16xf32>
    %120 = vector.shape_cast %119 : vector<2x8x8x16xf32> to vector<128x16xf32>
    %c2_156 = arith.constant 2 : index
    %c0_157 = arith.constant 0 : index
    %c0_158 = arith.constant 0 : index
    %121 = vector.load %arg7[%c2_156, %c0_157, %c0_158] : memref<9x16x16xf32, #tpu.memory_space<vmem>>, vector<1x16x16xf32>
    %122 = vector.shape_cast %121 : vector<1x16x16xf32> to vector<16x16xf32>
    %cst_159 = arith.constant dense<0.000000e+00> : vector<128x16xf32>
    %123 = tpu.matmul %120, %122, %cst_159 {dimension_numbers = #tpu.dot_dimension_numbers<[1], [0], [0], [1], [0, 0, 1, 1], [], []>} : vector<128x16xf32>, vector<16x16xf32>, vector<128x16xf32> -> vector<128x16xf32>
    %124 = arith.addf %118, %123 : vector<128x16xf32>
    %c0_160 = arith.constant 0 : index
    %c1_161 = arith.constant 1 : index
    %c0_162 = arith.constant 0 : index
    %c0_163 = arith.constant 0 : index
    %125 = vector.load %arg10[%c0_160, %c1_161, %c0_162, %c0_163] : memref<2x10x10x16xf32, #tpu.memory_space<vmem>>, vector<2x8x8x16xf32>
    %126 = vector.shape_cast %125 : vector<2x8x8x16xf32> to vector<128x16xf32>
    %c3_164 = arith.constant 3 : index
    %c0_165 = arith.constant 0 : index
    %c0_166 = arith.constant 0 : index
    %127 = vector.load %arg7[%c3_164, %c0_165, %c0_166] : memref<9x16x16xf32, #tpu.memory_space<vmem>>, vector<1x16x16xf32>
    %128 = vector.shape_cast %127 : vector<1x16x16xf32> to vector<16x16xf32>
    %cst_167 = arith.constant dense<0.000000e+00> : vector<128x16xf32>
    %129 = tpu.matmul %126, %128, %cst_167 {dimension_numbers = #tpu.dot_dimension_numbers<[1], [0], [0], [1], [0, 0, 1, 1], [], []>} : vector<128x16xf32>, vector<16x16xf32>, vector<128x16xf32> -> vector<128x16xf32>
    %130 = arith.addf %124, %129 : vector<128x16xf32>
    %c0_168 = arith.constant 0 : index
    %c1_169 = arith.constant 1 : index
    %c1_170 = arith.constant 1 : index
    %c0_171 = arith.constant 0 : index
    %131 = vector.load %arg10[%c0_168, %c1_169, %c1_170, %c0_171] : memref<2x10x10x16xf32, #tpu.memory_space<vmem>>, vector<2x8x8x16xf32>
    %132 = vector.shape_cast %131 : vector<2x8x8x16xf32> to vector<128x16xf32>
    %c4_172 = arith.constant 4 : index
    %c0_173 = arith.constant 0 : index
    %c0_174 = arith.constant 0 : index
    %133 = vector.load %arg7[%c4_172, %c0_173, %c0_174] : memref<9x16x16xf32, #tpu.memory_space<vmem>>, vector<1x16x16xf32>
    %134 = vector.shape_cast %133 : vector<1x16x16xf32> to vector<16x16xf32>
    %cst_175 = arith.constant dense<0.000000e+00> : vector<128x16xf32>
    %135 = tpu.matmul %132, %134, %cst_175 {dimension_numbers = #tpu.dot_dimension_numbers<[1], [0], [0], [1], [0, 0, 1, 1], [], []>} : vector<128x16xf32>, vector<16x16xf32>, vector<128x16xf32> -> vector<128x16xf32>
    %136 = arith.addf %130, %135 : vector<128x16xf32>
    %c0_176 = arith.constant 0 : index
    %c1_177 = arith.constant 1 : index
    %c2_178 = arith.constant 2 : index
    %c0_179 = arith.constant 0 : index
    %137 = vector.load %arg10[%c0_176, %c1_177, %c2_178, %c0_179] : memref<2x10x10x16xf32, #tpu.memory_space<vmem>>, vector<2x8x8x16xf32>
    %138 = vector.shape_cast %137 : vector<2x8x8x16xf32> to vector<128x16xf32>
    %c5_180 = arith.constant 5 : index
    %c0_181 = arith.constant 0 : index
    %c0_182 = arith.constant 0 : index
    %139 = vector.load %arg7[%c5_180, %c0_181, %c0_182] : memref<9x16x16xf32, #tpu.memory_space<vmem>>, vector<1x16x16xf32>
    %140 = vector.shape_cast %139 : vector<1x16x16xf32> to vector<16x16xf32>
    %cst_183 = arith.constant dense<0.000000e+00> : vector<128x16xf32>
    %141 = tpu.matmul %138, %140, %cst_183 {dimension_numbers = #tpu.dot_dimension_numbers<[1], [0], [0], [1], [0, 0, 1, 1], [], []>} : vector<128x16xf32>, vector<16x16xf32>, vector<128x16xf32> -> vector<128x16xf32>
    %142 = arith.addf %136, %141 : vector<128x16xf32>
    %c0_184 = arith.constant 0 : index
    %c2_185 = arith.constant 2 : index
    %c0_186 = arith.constant 0 : index
    %c0_187 = arith.constant 0 : index
    %143 = vector.load %arg10[%c0_184, %c2_185, %c0_186, %c0_187] : memref<2x10x10x16xf32, #tpu.memory_space<vmem>>, vector<2x8x8x16xf32>
    %144 = vector.shape_cast %143 : vector<2x8x8x16xf32> to vector<128x16xf32>
    %c6_188 = arith.constant 6 : index
    %c0_189 = arith.constant 0 : index
    %c0_190 = arith.constant 0 : index
    %145 = vector.load %arg7[%c6_188, %c0_189, %c0_190] : memref<9x16x16xf32, #tpu.memory_space<vmem>>, vector<1x16x16xf32>
    %146 = vector.shape_cast %145 : vector<1x16x16xf32> to vector<16x16xf32>
    %cst_191 = arith.constant dense<0.000000e+00> : vector<128x16xf32>
    %147 = tpu.matmul %144, %146, %cst_191 {dimension_numbers = #tpu.dot_dimension_numbers<[1], [0], [0], [1], [0, 0, 1, 1], [], []>} : vector<128x16xf32>, vector<16x16xf32>, vector<128x16xf32> -> vector<128x16xf32>
    %148 = arith.addf %142, %147 : vector<128x16xf32>
    %c0_192 = arith.constant 0 : index
    %c2_193 = arith.constant 2 : index
    %c1_194 = arith.constant 1 : index
    %c0_195 = arith.constant 0 : index
    %149 = vector.load %arg10[%c0_192, %c2_193, %c1_194, %c0_195] : memref<2x10x10x16xf32, #tpu.memory_space<vmem>>, vector<2x8x8x16xf32>
    %150 = vector.shape_cast %149 : vector<2x8x8x16xf32> to vector<128x16xf32>
    %c7_196 = arith.constant 7 : index
    %c0_197 = arith.constant 0 : index
    %c0_198 = arith.constant 0 : index
    %151 = vector.load %arg7[%c7_196, %c0_197, %c0_198] : memref<9x16x16xf32, #tpu.memory_space<vmem>>, vector<1x16x16xf32>
    %152 = vector.shape_cast %151 : vector<1x16x16xf32> to vector<16x16xf32>
    %cst_199 = arith.constant dense<0.000000e+00> : vector<128x16xf32>
    %153 = tpu.matmul %150, %152, %cst_199 {dimension_numbers = #tpu.dot_dimension_numbers<[1], [0], [0], [1], [0, 0, 1, 1], [], []>} : vector<128x16xf32>, vector<16x16xf32>, vector<128x16xf32> -> vector<128x16xf32>
    %154 = arith.addf %148, %153 : vector<128x16xf32>
    %c0_200 = arith.constant 0 : index
    %c2_201 = arith.constant 2 : index
    %c2_202 = arith.constant 2 : index
    %c0_203 = arith.constant 0 : index
    %155 = vector.load %arg10[%c0_200, %c2_201, %c2_202, %c0_203] : memref<2x10x10x16xf32, #tpu.memory_space<vmem>>, vector<2x8x8x16xf32>
    %156 = vector.shape_cast %155 : vector<2x8x8x16xf32> to vector<128x16xf32>
    %c8_204 = arith.constant 8 : index
    %c0_205 = arith.constant 0 : index
    %c0_206 = arith.constant 0 : index
    %157 = vector.load %arg7[%c8_204, %c0_205, %c0_206] : memref<9x16x16xf32, #tpu.memory_space<vmem>>, vector<1x16x16xf32>
    %158 = vector.shape_cast %157 : vector<1x16x16xf32> to vector<16x16xf32>
    %cst_207 = arith.constant dense<0.000000e+00> : vector<128x16xf32>
    %159 = tpu.matmul %156, %158, %cst_207 {dimension_numbers = #tpu.dot_dimension_numbers<[1], [0], [0], [1], [0, 0, 1, 1], [], []>} : vector<128x16xf32>, vector<16x16xf32>, vector<128x16xf32> -> vector<128x16xf32>
    %160 = arith.addf %154, %159 : vector<128x16xf32>
    %c0_208 = arith.constant 0 : index
    %c0_209 = arith.constant 0 : index
    %c0_210 = arith.constant 0 : index
    %c0_211 = arith.constant 0 : index
    %c0_212 = arith.constant 0 : index
    %161 = vector.load %arg1[%c0_208, %c0_209, %c0_210, %c0_211, %c0_212] : memref<1x2x8x8x16xf32, #tpu.memory_space<vmem>>, vector<1x2x8x8x16xf32>
    %162 = vector.shape_cast %161 : vector<1x2x8x8x16xf32> to vector<2x8x8x16xf32>
    %163 = vector.shape_cast %162 : vector<2x8x8x16xf32> to vector<128x16xf32>
    %164 = arith.addf %160, %163 : vector<128x16xf32>
    %165 = vector.shape_cast %164 : vector<128x16xf32> to vector<2x8x8x16xf32>
    %c0_213 = arith.constant 0 : index
    %c0_214 = arith.constant 0 : index
    %c0_215 = arith.constant 0 : index
    %c0_216 = arith.constant 0 : index
    %166 = vector.load %arg8[%c0_213, %c0_214, %c0_215, %c0_216] : memref<2x8x8x16xf32, #tpu.memory_space<vmem>>, vector<2x8x8x16xf32>
    tpu.vector_store %arg8[%c0_213, %c0_214, %c0_215, %c0_216], %165 {strides = array<i32>} : memref<2x8x8x16xf32, #tpu.memory_space<vmem>>, vector<2x8x8x16xf32>,
    return
  }
  func.func @transform_0(%arg0: i32) -> (i32, i32, i32, i32, i32) {
    %c0_i32 = arith.constant 0 : i32
    %c0_i32_0 = arith.constant 0 : i32
    %c0_i32_1 = arith.constant 0 : i32
    %c0_i32_2 = arith.constant 0 : i32
    %c0_i32_3 = arith.constant 0 : i32
    return %c0_i32, %arg0, %c0_i32_0, %c0_i32_1, %c0_i32_2 : i32, i32, i32, i32, i32
  }
  func.func @transform_1(%arg0: i32) -> (i32, i32) {
    %c0_i32 = arith.constant 0 : i32
    %c0_i32_0 = arith.constant 0 : i32
    %c0_i32_1 = arith.constant 0 : i32
    return %c0_i32, %c0_i32_0 : i32, i32
  }
  func.func @transform_2(%arg0: i32) -> (i32, i32) {
    %c0_i32 = arith.constant 0 : i32
    %c0_i32_0 = arith.constant 0 : i32
    %c0_i32_1 = arith.constant 0 : i32
    return %c0_i32, %c0_i32_0 : i32, i32
  }
  func.func @transform_3(%arg0: i32) -> (i32, i32, i32) {
    %c0_i32 = arith.constant 0 : i32
    %c0_i32_0 = arith.constant 0 : i32
    %c0_i32_1 = arith.constant 0 : i32
    %c0_i32_2 = arith.constant 0 : i32
    return %c0_i32, %c0_i32_0, %c0_i32_1 : i32, i32, i32
  }
  func.func @transform_4(%arg0: i32) -> (i32, i32) {
    %c0_i32 = arith.constant 0 : i32
    %c0_i32_0 = arith.constant 0 : i32
    %c0_i32_1 = arith.constant 0 : i32
    return %c0_i32, %c0_i32_0 : i32, i32
  }
  func.func @transform_5(%arg0: i32) -> (i32, i32) {
    %c0_i32 = arith.constant 0 : i32
    %c0_i32_0 = arith.constant 0 : i32
    %c0_i32_1 = arith.constant 0 : i32
    return %c0_i32, %c0_i32_0 : i32, i32
  }
  func.func @transform_6(%arg0: i32) -> (i32, i32, i32) {
    %c0_i32 = arith.constant 0 : i32
    %c0_i32_0 = arith.constant 0 : i32
    %c0_i32_1 = arith.constant 0 : i32
    %c0_i32_2 = arith.constant 0 : i32
    return %c0_i32, %c0_i32_0, %c0_i32_1 : i32, i32, i32
  }
  func.func @transform_7(%arg0: i32) -> (i32, i32, i32, i32) {
    %c0_i32 = arith.constant 0 : i32
    %c0_i32_0 = arith.constant 0 : i32
    %c0_i32_1 = arith.constant 0 : i32
    %c0_i32_2 = arith.constant 0 : i32
    return %arg0, %c0_i32, %c0_i32_0, %c0_i32_1 : i32, i32, i32, i32
  }
}

</mosaic_0001>

<bundles_post_ra>
// kernel: network_block_forward_nchw.3
= control target key start
LH: loop header
LB: loop body
LE: loop exit
PB: predicated region body
PF: predicated region fallthrough
CT: control target
= control target key end

     0   :  { %vm27_vm0 = vcmask 130048   ;;  %vm29_vm1 = vcmask 123904   ;;  %v5962_v4 = vmov 0.0   ;;  %vm39_vm2 = vcmask 122880   ;;  %s7272_s0 = inlined_call_operand.vmem [shape: f32[1,2,8,8,16], index: 0, kind: input, shape index: {}]   ;;  %s7273_s1 = inlined_call_operand.vmem [shape: f32[1,16], index: 1, kind: input, shape index: {}]   ;;  %s7274_s2 = inlined_call_operand.vmem [shape: f32[1,16], index: 2, kind: input, shape index: {}]   ;;  %s7275_s3 = inlined_call_operand.vmem [shape: f32[9,16,16], index: 3, kind: input, shape index: {}]   ;;  %s7276_s4 = inlined_call_operand.vmem [shape: f32[1,16], index: 4, kind: input, shape index: {}]   ;;  %s7277_s5 = inlined_call_operand.vmem [shape: f32[1,16], index: 5, kind: input, shape index: {}]   ;;  %s7278_s6 = inlined_call_operand.vmem [shape: f32[9,16,16], index: 6, kind: input, shape index: {}]   ;;  %s7279_s7 = inlined_call_operand.hbm [shape: f32[2,8,8,16], index: 7, kind: output, shape index: {}]  }
   0x1   :  { %v4456_v0 = vld [vmem:[%s7275_s3 + $0x10] sm:$0xff]  ;;  %v4457_v1 = vld [vmem:[%s7275_s3 + $0x18] sm:$0xff]  ;;  %v214_v2 = vld [vmem:[%s7275_s3] sm:$0xff]  ;;  %28 = vst.msk [vmem:[#allocation2] sm:$0xff] %vm27_vm0, %v5962_v4 }
   0x2   :  { %v6015_v3 = vpack.c.bf16 %v4457_v1, %v4456_v0  ;;  %30 = vst.msk [vmem:[#allocation2 + $0x8] sm:$0x3] %vm29_vm1, %v5962_v4  ;;  %32 = vst.msk [vmem:[#allocation2 + $0xa8] sm:$0x3] %vm29_vm1, %v5962_v4  ;;  %v215_v5 = vld [vmem:[%s7275_s3 + $0x8] sm:$0xff]  ;;  %v72_v6 = vld [vmem:[%s7272_s0] sm:$0xff] }
   0x3   :  { %31 = vst.msk [vmem:[#allocation2 + $0xa0] sm:$0xff] %vm27_vm0, %v5962_v4  ;;  %34 = vst.msk [vmem:[#allocation2 + $0x90] sm:$0xff] %vm27_vm0, %v5962_v4  ;;  %v6058_v7 = vld [vmem:[%s7273_s1] ss:$0 sm:$0xff]  ;;  %v6060_v8 = vpack.c.bf16 %v215_v5, %v214_v2  ;;  %v6073_v11 = vld [vmem:[%s7272_s0 + $0x8] sm:$0xff] }
   0x4   :  { %35 = vst.msk [vmem:[#allocation2 + $0x98] sm:$0x3] %vm29_vm1, %v5962_v4  ;;  %37 = vst.msk [vmem:[#allocation2 + $0x138] sm:$0x3] %vm29_vm1, %v5962_v4  ;;  %v6063_v9 = vmul.f32 %v6058_v7, %v72_v6  ;;  %v6068_v10 = vld [vmem:[%s7274_s2] ss:$0 sm:$0xff]  ;;  %5607 = vmatprep.subr.bf16.mxu0 %v6015_v3  ;;  %v96_v13 = vmul.f32 %v6058_v7, %v6073_v11 }
   0x5   :  { %36 = vst.msk [vmem:[#allocation2 + $0x130] sm:$0xff] %vm27_vm0, %v5962_v4  ;;  %2312 = vst.msk [vmem:[#allocation3] sm:$0xff] %vm27_vm0, %v5962_v4  ;;  %v6078_v12 = vld [vmem:[%s7272_s0 + $0x10] sm:$0xff]  ;;  %v75_v15 = vld [vmem:[%s7272_s0 + $0x18] sm:$0xff]  ;;  %5609 = vmatpush3.bf16.msra.mxu0 %v6015_v3 }
   0x6   :  { %2313 = vst.msk [vmem:[#allocation3 + $0x8] sm:$0x3] %vm29_vm1, %v5962_v4  ;;  %2315 = vst.msk [vmem:[#allocation3 + $0xa8] sm:$0x3] %vm29_vm1, %v5962_v4  ;;  %v97_v14 = vmul.f32 %v6058_v7, %v6078_v12  ;;  %v76_v16 = vld [vmem:[%s7272_s0 + $0x20] sm:$0xff]  ;;  %v77_v17 = vld [vmem:[%s7272_s0 + $0x28] sm:$0xff]  ;;  %v118_v18 = vadd.f32 %v6068_v10, %v6063_v9  ;;  %v98_v19 = vmul.f32 %v6058_v7, %v75_v15  ;;  %5611 = vmatprep.subr.bf16.mxu0 %v6060_v8 }
   0x7   :  { %2314 = vst.msk [vmem:[#allocation3 + $0xa0] sm:$0xff] %vm27_vm0, %v5962_v4  ;;  %2317 = vst.msk [vmem:[#allocation3 + $0x90] sm:$0xff] %vm27_vm0, %v5962_v4  ;;  %v99_v20 = vmul.f32 %v6058_v7, %v76_v16  ;;  %v100_v21 = vmul.f32 %v6058_v7, %v77_v17  ;;  %v78_v22 = vld [vmem:[%s7272_s0 + $0x30] sm:$0xff]  ;;  %v80_v23 = vld [vmem:[%s7272_s0 + $0x40] sm:$0xff]  ;;  %v119_v24 = vadd.f32 %v6068_v10, %v96_v13 }
   0x8   :  { %2318 = vst.msk [vmem:[#allocation3 + $0x98] sm:$0x3] %vm29_vm1, %v5962_v4  ;;  %2320 = vst.msk [vmem:[#allocation3 + $0x138] sm:$0x3] %vm29_vm1, %v5962_v4  ;;  %v120_v25 = vadd.f32 %v6068_v10, %v97_v14  ;;  %v101_v26 = vmul.f32 %v6058_v7, %v78_v22  ;;  %v103_v27 = vmul.f32 %v6058_v7, %v80_v23  ;;  %vm134_vm3 = vcmp.ge.f32.partialorder %v118_v18, 0.0  ;;  %v81_v31 = vld [vmem:[%s7272_s0 + $0x48] sm:$0xff] }
   0x9   :  { %2319 = vst.msk [vmem:[#allocation3 + $0x130] sm:$0xff] %vm27_vm0, %v5962_v4  ;;  %v150_v28 = vmul.f32 0.1, %v118_v18  ;;  %v121_v29 = vadd.f32 %v6068_v10, %v98_v19  ;;  %v122_v30 = vadd.f32 %v6068_v10, %v99_v20  ;;  %vm135_vm4 = vcmp.ge.f32.partialorder %v119_v24, 0.0  ;;  %v216_v34 = vld [vmem:[#allocation2 + $0x1] sm:$0xff]  ;;  %v82_v37 = vld [vmem:[%s7272_s0 + $0x50] sm:$0xff] }
   0xa   :  { %40 = vst.msk [vmem:[#allocation2 + $0x10] sm:$0x1] %vm39_vm2, %v5962_v4  ;;  %41 = vst.msk [vmem:[#allocation2 + $0x20] sm:$0x1] %vm39_vm2, %v5962_v4  ;;  %v151_v32 = vmul.f32 0.1, %v119_v24  ;;  %5106 = vmatprep.mubr.msk.f32.mxu0 %vm27_vm0, %v216_v34  ;;  %v123_v41 = vadd.f32 %v6068_v10, %v100_v21  ;;  %v124_v43 = vadd.f32 %v6068_v10, %v101_v26 }
   0xb   :  { %42 = vst.msk [vmem:[#allocation2 + $0x30] sm:$0x1] %vm39_vm2, %v5962_v4  ;;  %43 = vst.msk [vmem:[#allocation2 + $0x40] sm:$0x1] %vm39_vm2, %v5962_v4  ;;  %vm136_vm5 = vcmp.ge.f32.partialorder %v120_v25, 0.0  ;;  %v166_v35 = vsel %vm134_vm3, %v118_v18, %v150_v28  ;;  %vm137_vm6 = vcmp.ge.f32.partialorder %v121_v29, 0.0  ;;  %v126_v44 = vadd.f32 %v6068_v10, %v103_v27 }
   0xc   :  { %44 = vst.msk [vmem:[#allocation2 + $0x50] sm:$0x1] %vm39_vm2, %v5962_v4  ;;  %45 = vst.msk [vmem:[#allocation2 + $0x60] sm:$0x1] %vm39_vm2, %v5962_v4  ;;  %v152_v33 = vmul.f32 0.1, %v120_v25  ;;  %v167_v38 = vsel %vm135_vm4, %v119_v24, %v151_v32  ;;  %v104_v45 = vmul.f32 %v6058_v7, %v81_v31  ;;  %v105_v49 = vmul.f32 %v6058_v7, %v82_v37 }
   0xd   :  { %46 = vst.msk [vmem:[#allocation2 + $0x70] sm:$0x1] %vm39_vm2, %v5962_v4  ;;  %47 = vst.msk [vmem:[#allocation2 + $0x80] sm:$0x1] %vm39_vm2, %v5962_v4  ;;  %v153_v36 = vmul.f32 0.1, %v121_v29 }
   0xe   :  { %48 = vst.msk [vmem:[#allocation2 + $0xb0] sm:$0x1] %vm39_vm2, %v5962_v4  ;;  %49 = vst.msk [vmem:[#allocation2 + $0xc0] sm:$0x1] %vm39_vm2, %v5962_v4  ;;  %vm138_vm7 = vcmp.ge.f32.partialorder %v122_v30, 0.0  ;;  %v168_v39 = vsel %vm136_vm5, %v120_v25, %v152_v33  ;;  %v83_v46 = vld [vmem:[%s7272_s0 + $0x58] sm:$0xff]  ;;  %v127_v55 = vadd.f32 %v6068_v10, %v104_v45  ;;  %v128_v56 = vadd.f32 %v6068_v10, %v105_v49 }
   0xf   :  { %50 = vst.msk [vmem:[#allocation2 + $0xd0] sm:$0x1] %vm39_vm2, %v5962_v4  ;;  %51 = vst.msk [vmem:[#allocation2 + $0xe0] sm:$0x1] %vm39_vm2, %v5962_v4  ;;  %v154_v40 = vmul.f32 0.1, %v122_v30  ;;  %v169_v42 = vsel %vm137_vm6, %v121_v29, %v153_v36  ;;  %v106_v57 = vmul.f32 %v6058_v7, %v83_v46 }
  0x10   :  { %52 = vst.msk [vmem:[#allocation2 + $0xf0] sm:$0x1] %vm39_vm2, %v5962_v4  ;;  %53 = vst.msk [vmem:[#allocation2 + $0x100] sm:$0x1] %vm39_vm2, %v5962_v4  ;;  %vm139_vm8 = vcmp.ge.f32.partialorder %v123_v41, 0.0  ;;  %v84_v50 = vld [vmem:[%s7272_s0 + $0x60] sm:$0xff] }
  0x11   :  { %54 = vst.msk [vmem:[#allocation2 + $0x110] sm:$0x1] %vm39_vm2, %v5962_v4  ;;  %55 = vst.msk [vmem:[#allocation2 + $0x120] sm:$0x1] %vm39_vm2, %v5962_v4  ;;  %v170_v47 = vsel %vm138_vm7, %v122_v30, %v154_v40  ;;  %v155_v48 = vmul.f32 0.1, %v123_v41 }
  0x12   :  { %56 = vst.msk [vmem:[#allocation2 + $0x19] sm:$0x1] %vm39_vm2, %v5962_v4  ;;  %57 = vst.msk [vmem:[#allocation2 + $0x29] sm:$0x1] %vm39_vm2, %v5962_v4  ;;  %v85_v51 = vld [vmem:[%s7272_s0 + $0x68] sm:$0xff]  ;;  %vm140_vm9 = vcmp.ge.f32.partialorder %v124_v43, 0.0 }
  0x13   :  { %58 = vst.msk [vmem:[#allocation2 + $0x39] sm:$0x1] %vm39_vm2, %v5962_v4  ;;  %59 = vst.msk [vmem:[#allocation2 + $0x49] sm:$0x1] %vm39_vm2, %v5962_v4  ;;  %v156_v52 = vmul.f32 0.1, %v124_v43  ;;  %v171_v54 = vsel %vm139_vm8, %v123_v41, %v155_v48 }
  0x14   :  { %60 = vst.msk [vmem:[#allocation2 + $0x59] sm:$0x1] %vm39_vm2, %v5962_v4  ;;  %61 = vst.msk [vmem:[#allocation2 + $0x69] sm:$0x1] %vm39_vm2, %v5962_v4  ;;  %vm142_vm10 = vcmp.ge.f32.partialorder %v126_v44, 0.0  ;;  %v86_v58 = vld [vmem:[%s7272_s0 + $0x70] sm:$0xff] }
  0x15   :  { %62 = vst.msk [vmem:[#allocation2 + $0x79] sm:$0x1] %vm39_vm2, %v5962_v4  ;;  %63 = vst.msk [vmem:[#allocation2 + $0x89] sm:$0x1] %vm39_vm2, %v5962_v4  ;;  %v158_v53 = vmul.f32 0.1, %v126_v44 }
  0x16   :  { %64 = vst.msk [vmem:[#allocation2 + $0xb9] sm:$0x1] %vm39_vm2, %v5962_v4  ;;  %65 = vst.msk [vmem:[#allocation2 + $0xc9] sm:$0x1] %vm39_vm2, %v5962_v4 }
  0x17   :  { %66 = vst.msk [vmem:[#allocation2 + $0xd9] sm:$0x1] %vm39_vm2, %v5962_v4  ;;  %67 = vst.msk [vmem:[#allocation2 + $0xe9] sm:$0x1] %vm39_vm2, %v5962_v4 }
  0x18   :  { %68 = vst.msk [vmem:[#allocation2 + $0xf9] sm:$0x1] %vm39_vm2, %v5962_v4  ;;  %69 = vst.msk [vmem:[#allocation2 + $0x109] sm:$0x1] %vm39_vm2, %v5962_v4 }
  0x19   :  { %70 = vst.msk [vmem:[#allocation2 + $0x119] sm:$0x1] %vm39_vm2, %v5962_v4  ;;  %71 = vst.msk [vmem:[#allocation2 + $0x129] sm:$0x1] %vm39_vm2, %v5962_v4 }
  0x1a   :  { %2322 = vst.msk [vmem:[#allocation3 + $0x10] sm:$0x1] %vm39_vm2, %v5962_v4  ;;  %2323 = vst.msk [vmem:[#allocation3 + $0x20] sm:$0x1] %vm39_vm2, %v5962_v4 }
  0x1b   :  { %2324 = vst.msk [vmem:[#allocation3 + $0x30] sm:$0x1] %vm39_vm2, %v5962_v4  ;;  %2325 = vst.msk [vmem:[#allocation3 + $0x40] sm:$0x1] %vm39_vm2, %v5962_v4 }
  0x1c   :  { %2326 = vst.msk [vmem:[#allocation3 + $0x50] sm:$0x1] %vm39_vm2, %v5962_v4  ;;  %2327 = vst.msk [vmem:[#allocation3 + $0x60] sm:$0x1] %vm39_vm2, %v5962_v4 }
  0x1d   :  { %2328 = vst.msk [vmem:[#allocation3 + $0x70] sm:$0x1] %vm39_vm2, %v5962_v4  ;;  %2329 = vst.msk [vmem:[#allocation3 + $0x80] sm:$0x1] %vm39_vm2, %v5962_v4 }
  0x1e   :  { %2330 = vst.msk [vmem:[#allocation3 + $0xb0] sm:$0x1] %vm39_vm2, %v5962_v4  ;;  %2331 = vst.msk [vmem:[#allocation3 + $0xc0] sm:$0x1] %vm39_vm2, %v5962_v4 }
  0x1f   :  { %2332 = vst.msk [vmem:[#allocation3 + $0xd0] sm:$0x1] %vm39_vm2, %v5962_v4  ;;  %2333 = vst.msk [vmem:[#allocation3 + $0xe0] sm:$0x1] %vm39_vm2, %v5962_v4 }
  0x20   :  { %2334 = vst.msk [vmem:[#allocation3 + $0xf0] sm:$0x1] %vm39_vm2, %v5962_v4  ;;  %2335 = vst.msk [vmem:[#allocation3 + $0x100] sm:$0x1] %vm39_vm2, %v5962_v4 }
  0x21   :  { %2336 = vst.msk [vmem:[#allocation3 + $0x110] sm:$0x1] %vm39_vm2, %v5962_v4  ;;  %2337 = vst.msk [vmem:[#allocation3 + $0x120] sm:$0x1] %vm39_vm2, %v5962_v4 }
  0x22   :  { %2338 = vst.msk [vmem:[#allocation3 + $0x19] sm:$0x1] %vm39_vm2, %v5962_v4  ;;  %2339 = vst.msk [vmem:[#allocation3 + $0x29] sm:$0x1] %vm39_vm2, %v5962_v4 }
  0x23   :  { %2340 = vst.msk [vmem:[#allocation3 + $0x39] sm:$0x1] %vm39_vm2, %v5962_v4  ;;  %2341 = vst.msk [vmem:[#allocation3 + $0x49] sm:$0x1] %vm39_vm2, %v5962_v4 }
  0x24   :  { %2342 = vst.msk [vmem:[#allocation3 + $0x59] sm:$0x1] %vm39_vm2, %v5962_v4  ;;  %2343 = vst.msk [vmem:[#allocation3 + $0x69] sm:$0x1] %vm39_vm2, %v5962_v4 }
  0x25   :  { %2344 = vst.msk [vmem:[#allocation3 + $0x79] sm:$0x1] %vm39_vm2, %v5962_v4  ;;  %2345 = vst.msk [vmem:[#allocation3 + $0x89] sm:$0x1] %vm39_vm2, %v5962_v4 }
  0x26   :  { %2346 = vst.msk [vmem:[#allocation3 + $0xb9] sm:$0x1] %vm39_vm2, %v5962_v4  ;;  %2347 = vst.msk [vmem:[#allocation3 + $0xc9] sm:$0x1] %vm39_vm2, %v5962_v4 }
  0x27   :  { %2348 = vst.msk [vmem:[#allocation3 + $0xd9] sm:$0x1] %vm39_vm2, %v5962_v4  ;;  %2349 = vst.msk [vmem:[#allocation3 + $0xe9] sm:$0x1] %vm39_vm2, %v5962_v4 }
  0x28   :  { %2350 = vst.msk [vmem:[#allocation3 + $0xf9] sm:$0x1] %vm39_vm2, %v5962_v4  ;;  %2351 = vst.msk [vmem:[#allocation3 + $0x109] sm:$0x1] %vm39_vm2, %v5962_v4 }
  0x29   :  { %2352 = vst.msk [vmem:[#allocation3 + $0x119] sm:$0x1] %vm39_vm2, %v5962_v4  ;;  %2353 = vst.msk [vmem:[#allocation3 + $0x129] sm:$0x1] %vm39_vm2, %v5962_v4 }
  0x2a   :  { %182 = vst.msk [vmem:[#allocation2 + $0x11] sm:$0xff] %vm27_vm0, %v166_v35  ;;  %183 = vst.msk [vmem:[#allocation2 + $0x21] sm:$0xff] %vm27_vm0, %v167_v38 }
  0x2b   :  { %184 = vst.msk [vmem:[#allocation2 + $0x31] sm:$0xff] %vm27_vm0, %v168_v39  ;;  %185 = vst.msk [vmem:[#allocation2 + $0x41] sm:$0xff] %vm27_vm0, %v169_v42 }
  0x2c   :  { %186 = vst.msk [vmem:[#allocation2 + $0x51] sm:$0xff] %vm27_vm0, %v170_v47 }
  0x2d   :  { %12 = vsyncpa [#allocation5], 0  ;;  %187 = vst.msk [vmem:[#allocation2 + $0x61] sm:$0xff] %vm27_vm0, %v171_v54  ;;  %v172_v59 = vsel %vm140_vm9, %v124_v43, %v156_v52  ;;  %v174_v60 = vsel %vm142_vm10, %v126_v44, %v158_v53  ;;  %v107_v61 = vmul.f32 %v6058_v7, %v84_v50  ;;  %v108_v62 = vmul.f32 %v6058_v7, %v85_v51  ;;  %v4490_v63 = vld [vmem:[%s7275_s3 + $0x20] sm:$0xff]  ;;  %v4491_v0 = vld [vmem:[%s7275_s3 + $0x28] sm:$0xff] }
  0x2e   :  { %188 = vst.msk [vmem:[#allocation2 + $0x71] sm:$0xff] %vm27_vm0, %v172_v59  ;;  %190 = vst.msk [vmem:[#allocation2 + $0xb1] sm:$0xff] %vm27_vm0, %v174_v60  ;;  %vm143_vm11 = vcmp.ge.f32.partialorder %v127_v55, 0.0  ;;  %v159_v1 = vmul.f32 0.1, %v127_v55  ;;  %vm144_vm12 = vcmp.ge.f32.partialorder %v128_v56, 0.0  ;;  %v129_v4 = vadd.f32 %v6068_v10, %v106_v57 }
  0x2f   :  { %v160_v2 = vmul.f32 0.1, %v128_v56  ;;  %v130_v5 = vadd.f32 %v6068_v10, %v107_v61  ;;  %v131_v6 = vadd.f32 %v6068_v10, %v108_v62  ;;  %v109_v9 = vmul.f32 %v6058_v7, %v86_v58  ;;  %v79_v15 = vld [vmem:[%s7272_s0 + $0x38] sm:$0xff]  ;;  %v224_v36 = vld [vmem:[#allocation2 + $0xa1] sm:$0xff]  ;;  %v4508_v45 = vld [vmem:[%s7275_s3 + $0x30] sm:$0xff] }
  0x30   :  { %v175_v12 = vsel %vm143_vm11, %v127_v55, %v159_v1  ;;  %v6295_v14 = vpack.c.bf16 %v4491_v0, %v4490_v63  ;;  %v87_v16 = vld [vmem:[%s7272_s0 + $0x78] sm:$0xff]  ;;  %vm145_vm13 = vcmp.ge.f32.partialorder %v129_v4, 0.0  ;;  %v161_v18 = vmul.f32 0.1, %v129_v4  ;;  %v198_v44 = vld [vmem:[#allocation2] sm:$0xff]  ;;  %v4527_v1 = vld [vmem:[%s7275_s3 + $0x48] sm:$0xff] }
  0x31   :  { %v6285_v3 = vld [vmem:[#allocation2 + $0x11] sm:$0xff]  ;;  %v6293_v11 = vld [vmem:[#allocation2 + $0x21] sm:$0xff]  ;;  %v176_v13 = vsel %vm144_vm12, %v128_v56, %v160_v2  ;;  %191 = vst.msk [vmem:[#allocation2 + $0xc1] sm:$0xff] %vm27_vm0, %v175_v12  ;;  %vm146_vm14 = vcmp.ge.f32.partialorder %v130_v5, 0.0  ;;  %vm147_vm15 = vcmp.ge.f32.partialorder %v131_v6, 0.0  ;;  %v132_v22 = vadd.f32 %v6068_v10, %v109_v9 }
  0x32   :  { %5107 = vmatmul.mubr.msk.f32.vlgmr.msra.gmra.mrb[0].mxu0 %vm27_vm0, %v6285_v3  ;;  %v6306_v17 = vld [vmem:[#allocation2 + $0x31] sm:$0xff]  ;;  %192 = vst.msk [vmem:[#allocation2 + $0xd1] sm:$0xff] %vm27_vm0, %v176_v13  ;;  %v6310_v19 = vld [vmem:[#allocation2 + $0x41] sm:$0xff]  ;;  %v162_v20 = vmul.f32 0.1, %v130_v5  ;;  %v102_v23 = vmul.f32 %v6058_v7, %v79_v15  ;;  %v110_v24 = vmul.f32 %v6058_v7, %v87_v16 }
  0x33   :  { %5613 = vmatpush3.bf16.msra.mxu0 %v6060_v8  ;;  %5109 = vmatprep.mubr.msk.f32.mxu0 %vm27_vm0, %v6293_v11  ;;  %v163_v21 = vmul.f32 0.1, %v131_v6  ;;  %v177_v8 = vsel %vm145_vm13, %v129_v4, %v161_v18  ;;  %vm148_vm1 = vcmp.ge.f32.partialorder %v132_v22, 0.0  ;;  %v164_v27 = vmul.f32 0.1, %v132_v22  ;;  %v6321_v28 = vld [vmem:[#allocation2 + $0x51] sm:$0xff] }
  0x34   :  { %5615 = vmatprep.subr.bf16.mxu0 %v6295_v14  ;;  %193 = vst.msk [vmem:[#allocation2 + $0xe1] sm:$0xff] %vm27_vm0, %v177_v8  ;;  %v178_v25 = vsel %vm146_vm14, %v130_v5, %v162_v20  ;;  %v125_v7 = vadd.f32 %v6068_v10, %v102_v23  ;;  %v133_v29 = vadd.f32 %v6068_v10, %v110_v24  ;;  %v6327_v30 = vld [vmem:[#allocation2 + $0x61] sm:$0xff]  ;;  %v4509_v46 = vld [vmem:[%s7275_s3 + $0x38] sm:$0xff]  ;;  %v6376_v47 = vld [vmem:[#allocation2 + $0x10] sm:$0xff] }
  0x35   :  { %v179_v26 = vsel %vm147_vm15, %v131_v6, %v163_v21  ;;  %194 = vst.msk [vmem:[#allocation2 + $0xf1] sm:$0xff] %vm27_vm0, %v178_v25  ;;  %v180_v31 = vsel %vm148_vm1, %v132_v22, %v164_v27  ;;  %v6334_v34 = vld [vmem:[#allocation2 + $0x71] sm:$0xff]  ;;  %v6378_v48 = vld [vmem:[#allocation2 + $0x20] sm:$0xff]  ;;  %v5618_v49 = vpack.c.bf16 %v4509_v46, %v4508_v45  ;;  %v4599_v46 = vld [vmem:[%s7275_s3 + $0x88] sm:$0xff] }
  0x36   :  { %5110 = vmatmul.mubr.msk.f32.gmra.mrb[2].mxu0 %vm27_vm0, %v6306_v17  ;;  %195 = vst.msk [vmem:[#allocation2 + $0x101] sm:$0xff] %vm27_vm0, %v179_v26  ;;  %196 = vst.msk [vmem:[#allocation2 + $0x111] sm:$0xff] %vm27_vm0, %v180_v31  ;;  %vm141_vm2 = vcmp.ge.f32.partialorder %v125_v7, 0.0  ;;  %v157_v32 = vmul.f32 0.1, %v125_v7  ;;  %vm149_vm3 = vcmp.ge.f32.partialorder %v133_v29, 0.0 }
  0x37   :  { %5112 = vmatprep.mubr.msk.f32.mxu0 %vm27_vm0, %v6310_v19  ;;  %v165_v33 = vmul.f32 0.1, %v133_v29  ;;  %v6341_v37 = vld [vmem:[#allocation2 + $0xb1] sm:$0xff]  ;;  %v6387_v51 = vld [vmem:[#allocation2 + $0x40] sm:$0xff]  ;;  %v4563_v31 = vld [vmem:[%s7275_s3 + $0x68] sm:$0xff] }
  0x38   :  { %v173_v35 = vsel %vm141_vm2, %v125_v7, %v157_v32  ;;  %v6343_v38 = vld [vmem:[#allocation2 + $0xc1] sm:$0xff]  ;;  %v6385_v50 = vld [vmem:[#allocation2 + $0x30] sm:$0xff]  ;;  %v4545_v25 = vld [vmem:[%s7275_s3 + $0x58] sm:$0xff] }
  0x39   :  { %189 = vst.msk [vmem:[#allocation2 + $0x81] sm:$0xff] %vm27_vm0, %v173_v35  ;;  %v181_v10 = vsel %vm149_vm3, %v133_v29, %v165_v33  ;;  %v6349_v39 = vld [vmem:[#allocation2 + $0xd1] sm:$0xff]  ;;  %v6395_v53 = vld [vmem:[#allocation2 + $0x60] sm:$0xff] }
  0x3a   :  { %5113 = vmatmul.mubr.msk.f32.gmra.mrb[4].mxu0 %vm27_vm0, %v6321_v28  ;;  %197 = vst.msk [vmem:[#allocation2 + $0x121] sm:$0xff] %vm27_vm0, %v181_v10  ;;  %v6393_v52 = vld [vmem:[#allocation2 + $0x50] sm:$0xff]  ;;  %v206_v55 = vld [vmem:[#allocation2 + $0xa0] sm:$0xff] }
  0x3b   :  { %5115 = vmatprep.mubr.msk.f32.mxu0 %vm27_vm0, %v6327_v30  ;;  %v6351_v40 = vld [vmem:[#allocation2 + $0xe1] sm:$0xff]  ;;  %v6401_v54 = vld [vmem:[#allocation2 + $0x70] sm:$0xff] }
  0x3c   :  { %v6357_v41 = vld [vmem:[#allocation2 + $0xf1] sm:$0xff]  ;;  %v6408_v57 = vld [vmem:[#allocation2 + $0xc0] sm:$0xff] }
  0x3d   :  { %v6359_v42 = vld [vmem:[#allocation2 + $0x101] sm:$0xff]  ;;  %v6365_v43 = vld [vmem:[#allocation2 + $0x111] sm:$0xff] }
  0x3e   :  { %5116 = vmatmul.mubr.msk.f32.gmra.mrb[6].mxu0 %vm27_vm0, %v6334_v34  ;;  %v6406_v56 = vld [vmem:[#allocation2 + $0xb0] sm:$0xff]  ;;  %v6416_v59 = vld [vmem:[#allocation2 + $0xe0] sm:$0xff] }
  0x3f   :  { %5118 = vmatprep.mubr.msk.f32.mxu0 %vm27_vm0, %v224_v36  ;;  %v6414_v58 = vld [vmem:[#allocation2 + $0xd0] sm:$0xff]  ;;  %v6424_v61 = vld [vmem:[#allocation2 + $0x100] sm:$0xff]  ;;  %v4581_v36 = vld [vmem:[%s7275_s3 + $0x78] sm:$0xff] }
  0x40   :  { %v6422_v60 = vld [vmem:[#allocation2 + $0xf0] sm:$0xff]  ;;  %v621_v63 = vld [vmem:[#allocation2 + $0x2] sm:$0xff] }
  0x41   :  { %v6430_v62 = vld [vmem:[#allocation2 + $0x110] sm:$0xff]  ;;  %v4526_v0 = vld [vmem:[%s7275_s3 + $0x40] sm:$0xff] }
  0x42   :  { %5119 = vmatmul.mubr.msk.f32.gmra.mrb[8].mxu0 %vm27_vm0, %v6341_v37  ;;  %v6441_v2 = vld [vmem:[#allocation2 + $0x12] sm:$0xff]  ;;  %v6443_v4 = vld [vmem:[#allocation2 + $0x22] sm:$0xff]  ;;  %v5622_v5 = vpack.c.bf16 %v4527_v1, %v4526_v0 }
  0x43   :  { %5121 = vmatprep.mubr.msk.f32.mxu0 %vm27_vm0, %v6343_v38  ;;  %v6449_v6 = vld [vmem:[#allocation2 + $0x32] sm:$0xff]  ;;  %v6451_v9 = vld [vmem:[#allocation2 + $0x42] sm:$0xff] }
  0x44   :  { %v6457_v12 = vld [vmem:[#allocation2 + $0x52] sm:$0xff]  ;;  %v6459_v13 = vld [vmem:[#allocation2 + $0x62] sm:$0xff] }
  0x45   :  { %v629_v15 = vld [vmem:[#allocation2 + $0xa2] sm:$0xff]  ;;  %v6470_v16 = vld [vmem:[#allocation2 + $0xb2] sm:$0xff] }
  0x46   :  { %5122 = vmatmul.mubr.msk.f32.gmra.mrb[10].mxu0 %vm27_vm0, %v6349_v39  ;;  %v6472_v18 = vld [vmem:[#allocation2 + $0xc2] sm:$0xff]  ;;  %v6478_v20 = vld [vmem:[#allocation2 + $0xd2] sm:$0xff] }
  0x47   :  { %5124 = vmatprep.mubr.msk.f32.mxu0 %vm27_vm0, %v6351_v40  ;;  %v6480_v21 = vld [vmem:[#allocation2 + $0xe2] sm:$0xff]  ;;  %v6486_v22 = vld [vmem:[#allocation2 + $0xf2] sm:$0xff] }
  0x48   :  { %v6488_v8 = vld [vmem:[#allocation2 + $0x102] sm:$0xff]  ;;  %v6494_v23 = vld [vmem:[#allocation2 + $0x112] sm:$0xff] }
  0x49   :  { %v4544_v24 = vld [vmem:[%s7275_s3 + $0x50] sm:$0xff]  ;;  %v6518_v27 = vld [vmem:[#allocation2 + $0x80] sm:$0xff] }
  0x4a   :  { %5125 = vmatmul.mubr.msk.f32.gmra.mrb[12].mxu0 %vm27_vm0, %v6357_v41  ;;  %v5626_v26 = vpack.c.bf16 %v4545_v25, %v4544_v24  ;;  %v6536_v7 = vld [vmem:[#allocation2 + $0x120] sm:$0xff]  ;;  %v4580_v35 = vld [vmem:[%s7275_s3 + $0x70] sm:$0xff] }
  0x4b   :  { %5127 = vmatprep.mubr.msk.f32.mxu0 %vm27_vm0, %v6359_v42  ;;  %v4562_v29 = vld [vmem:[%s7275_s3 + $0x60] sm:$0xff]  ;;  %v5634_v10 = vpack.c.bf16 %v4581_v36, %v4580_v35 }
  0x4c   :  { %v5630_v32 = vpack.c.bf16 %v4563_v31, %v4562_v29  ;;  %v6578_v33 = vld [vmem:[#allocation2 + $0x121] sm:$0xff] }
  0x4d   :  { %v4598_v45 = vld [vmem:[%s7275_s3 + $0x80] sm:$0xff] }
  0x4e   :  { %5128 = vmatmul.mubr.msk.f32.gmra.mrb[14].mxu0 %vm27_vm0, %v6365_v43 }
  0x4f   :  { %5134 = vmatprep.mubr.msk.f32.mxu0 %vm27_vm0, %v198_v44  ;;  %v1320_v44 = vld [vmem:[#allocation2 + $0x122] sm:$0xff] }
  0x52   :  { %5135 = vmatmul.mubr.msk.f32.vlgmr.msra.gmra.mrb[0].mxu0 %vm27_vm0, %v6376_v47 }
  0x53   :  { %5617 = vmatpush3.bf16.msra.mxu0 %v6295_v14  ;;  %5137 = vmatprep.mubr.msk.f32.mxu0 %vm27_vm0, %v6378_v48  ;;  %v6465_v14 = vld [vmem:[#allocation2 + $0x72] sm:$0xff] }
  0x54   :  { %5619 = vmatprep.subr.bf16.mxu0 %v5618_v49 }
  0x56   :  { %5138 = vmatmul.mubr.msk.f32.gmra.mrb[2].mxu0 %vm27_vm0, %v6385_v50 }
  0x57   :  { %5140 = vmatprep.mubr.msk.f32.mxu0 %vm27_vm0, %v6387_v51 }
  0x5a   :  { %5141 = vmatmul.mubr.msk.f32.gmra.mrb[4].mxu0 %vm27_vm0, %v6393_v52 }
  0x5b   :  { %5143 = vmatprep.mubr.msk.f32.mxu0 %vm27_vm0, %v6395_v53 }
  0x5e   :  { %5144 = vmatmul.mubr.msk.f32.gmra.mrb[6].mxu0 %vm27_vm0, %v6401_v54 }
  0x5f   :  { %5146 = vmatprep.mubr.msk.f32.mxu0 %vm27_vm0, %v206_v55 }
  0x62   :  { %5147 = vmatmul.mubr.msk.f32.gmra.mrb[8].mxu0 %vm27_vm0, %v6406_v56 }
  0x63   :  { %5149 = vmatprep.mubr.msk.f32.mxu0 %vm27_vm0, %v6408_v57 }
  0x66   :  { %5150 = vmatmul.mubr.msk.f32.gmra.mrb[10].mxu0 %vm27_vm0, %v6414_v58 }
  0x67   :  { %5152 = vmatprep.mubr.msk.f32.mxu0 %vm27_vm0, %v6416_v59 }
  0x6a   :  { %5153 = vmatmul.mubr.msk.f32.gmra.mrb[12].mxu0 %vm27_vm0, %v6422_v60 }
  0x6b   :  { %5155 = vmatprep.mubr.msk.f32.mxu0 %vm27_vm0, %v6424_v61 }
  0x6e   :  { %5156 = vmatmul.mubr.msk.f32.gmra.mrb[14].mxu0 %vm27_vm0, %v6430_v62 }
  0x6f   :  { %5162 = vmatprep.mubr.msk.f32.mxu0 %vm27_vm0, %v621_v63 }
  0x72   :  { %5163 = vmatmul.mubr.msk.f32.vlgmr.msra.gmra.mrb[0].mxu0 %vm27_vm0, %v6441_v2 }
  0x73   :  { %5621 = vmatpush3.bf16.msra.mxu0 %v5618_v49  ;;  %5165 = vmatprep.mubr.msk.f32.mxu0 %vm27_vm0, %v6443_v4  ;;  %v1549_v49 = vld [vmem:[#allocation2 + $0x130] sm:$0xff] }
  0x74   :  { %5623 = vmatprep.subr.bf16.mxu0 %v5622_v5 }
  0x76   :  { %5166 = vmatmul.mubr.msk.f32.gmra.mrb[2].mxu0 %vm27_vm0, %v6449_v6 }
  0x77   :  { %5168 = vmatprep.mubr.msk.f32.mxu0 %vm27_vm0, %v6451_v9 }
  0x7a   :  { %5169 = vmatmul.mubr.msk.f32.gmra.mrb[4].mxu0 %vm27_vm0, %v6457_v12 }
  0x7b   :  { %5171 = vmatprep.mubr.msk.f32.mxu0 %vm27_vm0, %v6459_v13 }
  0x7e   :  { %5172 = vmatmul.mubr.msk.f32.gmra.mrb[6].mxu0 %vm27_vm0, %v6465_v14 }
  0x7f   :  { %5174 = vmatprep.mubr.msk.f32.mxu0 %vm27_vm0, %v629_v15 }
  0x82   :  { %5175 = vmatmul.mubr.msk.f32.gmra.mrb[8].mxu0 %vm27_vm0, %v6470_v16 }
  0x83   :  { %5177 = vmatprep.mubr.msk.f32.mxu0 %vm27_vm0, %v6472_v18 }
  0x86   :  { %5178 = vmatmul.mubr.msk.f32.gmra.mrb[10].mxu0 %vm27_vm0, %v6478_v20 }
  0x87   :  { %5180 = vmatprep.mubr.msk.f32.mxu0 %vm27_vm0, %v6480_v21 }
  0x8a   :  { %5181 = vmatmul.mubr.msk.f32.gmra.mrb[12].mxu0 %vm27_vm0, %v6486_v22 }
  0x8b   :  { %5183 = vmatprep.mubr.msk.f32.mxu0 %vm27_vm0, %v6488_v8 }
  0x8e   :  { %5184 = vmatmul.mubr.msk.f32.gmra.mrb[14].mxu0 %vm27_vm0, %v6494_v23 }
  0x8f   :  { %5190 = vmatprep.mubr.msk.f32.mxu0 %vm27_vm0, %v6376_v47  ;;  %v5638_v47 = vpack.c.bf16 %v4599_v46, %v4598_v45 }
  0x92   :  { %5191 = vmatmul.mubr.msk.f32.vlgmr.msra.gmra.mrb[0].mxu0 %vm27_vm0, %v6378_v48 }
  0x93   :  { %5625 = vmatpush3.bf16.msra.mxu0 %v5622_v5  ;;  %5193 = vmatprep.mubr.msk.f32.mxu0 %vm27_vm0, %v6385_v50 }
  0x94   :  { %5627 = vmatprep.subr.bf16.mxu0 %v5626_v26 }
  0x96   :  { %5194 = vmatmul.mubr.msk.f32.gmra.mrb[2].mxu0 %vm27_vm0, %v6387_v51 }
  0x97   :  { %5196 = vmatprep.mubr.msk.f32.mxu0 %vm27_vm0, %v6393_v52 }
  0x9a   :  { %5197 = vmatmul.mubr.msk.f32.gmra.mrb[4].mxu0 %vm27_vm0, %v6395_v53 }
  0x9b   :  { %5199 = vmatprep.mubr.msk.f32.mxu0 %vm27_vm0, %v6401_v54 }
  0x9e   :  { %5200 = vmatmul.mubr.msk.f32.gmra.mrb[6].mxu0 %vm27_vm0, %v6518_v27 }
  0x9f   :  { %5202 = vmatprep.mubr.msk.f32.mxu0 %vm27_vm0, %v6406_v56 }
  0xa2   :  { %5203 = vmatmul.mubr.msk.f32.gmra.mrb[8].mxu0 %vm27_vm0, %v6408_v57 }
  0xa3   :  { %5205 = vmatprep.mubr.msk.f32.mxu0 %vm27_vm0, %v6414_v58 }
  0xa6   :  { %5206 = vmatmul.mubr.msk.f32.gmra.mrb[10].mxu0 %vm27_vm0, %v6416_v59 }
  0xa7   :  { %5208 = vmatprep.mubr.msk.f32.mxu0 %vm27_vm0, %v6422_v60 }
  0xaa   :  { %5209 = vmatmul.mubr.msk.f32.gmra.mrb[12].mxu0 %vm27_vm0, %v6424_v61 }
  0xab   :  { %5211 = vmatprep.mubr.msk.f32.mxu0 %vm27_vm0, %v6430_v62 }
  0xae   :  { %5212 = vmatmul.mubr.msk.f32.gmra.mrb[14].mxu0 %vm27_vm0, %v6536_v7 }
  0xaf   :  { %5218 = vmatprep.mubr.msk.f32.mxu0 %vm27_vm0, %v6285_v3  ;;  %v6560_v3 = vld [vmem:[#allocation2 + $0x81] sm:$0xff] }
  0xb2   :  { %5219 = vmatmul.mubr.msk.f32.vlgmr.msra.gmra.mrb[0].mxu0 %vm27_vm0, %v6293_v11 }
  0xb3   :  { %5629 = vmatpush3.bf16.msra.mxu0 %v5626_v26  ;;  %5221 = vmatprep.mubr.msk.f32.mxu0 %vm27_vm0, %v6306_v17 }
  0xb4   :  { %5631 = vmatprep.subr.bf16.mxu0 %v5630_v32 }
  0xb6   :  { %5222 = vmatmul.mubr.msk.f32.gmra.mrb[2].mxu0 %vm27_vm0, %v6310_v19 }
  0xb7   :  { %5224 = vmatprep.mubr.msk.f32.mxu0 %vm27_vm0, %v6321_v28 }
  0xba   :  { %5225 = vmatmul.mubr.msk.f32.gmra.mrb[4].mxu0 %vm27_vm0, %v6327_v30 }
  0xbb   :  { %5227 = vmatprep.mubr.msk.f32.mxu0 %vm27_vm0, %v6334_v34 }
  0xbe   :  { %5228 = vmatmul.mubr.msk.f32.gmra.mrb[6].mxu0 %vm27_vm0, %v6560_v3 }
  0xbf   :  { %5230 = vmatprep.mubr.msk.f32.mxu0 %vm27_vm0, %v6341_v37  ;;  %v1312_v37 = vld [vmem:[#allocation2 + $0x82] sm:$0xff] }
  0xc2   :  { %5231 = vmatmul.mubr.msk.f32.gmra.mrb[8].mxu0 %vm27_vm0, %v6343_v38 }
  0xc3   :  { %5233 = vmatprep.mubr.msk.f32.mxu0 %vm27_vm0, %v6349_v39 }
  0xc6   :  { %5234 = vmatmul.mubr.msk.f32.gmra.mrb[10].mxu0 %vm27_vm0, %v6351_v40 }
  0xc7   :  { %5236 = vmatprep.mubr.msk.f32.mxu0 %vm27_vm0, %v6357_v41 }
  0xca   :  { %5237 = vmatmul.mubr.msk.f32.gmra.mrb[12].mxu0 %vm27_vm0, %v6359_v42 }
  0xcb   :  { %5239 = vmatprep.mubr.msk.f32.mxu0 %vm27_vm0, %v6365_v43 }
  0xce   :  { %5240 = vmatmul.mubr.msk.f32.gmra.mrb[14].mxu0 %vm27_vm0, %v6578_v33 }
  0xcf   :  { %5246 = vmatprep.mubr.msk.f32.mxu0 %vm27_vm0, %v6441_v2 }
  0xd2   :  { %5247 = vmatmul.mubr.msk.f32.vlgmr.msra.gmra.mrb[0].mxu0 %vm27_vm0, %v6443_v4 }
  0xd3   :  { %5633 = vmatpush3.bf16.msra.mxu0 %v5630_v32  ;;  %5249 = vmatprep.mubr.msk.f32.mxu0 %vm27_vm0, %v6449_v6 }
  0xd4   :  { %5635 = vmatprep.subr.bf16.mxu0 %v5634_v10 }
  0xd6   :  { %5250 = vmatmul.mubr.msk.f32.gmra.mrb[2].mxu0 %vm27_vm0, %v6451_v9 }
  0xd7   :  { %5252 = vmatprep.mubr.msk.f32.mxu0 %vm27_vm0, %v6457_v12 }
  0xda   :  { %5253 = vmatmul.mubr.msk.f32.gmra.mrb[4].mxu0 %vm27_vm0, %v6459_v13 }
  0xdb   :  { %5255 = vmatprep.mubr.msk.f32.mxu0 %vm27_vm0, %v6465_v14 }
  0xde   :  { %5256 = vmatmul.mubr.msk.f32.gmra.mrb[6].mxu0 %vm27_vm0, %v1312_v37 }
  0xdf   :  { %5258 = vmatprep.mubr.msk.f32.mxu0 %vm27_vm0, %v6470_v16 }
  0xe2   :  { %5259 = vmatmul.mubr.msk.f32.gmra.mrb[8].mxu0 %vm27_vm0, %v6472_v18 }
  0xe3   :  { %5261 = vmatprep.mubr.msk.f32.mxu0 %vm27_vm0, %v6478_v20 }
  0xe6   :  { %5262 = vmatmul.mubr.msk.f32.gmra.mrb[10].mxu0 %vm27_vm0, %v6480_v21 }
  0xe7   :  { %5264 = vmatprep.mubr.msk.f32.mxu0 %vm27_vm0, %v6486_v22 }
  0xea   :  { %5265 = vmatmul.mubr.msk.f32.gmra.mrb[12].mxu0 %vm27_vm0, %v6488_v8 }
  0xeb   :  { %5267 = vmatprep.mubr.msk.f32.mxu0 %vm27_vm0, %v6494_v23 }
  0xee   :  { %5268 = vmatmul.mubr.msk.f32.gmra.mrb[14].mxu0 %vm27_vm0, %v1320_v44 }
  0xef   :  { %5274 = vmatprep.mubr.msk.f32.mxu0 %vm27_vm0, %v6378_v48  ;;  %v1541_v48 = vld [vmem:[#allocation2 + $0x90] sm:$0xff] }
  0xf2   :  { %5275 = vmatmul.mubr.msk.f32.vlgmr.msra.gmra.mrb[0].mxu0 %vm27_vm0, %v6385_v50 }
  0xf3   :  { %5637 = vmatpush3.bf16.msra.mxu0 %v5634_v10  ;;  %5277 = vmatprep.mubr.msk.f32.mxu0 %vm27_vm0, %v6387_v51  ;;  %v6736_v51 = vld [vmem:[%s7277_s5] ss:$0 sm:$0xff] }
  0xf4   :  { %5639 = vmatprep.subr.bf16.mxu0 %v5638_v47 }
  0xf6   :  { %5278 = vmatmul.mubr.msk.f32.gmra.mrb[2].mxu0 %vm27_vm0, %v6393_v52 }
  0xf7   :  { %5280 = vmatprep.mubr.msk.f32.mxu0 %vm27_vm0, %v6395_v53 }
  0xfa   :  { %5281 = vmatmul.mubr.msk.f32.gmra.mrb[4].mxu0 %vm27_vm0, %v6401_v54 }
  0xfb   :  { %5283 = vmatprep.mubr.msk.f32.mxu0 %vm27_vm0, %v6518_v27 }
  0xfe   :  { %5284 = vmatmul.mubr.msk.f32.gmra.mrb[6].mxu0 %vm27_vm0, %v1541_v48 }
  0xff   :  { %5286 = vmatprep.mubr.msk.f32.mxu0 %vm27_vm0, %v6408_v57 }
 0x102   :  { %5287 = vmatmul.mubr.msk.f32.gmra.mrb[8].mxu0 %vm27_vm0, %v6414_v58 }
 0x103   :  { %5289 = vmatprep.mubr.msk.f32.mxu0 %vm27_vm0, %v6416_v59 }
 0x106   :  { %5290 = vmatmul.mubr.msk.f32.gmra.mrb[10].mxu0 %vm27_vm0, %v6422_v60 }
 0x107   :  { %5292 = vmatprep.mubr.msk.f32.mxu0 %vm27_vm0, %v6424_v61 }
 0x10a   :  { %5293 = vmatmul.mubr.msk.f32.gmra.mrb[12].mxu0 %vm27_vm0, %v6430_v62 }
 0x10b   :  { %5295 = vmatprep.mubr.msk.f32.mxu0 %vm27_vm0, %v6536_v7 }
 0x10e   :  { %5296 = vmatmul.mubr.msk.f32.gmra.mrb[14].mxu0 %vm27_vm0, %v1549_v49 }
 0x10f   :  { %5302 = vmatprep.mubr.msk.f32.mxu0 %vm27_vm0, %v6293_v11  ;;  %v1769_v11 = vld [vmem:[#allocation2 + $0x91] sm:$0xff] }
 0x112   :  { %5303 = vmatmul.mubr.msk.f32.vlgmr.msra.gmra.mrb[0].mxu0 %vm27_vm0, %v6306_v17  ;;  %v1777_v17 = vld [vmem:[#allocation2 + $0x131] sm:$0xff] }
 0x113   :  { %5641 = vmatpush3.bf16.msra.mxu0 %v5638_v47  ;;  %5305 = vmatprep.mubr.msk.f32.mxu0 %vm27_vm0, %v6310_v19  ;;  %v1997_v19 = vld [vmem:[#allocation2 + $0x92] sm:$0xff] }
 0x116   :  { %5306 = vmatmul.mubr.msk.f32.gmra.mrb[2].mxu0 %vm27_vm0, %v6321_v28  ;;  %v2005_v28 = vld [vmem:[#allocation2 + $0x132] sm:$0xff] }
 0x117   :  { %5308 = vmatprep.mubr.msk.f32.mxu0 %vm27_vm0, %v6327_v30  ;;  %v4618_v30 = vld [vmem:[%s7278_s6 + $0x10] sm:$0xff] }
 0x11a   :  { %5309 = vmatmul.mubr.msk.f32.gmra.mrb[4].mxu0 %vm27_vm0, %v6334_v34  ;;  %v4619_v34 = vld [vmem:[%s7278_s6 + $0x18] sm:$0xff] }
 0x11b   :  { %5311 = vmatprep.mubr.msk.f32.mxu0 %vm27_vm0, %v6560_v3 }
 0x11e   :  { %5312 = vmatmul.mubr.msk.f32.gmra.mrb[6].mxu0 %vm27_vm0, %v1769_v11 }
 0x11f   :  { %5314 = vmatprep.mubr.msk.f32.mxu0 %vm27_vm0, %v6343_v38  ;;  %v5642_v38 = vpack.c.bf16 %v4619_v34, %v4618_v30 }
 0x121   :  { %5643 = vmatprep.subr.bf16.mxu1 %v5642_v38 }
 0x122   :  { %5315 = vmatmul.mubr.msk.f32.gmra.mrb[8].mxu0 %vm27_vm0, %v6349_v39  ;;  %5645 = vmatpush3.bf16.msra.mxu1 %v5642_v38  ;;  %v2388_v39 = vld [vmem:[#allocation3 + $0x1] sm:$0xff] }
 0x123   :  { %5317 = vmatprep.mubr.msk.f32.mxu0 %vm27_vm0, %v6351_v40  ;;  %5358 = vmatprep.mubr.msk.f32.mxu1 %vm27_vm0, %v2388_v39  ;;  %v2386_v40 = vld [vmem:[%s7278_s6] sm:$0xff] }
 0x126   :  { %5318 = vmatmul.mubr.msk.f32.gmra.mrb[10].mxu0 %vm27_vm0, %v6357_v41  ;;  %v2387_v41 = vld [vmem:[%s7278_s6 + $0x8] sm:$0xff] }
 0x127   :  { %5320 = vmatprep.mubr.msk.f32.mxu0 %vm27_vm0, %v6359_v42  ;;  %v6725_v42 = vpack.c.bf16 %v2387_v41, %v2386_v40 }
 0x129   :  { %5647 = vmatprep.subr.bf16.mxu1 %v6725_v42 }
 0x12a   :  { %5321 = vmatmul.mubr.msk.f32.gmra.mrb[12].mxu0 %vm27_vm0, %v6365_v43  ;;  %v6731_v43 = vld [vmem:[%s7276_s4] ss:$0 sm:$0xff]  ;;  %s5963_s4 = smov [#allocation4]  }
 0x12b   :  { %5323 = vmatprep.mubr.msk.f32.mxu0 %vm27_vm0, %v6578_v33  ;;  %s4443_s5 = sshll.u32 %s5963_s4, 4  ;;  %s4444_s5 = int_to_ptr.vmem [resolvable:$true] %s4443_s5 }
 0x12c   :  { %s5938_s11 = scalar_lea.vmem %s4444_s5, 2048  ;;  %p5943_p1 = scmp.lt.s32.totalorder %s4444_s5, %s4444_s5 }
 0x12d   :  { %p5939_p0 = scmp.ne.s32.totalorder %s4444_s5, %s5938_s11  ;;  %p5944_p2 = scmp.lt.s32.totalorder %s5938_s11, %s5938_s11 }
 0x12e   :  { %5324 = vmatmul.mubr.msk.f32.gmra.mrb[14].mxu0 %vm27_vm0, %v1777_v17 }
 0x12f   :  { %5330 = vmatprep.mubr.msk.f32.mxu0 %vm27_vm0, %v6443_v4  ;;  %p5945_p3 = por %p5944_p2, %p5943_p1 }
 0x131   :  { %p5946_p4 = pnand %p5945_p3, %p5939_p0 }
 0x132   :  { %5331 = vmatmul.mubr.msk.f32.vlgmr.msra.gmra.mrb[0].mxu0 %vm27_vm0, %v6449_v6 }
 0x133   :  { %5333 = vmatprep.mubr.msk.f32.mxu0 %vm27_vm0, %v6451_v9 }
 0x136   :  { %5334 = vmatmul.mubr.msk.f32.gmra.mrb[2].mxu0 %vm27_vm0, %v6457_v12 }
 0x137   :  { %5336 = vmatprep.mubr.msk.f32.mxu0 %vm27_vm0, %v6459_v13 }
 0x13a   :  { %5337 = vmatmul.mubr.msk.f32.gmra.mrb[4].mxu0 %vm27_vm0, %v6465_v14 }
 0x13b   :  { %5339 = vmatprep.mubr.msk.f32.mxu0 %vm27_vm0, %v1312_v37 }
 0x13e   :  { %5340 = vmatmul.mubr.msk.f32.gmra.mrb[6].mxu0 %vm27_vm0, %v1997_v19 }
 0x13f   :  { %5342 = vmatprep.mubr.msk.f32.mxu0 %vm27_vm0, %v6472_v18 }
 0x142   :  { %5343 = vmatmul.mubr.msk.f32.gmra.mrb[8].mxu0 %vm27_vm0, %v6478_v20 }
 0x143   :  { %5345 = vmatprep.mubr.msk.f32.mxu0 %vm27_vm0, %v6480_v21  ;;  %v4652_v21 = vld [vmem:[%s7278_s6 + $0x20] sm:$0xff] }
 0x146   :  { %5346 = vmatmul.mubr.msk.f32.gmra.mrb[10].mxu0 %vm27_vm0, %v6486_v22  ;;  %v4653_v22 = vld [vmem:[%s7278_s6 + $0x28] sm:$0xff] }
 0x147   :  { %5348 = vmatprep.mubr.msk.f32.mxu0 %vm27_vm0, %v6488_v8  ;;  %v6763_v29 = vpack.c.bf16 %v4653_v22, %v4652_v21 }
 0x14a   :  { %5349 = vmatmul.mubr.msk.f32.gmra.mrb[12].mxu0 %vm27_vm0, %v6494_v23 }
 0x14b   :  { %5351 = vmatprep.mubr.msk.f32.mxu0 %vm27_vm0, %v1320_v44 }
 0x14e   :  { %5352 = vmatmul.mubr.msk.f32.gmra.mrb[14].mxu0 %vm27_vm0, %v2005_v28 }
 0x205   :  { %v5332_v50 = vpop.f32.mrb[0].mxu0 }
 0x206   :  { %v2226_v52 = vmul.f32 %v5332_v50, %v6731_v43  ;;  %v2123_v53 = vpop.f32.mrb[1].mxu0 }
 0x207   :  { %v2225_v54 = vmul.f32 %v6731_v43, %v2123_v53 }
 0x208   :  { %v2249_v55 = vadd.f32 %v6736_v51, %v2226_v52 }
 0x209   :  { %v2248_v56 = vadd.f32 %v6736_v51, %v2225_v54  ;;  %v5335_v57 = vpop.f32.mrb[2].mxu0 }
 0x20a   :  { %vm2265_vm4 = vcmp.ge.f32.partialorder %v2249_v55, 0.0  ;;  %v2281_v58 = vmul.f32 0.1, %v2249_v55  ;;  %v2228_v59 = vmul.f32 %v5335_v57, %v6731_v43  ;;  %v2133_v60 = vpop.f32.mrb[3].mxu0 }
 0x20b   :  { %vm2264_vm5 = vcmp.ge.f32.partialorder %v2248_v56, 0.0  ;;  %v2280_v61 = vmul.f32 0.1, %v2248_v56  ;;  %v2227_v62 = vmul.f32 %v6731_v43, %v2133_v60 }
 0x20c   :  { %v2297_v63 = vsel %vm2265_vm4, %v2249_v55, %v2281_v58  ;;  %v2251_v0 = vadd.f32 %v6736_v51, %v2228_v59 }
 0x20d   :  { %2355 = vst.msk [vmem:[#allocation3 + $0x21] sm:$0xff] %vm27_vm0, %v2297_v63  ;;  %v2296_v1 = vsel %vm2264_vm5, %v2248_v56, %v2280_v61  ;;  %v2250_v2 = vadd.f32 %v6736_v51, %v2227_v62  ;;  %v5338_v4 = vpop.f32.mrb[4].mxu0  ;;  %v2396_v62 = vld [vmem:[#allocation3 + $0xa1] sm:$0xff] }
 0x20e   :  { %2354 = vst.msk [vmem:[#allocation3 + $0x11] sm:$0xff] %vm27_vm0, %v2296_v1  ;;  %vm2267_vm6 = vcmp.ge.f32.partialorder %v2251_v0, 0.0  ;;  %v2283_v5 = vmul.f32 0.1, %v2251_v0  ;;  %v2230_v6 = vmul.f32 %v5338_v4, %v6731_v43  ;;  %v2143_v9 = vpop.f32.mrb[5].mxu0 }
 0x20f   :  { %vm2266_vm7 = vcmp.ge.f32.partialorder %v2250_v2, 0.0  ;;  %v2282_v12 = vmul.f32 0.1, %v2250_v2  ;;  %v2229_v13 = vmul.f32 %v6731_v43, %v2143_v9 }
 0x210   :  { %v2299_v14 = vsel %vm2267_vm6, %v2251_v0, %v2283_v5  ;;  %v2253_v15 = vadd.f32 %v6736_v51, %v2230_v6 }
 0x211   :  { %2357 = vst.msk [vmem:[#allocation3 + $0x41] sm:$0xff] %vm27_vm0, %v2299_v14  ;;  %v2298_v16 = vsel %vm2266_vm7, %v2250_v2, %v2282_v12  ;;  %v2252_v18 = vadd.f32 %v6736_v51, %v2229_v13  ;;  %v5341_v20 = vpop.f32.mrb[6].mxu0 }
 0x212   :  { %2356 = vst.msk [vmem:[#allocation3 + $0x31] sm:$0xff] %vm27_vm0, %v2298_v16  ;;  %vm2269_vm8 = vcmp.ge.f32.partialorder %v2253_v15, 0.0  ;;  %v2285_v8 = vmul.f32 0.1, %v2253_v15  ;;  %v2232_v23 = vmul.f32 %v5341_v20, %v6731_v43  ;;  %v2153_v24 = vpop.f32.mrb[7].mxu0 }
 0x213   :  { %vm2268_vm9 = vcmp.ge.f32.partialorder %v2252_v18, 0.0  ;;  %v2284_v25 = vmul.f32 0.1, %v2252_v18  ;;  %v2231_v26 = vmul.f32 %v6731_v43, %v2153_v24 }
 0x214   :  { %v2301_v27 = vsel %vm2269_vm8, %v2253_v15, %v2285_v8  ;;  %v2255_v7 = vadd.f32 %v6736_v51, %v2232_v23  ;;  %v6773_v37 = vld [vmem:[#allocation3 + $0x21] sm:$0xff] }
 0x215   :  { %2359 = vst.msk [vmem:[#allocation3 + $0x61] sm:$0xff] %vm27_vm0, %v2301_v27  ;;  %v2300_v31 = vsel %vm2268_vm9, %v2252_v18, %v2284_v25  ;;  %v2254_v32 = vadd.f32 %v6736_v51, %v2231_v26  ;;  %v5344_v3 = vpop.f32.mrb[8].mxu0  ;;  %v6767_v33 = vld [vmem:[#allocation3 + $0x11] sm:$0xff]  ;;  %v2370_v26 = vld [vmem:[#allocation3] sm:$0xff] }
 0x216   :  { %2358 = vst.msk [vmem:[#allocation3 + $0x51] sm:$0xff] %vm27_vm0, %v2300_v31  ;;  %vm2271_vm10 = vcmp.ge.f32.partialorder %v2255_v7, 0.0  ;;  %v2287_v35 = vmul.f32 0.1, %v2255_v7  ;;  %v2234_v36 = vmul.f32 %v5344_v3, %v6731_v43  ;;  %v2163_v10 = vpop.f32.mrb[9].mxu0  ;;  %5359 = vmatmul.mubr.msk.f32.vlgmr.msra.gmra.mrb[0].mxu1 %vm27_vm0, %v6767_v33  ;;  %v4671_v31 = vld [vmem:[%s7278_s6 + $0x38] sm:$0xff] }
 0x217   :  { %vm2270_vm11 = vcmp.ge.f32.partialorder %v2254_v32, 0.0  ;;  %v2286_v44 = vmul.f32 0.1, %v2254_v32  ;;  %v2233_v45 = vmul.f32 %v6731_v43, %v2163_v10  ;;  %5649 = vmatpush3.bf16.msra.mxu1 %v6725_v42  ;;  %5361 = vmatprep.mubr.msk.f32.mxu1 %vm27_vm0, %v6773_v37  ;;  %v6860_v3 = vld [vmem:[#allocation3 + $0x10] sm:$0xff] }
 0x218   :  { %v2303_v46 = vsel %vm2271_vm10, %v2255_v7, %v2287_v35  ;;  %v2257_v47 = vadd.f32 %v6736_v51, %v2234_v36  ;;  %5651 = vmatprep.subr.bf16.mxu1 %v6763_v29  ;;  %v6789_v34 = vld [vmem:[#allocation3 + $0x41] sm:$0xff]  ;;  %v4670_v7 = vld [vmem:[%s7278_s6 + $0x30] sm:$0xff] }
 0x219   :  { %2361 = vst.msk [vmem:[#allocation3 + $0x81] sm:$0xff] %vm27_vm0, %v2303_v46  ;;  %v2302_v48 = vsel %vm2270_vm11, %v2254_v32, %v2286_v44  ;;  %v2256_v49 = vadd.f32 %v6736_v51, %v2233_v45  ;;  %v5347_v11 = vpop.f32.mrb[10].mxu0  ;;  %v6783_v17 = vld [vmem:[#allocation3 + $0x31] sm:$0xff]  ;;  %v5654_v32 = vpack.c.bf16 %v4671_v31, %v4670_v7  ;;  %v6864_v35 = vld [vmem:[#allocation3 + $0x20] sm:$0xff]  ;;  %v4761_v31 = vld [vmem:[%s7278_s6 + $0x88] sm:$0xff] }
 0x21a   :  { %2360 = vst.msk [vmem:[#allocation3 + $0x71] sm:$0xff] %vm27_vm0, %v2302_v48  ;;  %vm2273_vm12 = vcmp.ge.f32.partialorder %v2257_v47, 0.0  ;;  %v2289_v19 = vmul.f32 0.1, %v2257_v47  ;;  %v2236_v28 = vmul.f32 %v5347_v11, %v6731_v43  ;;  %v2173_v30 = vpop.f32.mrb[11].mxu0  ;;  %5362 = vmatmul.mubr.msk.f32.gmra.mrb[2].mxu1 %vm27_vm0, %v6783_v17  ;;  %v6869_v36 = vld [vmem:[#allocation3 + $0x30] sm:$0xff] }
 0x21b   :  { %vm2272_vm13 = vcmp.ge.f32.partialorder %v2256_v49, 0.0  ;;  %v2288_v38 = vmul.f32 0.1, %v2256_v49  ;;  %v2235_v39 = vmul.f32 %v6731_v43, %v2173_v30  ;;  %5364 = vmatprep.mubr.msk.f32.mxu1 %vm27_vm0, %v6789_v34  ;;  %v6873_v10 = vld [vmem:[#allocation3 + $0x40] sm:$0xff] }
 0x21c   :  { %v2305_v40 = vsel %vm2273_vm12, %v2257_v47, %v2289_v19  ;;  %v2259_v41 = vadd.f32 %v6736_v51, %v2236_v28  ;;  %v6803_v57 = vld [vmem:[#allocation3 + $0x61] sm:$0xff] }
 0x21d   :  { %2363 = vst.msk [vmem:[#allocation3 + $0xc1] sm:$0xff] %vm27_vm0, %v2305_v40  ;;  %v2304_v42 = vsel %vm2272_vm13, %v2256_v49, %v2288_v38  ;;  %v2258_v50 = vadd.f32 %v6736_v51, %v2235_v39  ;;  %v5350_v52 = vpop.f32.mrb[12].mxu0  ;;  %v6797_v53 = vld [vmem:[#allocation3 + $0x51] sm:$0xff]  ;;  %v2378_v45 = vld [vmem:[#allocation3 + $0xa0] sm:$0xff]  ;;  %v4689_v40 = vld [vmem:[%s7278_s6 + $0x48] sm:$0xff] }
 0x21e   :  { %2362 = vst.msk [vmem:[#allocation3 + $0xb1] sm:$0xff] %vm27_vm0, %v2304_v42  ;;  %vm2275_vm14 = vcmp.ge.f32.partialorder %v2259_v41, 0.0  ;;  %v2291_v54 = vmul.f32 0.1, %v2259_v41  ;;  %v2238_v55 = vmul.f32 %v5350_v52, %v6731_v43  ;;  %v2183_v56 = vpop.f32.mrb[13].mxu0  ;;  %5365 = vmatmul.mubr.msk.f32.gmra.mrb[4].mxu1 %vm27_vm0, %v6797_v53  ;;  %v6877_v44 = vld [vmem:[#allocation3 + $0x50] sm:$0xff] }
 0x21f   :  { %vm2274_vm15 = vcmp.ge.f32.partialorder %v2258_v50, 0.0  ;;  %v2290_v58 = vmul.f32 0.1, %v2258_v50  ;;  %v2237_v59 = vmul.f32 %v6731_v43, %v2183_v56  ;;  %5367 = vmatprep.mubr.msk.f32.mxu1 %vm27_vm0, %v6803_v57  ;;  %v2793_v30 = vld [vmem:[#allocation3 + $0x2] sm:$0xff]  ;;  %v6925_v42 = vld [vmem:[#allocation3 + $0x12] sm:$0xff] }
 0x220   :  { %v2307_v60 = vsel %vm2275_vm14, %v2259_v41, %v2291_v54  ;;  %v2261_v61 = vadd.f32 %v6736_v51, %v2238_v55  ;;  %v4688_v39 = vld [vmem:[%s7278_s6 + $0x40] sm:$0xff]  ;;  %v6933_v52 = vld [vmem:[#allocation3 + $0x32] sm:$0xff] }
 0x221   :  { %2365 = vst.msk [vmem:[#allocation3 + $0xe1] sm:$0xff] %vm27_vm0, %v2307_v60  ;;  %v2306_v63 = vsel %vm2274_vm15, %v2258_v50, %v2290_v58  ;;  %v2260_v0 = vadd.f32 %v6736_v51, %v2237_v59  ;;  %v5353_v1 = vpop.f32.mrb[14].mxu0  ;;  %v6811_v2 = vld [vmem:[#allocation3 + $0x71] sm:$0xff]  ;;  %v5658_v41 = vpack.c.bf16 %v4689_v40, %v4688_v39  ;;  %v6929_v50 = vld [vmem:[#allocation3 + $0x22] sm:$0xff] }
 0x222   :  { %2364 = vst.msk [vmem:[#allocation3 + $0xd1] sm:$0xff] %vm27_vm0, %v2306_v63  ;;  %vm2277_vm1 = vcmp.ge.f32.partialorder %v2261_v61, 0.0  ;;  %v2293_v4 = vmul.f32 0.1, %v2261_v61  ;;  %v2240_v5 = vmul.f32 %v5353_v1, %v6731_v43  ;;  %v2193_v6 = vpop.f32.mrb[15].mxu0  ;;  %5368 = vmatmul.mubr.msk.f32.gmra.mrb[6].mxu1 %vm27_vm0, %v6811_v2  ;;  %v6885_v46 = vld [vmem:[#allocation3 + $0x70] sm:$0xff] }
 0x223   :  { %vm2276_vm2 = vcmp.ge.f32.partialorder %v2260_v0, 0.0  ;;  %v2292_v9 = vmul.f32 0.1, %v2260_v0  ;;  %v2239_v12 = vmul.f32 %v6731_v43, %v2193_v6  ;;  %5370 = vmatprep.mubr.msk.f32.mxu1 %vm27_vm0, %v2396_v62  ;;  %v6937_v54 = vld [vmem:[#allocation3 + $0x42] sm:$0xff]  ;;  %v6941_v55 = vld [vmem:[#allocation3 + $0x52] sm:$0xff] }
 0x224   :  { %v2309_v13 = vsel %vm2277_vm1, %v2261_v61, %v2293_v4  ;;  %v2263_v14 = vadd.f32 %v6736_v51, %v2240_v5  ;;  %v6827_v43 = vld [vmem:[#allocation3 + $0xc1] sm:$0xff]  ;;  %v6949_v59 = vld [vmem:[#allocation3 + $0x72] sm:$0xff] }
 0x225   :  { %2367 = vst.msk [vmem:[#allocation3 + $0x101] sm:$0xff] %vm27_vm0, %v2309_v13  ;;  %v2308_v15 = vsel %vm2276_vm2, %v2260_v0, %v2292_v9  ;;  %v2262_v16 = vadd.f32 %v6736_v51, %v2239_v12  ;;  %v6822_v18 = vld [vmem:[#allocation3 + $0xb1] sm:$0xff]  ;;  %v6894_v48 = vld [vmem:[#allocation3 + $0xc0] sm:$0xff] }
 0x226   :  { %2366 = vst.msk [vmem:[#allocation3 + $0xf1] sm:$0xff] %vm27_vm0, %v2308_v15  ;;  %vm2279_vm3 = vcmp.ge.f32.partialorder %v2263_v14, 0.0  ;;  %v2295_v20 = vmul.f32 0.1, %v2263_v14  ;;  %5371 = vmatmul.mubr.msk.f32.gmra.mrb[8].mxu1 %vm27_vm0, %v6822_v18  ;;  %v6890_v47 = vld [vmem:[#allocation3 + $0xb0] sm:$0xff]  ;;  %v6945_v56 = vld [vmem:[#allocation3 + $0x62] sm:$0xff] }
 0x227   :  { %vm2278_vm4 = vcmp.ge.f32.partialorder %v2262_v16, 0.0  ;;  %v2294_v21 = vmul.f32 0.1, %v2262_v16  ;;  %5373 = vmatprep.mubr.msk.f32.mxu1 %vm27_vm0, %v6827_v43  ;;  %v2801_v58 = vld [vmem:[#allocation3 + $0xa2] sm:$0xff]  ;;  %v6954_v60 = vld [vmem:[#allocation3 + $0xb2] sm:$0xff] }
 0x228   :  { %v2311_v22 = vsel %vm2279_vm3, %v2263_v14, %v2295_v20  ;;  %v6837_v23 = vld [vmem:[#allocation3 + $0xe1] sm:$0xff]  ;;  %v4706_v5 = vld [vmem:[%s7278_s6 + $0x50] sm:$0xff]  ;;  %v4707_v6 = vld [vmem:[%s7278_s6 + $0x58] sm:$0xff] }
 0x229   :  { %2369 = vst.msk [vmem:[#allocation3 + $0x121] sm:$0xff] %vm27_vm0, %v2311_v22  ;;  %v2310_v51 = vsel %vm2278_vm4, %v2262_v16, %v2294_v21  ;;  %v6832_v8 = vld [vmem:[#allocation3 + $0xd1] sm:$0xff]  ;;  %v6902_v11 = vld [vmem:[#allocation3 + $0xe0] sm:$0xff]  ;;  %v5662_v9 = vpack.c.bf16 %v4707_v6, %v4706_v5  ;;  %v4725_v15 = vld [vmem:[%s7278_s6 + $0x68] sm:$0xff] }
 0x22a   :  { %2368 = vst.msk [vmem:[#allocation3 + $0x111] sm:$0xff] %vm27_vm0, %v2310_v51  ;;  %5374 = vmatmul.mubr.msk.f32.gmra.mrb[10].mxu1 %vm27_vm0, %v6832_v8  ;;  %v6898_v49 = vld [vmem:[#allocation3 + $0xd0] sm:$0xff]  ;;  %v6958_v61 = vld [vmem:[#allocation3 + $0xc2] sm:$0xff]  ;;  %v4743_v21 = vld [vmem:[%s7278_s6 + $0x78] sm:$0xff] }
 0x22b   :  { %5376 = vmatprep.mubr.msk.f32.mxu1 %vm27_vm0, %v6837_v23  ;;  %v6962_v62 = vld [vmem:[#allocation3 + $0xd2] sm:$0xff]  ;;  %v6966_v63 = vld [vmem:[#allocation3 + $0xe2] sm:$0xff] }
 0x22c   :  { %v6845_v25 = vld [vmem:[#allocation3 + $0x101] sm:$0xff] }
 0x22d   :  { %v6841_v24 = vld [vmem:[#allocation3 + $0xf1] sm:$0xff]  ;;  %v6910_v28 = vld [vmem:[#allocation3 + $0x100] sm:$0xff] }
 0x22e   :  { %5377 = vmatmul.mubr.msk.f32.gmra.mrb[12].mxu1 %vm27_vm0, %v6841_v24  ;;  %v6906_v19 = vld [vmem:[#allocation3 + $0xf0] sm:$0xff]  ;;  %v6974_v1 = vld [vmem:[#allocation3 + $0x102] sm:$0xff] }
 0x22f   :  { %5379 = vmatprep.mubr.msk.f32.mxu1 %vm27_vm0, %v6845_v25  ;;  %v6970_v0 = vld [vmem:[#allocation3 + $0xf2] sm:$0xff]  ;;  %v7002_v12 = vld [vmem:[#allocation3 + $0x80] sm:$0xff] }
 0x230   :  { %v7020_v13 = vld [vmem:[#allocation3 + $0x120] sm:$0xff] }
 0x231   :  { %v6849_v27 = vld [vmem:[#allocation3 + $0x111] sm:$0xff]  ;;  %v4724_v14 = vld [vmem:[%s7278_s6 + $0x60] sm:$0xff] }
 0x232   :  { %5380 = vmatmul.mubr.msk.f32.gmra.mrb[14].mxu1 %vm27_vm0, %v6849_v27  ;;  %v6914_v38 = vld [vmem:[#allocation3 + $0x110] sm:$0xff]  ;;  %v5666_v16 = vpack.c.bf16 %v4725_v15, %v4724_v14  ;;  %v7062_v20 = vld [vmem:[#allocation3 + $0x121] sm:$0xff] }
 0x233   :  { %5386 = vmatprep.mubr.msk.f32.mxu1 %vm27_vm0, %v2370_v26  ;;  %v6978_v4 = vld [vmem:[#allocation3 + $0x112] sm:$0xff]  ;;  %v3484_v51 = vld [vmem:[#allocation3 + $0x82] sm:$0xff] }
 0x234   :  { %v3492_v26 = vld [vmem:[#allocation3 + $0x122] sm:$0xff] }
 0x235   :  { %v4760_v7 = vld [vmem:[%s7278_s6 + $0x80] sm:$0xff] }
 0x236   :  { %5387 = vmatmul.mubr.msk.f32.vlgmr.msra.gmra.mrb[0].mxu1 %vm27_vm0, %v6860_v3 }
 0x237   :  { %5653 = vmatpush3.bf16.msra.mxu1 %v6763_v29  ;;  %5389 = vmatprep.mubr.msk.f32.mxu1 %vm27_vm0, %v6864_v35  ;;  %v6881_v29 = vld [vmem:[#allocation3 + $0x60] sm:$0xff] }
 0x238   :  { %5655 = vmatprep.subr.bf16.mxu1 %v5654_v32 }
 0x23a   :  { %5390 = vmatmul.mubr.msk.f32.gmra.mrb[2].mxu1 %vm27_vm0, %v6869_v36 }
 0x23b   :  { %5392 = vmatprep.mubr.msk.f32.mxu1 %vm27_vm0, %v6873_v10 }
 0x23e   :  { %5393 = vmatmul.mubr.msk.f32.gmra.mrb[4].mxu1 %vm27_vm0, %v6877_v44 }
 0x23f   :  { %5395 = vmatprep.mubr.msk.f32.mxu1 %vm27_vm0, %v6881_v29 }
 0x242   :  { %5396 = vmatmul.mubr.msk.f32.gmra.mrb[6].mxu1 %vm27_vm0, %v6885_v46 }
 0x243   :  { %5398 = vmatprep.mubr.msk.f32.mxu1 %vm27_vm0, %v2378_v45  ;;  %v4395_v45 = vld [vmem:[%s7272_s0 + $0x28] sm:$0xff] }
 0x246   :  { %5399 = vmatmul.mubr.msk.f32.gmra.mrb[8].mxu1 %vm27_vm0, %v6890_v47 }
 0x247   :  { %5401 = vmatprep.mubr.msk.f32.mxu1 %vm27_vm0, %v6894_v48 }
 0x24a   :  { %5402 = vmatmul.mubr.msk.f32.gmra.mrb[10].mxu1 %vm27_vm0, %v6898_v49 }
 0x24b   :  { %5404 = vmatprep.mubr.msk.f32.mxu1 %vm27_vm0, %v6902_v11 }
 0x24e   :  { %5405 = vmatmul.mubr.msk.f32.gmra.mrb[12].mxu1 %vm27_vm0, %v6906_v19 }
 0x24f   :  { %5407 = vmatprep.mubr.msk.f32.mxu1 %vm27_vm0, %v6910_v28 }
 0x252   :  { %5408 = vmatmul.mubr.msk.f32.gmra.mrb[14].mxu1 %vm27_vm0, %v6914_v38 }
 0x253   :  { %5414 = vmatprep.mubr.msk.f32.mxu1 %vm27_vm0, %v2793_v30 }
 0x256   :  { %5415 = vmatmul.mubr.msk.f32.vlgmr.msra.gmra.mrb[0].mxu1 %vm27_vm0, %v6925_v42 }
 0x257   :  { %5657 = vmatpush3.bf16.msra.mxu1 %v5654_v32  ;;  %5417 = vmatprep.mubr.msk.f32.mxu1 %vm27_vm0, %v6929_v50  ;;  %v5674_v32 = vpack.c.bf16 %v4761_v31, %v4760_v7 }
 0x258   :  { %5659 = vmatprep.subr.bf16.mxu1 %v5658_v41 }
 0x25a   :  { %5418 = vmatmul.mubr.msk.f32.gmra.mrb[2].mxu1 %vm27_vm0, %v6933_v52 }
 0x25b   :  { %5420 = vmatprep.mubr.msk.f32.mxu1 %vm27_vm0, %v6937_v54 }
 0x25e   :  { %5421 = vmatmul.mubr.msk.f32.gmra.mrb[4].mxu1 %vm27_vm0, %v6941_v55 }
 0x25f   :  { %5423 = vmatprep.mubr.msk.f32.mxu1 %vm27_vm0, %v6945_v56 }
 0x262   :  { %5424 = vmatmul.mubr.msk.f32.gmra.mrb[6].mxu1 %vm27_vm0, %v6949_v59 }
 0x263   :  { %5426 = vmatprep.mubr.msk.f32.mxu1 %vm27_vm0, %v2801_v58  ;;  %v4400_v58 = vld [vmem:[%s7272_s0 + $0x50] sm:$0xff] }
 0x266   :  { %5427 = vmatmul.mubr.msk.f32.gmra.mrb[8].mxu1 %vm27_vm0, %v6954_v60 }
 0x267   :  { %5429 = vmatprep.mubr.msk.f32.mxu1 %vm27_vm0, %v6958_v61 }
 0x26a   :  { %5430 = vmatmul.mubr.msk.f32.gmra.mrb[10].mxu1 %vm27_vm0, %v6962_v62 }
 0x26b   :  { %5432 = vmatprep.mubr.msk.f32.mxu1 %vm27_vm0, %v6966_v63 }
 0x26e   :  { %5433 = vmatmul.mubr.msk.f32.gmra.mrb[12].mxu1 %vm27_vm0, %v6970_v0 }
 0x26f   :  { %5435 = vmatprep.mubr.msk.f32.mxu1 %vm27_vm0, %v6974_v1 }
 0x272   :  { %5436 = vmatmul.mubr.msk.f32.gmra.mrb[14].mxu1 %vm27_vm0, %v6978_v4 }
 0x273   :  { %5442 = vmatprep.mubr.msk.f32.mxu1 %vm27_vm0, %v6860_v3  ;;  %v3713_v3 = vld [vmem:[#allocation3 + $0x90] sm:$0xff] }
 0x276   :  { %5443 = vmatmul.mubr.msk.f32.vlgmr.msra.gmra.mrb[0].mxu1 %vm27_vm0, %v6864_v35 }
 0x277   :  { %5661 = vmatpush3.bf16.msra.mxu1 %v5658_v41  ;;  %5445 = vmatprep.mubr.msk.f32.mxu1 %vm27_vm0, %v6869_v36  ;;  %v4399_v41 = vld [vmem:[%s7272_s0 + $0x48] sm:$0xff] }
 0x278   :  { %5663 = vmatprep.subr.bf16.mxu1 %v5662_v9 }
 0x27a   :  { %5446 = vmatmul.mubr.msk.f32.gmra.mrb[2].mxu1 %vm27_vm0, %v6873_v10 }
 0x27b   :  { %5448 = vmatprep.mubr.msk.f32.mxu1 %vm27_vm0, %v6877_v44 }
 0x27e   :  { %5449 = vmatmul.mubr.msk.f32.gmra.mrb[4].mxu1 %vm27_vm0, %v6881_v29 }
 0x27f   :  { %5451 = vmatprep.mubr.msk.f32.mxu1 %vm27_vm0, %v6885_v46 }
 0x282   :  { %5452 = vmatmul.mubr.msk.f32.gmra.mrb[6].mxu1 %vm27_vm0, %v7002_v12 }
 0x283   :  { %5454 = vmatprep.mubr.msk.f32.mxu1 %vm27_vm0, %v6890_v47 }
 0x286   :  { %5455 = vmatmul.mubr.msk.f32.gmra.mrb[8].mxu1 %vm27_vm0, %v6894_v48 }
 0x287   :  { %5457 = vmatprep.mubr.msk.f32.mxu1 %vm27_vm0, %v6898_v49 }
 0x28a   :  { %5458 = vmatmul.mubr.msk.f32.gmra.mrb[10].mxu1 %vm27_vm0, %v6902_v11 }
 0x28b   :  { %5460 = vmatprep.mubr.msk.f32.mxu1 %vm27_vm0, %v6906_v19 }
 0x28e   :  { %5461 = vmatmul.mubr.msk.f32.gmra.mrb[12].mxu1 %vm27_vm0, %v6910_v28 }
 0x28f   :  { %5463 = vmatprep.mubr.msk.f32.mxu1 %vm27_vm0, %v6914_v38 }
 0x292   :  { %5464 = vmatmul.mubr.msk.f32.gmra.mrb[14].mxu1 %vm27_vm0, %v7020_v13 }
 0x293   :  { %5470 = vmatprep.mubr.msk.f32.mxu1 %vm27_vm0, %v6767_v33  ;;  %v7044_v33 = vld [vmem:[#allocation3 + $0x81] sm:$0xff] }
 0x296   :  { %5471 = vmatmul.mubr.msk.f32.vlgmr.msra.gmra.mrb[0].mxu1 %vm27_vm0, %v6773_v37 }
 0x297   :  { %5665 = vmatpush3.bf16.msra.mxu1 %v5662_v9  ;;  %5473 = vmatprep.mubr.msk.f32.mxu1 %vm27_vm0, %v6783_v17  ;;  %v4405_v9 = vld [vmem:[%s7272_s0 + $0x78] sm:$0xff] }
 0x298   :  { %5667 = vmatprep.subr.bf16.mxu1 %v5666_v16 }
 0x29a   :  { %5474 = vmatmul.mubr.msk.f32.gmra.mrb[2].mxu1 %vm27_vm0, %v6789_v34 }
 0x29b   :  { %5476 = vmatprep.mubr.msk.f32.mxu1 %vm27_vm0, %v6797_v53 }
 0x29e   :  { %5477 = vmatmul.mubr.msk.f32.gmra.mrb[4].mxu1 %vm27_vm0, %v6803_v57 }
 0x29f   :  { %5479 = vmatprep.mubr.msk.f32.mxu1 %vm27_vm0, %v6811_v2 }
 0x2a2   :  { %5480 = vmatmul.mubr.msk.f32.gmra.mrb[6].mxu1 %vm27_vm0, %v7044_v33 }
 0x2a3   :  { %5482 = vmatprep.mubr.msk.f32.mxu1 %vm27_vm0, %v6822_v18  ;;  %v4742_v18 = vld [vmem:[%s7278_s6 + $0x70] sm:$0xff] }
 0x2a4   :  { %v5670_v22 = vpack.c.bf16 %v4743_v21, %v4742_v18 }
 0x2a6   :  { %5483 = vmatmul.mubr.msk.f32.gmra.mrb[8].mxu1 %vm27_vm0, %v6827_v43 }
 0x2a7   :  { %5485 = vmatprep.mubr.msk.f32.mxu1 %vm27_vm0, %v6832_v8 }
 0x2aa   :  { %5486 = vmatmul.mubr.msk.f32.gmra.mrb[10].mxu1 %vm27_vm0, %v6837_v23 }
 0x2ab   :  { %5488 = vmatprep.mubr.msk.f32.mxu1 %vm27_vm0, %v6841_v24 }
 0x2ae   :  { %5489 = vmatmul.mubr.msk.f32.gmra.mrb[12].mxu1 %vm27_vm0, %v6845_v25 }
 0x2af   :  { %5491 = vmatprep.mubr.msk.f32.mxu1 %vm27_vm0, %v6849_v27 }
 0x2b2   :  { %5492 = vmatmul.mubr.msk.f32.gmra.mrb[14].mxu1 %vm27_vm0, %v7062_v20 }
 0x2b3   :  { %5498 = vmatprep.mubr.msk.f32.mxu1 %vm27_vm0, %v6925_v42  ;;  %v4398_v42 = vld [vmem:[%s7272_s0 + $0x40] sm:$0xff] }
 0x2b6   :  { %5499 = vmatmul.mubr.msk.f32.vlgmr.msra.gmra.mrb[0].mxu1 %vm27_vm0, %v6929_v50 }
 0x2b7   :  { %5669 = vmatpush3.bf16.msra.mxu1 %v5666_v16  ;;  %5501 = vmatprep.mubr.msk.f32.mxu1 %vm27_vm0, %v6933_v52 }
 0x2b8   :  { %5671 = vmatprep.subr.bf16.mxu1 %v5670_v22 }
 0x2ba   :  { %5502 = vmatmul.mubr.msk.f32.gmra.mrb[2].mxu1 %vm27_vm0, %v6937_v54 }
 0x2bb   :  { %5504 = vmatprep.mubr.msk.f32.mxu1 %vm27_vm0, %v6941_v55 }
 0x2be   :  { %5505 = vmatmul.mubr.msk.f32.gmra.mrb[4].mxu1 %vm27_vm0, %v6945_v56 }
 0x2bf   :  { %5507 = vmatprep.mubr.msk.f32.mxu1 %vm27_vm0, %v6949_v59 }
 0x2c2   :  { %5508 = vmatmul.mubr.msk.f32.gmra.mrb[6].mxu1 %vm27_vm0, %v3484_v51 }
 0x2c3   :  { %5510 = vmatprep.mubr.msk.f32.mxu1 %vm27_vm0, %v6954_v60 }
 0x2c6   :  { %5511 = vmatmul.mubr.msk.f32.gmra.mrb[8].mxu1 %vm27_vm0, %v6958_v61 }
 0x2c7   :  { %5513 = vmatprep.mubr.msk.f32.mxu1 %vm27_vm0, %v6962_v62 }
 0x2ca   :  { %5514 = vmatmul.mubr.msk.f32.gmra.mrb[10].mxu1 %vm27_vm0, %v6966_v63 }
 0x2cb   :  { %5516 = vmatprep.mubr.msk.f32.mxu1 %vm27_vm0, %v6970_v0 }
 0x2ce   :  { %5517 = vmatmul.mubr.msk.f32.gmra.mrb[12].mxu1 %vm27_vm0, %v6974_v1 }
 0x2cf   :  { %5519 = vmatprep.mubr.msk.f32.mxu1 %vm27_vm0, %v6978_v4 }
 0x2d2   :  { %5520 = vmatmul.mubr.msk.f32.gmra.mrb[14].mxu1 %vm27_vm0, %v3492_v26 }
 0x2d3   :  { %5526 = vmatprep.mubr.msk.f32.mxu1 %vm27_vm0, %v6864_v35  ;;  %v3721_v35 = vld [vmem:[#allocation3 + $0x130] sm:$0xff] }
 0x2d6   :  { %5527 = vmatmul.mubr.msk.f32.vlgmr.msra.gmra.mrb[0].mxu1 %vm27_vm0, %v6869_v36 }
 0x2d7   :  { %5673 = vmatpush3.bf16.msra.mxu1 %v5670_v22  ;;  %5529 = vmatprep.mubr.msk.f32.mxu1 %vm27_vm0, %v6873_v10 }
 0x2d8   :  { %5675 = vmatprep.subr.bf16.mxu1 %v5674_v32 }
 0x2da   :  { %5530 = vmatmul.mubr.msk.f32.gmra.mrb[2].mxu1 %vm27_vm0, %v6877_v44 }
 0x2db   :  { %5532 = vmatprep.mubr.msk.f32.mxu1 %vm27_vm0, %v6881_v29 }
 0x2de   :  { %5533 = vmatmul.mubr.msk.f32.gmra.mrb[4].mxu1 %vm27_vm0, %v6885_v46  ;;  %v4394_v46 = vld [vmem:[%s7272_s0 + $0x20] sm:$0xff] }
 0x2df   :  { %5535 = vmatprep.mubr.msk.f32.mxu1 %vm27_vm0, %v7002_v12  ;;  %v4404_v12 = vld [vmem:[%s7272_s0 + $0x70] sm:$0xff] }
 0x2e2   :  { %5536 = vmatmul.mubr.msk.f32.gmra.mrb[6].mxu1 %vm27_vm0, %v3713_v3 }
 0x2e3   :  { %5538 = vmatprep.mubr.msk.f32.mxu1 %vm27_vm0, %v6894_v48 }
 0x2e6   :  { %5539 = vmatmul.mubr.msk.f32.gmra.mrb[8].mxu1 %vm27_vm0, %v6898_v49 }
 0x2e7   :  { %5541 = vmatprep.mubr.msk.f32.mxu1 %vm27_vm0, %v6902_v11 }
 0x2ea   :  { %5542 = vmatmul.mubr.msk.f32.gmra.mrb[10].mxu1 %vm27_vm0, %v6906_v19  ;;  %v4397_v19 = vld [vmem:[%s7272_s0 + $0x38] sm:$0xff] }
 0x2eb   :  { %5544 = vmatprep.mubr.msk.f32.mxu1 %vm27_vm0, %v6910_v28  ;;  %v4396_v28 = vld [vmem:[%s7272_s0 + $0x30] sm:$0xff] }
 0x2ee   :  { %5545 = vmatmul.mubr.msk.f32.gmra.mrb[12].mxu1 %vm27_vm0, %v6914_v38 }
 0x2ef   :  { %5547 = vmatprep.mubr.msk.f32.mxu1 %vm27_vm0, %v7020_v13 }
 0x2f2   :  { %5548 = vmatmul.mubr.msk.f32.gmra.mrb[14].mxu1 %vm27_vm0, %v3721_v35 }
 0x2f3   :  { %5554 = vmatprep.mubr.msk.f32.mxu1 %vm27_vm0, %v6773_v37  ;;  %v3941_v37 = vld [vmem:[#allocation3 + $0x91] sm:$0xff] }
 0x2f6   :  { %5555 = vmatmul.mubr.msk.f32.vlgmr.msra.gmra.mrb[0].mxu1 %vm27_vm0, %v6783_v17  ;;  %v3949_v17 = vld [vmem:[#allocation3 + $0x131] sm:$0xff] }
 0x2f7   :  { %5677 = vmatpush3.bf16.msra.mxu1 %v5674_v32  ;;  %5557 = vmatprep.mubr.msk.f32.mxu1 %vm27_vm0, %v6789_v34  ;;  %v4169_v34 = vld [vmem:[#allocation3 + $0x92] sm:$0xff] }
 0x2fa   :  { %5558 = vmatmul.mubr.msk.f32.gmra.mrb[2].mxu1 %vm27_vm0, %v6797_v53  ;;  %v4177_v53 = vld [vmem:[#allocation3 + $0x132] sm:$0xff] }
 0x2fb   :  { %5560 = vmatprep.mubr.msk.f32.mxu1 %vm27_vm0, %v6803_v57  ;;  %v4391_v57 = vld [vmem:[%s7272_s0 + $0x8] sm:$0xff] }
 0x2fe   :  { %5561 = vmatmul.mubr.msk.f32.gmra.mrb[4].mxu1 %vm27_vm0, %v6811_v2  ;;  %v4390_v2 = vld [vmem:[%s7272_s0] sm:$0xff] }
 0x2ff   :  { %5563 = vmatprep.mubr.msk.f32.mxu1 %vm27_vm0, %v7044_v33 }
 0x302   :  { %5564 = vmatmul.mubr.msk.f32.gmra.mrb[6].mxu1 %vm27_vm0, %v3941_v37 }
 0x303   :  { %5566 = vmatprep.mubr.msk.f32.mxu1 %vm27_vm0, %v6827_v43 }
 0x306   :  { %5567 = vmatmul.mubr.msk.f32.gmra.mrb[8].mxu1 %vm27_vm0, %v6832_v8 }
 0x307   :  { %5569 = vmatprep.mubr.msk.f32.mxu1 %vm27_vm0, %v6837_v23 }
 0x30a   :  { %5570 = vmatmul.mubr.msk.f32.gmra.mrb[10].mxu1 %vm27_vm0, %v6841_v24 }
 0x30b   :  { %5572 = vmatprep.mubr.msk.f32.mxu1 %vm27_vm0, %v6845_v25  ;;  %v4393_v25 = vld [vmem:[%s7272_s0 + $0x18] sm:$0xff] }
 0x30e   :  { %5573 = vmatmul.mubr.msk.f32.gmra.mrb[12].mxu1 %vm27_vm0, %v6849_v27  ;;  %v4392_v27 = vld [vmem:[%s7272_s0 + $0x10] sm:$0xff] }
 0x30f   :  { %5575 = vmatprep.mubr.msk.f32.mxu1 %vm27_vm0, %v7062_v20 }
 0x312   :  { %5576 = vmatmul.mubr.msk.f32.gmra.mrb[14].mxu1 %vm27_vm0, %v3949_v17 }
 0x313   :  { %5582 = vmatprep.mubr.msk.f32.mxu1 %vm27_vm0, %v6929_v50 }
 0x316   :  { %5583 = vmatmul.mubr.msk.f32.vlgmr.msra.gmra.mrb[0].mxu1 %vm27_vm0, %v6933_v52 }
 0x317   :  { %5585 = vmatprep.mubr.msk.f32.mxu1 %vm27_vm0, %v6937_v54 }
 0x31a   :  { %5586 = vmatmul.mubr.msk.f32.gmra.mrb[2].mxu1 %vm27_vm0, %v6941_v55 }
 0x31b   :  { %5588 = vmatprep.mubr.msk.f32.mxu1 %vm27_vm0, %v6945_v56  ;;  %v4401_v56 = vld [vmem:[%s7272_s0 + $0x58] sm:$0xff] }
 0x31e   :  { %5589 = vmatmul.mubr.msk.f32.gmra.mrb[4].mxu1 %vm27_vm0, %v6949_v59 }
 0x31f   :  { %5591 = vmatprep.mubr.msk.f32.mxu1 %vm27_vm0, %v3484_v51 }
 0x322   :  { %5592 = vmatmul.mubr.msk.f32.gmra.mrb[6].mxu1 %vm27_vm0, %v4169_v34 }
 0x323   :  { %5594 = vmatprep.mubr.msk.f32.mxu1 %vm27_vm0, %v6958_v61 }
 0x326   :  { %5595 = vmatmul.mubr.msk.f32.gmra.mrb[8].mxu1 %vm27_vm0, %v6962_v62 }
 0x327   :  { %5597 = vmatprep.mubr.msk.f32.mxu1 %vm27_vm0, %v6966_v63  ;;  %v4403_v63 = vld [vmem:[%s7272_s0 + $0x68] sm:$0xff] }
 0x32a   :  { %5598 = vmatmul.mubr.msk.f32.gmra.mrb[10].mxu1 %vm27_vm0, %v6970_v0  ;;  %v4402_v0 = vld [vmem:[%s7272_s0 + $0x60] sm:$0xff] }
 0x32b   :  { %5600 = vmatprep.mubr.msk.f32.mxu1 %vm27_vm0, %v6974_v1 }
 0x32e   :  { %5601 = vmatmul.mubr.msk.f32.gmra.mrb[12].mxu1 %vm27_vm0, %v6978_v4 }
 0x32f   :  { %5603 = vmatprep.mubr.msk.f32.mxu1 %vm27_vm0, %v3492_v26 }
 0x332   :  { %5604 = vmatmul.mubr.msk.f32.gmra.mrb[14].mxu1 %vm27_vm0, %v4177_v53 }
 0x3e9   :  { %v5584_v43 = vpop.f32.mrb[0].mxu1 }
 0x3ea   :  { %v4407_v8 = vadd.f32 %v5584_v43, %v4391_v57  ;;  %v4295_v23 = vpop.f32.mrb[1].mxu1 }
 0x3eb   :  { %v4406_v24 = vadd.f32 %v4390_v2, %v4295_v23 }
 0x3ec   :  { %4423 = vst.msk [vmem:[#allocation4 + $0x8] sm:$0xff] %vm27_vm0, %v4407_v8 }
 0x3ed   :  { %4422 = vst.msk [vmem:[#allocation4] sm:$0xff] %vm27_vm0, %v4406_v24  ;;  %v5587_v36 = vpop.f32.mrb[2].mxu1 }
 0x3ee   :  { %v4409_v10 = vadd.f32 %v5587_v36, %v4393_v25  ;;  %v4305_v44 = vpop.f32.mrb[3].mxu1 }
 0x3ef   :  { %v4408_v29 = vadd.f32 %v4392_v27, %v4305_v44 }
 0x3f0   :  { %4425 = vst.msk [vmem:[#allocation4 + $0x18] sm:$0xff] %vm27_vm0, %v4409_v10 }
 0x3f1   :  { %4424 = vst.msk [vmem:[#allocation4 + $0x10] sm:$0xff] %vm27_vm0, %v4408_v29  ;;  %v5590_v47 = vpop.f32.mrb[4].mxu1 }
 0x3f2   :  { %v4411_v48 = vadd.f32 %v5590_v47, %v4395_v45  ;;  %v4315_v49 = vpop.f32.mrb[5].mxu1 }
 0x3f3   :  { %v4410_v11 = vadd.f32 %v4394_v46, %v4315_v49 }
 0x3f4   :  { %4427 = vst.msk [vmem:[#allocation4 + $0x28] sm:$0xff] %vm27_vm0, %v4411_v48 }
 0x3f5   :  { %4426 = vst.msk [vmem:[#allocation4 + $0x20] sm:$0xff] %vm27_vm0, %v4410_v11  ;;  %v5593_v30 = vpop.f32.mrb[6].mxu1 }
 0x3f6   :  { %v4413_v38 = vadd.f32 %v5593_v30, %v4397_v19  ;;  %v4325_v39 = vpop.f32.mrb[7].mxu1 }
 0x3f7   :  { %v4412_v40 = vadd.f32 %v4396_v28, %v4325_v39 }
 0x3f8   :  { %4429 = vst.msk [vmem:[#allocation4 + $0x38] sm:$0xff] %vm27_vm0, %v4413_v38 }
 0x3f9   :  { %4428 = vst.msk [vmem:[#allocation4 + $0x30] sm:$0xff] %vm27_vm0, %v4412_v40  ;;  %v5596_v50 = vpop.f32.mrb[8].mxu1 }
 0x3fa   :  { %v4415_v52 = vadd.f32 %v5596_v50, %v4399_v41  ;;  %v4335_v54 = vpop.f32.mrb[9].mxu1 }
 0x3fb   :  { %v4414_v55 = vadd.f32 %v4398_v42, %v4335_v54 }
 0x3fc   :  { %4431 = vst.msk [vmem:[#allocation4 + $0x48] sm:$0xff] %vm27_vm0, %v4415_v52 }
 0x3fd   :  { %4430 = vst.msk [vmem:[#allocation4 + $0x40] sm:$0xff] %vm27_vm0, %v4414_v55  ;;  %v5599_v59 = vpop.f32.mrb[10].mxu1 }
 0x3fe   :  { %v4417_v60 = vadd.f32 %v5599_v59, %v4401_v56  ;;  %v4345_v61 = vpop.f32.mrb[11].mxu1 }
 0x3ff   :  { %v4416_v62 = vadd.f32 %v4400_v58, %v4345_v61 }
 0x400   :  { %4433 = vst.msk [vmem:[#allocation4 + $0x58] sm:$0xff] %vm27_vm0, %v4417_v60 }
 0x401   :  { %4432 = vst.msk [vmem:[#allocation4 + $0x50] sm:$0xff] %vm27_vm0, %v4416_v62  ;;  %v5602_v1 = vpop.f32.mrb[12].mxu1 }
 0x402   :  { %v4419_v4 = vadd.f32 %v5602_v1, %v4403_v63  ;;  %v4355_v5 = vpop.f32.mrb[13].mxu1 }
 0x403   :  { %v4418_v6 = vadd.f32 %v4402_v0, %v4355_v5 }
 0x404   :  { %4435 = vst.msk [vmem:[#allocation4 + $0x68] sm:$0xff] %vm27_vm0, %v4419_v4 }
 0x405   :  { %4434 = vst.msk [vmem:[#allocation4 + $0x60] sm:$0xff] %vm27_vm0, %v4418_v6  ;;  %v5605_v13 = vpop.f32.mrb[14].mxu1 }
 0x406   :  { %v4421_v14 = vadd.f32 %v5605_v13, %v4405_v9  ;;  %v4365_v15 = vpop.f32.mrb[15].mxu1 }
 0x407   :  { %v4420_v16 = vadd.f32 %v4404_v12, %v4365_v15 }
 0x408   :  { %4437 = vst.msk [vmem:[#allocation4 + $0x78] sm:$0xff] %vm27_vm0, %v4421_v14 }
 0x409   :  { %4436 = vst.msk [vmem:[#allocation4 + $0x70] sm:$0xff] %vm27_vm0, %v4420_v16 }
 0x40a   :  { %5949 = shalt.err (!%p5946_p4)
}
 0x40b   :  { %s5950_s13 = scalar_lea.hbm %s7279_s7, 2048 }
 0x40c   :  { %p5951_p5 = scmp.ne.s32.totalorder %s7279_s7, %s5950_s13  ;;  %p5954_p6 = scmp.lt.u32.totalorder %s5950_s13, %s7279_s7 }
 0x40e   :  { %p5956_p7 = pnand %p5954_p6, %p5951_p5 }
 0x410   :  { %5959 = shalt.err (!%p5956_p7)
}
 0x411   :  { %s5964_s18 = smov 128   ;;  %s5965_s1 = smov 8  }
 0x412   :  { %4449 = dma.vmem_to_hbm [thread:$0]  %s4444_s5, 2048, %s7279_s7, [#allocation5], %s5964_s18, %s5964_s18, %s5965_s1  }
 0x413   :  { %5960 = dma.done.wait [#allocation5], 2048  }
 0x414   :  { %5961 = vsyncadd [#allocation5], 4294965248 }
 0x415   :  { %4453 = vsyncpa [#allocation5], 1 }

// kernel: network_block_forward_nchw.2
= control target key start
LH: loop header
LB: loop body
LE: loop exit
PB: predicated region body
PF: predicated region fallthrough
CT: control target
= control target key end

     0   :  { %vm29_vm0 = vcmask 64512   ;;  %vm31_vm1 = vcmask 58368   ;;  %vm65_vm2 = vcmask 57344   ;;  %v6581_v1 = vmov 0.0   ;;  %s8073_s3 = inlined_call_operand.vmem [shape: f32[9,8,16], index: 3, kind: input, shape index: {}]   ;;  %s8074_s0 = inlined_call_operand.vmem [shape: f32[4,2,8,8,8], index: 0, kind: input, shape index: {}]   ;;  %s8075_s1 = inlined_call_operand.vmem [shape: f32[1,8], index: 1, kind: input, shape index: {}]   ;;  %s8076_s2 = inlined_call_operand.vmem [shape: f32[1,8], index: 2, kind: input, shape index: {}]   ;;  %s8077_s6 = inlined_call_operand.vmem [shape: f32[9,16,16], index: 6, kind: input, shape index: {}]   ;;  %s8078_s4 = inlined_call_operand.vmem [shape: f32[1,16], index: 4, kind: input, shape index: {}]   ;;  %s8079_s5 = inlined_call_operand.vmem [shape: f32[1,16], index: 5, kind: input, shape index: {}]   ;;  %s8080_s7 = inlined_call_operand.vmem [shape: f32[8,16], index: 7, kind: input, shape index: {}]   ;;  %s8081_s8 = inlined_call_operand.vmem [shape: f32[2,8,8,16], index: 8, kind: output, shape index: {}]  }
   0x1   :  { %v5094_v0 = vld [vmem:[%s8073_s3 + $0x8] sm:$0xff]  ;;  %39 = vst.msk [vmem:[#allocation2 + $0x280] sm:$0xff] %vm29_vm0, %v6581_v1  ;;  %41 = vst.msk [vmem:[#allocation2 + $0x320] sm:$0xff] %vm29_vm0, %v6581_v1  ;;  %v6645_v2 = vld [vmem:[%s8073_s3] sm:$0xff] }
   0x2   :  { %40 = vst.msk [vmem:[#allocation2 + $0x288] sm:$0x3] %vm31_vm1, %v6581_v1  ;;  %42 = vst.msk [vmem:[#allocation2 + $0x328] sm:$0x3] %vm31_vm1, %v6581_v1  ;;  %v226_v3 = vld [vmem:[%s8074_s0 + $0x100] sm:$0xff]  ;;  %5756 = vmatprep.subr.mxu0 %v5094_v0  ;;  %v227_v6 = vld [vmem:[%s8074_s0 + $0x108] sm:$0xff] }
   0x3   :  { %43 = vst.msk [vmem:[#allocation2 + $0x3c0] sm:$0xff] %vm29_vm0, %v6581_v1  ;;  %45 = vst.msk [vmem:[#allocation2 + $0x460] sm:$0xff] %vm29_vm0, %v6581_v1  ;;  %v6717_v4 = vld [vmem:[%s8075_s1] ss:$0 sm:$0xff]  ;;  %5757 = vmatpush3.msra.mxu0 %v5094_v0  ;;  %v228_v9 = vld [vmem:[%s8074_s0 + $0x110] sm:$0xff] }
   0x4   :  { %44 = vst.msk [vmem:[#allocation2 + $0x3c8] sm:$0x3] %vm31_vm1, %v6581_v1  ;;  %46 = vst.msk [vmem:[#allocation2 + $0x468] sm:$0x3] %vm31_vm1, %v6581_v1  ;;  %v6722_v5 = vld [vmem:[%s8076_s2] ss:$0 sm:$0xff]  ;;  %v297_v7 = vmul.f32 %v6717_v4, %v226_v3  ;;  %v298_v8 = vmul.f32 %v6717_v4, %v227_v6  ;;  %5782 = vmatprep.subr.mxu0 %v6645_v2  ;;  %v299_v12 = vmul.f32 %v6717_v4, %v228_v9 }
   0x5   :  { %114 = vst.msk [vmem:[#allocation2 + $0x3d0] sm:$0x1] %vm65_vm2, %v6581_v1  ;;  %82 = vst.msk [vmem:[#allocation2 + $0x150] sm:$0x1] %vm65_vm2, %v6581_v1  ;;  %v229_v10 = vld [vmem:[%s8074_s0 + $0x118] sm:$0xff]  ;;  %v230_v11 = vld [vmem:[%s8074_s0 + $0x120] sm:$0xff] }
   0x6   :  { %83 = vst.msk [vmem:[#allocation2 + $0x160] sm:$0x1] %vm65_vm2, %v6581_v1  ;;  %84 = vst.msk [vmem:[#allocation2 + $0x170] sm:$0x1] %vm65_vm2, %v6581_v1  ;;  %v300_v13 = vmul.f32 %v6717_v4, %v229_v10  ;;  %v301_v14 = vmul.f32 %v6717_v4, %v230_v11  ;;  %v231_v15 = vld [vmem:[%s8074_s0 + $0x128] sm:$0xff]  ;;  %v232_v16 = vld [vmem:[%s8074_s0 + $0x130] sm:$0xff]  ;;  %v368_v18 = vadd.f32 %v6722_v5, %v297_v7 }
   0x7   :  { %85 = vst.msk [vmem:[#allocation2 + $0x180] sm:$0x1] %vm65_vm2, %v6581_v1  ;;  %86 = vst.msk [vmem:[#allocation2 + $0x190] sm:$0x1] %vm65_vm2, %v6581_v1  ;;  %v234_v17 = vld [vmem:[%s8074_s0 + $0x140] sm:$0xff]  ;;  %v369_v19 = vadd.f32 %v6722_v5, %v298_v8  ;;  %v302_v20 = vmul.f32 %v6717_v4, %v231_v15  ;;  %v303_v21 = vmul.f32 %v6717_v4, %v232_v16  ;;  %v235_v26 = vld [vmem:[%s8074_s0 + $0x148] sm:$0xff] }
   0x8   :  { %87 = vst.msk [vmem:[#allocation2 + $0x1a0] sm:$0x1] %vm65_vm2, %v6581_v1  ;;  %88 = vst.msk [vmem:[#allocation2 + $0x1b0] sm:$0x1] %vm65_vm2, %v6581_v1  ;;  %v370_v22 = vadd.f32 %v6722_v5, %v299_v12  ;;  %v371_v23 = vadd.f32 %v6722_v5, %v300_v13  ;;  %v372_v24 = vadd.f32 %v6722_v5, %v301_v14  ;;  %v236_v27 = vld [vmem:[%s8074_s0 + $0x150] sm:$0xff]  ;;  %vm432_vm3 = vcmp.ge.f32.partialorder %v368_v18, 0.0 }
   0x9   :  { %89 = vst.msk [vmem:[#allocation2 + $0x1c0] sm:$0x1] %vm65_vm2, %v6581_v1  ;;  %90 = vst.msk [vmem:[#allocation2 + $0x1f0] sm:$0x1] %vm65_vm2, %v6581_v1  ;;  %v305_v25 = vmul.f32 %v6717_v4, %v234_v17  ;;  %v496_v28 = vmul.f32 0.1, %v368_v18  ;;  %v373_v37 = vadd.f32 %v6722_v5, %v302_v20  ;;  %v374_v38 = vadd.f32 %v6722_v5, %v303_v21 }
   0xa   :  { %91 = vst.msk [vmem:[#allocation2 + $0x200] sm:$0x1] %vm65_vm2, %v6581_v1  ;;  %92 = vst.msk [vmem:[#allocation2 + $0x210] sm:$0x1] %vm65_vm2, %v6581_v1  ;;  %vm433_vm4 = vcmp.ge.f32.partialorder %v369_v19, 0.0  ;;  %v675_v30 = vld [vmem:[#allocation2 + $0x281] sm:$0xff]  ;;  %v306_v42 = vmul.f32 %v6717_v4, %v235_v26  ;;  %v307_v43 = vmul.f32 %v6717_v4, %v236_v27 }
   0xb   :  { %93 = vst.msk [vmem:[#allocation2 + $0x220] sm:$0x1] %vm65_vm2, %v6581_v1  ;;  %94 = vst.msk [vmem:[#allocation2 + $0x230] sm:$0x1] %vm65_vm2, %v6581_v1  ;;  %v497_v29 = vmul.f32 0.1, %v369_v19  ;;  %5758 = vmatprep.mubr.msk.f32.mxu0 %vm29_vm0, %v675_v30  ;;  %v560_v32 = vsel %vm432_vm3, %v368_v18, %v496_v28  ;;  %v376_v39 = vadd.f32 %v6722_v5, %v305_v25 }
   0xc   :  { %95 = vst.msk [vmem:[#allocation2 + $0x240] sm:$0x1] %vm65_vm2, %v6581_v1  ;;  %96 = vst.msk [vmem:[#allocation2 + $0x250] sm:$0x1] %vm65_vm2, %v6581_v1  ;;  %vm434_vm5 = vcmp.ge.f32.partialorder %v370_v22, 0.0  ;;  %vm435_vm6 = vcmp.ge.f32.partialorder %v371_v23, 0.0  ;;  %v377_v49 = vadd.f32 %v6722_v5, %v306_v42  ;;  %v378_v50 = vadd.f32 %v6722_v5, %v307_v43 }
   0xd   :  { %97 = vst.msk [vmem:[#allocation2 + $0x260] sm:$0x1] %vm65_vm2, %v6581_v1  ;;  %115 = vst.msk [vmem:[#allocation2 + $0x3e0] sm:$0x1] %vm65_vm2, %v6581_v1  ;;  %v498_v31 = vmul.f32 0.1, %v370_v22  ;;  %v561_v33 = vsel %vm433_vm4, %v369_v19, %v497_v29 }
   0xe   :  { %116 = vst.msk [vmem:[#allocation2 + $0x3f0] sm:$0x1] %vm65_vm2, %v6581_v1  ;;  %117 = vst.msk [vmem:[#allocation2 + $0x400] sm:$0x1] %vm65_vm2, %v6581_v1  ;;  %vm436_vm7 = vcmp.ge.f32.partialorder %v372_v24, 0.0  ;;  %v237_v44 = vld [vmem:[%s8074_s0 + $0x158] sm:$0xff] }
   0xf   :  { %118 = vst.msk [vmem:[#allocation2 + $0x410] sm:$0x1] %vm65_vm2, %v6581_v1  ;;  %119 = vst.msk [vmem:[#allocation2 + $0x420] sm:$0x1] %vm65_vm2, %v6581_v1  ;;  %v499_v34 = vmul.f32 0.1, %v371_v23  ;;  %v562_v36 = vsel %vm434_vm5, %v370_v22, %v498_v31  ;;  %v308_v54 = vmul.f32 %v6717_v4, %v237_v44 }
  0x10   :  { %120 = vst.msk [vmem:[#allocation2 + $0x430] sm:$0x1] %vm65_vm2, %v6581_v1  ;;  %121 = vst.msk [vmem:[#allocation2 + $0x440] sm:$0x1] %vm65_vm2, %v6581_v1  ;;  %v500_v35 = vmul.f32 0.1, %v372_v24 }
  0x11   :  { %122 = vst.msk [vmem:[#allocation2 + $0x470] sm:$0x1] %vm65_vm2, %v6581_v1  ;;  %123 = vst.msk [vmem:[#allocation2 + $0x480] sm:$0x1] %vm65_vm2, %v6581_v1  ;;  %v563_v40 = vsel %vm435_vm6, %v371_v23, %v499_v34  ;;  %v238_v45 = vld [vmem:[%s8074_s0 + $0x160] sm:$0xff]  ;;  %vm437_vm8 = vcmp.ge.f32.partialorder %v373_v37, 0.0  ;;  %v379_v62 = vadd.f32 %v6722_v5, %v308_v54 }
  0x12   :  { %124 = vst.msk [vmem:[#allocation2 + $0x490] sm:$0x1] %vm65_vm2, %v6581_v1  ;;  %125 = vst.msk [vmem:[#allocation2 + $0x4a0] sm:$0x1] %vm65_vm2, %v6581_v1  ;;  %v564_v41 = vsel %vm436_vm7, %v372_v24, %v500_v35  ;;  %v501_v46 = vmul.f32 0.1, %v373_v37  ;;  %v309_v55 = vmul.f32 %v6717_v4, %v238_v45 }
  0x13   :  { %126 = vst.msk [vmem:[#allocation2 + $0x4b0] sm:$0x1] %vm65_vm2, %v6581_v1  ;;  %127 = vst.msk [vmem:[#allocation2 + $0x4c0] sm:$0x1] %vm65_vm2, %v6581_v1  ;;  %vm438_vm9 = vcmp.ge.f32.partialorder %v374_v38, 0.0  ;;  %vm440_vm10 = vcmp.ge.f32.partialorder %v376_v39, 0.0 }
  0x14   :  { %128 = vst.msk [vmem:[#allocation2 + $0x4d0] sm:$0x1] %vm65_vm2, %v6581_v1  ;;  %129 = vst.msk [vmem:[#allocation2 + $0x4e0] sm:$0x1] %vm65_vm2, %v6581_v1  ;;  %v502_v47 = vmul.f32 0.1, %v374_v38  ;;  %v565_v52 = vsel %vm437_vm8, %v373_v37, %v501_v46  ;;  %v380_v63 = vadd.f32 %v6722_v5, %v309_v55 }
  0x15   :  { %624 = vst.msk [vmem:[#allocation2 + $0x291] sm:$0xff] %vm29_vm0, %v560_v32  ;;  %625 = vst.msk [vmem:[#allocation2 + $0x2a1] sm:$0xff] %vm29_vm0, %v561_v33  ;;  %v504_v48 = vmul.f32 0.1, %v376_v39  ;;  %v239_v51 = vld [vmem:[%s8074_s0 + $0x168] sm:$0xff]  ;;  %v240_v56 = vld [vmem:[%s8074_s0 + $0x170] sm:$0xff] }
  0x16   :  { %626 = vst.msk [vmem:[#allocation2 + $0x2b1] sm:$0xff] %vm29_vm0, %v562_v36  ;;  %627 = vst.msk [vmem:[#allocation2 + $0x2c1] sm:$0xff] %vm29_vm0, %v563_v40  ;;  %v566_v53 = vsel %vm438_vm9, %v374_v38, %v502_v47  ;;  %v242_v57 = vld [vmem:[%s8074_s0 + $0x180] sm:$0xff]  ;;  %v243_v58 = vld [vmem:[%s8074_s0 + $0x188] sm:$0xff]  ;;  %vm441_vm11 = vcmp.ge.f32.partialorder %v377_v49, 0.0  ;;  %vm442_vm12 = vcmp.ge.f32.partialorder %v378_v50, 0.0  ;;  %v310_v0 = vmul.f32 %v6717_v4, %v239_v51 }
  0x17   :  { %628 = vst.msk [vmem:[#allocation2 + $0x2d1] sm:$0xff] %vm29_vm0, %v564_v41  ;;  %629 = vst.msk [vmem:[#allocation2 + $0x2e1] sm:$0xff] %vm29_vm0, %v565_v52  ;;  %v568_v59 = vsel %vm440_vm10, %v376_v39, %v504_v48  ;;  %v505_v60 = vmul.f32 0.1, %v377_v49  ;;  %v506_v61 = vmul.f32 0.1, %v378_v50  ;;  %v311_v10 = vmul.f32 %v6717_v4, %v240_v56 }
  0x18   :  { %630 = vst.msk [vmem:[#allocation2 + $0x2f1] sm:$0xff] %vm29_vm0, %v566_v53  ;;  %632 = vst.msk [vmem:[#allocation2 + $0x331] sm:$0xff] %vm29_vm0, %v568_v59  ;;  %v6807_v3 = vld [vmem:[%s8073_s3 + $0x10] sm:$0xff]  ;;  %v313_v11 = vmul.f32 %v6717_v4, %v242_v57  ;;  %v314_v12 = vmul.f32 %v6717_v4, %v243_v58  ;;  %v245_v13 = vld [vmem:[%s8074_s0 + $0x198] sm:$0xff]  ;;  %vm443_vm13 = vcmp.ge.f32.partialorder %v379_v62, 0.0  ;;  %vm444_vm14 = vcmp.ge.f32.partialorder %v380_v63, 0.0 }
  0x19   :  { %v244_v6 = vld [vmem:[%s8074_s0 + $0x190] sm:$0xff]  ;;  %v569_v9 = vsel %vm441_vm11, %v377_v49, %v505_v60  ;;  %v570_v14 = vsel %vm442_vm12, %v378_v50, %v506_v61  ;;  %v507_v15 = vmul.f32 0.1, %v379_v62  ;;  %v508_v17 = vmul.f32 0.1, %v380_v63  ;;  %v246_v27 = vld [vmem:[%s8074_s0 + $0x1a0] sm:$0xff] }
  0x1a   :  { %633 = vst.msk [vmem:[#allocation2 + $0x341] sm:$0xff] %vm29_vm0, %v569_v9  ;;  %634 = vst.msk [vmem:[#allocation2 + $0x351] sm:$0xff] %vm29_vm0, %v570_v14  ;;  %v381_v18 = vadd.f32 %v6722_v5, %v310_v0  ;;  %v382_v19 = vadd.f32 %v6722_v5, %v311_v10  ;;  %v384_v20 = vadd.f32 %v6722_v5, %v313_v11  ;;  %v247_v30 = vld [vmem:[%s8074_s0 + $0x1a8] sm:$0xff]  ;;  %v248_v31 = vld [vmem:[%s8074_s0 + $0x1b0] sm:$0xff] }
  0x1b   :  { %v571_v22 = vsel %vm443_vm13, %v379_v62, %v507_v15  ;;  %v385_v23 = vadd.f32 %v6722_v5, %v314_v12  ;;  %v316_v24 = vmul.f32 %v6717_v4, %v245_v13  ;;  %v572_v25 = vsel %vm444_vm14, %v380_v63, %v508_v17  ;;  %v250_v37 = vld [vmem:[%s8074_s0 + $0x1c0] sm:$0xff]  ;;  %v251_v42 = vld [vmem:[%s8074_s0 + $0x1c8] sm:$0xff]  ;;  %v252_v43 = vld [vmem:[%s8074_s0 + $0x1d0] sm:$0xff] }
  0x1c   :  { %v676_v7 = vld [vmem:[#allocation2 + $0x291] sm:$0xff]  ;;  %v677_v8 = vld [vmem:[#allocation2 + $0x2a1] sm:$0xff]  ;;  %635 = vst.msk [vmem:[#allocation2 + $0x361] sm:$0xff] %vm29_vm0, %v571_v22  ;;  %vm445_vm15 = vcmp.ge.f32.partialorder %v381_v18, 0.0  ;;  %v509_v26 = vmul.f32 0.1, %v381_v18  ;;  %v317_v41 = vmul.f32 %v6717_v4, %v246_v27  ;;  %v318_v49 = vmul.f32 %v6717_v4, %v247_v30 }
  0x1d   :  { %5759 = vmatmul.mubr.msk.f32.vlgmr.msra.gmra.mrb[0].mxu0 %vm29_vm0, %v676_v7  ;;  %v678_v16 = vld [vmem:[#allocation2 + $0x2b1] sm:$0xff]  ;;  %v679_v21 = vld [vmem:[#allocation2 + $0x2c1] sm:$0xff]  ;;  %vm446_vm1 = vcmp.ge.f32.partialorder %v382_v19, 0.0  ;;  %636 = vst.msk [vmem:[#allocation2 + $0x371] sm:$0xff] %vm29_vm0, %v572_v25  ;;  %v510_v28 = vmul.f32 0.1, %v382_v19  ;;  %v387_v36 = vadd.f32 %v6722_v5, %v316_v24  ;;  %v319_v50 = vmul.f32 %v6717_v4, %v248_v31 }
  0x1e   :  { %5783 = vmatpush3.msra.mxu0 %v6645_v2  ;;  %5761 = vmatprep.mubr.msk.f32.mxu0 %vm29_vm0, %v677_v8  ;;  %v315_v2 = vmul.f32 %v6717_v4, %v244_v6  ;;  %vm448_vm2 = vcmp.ge.f32.partialorder %v384_v20, 0.0  ;;  %vm449_vm3 = vcmp.ge.f32.partialorder %v385_v23, 0.0  ;;  %v680_v32 = vld [vmem:[#allocation2 + $0x2d1] sm:$0xff]  ;;  %v573_v33 = vsel %vm445_vm15, %v381_v18, %v509_v26  ;;  %v681_v38 = vld [vmem:[#allocation2 + $0x2e1] sm:$0xff] }
  0x1f   :  { %5808 = vmatprep.subr.mxu0 %v6807_v3  ;;  %v512_v34 = vmul.f32 0.1, %v384_v20  ;;  %v513_v35 = vmul.f32 0.1, %v385_v23  ;;  %637 = vst.msk [vmem:[#allocation2 + $0x381] sm:$0xff] %vm29_vm0, %v573_v33  ;;  %v574_v39 = vsel %vm446_vm1, %v382_v19, %v510_v28  ;;  %vm451_vm5 = vcmp.ge.f32.partialorder %v387_v36, 0.0 }
  0x20   :  { %v386_v29 = vadd.f32 %v6722_v5, %v315_v2  ;;  %638 = vst.msk [vmem:[#allocation2 + $0x391] sm:$0xff] %vm29_vm0, %v574_v39  ;;  %v515_v46 = vmul.f32 0.1, %v387_v36  ;;  %v388_v48 = vadd.f32 %v6722_v5, %v317_v41  ;;  %v253_v51 = vld [vmem:[%s8074_s0 + $0x1d8] sm:$0xff]  ;;  %v321_v54 = vmul.f32 %v6717_v4, %v250_v37  ;;  %v683_v57 = vld [vmem:[#allocation2 + $0x321] sm:$0xff]  ;;  %v256_v10 = vld [vmem:[%s8074_s0 + $0x1f0] sm:$0xff] }
  0x21   :  { %5762 = vmatmul.mubr.msk.f32.gmra.mrb[2].mxu0 %vm29_vm0, %v678_v16  ;;  %v576_v44 = vsel %vm448_vm2, %v384_v20, %v512_v34  ;;  %v577_v45 = vsel %vm449_vm3, %v385_v23, %v513_v35  ;;  %v682_v52 = vld [vmem:[#allocation2 + $0x2f1] sm:$0xff]  ;;  %v322_v55 = vmul.f32 %v6717_v4, %v251_v42  ;;  %v323_v56 = vmul.f32 %v6717_v4, %v252_v43  ;;  %v254_v6 = vld [vmem:[%s8074_s0 + $0x1e0] sm:$0xff]  ;;  %v255_v7 = vld [vmem:[%s8074_s0 + $0x1e8] sm:$0xff] }
  0x22   :  { %5764 = vmatprep.mubr.msk.f32.mxu0 %vm29_vm0, %v679_v21  ;;  %vm450_vm4 = vcmp.ge.f32.partialorder %v386_v29, 0.0  ;;  %v514_v40 = vmul.f32 0.1, %v386_v29  ;;  %640 = vst.msk [vmem:[#allocation2 + $0x3d1] sm:$0xff] %vm29_vm0, %v576_v44  ;;  %641 = vst.msk [vmem:[#allocation2 + $0x3e1] sm:$0xff] %vm29_vm0, %v577_v45  ;;  %v579_v53 = vsel %vm451_vm5, %v387_v36, %v515_v46  ;;  %vm452_vm6 = vcmp.ge.f32.partialorder %v388_v48, 0.0 }
  0x23   :  { %643 = vst.msk [vmem:[#allocation2 + $0x401] sm:$0xff] %vm29_vm0, %v579_v53  ;;  %v516_v58 = vmul.f32 0.1, %v388_v48  ;;  %v389_v59 = vadd.f32 %v6722_v5, %v318_v49  ;;  %v390_v60 = vadd.f32 %v6722_v5, %v319_v50  ;;  %v392_v61 = vadd.f32 %v6722_v5, %v321_v54  ;;  %v210_v11 = vld [vmem:[%s8074_s0 + $0x80] sm:$0xff]  ;;  %v684_v12 = vld [vmem:[#allocation2 + $0x331] sm:$0xff]  ;;  %v211_v19 = vld [vmem:[%s8074_s0 + $0x88] sm:$0xff] }
  0x24   :  { %v578_v47 = vsel %vm450_vm4, %v386_v29, %v514_v40  ;;  %v393_v62 = vadd.f32 %v6722_v5, %v322_v55  ;;  %v394_v63 = vadd.f32 %v6722_v5, %v323_v56  ;;  %v324_v0 = vmul.f32 %v6717_v4, %v253_v51  ;;  %v685_v16 = vld [vmem:[#allocation2 + $0x341] sm:$0xff]  ;;  %v212_v23 = vld [vmem:[%s8074_s0 + $0x90] sm:$0xff]  ;;  %v213_v27 = vld [vmem:[%s8074_s0 + $0x98] sm:$0xff] }
  0x25   :  { %5765 = vmatmul.mubr.msk.f32.gmra.mrb[4].mxu0 %vm29_vm0, %v680_v32  ;;  %642 = vst.msk [vmem:[#allocation2 + $0x3f1] sm:$0xff] %vm29_vm0, %v578_v47  ;;  %v580_v8 = vsel %vm452_vm6, %v388_v48, %v516_v58  ;;  %vm453_vm7 = vcmp.ge.f32.partialorder %v389_v59, 0.0  ;;  %v517_v9 = vmul.f32 0.1, %v389_v59  ;;  %vm454_vm8 = vcmp.ge.f32.partialorder %v390_v60, 0.0  ;;  %v686_v28 = vld [vmem:[#allocation2 + $0x351] sm:$0xff] }
  0x26   :  { %5767 = vmatprep.mubr.msk.f32.mxu0 %vm29_vm0, %v681_v38  ;;  %644 = vst.msk [vmem:[#allocation2 + $0x411] sm:$0xff] %vm29_vm0, %v580_v8  ;;  %v518_v13 = vmul.f32 0.1, %v390_v60  ;;  %vm456_vm9 = vcmp.ge.f32.partialorder %v392_v61, 0.0  ;;  %v520_v14 = vmul.f32 0.1, %v392_v61  ;;  %v395_v15 = vadd.f32 %v6722_v5, %v324_v0 }
  0x27   :  { %v581_v17 = vsel %vm453_vm7, %v389_v59, %v517_v9  ;;  %vm457_vm10 = vcmp.ge.f32.partialorder %v393_v62, 0.0  ;;  %v521_v18 = vmul.f32 0.1, %v393_v62  ;;  %vm458_vm11 = vcmp.ge.f32.partialorder %v394_v63, 0.0  ;;  %v687_v33 = vld [vmem:[#allocation2 + $0x361] sm:$0xff]  ;;  %v688_v43 = vld [vmem:[#allocation2 + $0x371] sm:$0xff] }
  0x28   :  { %645 = vst.msk [vmem:[#allocation2 + $0x421] sm:$0xff] %vm29_vm0, %v581_v17  ;;  %v582_v20 = vsel %vm454_vm8, %v390_v60, %v518_v13  ;;  %v584_v21 = vsel %vm456_vm9, %v392_v61, %v520_v14  ;;  %v522_v22 = vmul.f32 0.1, %v394_v63  ;;  %vm459_vm12 = vcmp.ge.f32.partialorder %v395_v15, 0.0  ;;  %v214_v42 = vld [vmem:[%s8074_s0 + $0xa0] sm:$0xff]  ;;  %v215_v46 = vld [vmem:[%s8074_s0 + $0xa8] sm:$0xff] }
  0x29   :  { %5768 = vmatmul.mubr.msk.f32.gmra.mrb[6].mxu0 %vm29_vm0, %v682_v52  ;;  %646 = vst.msk [vmem:[#allocation2 + $0x431] sm:$0xff] %vm29_vm0, %v582_v20  ;;  %648 = vst.msk [vmem:[#allocation2 + $0x471] sm:$0xff] %vm29_vm0, %v584_v21  ;;  %v585_v2 = vsel %vm457_vm10, %v393_v62, %v521_v18  ;;  %v523_v24 = vmul.f32 0.1, %v395_v15  ;;  %v325_v25 = vmul.f32 %v6717_v4, %v254_v6  ;;  %v689_v49 = vld [vmem:[#allocation2 + $0x381] sm:$0xff]  ;;  %v216_v52 = vld [vmem:[%s8074_s0 + $0xb0] sm:$0xff] }
  0x2a   :  { %5770 = vmatprep.mubr.msk.f32.mxu0 %vm29_vm0, %v683_v57  ;;  %v326_v26 = vmul.f32 %v6717_v4, %v255_v7  ;;  %649 = vst.msk [vmem:[#allocation2 + $0x481] sm:$0xff] %vm29_vm0, %v585_v2  ;;  %v586_v29 = vsel %vm458_vm11, %v394_v63, %v522_v22  ;;  %v327_v30 = vmul.f32 %v6717_v4, %v256_v10  ;;  %v217_v57 = vld [vmem:[%s8074_s0 + $0xb8] sm:$0xff]  ;;  %v218_v62 = vld [vmem:[%s8074_s0 + $0xc0] sm:$0xff]  ;;  %v219_v63 = vld [vmem:[%s8074_s0 + $0xc8] sm:$0xff] }
  0x2b   :  { %v281_v31 = vmul.f32 %v6717_v4, %v210_v11  ;;  %v282_v32 = vmul.f32 %v6717_v4, %v211_v19  ;;  %650 = vst.msk [vmem:[#allocation2 + $0x491] sm:$0xff] %vm29_vm0, %v586_v29  ;;  %v587_v34 = vsel %vm459_vm12, %v395_v15, %v523_v24  ;;  %v396_v35 = vadd.f32 %v6722_v5, %v325_v25  ;;  %v690_v0 = vld [vmem:[#allocation2 + $0x391] sm:$0xff]  ;;  %v657_v9 = vld [vmem:[#allocation2 + $0x3c0] sm:$0xff] }
  0x2c   :  { %v397_v36 = vadd.f32 %v6722_v5, %v326_v26  ;;  %v283_v37 = vmul.f32 %v6717_v4, %v212_v23  ;;  %651 = vst.msk [vmem:[#allocation2 + $0x4a1] sm:$0xff] %vm29_vm0, %v587_v34  ;;  %v398_v38 = vadd.f32 %v6722_v5, %v327_v30  ;;  %v284_v41 = vmul.f32 %v6717_v4, %v213_v27  ;;  %v220_v18 = vld [vmem:[%s8074_s0 + $0xd0] sm:$0xff]  ;;  %v221_v19 = vld [vmem:[%s8074_s0 + $0xd8] sm:$0xff]  ;;  %v6984_v25 = vld [vmem:[#allocation2 + $0x3e0] sm:$0xff] }
  0x2d   :  { %5771 = vmatmul.mubr.msk.f32.gmra.mrb[8].mxu0 %vm29_vm0, %v684_v12  ;;  %v352_v39 = vadd.f32 %v6722_v5, %v281_v31  ;;  %v353_v40 = vadd.f32 %v6722_v5, %v282_v32  ;;  %vm460_vm13 = vcmp.ge.f32.partialorder %v396_v35, 0.0  ;;  %v524_v44 = vmul.f32 0.1, %v396_v35  ;;  %v658_v22 = vld [vmem:[#allocation2 + $0x3d0] sm:$0xff]  ;;  %v222_v30 = vld [vmem:[%s8074_s0 + $0xe0] sm:$0xff]  ;;  %v6994_v31 = vld [vmem:[%s8073_s3 + $0x18] sm:$0xff] }
  0x2e   :  { %5773 = vmatprep.mubr.msk.f32.mxu0 %vm29_vm0, %v685_v16  ;;  %vm461_vm14 = vcmp.ge.f32.partialorder %v397_v36, 0.0  ;;  %v354_v45 = vadd.f32 %v6722_v5, %v283_v37  ;;  %v525_v47 = vmul.f32 0.1, %v397_v36  ;;  %vm462_vm15 = vcmp.ge.f32.partialorder %v398_v38, 0.0 }
  0x2f   :  { %v526_v48 = vmul.f32 0.1, %v398_v38  ;;  %vm416_vm1 = vcmp.ge.f32.partialorder %v352_v39, 0.0  ;;  %v588_v50 = vsel %vm460_vm13, %v396_v35, %v524_v44  ;;  %v480_v51 = vmul.f32 0.1, %v352_v39  ;;  %v223_v35 = vld [vmem:[%s8074_s0 + $0xe8] sm:$0xff] }
  0x30   :  { %vm417_vm2 = vcmp.ge.f32.partialorder %v353_v40, 0.0  ;;  %vm418_vm3 = vcmp.ge.f32.partialorder %v354_v45, 0.0  ;;  %652 = vst.msk [vmem:[#allocation2 + $0x4b1] sm:$0xff] %vm29_vm0, %v588_v50  ;;  %v589_v53 = vsel %vm461_vm14, %v397_v36, %v525_v47  ;;  %v481_v55 = vmul.f32 0.1, %v353_v40  ;;  %v225_v44 = vld [vmem:[%s8074_s0 + $0xf8] sm:$0xff] }
  0x31   :  { %5774 = vmatmul.mubr.msk.f32.gmra.mrb[10].mxu0 %vm29_vm0, %v686_v28  ;;  %v590_v54 = vsel %vm462_vm15, %v398_v38, %v526_v48  ;;  %v355_v56 = vadd.f32 %v6722_v5, %v284_v41  ;;  %653 = vst.msk [vmem:[#allocation2 + $0x4c1] sm:$0xff] %vm29_vm0, %v589_v53  ;;  %v544_v58 = vsel %vm416_vm1, %v352_v39, %v480_v51  ;;  %v482_v59 = vmul.f32 0.1, %v354_v45  ;;  %v7008_v38 = vld [vmem:[#allocation2 + $0x3f0] sm:$0xff]  ;;  %v194_v48 = vld [vmem:[%s8074_s0] sm:$0xff] }
  0x32   :  { %5776 = vmatprep.mubr.msk.f32.mxu0 %vm29_vm0, %v687_v33  ;;  %654 = vst.msk [vmem:[#allocation2 + $0x4d1] sm:$0xff] %vm29_vm0, %v590_v54  ;;  %v285_v60 = vmul.f32 %v6717_v4, %v214_v42  ;;  %v286_v61 = vmul.f32 %v6717_v4, %v215_v46  ;;  %608 = vst.msk [vmem:[#allocation2 + $0x151] sm:$0xff] %vm29_vm0, %v544_v58  ;;  %v545_v6 = vsel %vm417_vm2, %v353_v40, %v481_v55  ;;  %v7044_v58 = vld [vmem:[#allocation2 + $0x410] sm:$0xff] }
  0x33   :  { %vm419_vm4 = vcmp.ge.f32.partialorder %v355_v56, 0.0  ;;  %v483_v7 = vmul.f32 0.1, %v355_v56  ;;  %v287_v8 = vmul.f32 %v6717_v4, %v216_v52  ;;  %609 = vst.msk [vmem:[#allocation2 + $0x161] sm:$0xff] %vm29_vm0, %v545_v6  ;;  %v546_v10 = vsel %vm418_vm3, %v354_v45, %v482_v59 }
  0x34   :  { %v356_v11 = vadd.f32 %v6722_v5, %v285_v60  ;;  %v357_v12 = vadd.f32 %v6722_v5, %v286_v61  ;;  %v288_v13 = vmul.f32 %v6717_v4, %v217_v57  ;;  %610 = vst.msk [vmem:[#allocation2 + $0x171] sm:$0xff] %vm29_vm0, %v546_v10  ;;  %v289_v16 = vmul.f32 %v6717_v4, %v218_v62  ;;  %v196_v57 = vld [vmem:[%s8074_s0 + $0x10] sm:$0xff]  ;;  %v7048_v62 = vld [vmem:[#allocation2 + $0x420] sm:$0xff] }
  0x35   :  { %5777 = vmatmul.mubr.msk.f32.gmra.mrb[12].mxu0 %vm29_vm0, %v688_v43  ;;  %v547_v14 = vsel %vm419_vm4, %v355_v56, %v483_v7  ;;  %v358_v15 = vadd.f32 %v6722_v5, %v287_v8  ;;  %v290_v17 = vmul.f32 %v6717_v4, %v219_v63  ;;  %v291_v29 = vmul.f32 %v6717_v4, %v220_v18  ;;  %v224_v43 = vld [vmem:[%s8074_s0 + $0xf0] sm:$0xff]  ;;  %v195_v56 = vld [vmem:[%s8074_s0 + $0x8] sm:$0xff] }
  0x36   :  { %5779 = vmatprep.mubr.msk.f32.mxu0 %vm29_vm0, %v689_v49  ;;  %611 = vst.msk [vmem:[#allocation2 + $0x181] sm:$0xff] %vm29_vm0, %v547_v14  ;;  %vm420_vm5 = vcmp.ge.f32.partialorder %v356_v11, 0.0  ;;  %v484_v20 = vmul.f32 0.1, %v356_v11  ;;  %vm421_vm6 = vcmp.ge.f32.partialorder %v357_v12, 0.0  ;;  %v359_v2 = vadd.f32 %v6722_v5, %v288_v13  ;;  %v665_v13 = vld [vmem:[#allocation2 + $0x460] sm:$0xff] }
  0x37   :  { %v485_v21 = vmul.f32 0.1, %v357_v12  ;;  %vm422_vm7 = vcmp.ge.f32.partialorder %v358_v15, 0.0  ;;  %v486_v23 = vmul.f32 0.1, %v358_v15  ;;  %v360_v24 = vadd.f32 %v6722_v5, %v289_v16  ;;  %v7067_v16 = vld [vmem:[#allocation2 + $0x430] sm:$0xff] }
  0x38   :  { %v548_v26 = vsel %vm420_vm5, %v356_v11, %v484_v20  ;;  %v361_v28 = vadd.f32 %v6722_v5, %v290_v17  ;;  %vm423_vm8 = vcmp.ge.f32.partialorder %v359_v2, 0.0  ;;  %v487_v33 = vmul.f32 0.1, %v359_v2  ;;  %v197_v11 = vld [vmem:[%s8074_s0 + $0x18] sm:$0xff] }
  0x39   :  { %5780 = vmatmul.mubr.msk.f32.gmra.mrb[14].mxu0 %vm29_vm0, %v690_v0  ;;  %v549_v27 = vsel %vm421_vm6, %v357_v12, %v485_v21  ;;  %612 = vst.msk [vmem:[#allocation2 + $0x191] sm:$0xff] %vm29_vm0, %v548_v26  ;;  %v550_v32 = vsel %vm422_vm7, %v358_v15, %v486_v23  ;;  %v292_v34 = vmul.f32 %v6717_v4, %v221_v19  ;;  %vm424_vm9 = vcmp.ge.f32.partialorder %v360_v24, 0.0  ;;  %v198_v12 = vld [vmem:[%s8074_s0 + $0x20] sm:$0xff]  ;;  %v201_v26 = vld [vmem:[%s8074_s0 + $0x38] sm:$0xff] }
  0x3a   :  { %5784 = vmatprep.mubr.msk.f32.mxu0 %vm29_vm0, %v657_v9  ;;  %613 = vst.msk [vmem:[#allocation2 + $0x1a1] sm:$0xff] %vm29_vm0, %v549_v27  ;;  %614 = vst.msk [vmem:[#allocation2 + $0x1b1] sm:$0xff] %vm29_vm0, %v550_v32  ;;  %v488_v36 = vmul.f32 0.1, %v360_v24  ;;  %vm425_vm10 = vcmp.ge.f32.partialorder %v361_v28, 0.0  ;;  %v362_v37 = vadd.f32 %v6722_v5, %v291_v29  ;;  %v551_v39 = vsel %vm423_vm8, %v359_v2, %v487_v33  ;;  %v199_v2 = vld [vmem:[%s8074_s0 + $0x28] sm:$0xff] }
  0x3b   :  { %v489_v40 = vmul.f32 0.1, %v361_v28  ;;  %v363_v41 = vadd.f32 %v6722_v5, %v292_v34  ;;  %v293_v42 = vmul.f32 %v6717_v4, %v222_v30  ;;  %615 = vst.msk [vmem:[#allocation2 + $0x1c1] sm:$0xff] %vm29_vm0, %v551_v39  ;;  %v294_v47 = vmul.f32 %v6717_v4, %v223_v35  ;;  %v202_v34 = vld [vmem:[%s8074_s0 + $0x40] sm:$0xff]  ;;  %v7095_v35 = vld [vmem:[#allocation2 + $0x470] sm:$0xff] }
  0x3c   :  { %v552_v45 = vsel %vm424_vm9, %v360_v24, %v488_v36  ;;  %vm426_vm11 = vcmp.ge.f32.partialorder %v362_v37, 0.0  ;;  %v490_v46 = vmul.f32 0.1, %v362_v37  ;;  %v295_v54 = vmul.f32 %v6717_v4, %v224_v43  ;;  %v200_v24 = vld [vmem:[%s8074_s0 + $0x30] sm:$0xff]  ;;  %v7106_v43 = vld [vmem:[#allocation2 + $0x480] sm:$0xff] }
  0x3d   :  { %5785 = vmatmul.mubr.msk.f32.vlgmr.msra.gmra.mrb[0].mxu0 %vm29_vm0, %v658_v22  ;;  %616 = vst.msk [vmem:[#allocation2 + $0x1f1] sm:$0xff] %vm29_vm0, %v552_v45  ;;  %v553_v49 = vsel %vm425_vm10, %v361_v28, %v489_v40  ;;  %vm427_vm12 = vcmp.ge.f32.partialorder %v363_v41, 0.0  ;;  %v491_v50 = vmul.f32 0.1, %v363_v41  ;;  %v364_v51 = vadd.f32 %v6722_v5, %v293_v42  ;;  %v204_v42 = vld [vmem:[%s8074_s0 + $0x50] sm:$0xff] }
  0x3e   :  { %5809 = vmatpush3.msra.mxu0 %v6807_v3  ;;  %5787 = vmatprep.mubr.msk.f32.mxu0 %vm29_vm0, %v6984_v25  ;;  %v7018_v3 = vld [vmem:[#allocation2 + $0x400] sm:$0xff]  ;;  %617 = vst.msk [vmem:[#allocation2 + $0x201] sm:$0xff] %vm29_vm0, %v553_v49  ;;  %v554_v52 = vsel %vm426_vm11, %v362_v37, %v490_v46  ;;  %v365_v53 = vadd.f32 %v6722_v5, %v294_v47 }
  0x3f   :  { %5834 = vmatprep.subr.mxu0 %v6994_v31  ;;  %v296_v55 = vmul.f32 %v6717_v4, %v225_v44  ;;  %618 = vst.msk [vmem:[#allocation2 + $0x211] sm:$0xff] %vm29_vm0, %v554_v52  ;;  %v555_v59 = vsel %vm427_vm12, %v363_v41, %v491_v50  ;;  %vm428_vm13 = vcmp.ge.f32.partialorder %v364_v51, 0.0  ;;  %v492_v60 = vmul.f32 0.1, %v364_v51  ;;  %v203_v41 = vld [vmem:[%s8074_s0 + $0x48] sm:$0xff] }
  0x40   :  { %v265_v61 = vmul.f32 %v6717_v4, %v194_v48  ;;  %619 = vst.msk [vmem:[#allocation2 + $0x221] sm:$0xff] %vm29_vm0, %v555_v59  ;;  %vm429_vm14 = vcmp.ge.f32.partialorder %v365_v53, 0.0  ;;  %v493_v63 = vmul.f32 0.1, %v365_v53  ;;  %v366_v0 = vadd.f32 %v6722_v5, %v295_v54  ;;  %v205_v54 = vld [vmem:[%s8074_s0 + $0x58] sm:$0xff]  ;;  %v7126_v59 = vld [vmem:[#allocation2 + $0x4a0] sm:$0xff] }
  0x41   :  { %5788 = vmatmul.mubr.msk.f32.gmra.mrb[2].mxu0 %vm29_vm0, %v7008_v38  ;;  %v367_v6 = vadd.f32 %v6722_v5, %v296_v55  ;;  %v556_v7 = vsel %vm428_vm13, %v364_v51, %v492_v60  ;;  %v266_v9 = vmul.f32 %v6717_v4, %v195_v56  ;;  %v267_v10 = vmul.f32 %v6717_v4, %v196_v57  ;;  %v7123_v55 = vld [vmem:[#allocation2 + $0x490] sm:$0xff] }
  0x42   :  { %5790 = vmatprep.mubr.msk.f32.mxu0 %vm29_vm0, %v7018_v3  ;;  %v336_v8 = vadd.f32 %v6722_v5, %v265_v61  ;;  %620 = vst.msk [vmem:[#allocation2 + $0x231] sm:$0xff] %vm29_vm0, %v556_v7  ;;  %v557_v14 = vsel %vm429_vm14, %v365_v53, %v493_v63  ;;  %vm430_vm15 = vcmp.ge.f32.partialorder %v366_v0, 0.0  ;;  %v494_v15 = vmul.f32 0.1, %v366_v0 }
  0x43   :  { %vm431_vm1 = vcmp.ge.f32.partialorder %v367_v6, 0.0  ;;  %621 = vst.msk [vmem:[#allocation2 + $0x241] sm:$0xff] %vm29_vm0, %v557_v14  ;;  %v495_v17 = vmul.f32 0.1, %v367_v6  ;;  %v337_v19 = vadd.f32 %v6722_v5, %v266_v9  ;;  %v338_v21 = vadd.f32 %v6722_v5, %v267_v10  ;;  %v206_v9 = vld [vmem:[%s8074_s0 + $0x60] sm:$0xff]  ;;  %v207_v10 = vld [vmem:[%s8074_s0 + $0x68] sm:$0xff] }
  0x44   :  { %vm400_vm2 = vcmp.ge.f32.partialorder %v336_v8, 0.0  ;;  %v464_v18 = vmul.f32 0.1, %v336_v8  ;;  %v558_v20 = vsel %vm430_vm15, %v366_v0, %v494_v15  ;;  %v268_v22 = vmul.f32 %v6717_v4, %v197_v11  ;;  %v208_v14 = vld [vmem:[%s8074_s0 + $0x70] sm:$0xff] }
  0x45   :  { %5791 = vmatmul.mubr.msk.f32.gmra.mrb[4].mxu0 %vm29_vm0, %v7044_v58  ;;  %v269_v23 = vmul.f32 %v6717_v4, %v198_v12  ;;  %622 = vst.msk [vmem:[#allocation2 + $0x251] sm:$0xff] %vm29_vm0, %v558_v20  ;;  %v559_v27 = vsel %vm431_vm1, %v367_v6, %v495_v17  ;;  %vm401_vm3 = vcmp.ge.f32.partialorder %v337_v19, 0.0  ;;  %v465_v29 = vmul.f32 0.1, %v337_v19  ;;  %v7147_v15 = vld [vmem:[#allocation2 + $0x4b0] sm:$0xff]  ;;  %v7155_v20 = vld [vmem:[#allocation2 + $0x4c0] sm:$0xff] }
  0x46   :  { %5793 = vmatprep.mubr.msk.f32.mxu0 %vm29_vm0, %v7048_v62  ;;  %v528_v28 = vsel %vm400_vm2, %v336_v8, %v464_v18  ;;  %623 = vst.msk [vmem:[#allocation2 + $0x261] sm:$0xff] %vm29_vm0, %v559_v27  ;;  %vm402_vm4 = vcmp.ge.f32.partialorder %v338_v21, 0.0  ;;  %v466_v30 = vmul.f32 0.1, %v338_v21  ;;  %v339_v32 = vadd.f32 %v6722_v5, %v268_v22 }
  0x47   :  { %592 = vst.msk [vmem:[#allocation2 + $0x11] sm:$0xff] %vm29_vm0, %v528_v28  ;;  %v340_v33 = vadd.f32 %v6722_v5, %v269_v23  ;;  %v529_v36 = vsel %vm401_vm3, %v337_v19, %v465_v29  ;;  %v270_v37 = vmul.f32 %v6717_v4, %v199_v2  ;;  %v271_v39 = vmul.f32 %v6717_v4, %v200_v24  ;;  %v209_v19 = vld [vmem:[%s8074_s0 + $0x78] sm:$0xff] }
  0x48   :  { %v272_v40 = vmul.f32 %v6717_v4, %v201_v26  ;;  %593 = vst.msk [vmem:[#allocation2 + $0x21] sm:$0xff] %vm29_vm0, %v529_v36  ;;  %v530_v44 = vsel %vm402_vm4, %v338_v21, %v466_v30  ;;  %vm403_vm5 = vcmp.ge.f32.partialorder %v339_v32, 0.0  ;;  %v467_v45 = vmul.f32 0.1, %v339_v32 }
  0x49   :  { %5794 = vmatmul.mubr.msk.f32.gmra.mrb[6].mxu0 %vm29_vm0, %v7067_v16  ;;  %vm404_vm6 = vcmp.ge.f32.partialorder %v340_v33, 0.0  ;;  %594 = vst.msk [vmem:[#allocation2 + $0x31] sm:$0xff] %vm29_vm0, %v530_v44  ;;  %v468_v46 = vmul.f32 0.1, %v340_v33  ;;  %v341_v47 = vadd.f32 %v6722_v5, %v270_v37  ;;  %v342_v48 = vadd.f32 %v6722_v5, %v271_v39 }
  0x4a   :  { %5796 = vmatprep.mubr.msk.f32.mxu0 %vm29_vm0, %v665_v13  ;;  %v343_v49 = vadd.f32 %v6722_v5, %v272_v40  ;;  %v531_v50 = vsel %vm403_vm5, %v339_v32, %v467_v45  ;;  %v273_v51 = vmul.f32 %v6717_v4, %v202_v34  ;;  %v274_v52 = vmul.f32 %v6717_v4, %v203_v41  ;;  %v1079_v34 = vld [vmem:[#allocation2 + $0x3c1] sm:$0xff] }
  0x4b   :  { %v275_v53 = vmul.f32 %v6717_v4, %v204_v42  ;;  %595 = vst.msk [vmem:[#allocation2 + $0x41] sm:$0xff] %vm29_vm0, %v531_v50  ;;  %v532_v56 = vsel %vm404_vm6, %v340_v33, %v468_v46  ;;  %vm405_vm7 = vcmp.ge.f32.partialorder %v341_v47, 0.0  ;;  %v469_v57 = vmul.f32 0.1, %v341_v47  ;;  %v7169_v33 = vld [vmem:[#allocation2 + $0x4d0] sm:$0xff]  ;;  %v7185_v50 = vld [vmem:[#allocation2 + $0x3e1] sm:$0xff] }
  0x4c   :  { %vm406_vm8 = vcmp.ge.f32.partialorder %v342_v48, 0.0  ;;  %596 = vst.msk [vmem:[#allocation2 + $0x51] sm:$0xff] %vm29_vm0, %v532_v56  ;;  %v470_v60 = vmul.f32 0.1, %v342_v48  ;;  %vm407_vm9 = vcmp.ge.f32.partialorder %v343_v49, 0.0  ;;  %v344_v63 = vadd.f32 %v6722_v5, %v273_v51  ;;  %v7178_v46 = vld [vmem:[#allocation2 + $0x3d1] sm:$0xff] }
  0x4d   :  { %5797 = vmatmul.mubr.msk.f32.gmra.mrb[8].mxu0 %vm29_vm0, %v7095_v35  ;;  %v471_v61 = vmul.f32 0.1, %v343_v49  ;;  %v533_v0 = vsel %vm405_vm7, %v341_v47, %v469_v57  ;;  %v345_v6 = vadd.f32 %v6722_v5, %v274_v52  ;;  %v346_v7 = vadd.f32 %v6722_v5, %v275_v53  ;;  %v5161_v52 = vld [vmem:[%s8073_s3 + $0x20] sm:$0xff]  ;;  %v7199_v56 = vld [vmem:[#allocation2 + $0x3f1] sm:$0xff] }
  0x4e   :  { %5799 = vmatprep.mubr.msk.f32.mxu0 %vm29_vm0, %v7106_v43  ;;  %v276_v8 = vmul.f32 %v6717_v4, %v205_v54  ;;  %597 = vst.msk [vmem:[#allocation2 + $0x61] sm:$0xff] %vm29_vm0, %v533_v0  ;;  %v534_v11 = vsel %vm406_vm8, %v342_v48, %v470_v60  ;;  %vm408_vm10 = vcmp.ge.f32.partialorder %v344_v63, 0.0  ;;  %v472_v13 = vmul.f32 0.1, %v344_v63  ;;  %v257_v0 = vld [vmem:[%s8074_s0 + $0x1f8] sm:$0xff] }
  0x4f   :  { %v535_v12 = vsel %vm407_vm9, %v343_v49, %v471_v61  ;;  %598 = vst.msk [vmem:[#allocation2 + $0x71] sm:$0xff] %vm29_vm0, %v534_v11  ;;  %vm409_vm11 = vcmp.ge.f32.partialorder %v345_v6, 0.0  ;;  %v473_v17 = vmul.f32 0.1, %v345_v6  ;;  %vm410_vm12 = vcmp.ge.f32.partialorder %v346_v7, 0.0  ;;  %v249_v49 = vld [vmem:[%s8074_s0 + $0x1b8] sm:$0xff] }
  0x50   :  { %599 = vst.msk [vmem:[#allocation2 + $0x81] sm:$0xff] %vm29_vm0, %v535_v12  ;;  %v347_v18 = vadd.f32 %v6722_v5, %v276_v8  ;;  %v536_v21 = vsel %vm408_vm10, %v344_v63, %v472_v13  ;;  %v474_v22 = vmul.f32 0.1, %v346_v7  ;;  %v277_v23 = vmul.f32 %v6717_v4, %v206_v9  ;;  %v7216_v61 = vld [vmem:[#allocation2 + $0x431] sm:$0xff]  ;;  %v1087_v63 = vld [vmem:[#allocation2 + $0x461] sm:$0xff] }
  0x51   :  { %5800 = vmatmul.mubr.msk.f32.gmra.mrb[10].mxu0 %vm29_vm0, %v7123_v55  ;;  %v278_v2 = vmul.f32 %v6717_v4, %v207_v10  ;;  %600 = vst.msk [vmem:[#allocation2 + $0xb1] sm:$0xff] %vm29_vm0, %v536_v21  ;;  %v537_v24 = vsel %vm409_vm11, %v345_v6, %v473_v17  ;;  %v279_v27 = vmul.f32 %v6717_v4, %v208_v14  ;;  %v7224_v6 = vld [vmem:[#allocation2 + $0x471] sm:$0xff]  ;;  %v7229_v9 = vld [vmem:[#allocation2 + $0x481] sm:$0xff]  ;;  %v6580_v10 = vld [vmem:[%s8076_s2] ss:$0 sm:$0xff]  ;;  %vm2765_vm7 = vcmask 130048  }
  0x52   :  { %5802 = vmatprep.mubr.msk.f32.mxu0 %vm29_vm0, %v7126_v59  ;;  %vm411_vm13 = vcmp.ge.f32.partialorder %v347_v18, 0.0  ;;  %v475_v26 = vmul.f32 0.1, %v347_v18  ;;  %601 = vst.msk [vmem:[#allocation2 + $0xc1] sm:$0xff] %vm29_vm0, %v537_v24  ;;  %v538_v28 = vsel %vm410_vm12, %v346_v7, %v474_v22  ;;  %v348_v29 = vadd.f32 %v6722_v5, %v277_v23  ;;  %v6579_v7 = vld [vmem:[%s8075_s1] ss:$0 sm:$0xff] }
  0x53   :  { %v349_v30 = vadd.f32 %v6722_v5, %v278_v2  ;;  %v280_v32 = vmul.f32 %v6717_v4, %v209_v19  ;;  %602 = vst.msk [vmem:[#allocation2 + $0xd1] sm:$0xff] %vm29_vm0, %v538_v28  ;;  %v350_v37 = vadd.f32 %v6722_v5, %v279_v27  ;;  %v320_v51 = vmul.f32 %v6717_v4, %v249_v49  ;;  %v7201_v4 = vld [vmem:[#allocation2 + $0x401] sm:$0xff]  ;;  %v7238_v12 = vld [vmem:[#allocation2 + $0x491] sm:$0xff] }
  0x54   :  { %v539_v36 = vsel %vm411_vm13, %v347_v18, %v475_v26  ;;  %vm412_vm14 = vcmp.ge.f32.partialorder %v348_v29, 0.0  ;;  %v476_v39 = vmul.f32 0.1, %v348_v29  ;;  %v328_v8 = vmul.f32 %v6579_v7, %v257_v0  ;;  %v7240_v14 = vld [vmem:[#allocation2 + $0x4a1] sm:$0xff]  ;;  %v7247_v18 = vld [vmem:[#allocation2 + $0x4b1] sm:$0xff]  ;;  %2766 = vst.msk [vmem:[#allocation3] sm:$0xff] %vm2765_vm7, %v6581_v1 }
  0x55   :  { %5803 = vmatmul.mubr.msk.f32.gmra.mrb[12].mxu0 %vm29_vm0, %v7147_v15  ;;  %603 = vst.msk [vmem:[#allocation2 + $0xe1] sm:$0xff] %vm29_vm0, %v539_v36  ;;  %vm413_vm15 = vcmp.ge.f32.partialorder %v349_v30, 0.0  ;;  %v477_v40 = vmul.f32 0.1, %v349_v30  ;;  %vm414_vm1 = vcmp.ge.f32.partialorder %v350_v37, 0.0  ;;  %v351_v42 = vadd.f32 %v6722_v5, %v280_v32  ;;  %v7249_v19 = vld [vmem:[#allocation2 + $0x4c1] sm:$0xff] }
  0x56   :  { %5805 = vmatprep.mubr.msk.f32.mxu0 %vm29_vm0, %v7155_v20  ;;  %v478_v41 = vmul.f32 0.1, %v350_v37  ;;  %v540_v44 = vsel %vm412_vm14, %v348_v29, %v476_v39  ;;  %v391_v54 = vadd.f32 %v6722_v5, %v320_v51  ;;  %v7207_v5 = vld [vmem:[#allocation2 + $0x411] sm:$0xff]  ;;  %v399_v11 = vadd.f32 %v6580_v10, %v328_v8  ;;  %v1308_v2 = vld [vmem:[#allocation2 + $0x160] sm:$0xff]  ;;  %v5178_v27 = vld [vmem:[%s8073_s3 + $0x28] sm:$0xff]  ;;  %2769 = vst.msk [vmem:[#allocation3 + $0xa0] sm:$0xff] %vm2765_vm7, %v6581_v1 }
  0x57   :  { %v541_v45 = vsel %vm413_vm15, %v349_v30, %v477_v40  ;;  %604 = vst.msk [vmem:[#allocation2 + $0xf1] sm:$0xff] %vm29_vm0, %v540_v44  ;;  %vm415_vm2 = vcmp.ge.f32.partialorder %v351_v42, 0.0  ;;  %v479_v48 = vmul.f32 0.1, %v351_v42  ;;  %v7255_v21 = vld [vmem:[#allocation2 + $0x4d1] sm:$0xff]  ;;  %v1310_v29 = vld [vmem:[#allocation2 + $0x180] sm:$0xff] }
  0x58   :  { %605 = vst.msk [vmem:[#allocation2 + $0x101] sm:$0xff] %vm29_vm0, %v541_v45  ;;  %v542_v47 = vsel %vm414_vm1, %v350_v37, %v478_v41  ;;  %vm455_vm3 = vcmp.ge.f32.partialorder %v391_v54, 0.0  ;;  %v519_v57 = vmul.f32 0.1, %v391_v54  ;;  %v527_v13 = vmul.f32 0.1, %v399_v11 }
  0x59   :  { %5806 = vmatmul.mubr.msk.f32.gmra.mrb[14].mxu0 %vm29_vm0, %v7169_v33  ;;  %606 = vst.msk [vmem:[#allocation2 + $0x111] sm:$0xff] %vm29_vm0, %v542_v47  ;;  %v543_v53 = vsel %vm415_vm2, %v351_v42, %v479_v48  ;;  %vm463_vm4 = vcmp.ge.f32.partialorder %v399_v11, 0.0  ;;  %v1307_v22 = vld [vmem:[#allocation2 + $0x150] sm:$0xff]  ;;  %v233_v23 = vld [vmem:[%s8074_s0 + $0x138] sm:$0xff]  ;;  %v1312_v36 = vld [vmem:[#allocation2 + $0x1a0] sm:$0xff]  ;;  %vm2767_vm8 = vcmask 123904  }
  0x5a   :  { %5810 = vmatprep.mubr.msk.f32.mxu0 %vm29_vm0, %v1079_v34  ;;  %607 = vst.msk [vmem:[#allocation2 + $0x121] sm:$0xff] %vm29_vm0, %v543_v53  ;;  %v583_v60 = vsel %vm455_vm3, %v391_v54, %v519_v57  ;;  %v591_v17 = vsel %vm463_vm4, %v399_v11, %v527_v13  ;;  %v304_v24 = vmul.f32 %v6579_v7, %v233_v23  ;;  %v1309_v26 = vld [vmem:[#allocation2 + $0x170] sm:$0xff]  ;;  %v1314_v39 = vld [vmem:[#allocation2 + $0x1c0] sm:$0xff]  ;;  %v241_v41 = vld [vmem:[%s8074_s0 + $0x178] sm:$0xff]  ;;  %vm2777_vm9 = vcmask 122880  }
  0x5b   :  { %647 = vst.msk [vmem:[#allocation2 + $0x441] sm:$0xff] %vm29_vm0, %v583_v60  ;;  %655 = vst.msk [vmem:[#allocation2 + $0x4e1] sm:$0xff] %vm29_vm0, %v591_v17  ;;  %v1311_v32 = vld [vmem:[#allocation2 + $0x190] sm:$0xff]  ;;  %v1316_v42 = vld [vmem:[#allocation2 + $0x200] sm:$0xff]  ;;  %v312_v44 = vmul.f32 %v6579_v7, %v241_v41 }
  0x5c   :  { %v375_v28 = vadd.f32 %v6580_v10, %v304_v24  ;;  %v1313_v37 = vld [vmem:[#allocation2 + $0x1b0] sm:$0xff]  ;;  %v1318_v48 = vld [vmem:[#allocation2 + $0x220] sm:$0xff]  ;;  %2772 = vst.msk [vmem:[#allocation3 + $0x90] sm:$0xff] %vm2765_vm7, %v6581_v1  ;;  %2774 = vst.msk [vmem:[#allocation3 + $0x130] sm:$0xff] %vm2765_vm7, %v6581_v1 }
  0x5d   :  { %5811 = vmatmul.mubr.msk.f32.vlgmr.msra.gmra.mrb[0].mxu0 %vm29_vm0, %v7178_v46  ;;  %v1315_v40 = vld [vmem:[#allocation2 + $0x1f0] sm:$0xff]  ;;  %v383_v47 = vadd.f32 %v6580_v10, %v312_v44  ;;  %v1320_v53 = vld [vmem:[#allocation2 + $0x240] sm:$0xff]  ;;  %2768 = vst.msk [vmem:[#allocation3 + $0x8] sm:$0x3] %vm2767_vm8, %v6581_v1  ;;  %2770 = vst.msk [vmem:[#allocation3 + $0xa8] sm:$0x3] %vm2767_vm8, %v6581_v1 }
  0x5e   :  { %5835 = vmatpush3.msra.mxu0 %v6994_v31  ;;  %5813 = vmatprep.mubr.msk.f32.mxu0 %vm29_vm0, %v7185_v50  ;;  %v7210_v31 = vld [vmem:[#allocation2 + $0x421] sm:$0xff]  ;;  %v503_v30 = vmul.f32 0.1, %v375_v28  ;;  %vm439_vm5 = vcmp.ge.f32.partialorder %v375_v28, 0.0  ;;  %v1317_v45 = vld [vmem:[#allocation2 + $0x210] sm:$0xff] }
  0x5f   :  { %5860 = vmatprep.subr.mxu0 %v5161_v52  ;;  %v511_v49 = vmul.f32 0.1, %v383_v47  ;;  %v1319_v51 = vld [vmem:[#allocation2 + $0x230] sm:$0xff]  ;;  %vm447_vm6 = vcmp.ge.f32.partialorder %v383_v47, 0.0  ;;  %v1322_v57 = vld [vmem:[#allocation2 + $0x260] sm:$0xff] }
  0x60   :  { %v567_v34 = vsel %vm439_vm5, %v375_v28, %v503_v30  ;;  %v1321_v54 = vld [vmem:[#allocation2 + $0x250] sm:$0xff]  ;;  %v1537_v8 = vld [vmem:[#allocation2 + $0x41] sm:$0xff]  ;;  %2773 = vst.msk [vmem:[#allocation3 + $0x98] sm:$0x3] %vm2767_vm8, %v6581_v1  ;;  %2775 = vst.msk [vmem:[#allocation3 + $0x138] sm:$0x3] %vm2767_vm8, %v6581_v1 }
  0x61   :  { %5814 = vmatmul.mubr.msk.f32.gmra.mrb[2].mxu0 %vm29_vm0, %v7199_v56  ;;  %631 = vst.msk [vmem:[#allocation2 + $0x301] sm:$0xff] %vm29_vm0, %v567_v34  ;;  %v1534_v60 = vld [vmem:[#allocation2 + $0x11] sm:$0xff]  ;;  %v1539_v11 = vld [vmem:[#allocation2 + $0x61] sm:$0xff] }
  0x62   :  { %5816 = vmatprep.mubr.msk.f32.mxu0 %vm29_vm0, %v7201_v4  ;;  %v1536_v0 = vld [vmem:[#allocation2 + $0x31] sm:$0xff]  ;;  %v1541_v17 = vld [vmem:[#allocation2 + $0x81] sm:$0xff]  ;;  %2778 = vst.msk [vmem:[#allocation3 + $0x10] sm:$0x1] %vm2777_vm9, %v6581_v1  ;;  %2779 = vst.msk [vmem:[#allocation3 + $0x20] sm:$0x1] %vm2777_vm9, %v6581_v1 }
  0x63   :  { %v5195_v7 = vld [vmem:[%s8073_s3 + $0x30] sm:$0xff]  ;;  %v1543_v23 = vld [vmem:[#allocation2 + $0xc1] sm:$0xff]  ;;  %2780 = vst.msk [vmem:[#allocation3 + $0x30] sm:$0x1] %vm2777_vm9, %v6581_v1  ;;  %2781 = vst.msk [vmem:[#allocation3 + $0x40] sm:$0x1] %vm2777_vm9, %v6581_v1 }
  0x64   :  { %v1538_v10 = vld [vmem:[#allocation2 + $0x51] sm:$0xff]  ;;  %v1545_v24 = vld [vmem:[#allocation2 + $0xe1] sm:$0xff]  ;;  %2782 = vst.msk [vmem:[#allocation3 + $0x50] sm:$0x1] %vm2777_vm9, %v6581_v1  ;;  %2783 = vst.msk [vmem:[#allocation3 + $0x60] sm:$0x1] %vm2777_vm9, %v6581_v1 }
  0x65   :  { %5817 = vmatmul.mubr.msk.f32.gmra.mrb[4].mxu0 %vm29_vm0, %v7207_v5  ;;  %v1540_v13 = vld [vmem:[#allocation2 + $0x71] sm:$0xff]  ;;  %2784 = vst.msk [vmem:[#allocation3 + $0x70] sm:$0x1] %vm2777_vm9, %v6581_v1  ;;  %2785 = vst.msk [vmem:[#allocation3 + $0x80] sm:$0x1] %vm2777_vm9, %v6581_v1 }
  0x66   :  { %5819 = vmatprep.mubr.msk.f32.mxu0 %vm29_vm0, %v7210_v31  ;;  %v1548_v28 = vld [vmem:[#allocation2 + $0x111] sm:$0xff]  ;;  %2786 = vst.msk [vmem:[#allocation3 + $0xb0] sm:$0x1] %vm2777_vm9, %v6581_v1  ;;  %2787 = vst.msk [vmem:[#allocation3 + $0xc0] sm:$0x1] %vm2777_vm9, %v6581_v1 }
  0x67   :  { %v1761_v30 = vld [vmem:[#allocation2 + $0x151] sm:$0xff]  ;;  %2788 = vst.msk [vmem:[#allocation3 + $0xd0] sm:$0x1] %vm2777_vm9, %v6581_v1  ;;  %2789 = vst.msk [vmem:[#allocation3 + $0xe0] sm:$0x1] %vm2777_vm9, %v6581_v1 }
  0x68   :  { %v1763_v34 = vld [vmem:[#allocation2 + $0x171] sm:$0xff]  ;;  %2790 = vst.msk [vmem:[#allocation3 + $0xf0] sm:$0x1] %vm2777_vm9, %v6581_v1  ;;  %2791 = vst.msk [vmem:[#allocation3 + $0x100] sm:$0x1] %vm2777_vm9, %v6581_v1 }
  0x69   :  { %5820 = vmatmul.mubr.msk.f32.gmra.mrb[6].mxu0 %vm29_vm0, %v7216_v61  ;;  %v1767_v41 = vld [vmem:[#allocation2 + $0x1b1] sm:$0xff]  ;;  %2792 = vst.msk [vmem:[#allocation3 + $0x110] sm:$0x1] %vm2777_vm9, %v6581_v1  ;;  %2793 = vst.msk [vmem:[#allocation3 + $0x120] sm:$0x1] %vm2777_vm9, %v6581_v1 }
  0x6a   :  { %5822 = vmatprep.mubr.msk.f32.mxu0 %vm29_vm0, %v1087_v63  ;;  %v1535_v63 = vld [vmem:[#allocation2 + $0x21] sm:$0xff]  ;;  %v1769_v44 = vld [vmem:[#allocation2 + $0x1f1] sm:$0xff]  ;;  %2794 = vst.msk [vmem:[#allocation3 + $0x19] sm:$0x1] %vm2777_vm9, %v6581_v1  ;;  %2795 = vst.msk [vmem:[#allocation3 + $0x29] sm:$0x1] %vm2777_vm9, %v6581_v1 }
  0x6b   :  { %2796 = vst.msk [vmem:[#allocation3 + $0x39] sm:$0x1] %vm2777_vm9, %v6581_v1  ;;  %2797 = vst.msk [vmem:[#allocation3 + $0x49] sm:$0x1] %vm2777_vm9, %v6581_v1 }
  0x6c   :  { %2798 = vst.msk [vmem:[#allocation3 + $0x59] sm:$0x1] %vm2777_vm9, %v6581_v1  ;;  %2799 = vst.msk [vmem:[#allocation3 + $0x69] sm:$0x1] %vm2777_vm9, %v6581_v1 }
  0x6d   :  { %5823 = vmatmul.mubr.msk.f32.gmra.mrb[8].mxu0 %vm29_vm0, %v7224_v6  ;;  %2800 = vst.msk [vmem:[#allocation3 + $0x79] sm:$0x1] %vm2777_vm9, %v6581_v1  ;;  %2801 = vst.msk [vmem:[#allocation3 + $0x89] sm:$0x1] %vm2777_vm9, %v6581_v1 }
  0x6e   :  { %5825 = vmatprep.mubr.msk.f32.mxu0 %vm29_vm0, %v7229_v9  ;;  %2802 = vst.msk [vmem:[#allocation3 + $0xb9] sm:$0x1] %vm2777_vm9, %v6581_v1  ;;  %2803 = vst.msk [vmem:[#allocation3 + $0xc9] sm:$0x1] %vm2777_vm9, %v6581_v1 }
  0x6f   :  { %2804 = vst.msk [vmem:[#allocation3 + $0xd9] sm:$0x1] %vm2777_vm9, %v6581_v1  ;;  %2805 = vst.msk [vmem:[#allocation3 + $0xe9] sm:$0x1] %vm2777_vm9, %v6581_v1 }
  0x70   :  { %2806 = vst.msk [vmem:[#allocation3 + $0xf9] sm:$0x1] %vm2777_vm9, %v6581_v1  ;;  %2807 = vst.msk [vmem:[#allocation3 + $0x109] sm:$0x1] %vm2777_vm9, %v6581_v1 }
  0x71   :  { %5826 = vmatmul.mubr.msk.f32.gmra.mrb[10].mxu0 %vm29_vm0, %v7238_v12  ;;  %2808 = vst.msk [vmem:[#allocation3 + $0x119] sm:$0x1] %vm2777_vm9, %v6581_v1  ;;  %2809 = vst.msk [vmem:[#allocation3 + $0x129] sm:$0x1] %vm2777_vm9, %v6581_v1  ;;  %v2842_v1 = vld [vmem:[%s8077_s6] sm:$0xff] }
  0x72   :  { %5828 = vmatprep.mubr.msk.f32.mxu0 %vm29_vm0, %v7240_v14 }
  0x75   :  { %5829 = vmatmul.mubr.msk.f32.gmra.mrb[12].mxu0 %vm29_vm0, %v7247_v18 }
  0x76   :  { %5831 = vmatprep.mubr.msk.f32.mxu0 %vm29_vm0, %v7249_v19 }
  0x79   :  { %5832 = vmatmul.mubr.msk.f32.gmra.mrb[14].mxu0 %vm29_vm0, %v7255_v21 }
  0x7a   :  { %5836 = vmatprep.mubr.msk.f32.mxu0 %vm29_vm0, %v1307_v22  ;;  %v1542_v22 = vld [vmem:[#allocation2 + $0xb1] sm:$0xff] }
  0x7d   :  { %5837 = vmatmul.mubr.msk.f32.vlgmr.msra.gmra.mrb[0].mxu0 %vm29_vm0, %v1308_v2  ;;  %v1544_v2 = vld [vmem:[#allocation2 + $0xd1] sm:$0xff] }
  0x7e   :  { %5861 = vmatpush3.msra.mxu0 %v5161_v52  ;;  %5839 = vmatprep.mubr.msk.f32.mxu0 %vm29_vm0, %v1309_v26  ;;  %v575_v52 = vsel %vm447_vm6, %v383_v47, %v511_v49  ;;  %v1546_v26 = vld [vmem:[#allocation2 + $0xf1] sm:$0xff] }
  0x7f   :  { %5886 = vmatprep.subr.mxu0 %v5178_v27  ;;  %639 = vst.msk [vmem:[#allocation2 + $0x3a1] sm:$0xff] %vm29_vm0, %v575_v52  ;;  %v1771_v47 = vld [vmem:[#allocation2 + $0x211] sm:$0xff] }
  0x80   :  { %v1773_v49 = vld [vmem:[#allocation2 + $0x231] sm:$0xff] }
  0x81   :  { %5840 = vmatmul.mubr.msk.f32.gmra.mrb[2].mxu0 %vm29_vm0, %v1310_v29  ;;  %v1549_v29 = vld [vmem:[#allocation2 + $0x121] sm:$0xff]  ;;  %v1775_v52 = vld [vmem:[#allocation2 + $0x251] sm:$0xff] }
  0x82   :  { %5842 = vmatprep.mubr.msk.f32.mxu0 %vm29_vm0, %v1311_v32  ;;  %v1762_v32 = vld [vmem:[#allocation2 + $0x161] sm:$0xff] }
  0x85   :  { %5843 = vmatmul.mubr.msk.f32.gmra.mrb[4].mxu0 %vm29_vm0, %v1312_v36  ;;  %v5212_v36 = vld [vmem:[%s8073_s3 + $0x38] sm:$0xff] }
  0x86   :  { %5845 = vmatprep.mubr.msk.f32.mxu0 %vm29_vm0, %v1313_v37  ;;  %v1764_v37 = vld [vmem:[#allocation2 + $0x181] sm:$0xff] }
  0x89   :  { %5846 = vmatmul.mubr.msk.f32.gmra.mrb[6].mxu0 %vm29_vm0, %v1314_v39  ;;  %v1765_v39 = vld [vmem:[#allocation2 + $0x191] sm:$0xff] }
  0x8a   :  { %5848 = vmatprep.mubr.msk.f32.mxu0 %vm29_vm0, %v1315_v40  ;;  %v1766_v40 = vld [vmem:[#allocation2 + $0x1a1] sm:$0xff] }
  0x8d   :  { %5849 = vmatmul.mubr.msk.f32.gmra.mrb[8].mxu0 %vm29_vm0, %v1316_v42  ;;  %v1768_v42 = vld [vmem:[#allocation2 + $0x1c1] sm:$0xff] }
  0x8e   :  { %5851 = vmatprep.mubr.msk.f32.mxu0 %vm29_vm0, %v1317_v45  ;;  %v1770_v45 = vld [vmem:[#allocation2 + $0x201] sm:$0xff] }
  0x91   :  { %5852 = vmatmul.mubr.msk.f32.gmra.mrb[10].mxu0 %vm29_vm0, %v1318_v48  ;;  %v1772_v48 = vld [vmem:[#allocation2 + $0x221] sm:$0xff] }
  0x92   :  { %5854 = vmatprep.mubr.msk.f32.mxu0 %vm29_vm0, %v1319_v51  ;;  %v1774_v51 = vld [vmem:[#allocation2 + $0x241] sm:$0xff] }
  0x95   :  { %5855 = vmatmul.mubr.msk.f32.gmra.mrb[12].mxu0 %vm29_vm0, %v1320_v53  ;;  %v1776_v53 = vld [vmem:[#allocation2 + $0x261] sm:$0xff] }
  0x96   :  { %5857 = vmatprep.mubr.msk.f32.mxu0 %vm29_vm0, %v1321_v54  ;;  %v1989_v54 = vld [vmem:[#allocation2 + $0x3d0] sm:$0xff] }
  0x99   :  { %5858 = vmatmul.mubr.msk.f32.gmra.mrb[14].mxu0 %vm29_vm0, %v1322_v57  ;;  %v5229_v57 = vld [vmem:[%s8073_s3 + $0x40] sm:$0xff] }
  0x9a   :  { %5862 = vmatprep.mubr.msk.f32.mxu0 %vm29_vm0, %v1534_v60  ;;  %v1996_v60 = vld [vmem:[#allocation2 + $0x440] sm:$0xff] }
  0x9d   :  { %5863 = vmatmul.mubr.msk.f32.vlgmr.msra.gmra.mrb[0].mxu0 %vm29_vm0, %v1535_v63  ;;  %v2229_v63 = vld [vmem:[#allocation2 + $0x371] sm:$0xff] }
  0x9e   :  { %5887 = vmatpush3.msra.mxu0 %v5178_v27  ;;  %5865 = vmatprep.mubr.msk.f32.mxu0 %vm29_vm0, %v1536_v0  ;;  %v1547_v27 = vld [vmem:[#allocation2 + $0x101] sm:$0xff] }
  0x9f   :  { %5912 = vmatprep.subr.mxu0 %v5195_v7  ;;  %v2230_v0 = vld [vmem:[#allocation2 + $0x381] sm:$0xff] }
  0xa1   :  { %5866 = vmatmul.mubr.msk.f32.gmra.mrb[2].mxu0 %vm29_vm0, %v1537_v8  ;;  %v2232_v8 = vld [vmem:[#allocation2 + $0x3a1] sm:$0xff] }
  0xa2   :  { %5868 = vmatprep.mubr.msk.f32.mxu0 %vm29_vm0, %v1538_v10  ;;  %v2451_v10 = vld [vmem:[#allocation2 + $0x441] sm:$0xff] }
  0xa5   :  { %5869 = vmatmul.mubr.msk.f32.gmra.mrb[4].mxu0 %vm29_vm0, %v1539_v11 }
  0xa6   :  { %5871 = vmatprep.mubr.msk.f32.mxu0 %vm29_vm0, %v1540_v13 }
  0xa9   :  { %5872 = vmatmul.mubr.msk.f32.gmra.mrb[6].mxu0 %vm29_vm0, %v1541_v17 }
  0xaa   :  { %5874 = vmatprep.mubr.msk.f32.mxu0 %vm29_vm0, %v1542_v22 }
  0xad   :  { %5875 = vmatmul.mubr.msk.f32.gmra.mrb[8].mxu0 %vm29_vm0, %v1543_v23 }
  0xae   :  { %5877 = vmatprep.mubr.msk.f32.mxu0 %vm29_vm0, %v1544_v2 }
  0xb1   :  { %5878 = vmatmul.mubr.msk.f32.gmra.mrb[10].mxu0 %vm29_vm0, %v1545_v24 }
  0xb2   :  { %5880 = vmatprep.mubr.msk.f32.mxu0 %vm29_vm0, %v1546_v26 }
  0xb5   :  { %5881 = vmatmul.mubr.msk.f32.gmra.mrb[12].mxu0 %vm29_vm0, %v1547_v27 }
  0xb6   :  { %5883 = vmatprep.mubr.msk.f32.mxu0 %vm29_vm0, %v1548_v28 }
  0xb9   :  { %5884 = vmatmul.mubr.msk.f32.gmra.mrb[14].mxu0 %vm29_vm0, %v1549_v29 }
  0xba   :  { %5888 = vmatprep.mubr.msk.f32.mxu0 %vm29_vm0, %v1761_v30 }
  0xbd   :  { %5889 = vmatmul.mubr.msk.f32.vlgmr.msra.gmra.mrb[0].mxu0 %vm29_vm0, %v1762_v32 }
  0xbe   :  { %5913 = vmatpush3.msra.mxu0 %v5195_v7  ;;  %5891 = vmatprep.mubr.msk.f32.mxu0 %vm29_vm0, %v1763_v34  ;;  %v2231_v7 = vld [vmem:[#allocation2 + $0x391] sm:$0xff] }
  0xbf   :  { %5938 = vmatprep.subr.mxu0 %v5212_v36 }
  0xc1   :  { %5892 = vmatmul.mubr.msk.f32.gmra.mrb[2].mxu0 %vm29_vm0, %v1764_v37 }
  0xc2   :  { %5894 = vmatprep.mubr.msk.f32.mxu0 %vm29_vm0, %v1765_v39 }
  0xc5   :  { %5895 = vmatmul.mubr.msk.f32.gmra.mrb[4].mxu0 %vm29_vm0, %v1766_v40 }
  0xc6   :  { %5897 = vmatprep.mubr.msk.f32.mxu0 %vm29_vm0, %v1767_v41 }
  0xc9   :  { %5898 = vmatmul.mubr.msk.f32.gmra.mrb[6].mxu0 %vm29_vm0, %v1768_v42 }
  0xca   :  { %5900 = vmatprep.mubr.msk.f32.mxu0 %vm29_vm0, %v1769_v44 }
  0xcd   :  { %5901 = vmatmul.mubr.msk.f32.gmra.mrb[8].mxu0 %vm29_vm0, %v1770_v45 }
  0xce   :  { %5903 = vmatprep.mubr.msk.f32.mxu0 %vm29_vm0, %v1771_v47 }
  0xd1   :  { %5904 = vmatmul.mubr.msk.f32.gmra.mrb[10].mxu0 %vm29_vm0, %v1772_v48 }
  0xd2   :  { %5906 = vmatprep.mubr.msk.f32.mxu0 %vm29_vm0, %v1773_v49 }
  0xd5   :  { %5907 = vmatmul.mubr.msk.f32.gmra.mrb[12].mxu0 %vm29_vm0, %v1774_v51 }
  0xd6   :  { %5909 = vmatprep.mubr.msk.f32.mxu0 %vm29_vm0, %v1775_v52 }
  0xd9   :  { %5910 = vmatmul.mubr.msk.f32.gmra.mrb[14].mxu0 %vm29_vm0, %v1776_v53 }
  0xda   :  { %5914 = vmatprep.mubr.msk.f32.mxu0 %vm29_vm0, %v1989_v54 }
  0xdd   :  { %5915 = vmatmul.mubr.msk.f32.vlgmr.msra.gmra.mrb[0].mxu0 %vm29_vm0, %v6984_v25  ;;  %v2004_v25 = vld [vmem:[#allocation2 + $0x4e0] sm:$0xff] }
  0xde   :  { %5939 = vmatpush3.msra.mxu0 %v5212_v36  ;;  %5917 = vmatprep.mubr.msk.f32.mxu0 %vm29_vm0, %v7008_v38  ;;  %v2217_v38 = vld [vmem:[#allocation2 + $0x291] sm:$0xff] }
  0xdf   :  { %5964 = vmatprep.subr.mxu0 %v5229_v57 }
  0xe1   :  { %5918 = vmatmul.mubr.msk.f32.gmra.mrb[2].mxu0 %vm29_vm0, %v7018_v3  ;;  %v2218_v3 = vld [vmem:[#allocation2 + $0x2a1] sm:$0xff] }
  0xe2   :  { %5920 = vmatprep.mubr.msk.f32.mxu0 %vm29_vm0, %v7044_v58  ;;  %v2219_v58 = vld [vmem:[#allocation2 + $0x2b1] sm:$0xff] }
  0xe5   :  { %5921 = vmatmul.mubr.msk.f32.gmra.mrb[4].mxu0 %vm29_vm0, %v7048_v62  ;;  %v2220_v62 = vld [vmem:[#allocation2 + $0x2c1] sm:$0xff] }
  0xe6   :  { %5923 = vmatprep.mubr.msk.f32.mxu0 %vm29_vm0, %v7067_v16  ;;  %v2221_v16 = vld [vmem:[#allocation2 + $0x2d1] sm:$0xff] }
  0xe9   :  { %5924 = vmatmul.mubr.msk.f32.gmra.mrb[6].mxu0 %vm29_vm0, %v1996_v60 }
  0xea   :  { %5926 = vmatprep.mubr.msk.f32.mxu0 %vm29_vm0, %v7095_v35  ;;  %v2222_v35 = vld [vmem:[#allocation2 + $0x2e1] sm:$0xff] }
  0xed   :  { %5927 = vmatmul.mubr.msk.f32.gmra.mrb[8].mxu0 %vm29_vm0, %v7106_v43  ;;  %v2223_v43 = vld [vmem:[#allocation2 + $0x2f1] sm:$0xff] }
  0xee   :  { %5929 = vmatprep.mubr.msk.f32.mxu0 %vm29_vm0, %v7123_v55  ;;  %v2224_v55 = vld [vmem:[#allocation2 + $0x301] sm:$0xff] }
  0xf1   :  { %5930 = vmatmul.mubr.msk.f32.gmra.mrb[10].mxu0 %vm29_vm0, %v7126_v59  ;;  %v2225_v59 = vld [vmem:[#allocation2 + $0x331] sm:$0xff] }
  0xf2   :  { %5932 = vmatprep.mubr.msk.f32.mxu0 %vm29_vm0, %v7147_v15  ;;  %v2226_v15 = vld [vmem:[#allocation2 + $0x341] sm:$0xff] }
  0xf5   :  { %5933 = vmatmul.mubr.msk.f32.gmra.mrb[12].mxu0 %vm29_vm0, %v7155_v20  ;;  %v2227_v20 = vld [vmem:[#allocation2 + $0x351] sm:$0xff] }
  0xf6   :  { %5935 = vmatprep.mubr.msk.f32.mxu0 %vm29_vm0, %v7169_v33  ;;  %v2228_v33 = vld [vmem:[#allocation2 + $0x361] sm:$0xff] }
  0xf9   :  { %5936 = vmatmul.mubr.msk.f32.gmra.mrb[14].mxu0 %vm29_vm0, %v2004_v25 }
  0xfa   :  { %5940 = vmatprep.mubr.msk.f32.mxu0 %vm29_vm0, %v2217_v38 }
  0xfd   :  { %5941 = vmatmul.mubr.msk.f32.vlgmr.msra.gmra.mrb[0].mxu0 %vm29_vm0, %v2218_v3 }
  0xfe   :  { %5965 = vmatpush3.msra.mxu0 %v5229_v57  ;;  %5943 = vmatprep.mubr.msk.f32.mxu0 %vm29_vm0, %v2219_v58 }
 0x101   :  { %5944 = vmatmul.mubr.msk.f32.gmra.mrb[2].mxu0 %vm29_vm0, %v2220_v62 }
 0x102   :  { %5946 = vmatprep.mubr.msk.f32.mxu0 %vm29_vm0, %v2221_v16 }
 0x105   :  { %5947 = vmatmul.mubr.msk.f32.gmra.mrb[4].mxu0 %vm29_vm0, %v2222_v35 }
 0x106   :  { %5949 = vmatprep.mubr.msk.f32.mxu0 %vm29_vm0, %v2223_v43 }
 0x109   :  { %5950 = vmatmul.mubr.msk.f32.gmra.mrb[6].mxu0 %vm29_vm0, %v2224_v55 }
 0x10a   :  { %5952 = vmatprep.mubr.msk.f32.mxu0 %vm29_vm0, %v2225_v59 }
 0x10d   :  { %5953 = vmatmul.mubr.msk.f32.gmra.mrb[8].mxu0 %vm29_vm0, %v2226_v15 }
 0x10e   :  { %5955 = vmatprep.mubr.msk.f32.mxu0 %vm29_vm0, %v2227_v20 }
 0x111   :  { %5956 = vmatmul.mubr.msk.f32.gmra.mrb[10].mxu0 %vm29_vm0, %v2228_v33 }
 0x112   :  { %5958 = vmatprep.mubr.msk.f32.mxu0 %vm29_vm0, %v2229_v63 }
 0x115   :  { %5959 = vmatmul.mubr.msk.f32.gmra.mrb[12].mxu0 %vm29_vm0, %v2230_v0 }
 0x116   :  { %5961 = vmatprep.mubr.msk.f32.mxu0 %vm29_vm0, %v2231_v7 }
 0x119   :  { %5962 = vmatmul.mubr.msk.f32.gmra.mrb[14].mxu0 %vm29_vm0, %v2232_v8 }
 0x11a   :  { %5966 = vmatprep.mubr.msk.f32.mxu0 %vm29_vm0, %v7178_v46  ;;  %v2459_v46 = vld [vmem:[#allocation2 + $0x4e1] sm:$0xff] }
 0x11d   :  { %5967 = vmatmul.mubr.msk.f32.vlgmr.msra.gmra.mrb[0].mxu0 %vm29_vm0, %v7185_v50  ;;  %v5248_v50 = vld [vmem:[%s8077_s6 + $0x10] sm:$0xff] }
 0x11e   :  { %5969 = vmatprep.mubr.msk.f32.mxu0 %vm29_vm0, %v7199_v56  ;;  %v5249_v56 = vld [vmem:[%s8077_s6 + $0x18] sm:$0xff] }
 0x121   :  { %5970 = vmatmul.mubr.msk.f32.gmra.mrb[2].mxu0 %vm29_vm0, %v7201_v4  ;;  %v6268_v4 = vpack.c.bf16 %v5249_v56, %v5248_v50 }
 0x122   :  { %5972 = vmatprep.mubr.msk.f32.mxu0 %vm29_vm0, %v7207_v5  ;;  %v2844_v5 = vld [vmem:[#allocation3 + $0x1] sm:$0xff] }
 0x123   :  { %6269 = vmatprep.subr.bf16.mxu0 %v6268_v4  ;;  %6304 = vmatprep.subr.bf16.mxu1 %v6268_v4 }
 0x124   :  { %6271 = vmatpush3.bf16.msra.mxu0 %v6268_v4  ;;  %6305 = vmatpush3.bf16.msra.mxu1 %v6268_v4 }
 0x125   :  { %5973 = vmatmul.mubr.msk.f32.gmra.mrb[4].mxu0 %vm29_vm0, %v7210_v31  ;;  %v2852_v31 = vld [vmem:[#allocation3 + $0xa1] sm:$0xff] }
 0x126   :  { %5975 = vmatprep.mubr.msk.f32.mxu0 %vm29_vm0, %v7216_v61  ;;  %6006 = vmatprep.mubr.msk.f32.mxu1 %vm2765_vm7, %v2852_v31  ;;  %v2843_v61 = vld [vmem:[%s8077_s6 + $0x8] sm:$0xff] }
 0x129   :  { %5976 = vmatmul.mubr.msk.f32.gmra.mrb[6].mxu0 %vm29_vm0, %v2451_v10 }
 0x12a   :  { %5978 = vmatprep.mubr.msk.f32.mxu0 %vm29_vm0, %v7224_v6  ;;  %v7492_v6 = vpack.c.bf16 %v2843_v61, %v2842_v1 }
 0x12c   :  { %6273 = vmatprep.subr.bf16.mxu1 %v7492_v6 }
 0x12d   :  { %5979 = vmatmul.mubr.msk.f32.gmra.mrb[8].mxu0 %vm29_vm0, %v7229_v9  ;;  %v7498_v9 = vld [vmem:[%s8078_s4] ss:$0 sm:$0xff] }
 0x12e   :  { %5981 = vmatprep.mubr.msk.f32.mxu0 %vm29_vm0, %v7238_v12 }
 0x131   :  { %5982 = vmatmul.mubr.msk.f32.gmra.mrb[10].mxu0 %vm29_vm0, %v7240_v14  ;;  %v7503_v14 = vld [vmem:[%s8079_s5] ss:$0 sm:$0xff] }
 0x132   :  { %5984 = vmatprep.mubr.msk.f32.mxu0 %vm29_vm0, %v7247_v18 }
 0x135   :  { %5985 = vmatmul.mubr.msk.f32.gmra.mrb[12].mxu0 %vm29_vm0, %v7249_v19 }
 0x136   :  { %5987 = vmatprep.mubr.msk.f32.mxu0 %vm29_vm0, %v7255_v21 }
 0x139   :  { %5988 = vmatmul.mubr.msk.f32.gmra.mrb[14].mxu0 %vm29_vm0, %v2459_v46 }
 0x13a   :  { %5994 = vmatprep.mubr.msk.f32.mxu0 %vm2765_vm7, %v2844_v5 }
 0x1f0   :  { %v5968_v12 = vpop.f32.mrb[0].mxu0 }
 0x1f1   :  { %v2679_v18 = vmul.f32 %v5968_v12, %v7498_v9  ;;  %v2576_v19 = vpop.f32.mrb[1].mxu0 }
 0x1f2   :  { %v2678_v21 = vmul.f32 %v7498_v9, %v2576_v19 }
 0x1f3   :  { %v2702_v11 = vadd.f32 %v7503_v14, %v2679_v18 }
 0x1f4   :  { %v2701_v13 = vadd.f32 %v7503_v14, %v2678_v21  ;;  %v5971_v17 = vpop.f32.mrb[2].mxu0 }
 0x1f5   :  { %vm2718_vm10 = vcmp.ge.f32.partialorder %v2702_v11, 0.0  ;;  %v2734_v22 = vmul.f32 0.1, %v2702_v11  ;;  %v2681_v23 = vmul.f32 %v5971_v17, %v7498_v9  ;;  %v2586_v2 = vpop.f32.mrb[3].mxu0 }
 0x1f6   :  { %vm2717_vm11 = vcmp.ge.f32.partialorder %v2701_v13, 0.0  ;;  %v2733_v24 = vmul.f32 0.1, %v2701_v13  ;;  %v2680_v26 = vmul.f32 %v7498_v9, %v2586_v2 }
 0x1f7   :  { %v2750_v27 = vsel %vm2718_vm10, %v2702_v11, %v2734_v22  ;;  %v2704_v28 = vadd.f32 %v7503_v14, %v2681_v23 }
 0x1f8   :  { %2811 = vst.msk [vmem:[#allocation3 + $0x21] sm:$0xff] %vm2765_vm7, %v2750_v27  ;;  %v2749_v29 = vsel %vm2717_vm11, %v2701_v13, %v2733_v24  ;;  %v2703_v30 = vadd.f32 %v7503_v14, %v2680_v26  ;;  %v5974_v32 = vpop.f32.mrb[4].mxu0 }
 0x1f9   :  { %2810 = vst.msk [vmem:[#allocation3 + $0x11] sm:$0xff] %vm2765_vm7, %v2749_v29  ;;  %vm2720_vm12 = vcmp.ge.f32.partialorder %v2704_v28, 0.0  ;;  %v2736_v34 = vmul.f32 0.1, %v2704_v28  ;;  %v2683_v36 = vmul.f32 %v5974_v32, %v7498_v9  ;;  %v2596_v37 = vpop.f32.mrb[5].mxu0  ;;  %v5283_v29 = vld [vmem:[%s8077_s6 + $0x28] sm:$0xff] }
 0x1fa   :  { %vm2719_vm13 = vcmp.ge.f32.partialorder %v2703_v30, 0.0  ;;  %v2735_v39 = vmul.f32 0.1, %v2703_v30  ;;  %v2682_v40 = vmul.f32 %v7498_v9, %v2596_v37 }
 0x1fb   :  { %v2752_v41 = vsel %vm2720_vm12, %v2704_v28, %v2736_v34  ;;  %v2706_v42 = vadd.f32 %v7503_v14, %v2683_v36  ;;  %v5282_v28 = vld [vmem:[%s8077_s6 + $0x20] sm:$0xff] }
 0x1fc   :  { %2813 = vst.msk [vmem:[#allocation3 + $0x41] sm:$0xff] %vm2765_vm7, %v2752_v41  ;;  %v2751_v44 = vsel %vm2719_vm13, %v2703_v30, %v2735_v39  ;;  %v2705_v45 = vadd.f32 %v7503_v14, %v2682_v40  ;;  %v5977_v47 = vpop.f32.mrb[6].mxu0  ;;  %v6276_v41 = vpack.c.bf16 %v5283_v29, %v5282_v28 }
 0x1fd   :  { %2812 = vst.msk [vmem:[#allocation3 + $0x31] sm:$0xff] %vm2765_vm7, %v2751_v44  ;;  %vm2722_vm14 = vcmp.ge.f32.partialorder %v2706_v42, 0.0  ;;  %v2738_v48 = vmul.f32 0.1, %v2706_v42  ;;  %v2685_v49 = vmul.f32 %v5977_v47, %v7498_v9  ;;  %v2606_v51 = vpop.f32.mrb[7].mxu0 }
 0x1fe   :  { %vm2721_vm15 = vcmp.ge.f32.partialorder %v2705_v45, 0.0  ;;  %v2737_v52 = vmul.f32 0.1, %v2705_v45  ;;  %v2684_v53 = vmul.f32 %v7498_v9, %v2606_v51 }
 0x1ff   :  { %v2754_v54 = vsel %vm2722_vm14, %v2706_v42, %v2738_v48  ;;  %v2708_v57 = vadd.f32 %v7503_v14, %v2685_v49  ;;  %v7532_v35 = vld [vmem:[#allocation3 + $0x21] sm:$0xff] }
 0x200   :  { %2815 = vst.msk [vmem:[#allocation3 + $0x61] sm:$0xff] %vm2765_vm7, %v2754_v54  ;;  %v2753_v60 = vsel %vm2721_vm15, %v2705_v45, %v2737_v52  ;;  %v2707_v25 = vadd.f32 %v7503_v14, %v2684_v53  ;;  %v5980_v38 = vpop.f32.mrb[8].mxu0  ;;  %v7526_v3 = vld [vmem:[#allocation3 + $0x11] sm:$0xff]  ;;  %v2826_v54 = vld [vmem:[#allocation3] sm:$0xff] }
 0x201   :  { %2814 = vst.msk [vmem:[#allocation3 + $0x51] sm:$0xff] %vm2765_vm7, %v2753_v60  ;;  %vm2724_vm1 = vcmp.ge.f32.partialorder %v2708_v57, 0.0  ;;  %v2740_v58 = vmul.f32 0.1, %v2708_v57  ;;  %v2687_v62 = vmul.f32 %v5980_v38, %v7498_v9  ;;  %v2616_v16 = vpop.f32.mrb[9].mxu0  ;;  %5995 = vmatmul.mubr.msk.f32.vlgmr.msra.gmra.mrb[16].mxu0 %vm2765_vm7, %v7526_v3  ;;  %v5300_v60 = vld [vmem:[%s8077_s6 + $0x30] sm:$0xff] }
 0x202   :  { %vm2723_vm2 = vcmp.ge.f32.partialorder %v2707_v25, 0.0  ;;  %v2739_v43 = vmul.f32 0.1, %v2707_v25  ;;  %v2686_v55 = vmul.f32 %v7498_v9, %v2616_v16  ;;  %5997 = vmatprep.mubr.msk.f32.mxu0 %vm2765_vm7, %v7532_v35 }
 0x203   :  { %v2756_v59 = vsel %vm2724_vm1, %v2708_v57, %v2740_v58  ;;  %v2710_v15 = vadd.f32 %v7503_v14, %v2687_v62  ;;  %v7546_v46 = vld [vmem:[#allocation3 + $0x41] sm:$0xff]  ;;  %v7623_v58 = vld [vmem:[#allocation3 + $0x10] sm:$0xff] }
 0x204   :  { %2817 = vst.msk [vmem:[#allocation3 + $0x81] sm:$0xff] %vm2765_vm7, %v2756_v59  ;;  %v2755_v20 = vsel %vm2723_vm2, %v2707_v25, %v2739_v43  ;;  %v2709_v33 = vadd.f32 %v7503_v14, %v2686_v55  ;;  %v5983_v63 = vpop.f32.mrb[10].mxu0  ;;  %v7540_v0 = vld [vmem:[#allocation3 + $0x31] sm:$0xff]  ;;  %v7627_v62 = vld [vmem:[#allocation3 + $0x20] sm:$0xff] }
 0x205   :  { %2816 = vst.msk [vmem:[#allocation3 + $0x71] sm:$0xff] %vm2765_vm7, %v2755_v20  ;;  %vm2726_vm3 = vcmp.ge.f32.partialorder %v2710_v15, 0.0  ;;  %v2742_v7 = vmul.f32 0.1, %v2710_v15  ;;  %v2689_v8 = vmul.f32 %v5983_v63, %v7498_v9  ;;  %v2626_v10 = vpop.f32.mrb[11].mxu0  ;;  %5998 = vmatmul.mubr.msk.f32.gmra.mrb[18].mxu0 %vm2765_vm7, %v7540_v0  ;;  %v5301_v25 = vld [vmem:[%s8077_s6 + $0x38] sm:$0xff] }
 0x206   :  { %vm2725_vm4 = vcmp.ge.f32.partialorder %v2709_v33, 0.0  ;;  %v2741_v50 = vmul.f32 0.1, %v2709_v33  ;;  %v2688_v56 = vmul.f32 %v7498_v9, %v2626_v10  ;;  %6000 = vmatprep.mubr.msk.f32.mxu0 %vm2765_vm7, %v7546_v46  ;;  %v6280_v38 = vpack.c.bf16 %v5301_v25, %v5300_v60  ;;  %v7631_v16 = vld [vmem:[#allocation3 + $0x30] sm:$0xff]  ;;  %v7635_v43 = vld [vmem:[#allocation3 + $0x40] sm:$0xff]  ;;  %v5391_v25 = vld [vmem:[%s8077_s6 + $0x88] sm:$0xff] }
 0x207   :  { %v2758_v4 = vsel %vm2726_vm3, %v2710_v15, %v2742_v7  ;;  %v2712_v5 = vadd.f32 %v7503_v14, %v2689_v8  ;;  %v7560_v11 = vld [vmem:[#allocation3 + $0x61] sm:$0xff] }
 0x208   :  { %2819 = vst.msk [vmem:[#allocation3 + $0xc1] sm:$0xff] %vm2765_vm7, %v2758_v4  ;;  %v2757_v31 = vsel %vm2725_vm4, %v2709_v33, %v2741_v50  ;;  %v2711_v1 = vadd.f32 %v7503_v14, %v2688_v56  ;;  %v5986_v61 = vpop.f32.mrb[12].mxu0  ;;  %v7554_v12 = vld [vmem:[#allocation3 + $0x51] sm:$0xff]  ;;  %v7643_v59 = vld [vmem:[#allocation3 + $0x60] sm:$0xff] }
 0x209   :  { %2818 = vst.msk [vmem:[#allocation3 + $0xb1] sm:$0xff] %vm2765_vm7, %v2757_v31  ;;  %vm2728_vm5 = vcmp.ge.f32.partialorder %v2712_v5, 0.0  ;;  %v2744_v18 = vmul.f32 0.1, %v2712_v5  ;;  %v2691_v19 = vmul.f32 %v5986_v61, %v7498_v9  ;;  %v2636_v21 = vpop.f32.mrb[13].mxu0  ;;  %6001 = vmatmul.mubr.msk.f32.gmra.mrb[20].mxu0 %vm2765_vm7, %v7554_v12  ;;  %v7639_v55 = vld [vmem:[#allocation3 + $0x50] sm:$0xff] }
 0x20a   :  { %vm2727_vm6 = vcmp.ge.f32.partialorder %v2711_v1, 0.0  ;;  %v2743_v13 = vmul.f32 0.1, %v2711_v1  ;;  %v2690_v17 = vmul.f32 %v7498_v9, %v2636_v21  ;;  %6003 = vmatprep.mubr.msk.f32.mxu0 %vm2765_vm7, %v7560_v11  ;;  %v2834_v15 = vld [vmem:[#allocation3 + $0xa0] sm:$0xff]  ;;  %v5319_v31 = vld [vmem:[%s8077_s6 + $0x48] sm:$0xff]  ;;  %v7687_v61 = vld [vmem:[#allocation3 + $0x12] sm:$0xff] }
 0x20b   :  { %v2760_v22 = vsel %vm2728_vm5, %v2712_v5, %v2744_v18  ;;  %v2714_v23 = vadd.f32 %v7503_v14, %v2691_v19  ;;  %v3249_v56 = vld [vmem:[#allocation3 + $0x2] sm:$0xff]  ;;  %v7695_v19 = vld [vmem:[#allocation3 + $0x32] sm:$0xff] }
 0x20c   :  { %2821 = vst.msk [vmem:[#allocation3 + $0xe1] sm:$0xff] %vm2765_vm7, %v2760_v22  ;;  %v2759_v2 = vsel %vm2727_vm6, %v2711_v1, %v2743_v13  ;;  %v2713_v24 = vadd.f32 %v7503_v14, %v2690_v17  ;;  %v5989_v26 = vpop.f32.mrb[14].mxu0  ;;  %v7568_v27 = vld [vmem:[#allocation3 + $0x71] sm:$0xff]  ;;  %v5318_v5 = vld [vmem:[%s8077_s6 + $0x40] sm:$0xff] }
 0x20d   :  { %2820 = vst.msk [vmem:[#allocation3 + $0xd1] sm:$0xff] %vm2765_vm7, %v2759_v2  ;;  %vm2730_vm8 = vcmp.ge.f32.partialorder %v2714_v23, 0.0  ;;  %v2746_v30 = vmul.f32 0.1, %v2714_v23  ;;  %v2693_v32 = vmul.f32 %v5989_v26, %v7498_v9  ;;  %v2646_v34 = vpop.f32.mrb[15].mxu0  ;;  %6004 = vmatmul.mubr.msk.f32.gmra.mrb[22].mxu0 %vm2765_vm7, %v7568_v27  ;;  %v7647_v20 = vld [vmem:[#allocation3 + $0x70] sm:$0xff]  ;;  %v6284_v1 = vpack.c.bf16 %v5319_v31, %v5318_v5 }
 0x20e   :  { %vm2729_vm9 = vcmp.ge.f32.partialorder %v2713_v24, 0.0  ;;  %v2745_v36 = vmul.f32 0.1, %v2713_v24  ;;  %v2692_v37 = vmul.f32 %v7498_v9, %v2646_v34  ;;  %v7691_v18 = vld [vmem:[#allocation3 + $0x22] sm:$0xff]  ;;  %v7703_v13 = vld [vmem:[#allocation3 + $0x52] sm:$0xff] }
 0x20f   :  { %v2762_v39 = vsel %vm2730_vm8, %v2714_v23, %v2746_v30  ;;  %v2716_v40 = vadd.f32 %v7503_v14, %v2693_v32  ;;  %v7589_v48 = vld [vmem:[#allocation3 + $0xc1] sm:$0xff]  ;;  %v7711_v23 = vld [vmem:[#allocation3 + $0x72] sm:$0xff] }
 0x210   :  { %2823 = vst.msk [vmem:[#allocation3 + $0x101] sm:$0xff] %vm2765_vm7, %v2762_v39  ;;  %v2761_v42 = vsel %vm2729_vm9, %v2713_v24, %v2745_v36  ;;  %v2715_v44 = vadd.f32 %v7503_v14, %v2692_v37  ;;  %v7584_v45 = vld [vmem:[#allocation3 + $0xb1] sm:$0xff]  ;;  %v7656_v63 = vld [vmem:[#allocation3 + $0xc0] sm:$0xff] }
 0x211   :  { %2822 = vst.msk [vmem:[#allocation3 + $0xf1] sm:$0xff] %vm2765_vm7, %v2761_v42  ;;  %vm2732_vm10 = vcmp.ge.f32.partialorder %v2716_v40, 0.0  ;;  %v2748_v47 = vmul.f32 0.1, %v2716_v40  ;;  %6007 = vmatmul.mubr.msk.f32.vlgmr.msra.gmra.mrb[0].mxu1 %vm2765_vm7, %v7584_v45  ;;  %v7652_v33 = vld [vmem:[#allocation3 + $0xb0] sm:$0xff]  ;;  %v7699_v21 = vld [vmem:[#allocation3 + $0x42] sm:$0xff] }
 0x212   :  { %vm2731_vm11 = vcmp.ge.f32.partialorder %v2715_v44, 0.0  ;;  %v2747_v9 = vmul.f32 0.1, %v2715_v44  ;;  %6275 = vmatpush3.bf16.msra.mxu1 %v7492_v6  ;;  %6009 = vmatprep.mubr.msk.f32.mxu1 %vm2765_vm7, %v7589_v48  ;;  %v7707_v17 = vld [vmem:[#allocation3 + $0x62] sm:$0xff]  ;;  %v7716_v2 = vld [vmem:[#allocation3 + $0xb2] sm:$0xff] }
 0x213   :  { %v2764_v49 = vsel %vm2732_vm10, %v2716_v40, %v2748_v47  ;;  %6277 = vmatprep.subr.bf16.mxu1 %v6276_v41  ;;  %v7600_v52 = vld [vmem:[#allocation3 + $0xe1] sm:$0xff]  ;;  %v5336_v34 = vld [vmem:[%s8077_s6 + $0x50] sm:$0xff]  ;;  %v5337_v36 = vld [vmem:[%s8077_s6 + $0x58] sm:$0xff] }
 0x214   :  { %2825 = vst.msk [vmem:[#allocation3 + $0x121] sm:$0xff] %vm2765_vm7, %v2764_v49  ;;  %v2763_v14 = vsel %vm2731_vm11, %v2715_v44, %v2747_v9  ;;  %v7595_v51 = vld [vmem:[#allocation3 + $0xd1] sm:$0xff]  ;;  %v7664_v8 = vld [vmem:[#allocation3 + $0xe0] sm:$0xff]  ;;  %v6288_v37 = vpack.c.bf16 %v5337_v36, %v5336_v34  ;;  %v5355_v42 = vld [vmem:[%s8077_s6 + $0x68] sm:$0xff] }
 0x215   :  { %2824 = vst.msk [vmem:[#allocation3 + $0x111] sm:$0xff] %vm2765_vm7, %v2763_v14  ;;  %6010 = vmatmul.mubr.msk.f32.gmra.mrb[2].mxu1 %vm2765_vm7, %v7595_v51  ;;  %v7660_v7 = vld [vmem:[#allocation3 + $0xd0] sm:$0xff]  ;;  %v3257_v22 = vld [vmem:[#allocation3 + $0xa2] sm:$0xff]  ;;  %v5373_v9 = vld [vmem:[%s8077_s6 + $0x78] sm:$0xff] }
 0x216   :  { %6012 = vmatprep.mubr.msk.f32.mxu1 %vm2765_vm7, %v7600_v52  ;;  %v7720_v24 = vld [vmem:[#allocation3 + $0xc2] sm:$0xff]  ;;  %v7724_v26 = vld [vmem:[#allocation3 + $0xd2] sm:$0xff] }
 0x217   :  { %v7608_v53 = vld [vmem:[#allocation3 + $0x101] sm:$0xff]  ;;  %v4860_v31 = vld [vmem:[#allocation2 + $0x111] sm:$0xff] }
 0x218   :  { %v7604_v6 = vld [vmem:[#allocation3 + $0xf1] sm:$0xff]  ;;  %v7672_v50 = vld [vmem:[#allocation3 + $0x100] sm:$0xff] }
 0x219   :  { %6013 = vmatmul.mubr.msk.f32.gmra.mrb[4].mxu1 %vm2765_vm7, %v7604_v6  ;;  %v7668_v10 = vld [vmem:[#allocation3 + $0xf0] sm:$0xff]  ;;  %v7728_v28 = vld [vmem:[#allocation3 + $0xe2] sm:$0xff] }
 0x21a   :  { %6015 = vmatprep.mubr.msk.f32.mxu1 %vm2765_vm7, %v7608_v53  ;;  %v7732_v29 = vld [vmem:[#allocation3 + $0xf2] sm:$0xff]  ;;  %v7736_v30 = vld [vmem:[#allocation3 + $0x102] sm:$0xff] }
 0x21b   :  { %v7764_v39 = vld [vmem:[#allocation3 + $0x80] sm:$0xff] }
 0x21c   :  { %v7612_v57 = vld [vmem:[#allocation3 + $0x111] sm:$0xff]  ;;  %v7782_v40 = vld [vmem:[#allocation3 + $0x120] sm:$0xff] }
 0x21d   :  { %6016 = vmatmul.mubr.msk.f32.gmra.mrb[6].mxu1 %vm2765_vm7, %v7612_v57  ;;  %v7676_v4 = vld [vmem:[#allocation3 + $0x110] sm:$0xff]  ;;  %v7824_v47 = vld [vmem:[#allocation3 + $0x121] sm:$0xff] }
 0x21e   :  { %6022 = vmatprep.mubr.msk.f32.mxu1 %vm2765_vm7, %v2826_v54  ;;  %v7740_v32 = vld [vmem:[#allocation3 + $0x112] sm:$0xff]  ;;  %v7848_v14 = vld [vmem:[#allocation3 + $0x82] sm:$0xff] }
 0x21f   :  { %v7866_v54 = vld [vmem:[#allocation3 + $0x122] sm:$0xff] }
 0x220   :  { %v5390_v60 = vld [vmem:[%s8077_s6 + $0x80] sm:$0xff] }
 0x221   :  { %6023 = vmatmul.mubr.msk.f32.vlgmr.msra.gmra.mrb[8].mxu1 %vm2765_vm7, %v7623_v58  ;;  %v4859_v5 = vld [vmem:[#allocation2 + $0x101] sm:$0xff] }
 0x222   :  { %6279 = vmatpush3.bf16.msra.mxu1 %v6276_v41  ;;  %6025 = vmatprep.mubr.msk.f32.mxu1 %vm2765_vm7, %v7627_v62  ;;  %v5354_v41 = vld [vmem:[%s8077_s6 + $0x60] sm:$0xff] }
 0x223   :  { %6281 = vmatprep.subr.bf16.mxu1 %v6280_v38  ;;  %v6292_v44 = vpack.c.bf16 %v5355_v42, %v5354_v41 }
 0x225   :  { %6026 = vmatmul.mubr.msk.f32.gmra.mrb[10].mxu1 %vm2765_vm7, %v7631_v16 }
 0x226   :  { %6028 = vmatprep.mubr.msk.f32.mxu1 %vm2765_vm7, %v7635_v43 }
 0x229   :  { %6029 = vmatmul.mubr.msk.f32.gmra.mrb[12].mxu1 %vm2765_vm7, %v7639_v55 }
 0x22a   :  { %6031 = vmatprep.mubr.msk.f32.mxu1 %vm2765_vm7, %v7643_v59 }
 0x22d   :  { %6032 = vmatmul.mubr.msk.f32.gmra.mrb[14].mxu1 %vm2765_vm7, %v7647_v20 }
 0x22e   :  { %6034 = vmatprep.mubr.msk.f32.mxu1 %vm2765_vm7, %v2834_v15 }
 0x231   :  { %6035 = vmatmul.mubr.msk.f32.gmra.mrb[0].mxu1 %vm2765_vm7, %v7652_v33 }
 0x232   :  { %6037 = vmatprep.mubr.msk.f32.mxu1 %vm2765_vm7, %v7656_v63 }
 0x235   :  { %6038 = vmatmul.mubr.msk.f32.gmra.mrb[2].mxu1 %vm2765_vm7, %v7660_v7 }
 0x236   :  { %6040 = vmatprep.mubr.msk.f32.mxu1 %vm2765_vm7, %v7664_v8 }
 0x239   :  { %6041 = vmatmul.mubr.msk.f32.gmra.mrb[4].mxu1 %vm2765_vm7, %v7668_v10 }
 0x23a   :  { %6043 = vmatprep.mubr.msk.f32.mxu1 %vm2765_vm7, %v7672_v50 }
 0x23d   :  { %6044 = vmatmul.mubr.msk.f32.gmra.mrb[6].mxu1 %vm2765_vm7, %v7676_v4 }
 0x23e   :  { %6050 = vmatprep.mubr.msk.f32.mxu1 %vm2765_vm7, %v3249_v56  ;;  %v4857_v56 = vld [vmem:[#allocation2 + $0xe1] sm:$0xff] }
 0x241   :  { %6051 = vmatmul.mubr.msk.f32.vlgmr.msra.gmra.mrb[8].mxu1 %vm2765_vm7, %v7687_v61 }
 0x242   :  { %6283 = vmatpush3.bf16.msra.mxu1 %v6280_v38  ;;  %6053 = vmatprep.mubr.msk.f32.mxu1 %vm2765_vm7, %v7691_v18  ;;  %v6300_v38 = vpack.c.bf16 %v5391_v25, %v5390_v60 }
 0x243   :  { %6285 = vmatprep.subr.bf16.mxu1 %v6284_v1 }
 0x245   :  { %6054 = vmatmul.mubr.msk.f32.gmra.mrb[10].mxu1 %vm2765_vm7, %v7695_v19 }
 0x246   :  { %6056 = vmatprep.mubr.msk.f32.mxu1 %vm2765_vm7, %v7699_v21 }
 0x249   :  { %6057 = vmatmul.mubr.msk.f32.gmra.mrb[12].mxu1 %vm2765_vm7, %v7703_v13 }
 0x24a   :  { %6059 = vmatprep.mubr.msk.f32.mxu1 %vm2765_vm7, %v7707_v17 }
 0x24d   :  { %6060 = vmatmul.mubr.msk.f32.gmra.mrb[14].mxu1 %vm2765_vm7, %v7711_v23 }
 0x24e   :  { %6062 = vmatprep.mubr.msk.f32.mxu1 %vm2765_vm7, %v3257_v22 }
 0x251   :  { %6063 = vmatmul.mubr.msk.f32.gmra.mrb[0].mxu1 %vm2765_vm7, %v7716_v2 }
 0x252   :  { %6065 = vmatprep.mubr.msk.f32.mxu1 %vm2765_vm7, %v7720_v24 }
 0x255   :  { %6066 = vmatmul.mubr.msk.f32.gmra.mrb[2].mxu1 %vm2765_vm7, %v7724_v26 }
 0x256   :  { %6068 = vmatprep.mubr.msk.f32.mxu1 %vm2765_vm7, %v7728_v28 }
 0x259   :  { %6069 = vmatmul.mubr.msk.f32.gmra.mrb[4].mxu1 %vm2765_vm7, %v7732_v29 }
 0x25a   :  { %6071 = vmatprep.mubr.msk.f32.mxu1 %vm2765_vm7, %v7736_v30 }
 0x25d   :  { %6072 = vmatmul.mubr.msk.f32.gmra.mrb[6].mxu1 %vm2765_vm7, %v7740_v32 }
 0x25e   :  { %6078 = vmatprep.mubr.msk.f32.mxu1 %vm2765_vm7, %v7623_v58  ;;  %v4169_v58 = vld [vmem:[#allocation3 + $0x90] sm:$0xff] }
 0x261   :  { %6079 = vmatmul.mubr.msk.f32.vlgmr.msra.gmra.mrb[8].mxu1 %vm2765_vm7, %v7627_v62 }
 0x262   :  { %6287 = vmatpush3.bf16.msra.mxu1 %v6284_v1  ;;  %6081 = vmatprep.mubr.msk.f32.mxu1 %vm2765_vm7, %v7631_v16  ;;  %v4861_v1 = vld [vmem:[#allocation2 + $0x121] sm:$0xff] }
 0x263   :  { %6289 = vmatprep.subr.bf16.mxu1 %v6288_v37 }
 0x265   :  { %6082 = vmatmul.mubr.msk.f32.gmra.mrb[10].mxu1 %vm2765_vm7, %v7635_v43 }
 0x266   :  { %6084 = vmatprep.mubr.msk.f32.mxu1 %vm2765_vm7, %v7639_v55 }
 0x269   :  { %6085 = vmatmul.mubr.msk.f32.gmra.mrb[12].mxu1 %vm2765_vm7, %v7643_v59 }
 0x26a   :  { %6087 = vmatprep.mubr.msk.f32.mxu1 %vm2765_vm7, %v7647_v20 }
 0x26d   :  { %6088 = vmatmul.mubr.msk.f32.gmra.mrb[14].mxu1 %vm2765_vm7, %v7764_v39 }
 0x26e   :  { %6090 = vmatprep.mubr.msk.f32.mxu1 %vm2765_vm7, %v7652_v33 }
 0x271   :  { %6091 = vmatmul.mubr.msk.f32.gmra.mrb[0].mxu1 %vm2765_vm7, %v7656_v63 }
 0x272   :  { %6093 = vmatprep.mubr.msk.f32.mxu1 %vm2765_vm7, %v7660_v7 }
 0x275   :  { %6094 = vmatmul.mubr.msk.f32.gmra.mrb[2].mxu1 %vm2765_vm7, %v7664_v8 }
 0x276   :  { %6096 = vmatprep.mubr.msk.f32.mxu1 %vm2765_vm7, %v7668_v10 }
 0x279   :  { %6097 = vmatmul.mubr.msk.f32.gmra.mrb[4].mxu1 %vm2765_vm7, %v7672_v50 }
 0x27a   :  { %6099 = vmatprep.mubr.msk.f32.mxu1 %vm2765_vm7, %v7676_v4 }
 0x27d   :  { %6100 = vmatmul.mubr.msk.f32.gmra.mrb[6].mxu1 %vm2765_vm7, %v7782_v40 }
 0x27e   :  { %6106 = vmatprep.mubr.msk.f32.mxu1 %vm2765_vm7, %v7526_v3  ;;  %v7806_v3 = vld [vmem:[#allocation3 + $0x81] sm:$0xff] }
 0x281   :  { %6107 = vmatmul.mubr.msk.f32.vlgmr.msra.gmra.mrb[8].mxu1 %vm2765_vm7, %v7532_v35 }
 0x282   :  { %6291 = vmatpush3.bf16.msra.mxu1 %v6288_v37  ;;  %6109 = vmatprep.mubr.msk.f32.mxu1 %vm2765_vm7, %v7540_v0 }
 0x283   :  { %6293 = vmatprep.subr.bf16.mxu1 %v6292_v44 }
 0x285   :  { %6110 = vmatmul.mubr.msk.f32.gmra.mrb[10].mxu1 %vm2765_vm7, %v7546_v46 }
 0x286   :  { %6112 = vmatprep.mubr.msk.f32.mxu1 %vm2765_vm7, %v7554_v12 }
 0x289   :  { %6113 = vmatmul.mubr.msk.f32.gmra.mrb[12].mxu1 %vm2765_vm7, %v7560_v11 }
 0x28a   :  { %6115 = vmatprep.mubr.msk.f32.mxu1 %vm2765_vm7, %v7568_v27 }
 0x28d   :  { %6116 = vmatmul.mubr.msk.f32.gmra.mrb[14].mxu1 %vm2765_vm7, %v7806_v3 }
 0x28e   :  { %6118 = vmatprep.mubr.msk.f32.mxu1 %vm2765_vm7, %v7584_v45  ;;  %v5372_v45 = vld [vmem:[%s8077_s6 + $0x70] sm:$0xff] }
 0x28f   :  { %v6296_v49 = vpack.c.bf16 %v5373_v9, %v5372_v45 }
 0x291   :  { %6119 = vmatmul.mubr.msk.f32.gmra.mrb[0].mxu1 %vm2765_vm7, %v7589_v48 }
 0x292   :  { %6121 = vmatprep.mubr.msk.f32.mxu1 %vm2765_vm7, %v7595_v51 }
 0x295   :  { %6122 = vmatmul.mubr.msk.f32.gmra.mrb[2].mxu1 %vm2765_vm7, %v7600_v52 }
 0x296   :  { %6124 = vmatprep.mubr.msk.f32.mxu1 %vm2765_vm7, %v7604_v6 }
 0x299   :  { %6125 = vmatmul.mubr.msk.f32.gmra.mrb[4].mxu1 %vm2765_vm7, %v7608_v53 }
 0x29a   :  { %6127 = vmatprep.mubr.msk.f32.mxu1 %vm2765_vm7, %v7612_v57 }
 0x29d   :  { %6128 = vmatmul.mubr.msk.f32.gmra.mrb[6].mxu1 %vm2765_vm7, %v7824_v47 }
 0x29e   :  { %6134 = vmatprep.mubr.msk.f32.mxu1 %vm2765_vm7, %v7687_v61 }
 0x2a1   :  { %6135 = vmatmul.mubr.msk.f32.vlgmr.msra.gmra.mrb[8].mxu1 %vm2765_vm7, %v7691_v18 }
 0x2a2   :  { %6295 = vmatpush3.bf16.msra.mxu1 %v6292_v44  ;;  %6137 = vmatprep.mubr.msk.f32.mxu1 %vm2765_vm7, %v7695_v19 }
 0x2a3   :  { %6297 = vmatprep.subr.bf16.mxu1 %v6296_v49 }
 0x2a5   :  { %6138 = vmatmul.mubr.msk.f32.gmra.mrb[10].mxu1 %vm2765_vm7, %v7699_v21 }
 0x2a6   :  { %6140 = vmatprep.mubr.msk.f32.mxu1 %vm2765_vm7, %v7703_v13 }
 0x2a9   :  { %6141 = vmatmul.mubr.msk.f32.gmra.mrb[12].mxu1 %vm2765_vm7, %v7707_v17 }
 0x2aa   :  { %6143 = vmatprep.mubr.msk.f32.mxu1 %vm2765_vm7, %v7711_v23 }
 0x2ad   :  { %6144 = vmatmul.mubr.msk.f32.gmra.mrb[14].mxu1 %vm2765_vm7, %v7848_v14 }
 0x2ae   :  { %6146 = vmatprep.mubr.msk.f32.mxu1 %vm2765_vm7, %v7716_v2 }
 0x2b1   :  { %6147 = vmatmul.mubr.msk.f32.gmra.mrb[0].mxu1 %vm2765_vm7, %v7720_v24 }
 0x2b2   :  { %6149 = vmatprep.mubr.msk.f32.mxu1 %vm2765_vm7, %v7724_v26 }
 0x2b5   :  { %6150 = vmatmul.mubr.msk.f32.gmra.mrb[2].mxu1 %vm2765_vm7, %v7728_v28 }
 0x2b6   :  { %6152 = vmatprep.mubr.msk.f32.mxu1 %vm2765_vm7, %v7732_v29 }
 0x2b9   :  { %6153 = vmatmul.mubr.msk.f32.gmra.mrb[4].mxu1 %vm2765_vm7, %v7736_v30 }
 0x2ba   :  { %6155 = vmatprep.mubr.msk.f32.mxu1 %vm2765_vm7, %v7740_v32 }
 0x2bd   :  { %6156 = vmatmul.mubr.msk.f32.gmra.mrb[6].mxu1 %vm2765_vm7, %v7866_v54 }
 0x2be   :  { %6162 = vmatprep.mubr.msk.f32.mxu1 %vm2765_vm7, %v7627_v62 }
 0x2c1   :  { %6163 = vmatmul.mubr.msk.f32.vlgmr.msra.gmra.mrb[8].mxu1 %vm2765_vm7, %v7631_v16 }
 0x2c2   :  { %6299 = vmatpush3.bf16.msra.mxu1 %v6296_v49  ;;  %6165 = vmatprep.mubr.msk.f32.mxu1 %vm2765_vm7, %v7635_v43 }
 0x2c3   :  { %6301 = vmatprep.subr.bf16.mxu1 %v6300_v38 }
 0x2c5   :  { %6166 = vmatmul.mubr.msk.f32.gmra.mrb[10].mxu1 %vm2765_vm7, %v7639_v55 }
 0x2c6   :  { %6168 = vmatprep.mubr.msk.f32.mxu1 %vm2765_vm7, %v7643_v59  ;;  %v4177_v59 = vld [vmem:[#allocation3 + $0x130] sm:$0xff] }
 0x2c9   :  { %6169 = vmatmul.mubr.msk.f32.gmra.mrb[12].mxu1 %vm2765_vm7, %v7647_v20 }
 0x2ca   :  { %6171 = vmatprep.mubr.msk.f32.mxu1 %vm2765_vm7, %v7764_v39 }
 0x2cd   :  { %6172 = vmatmul.mubr.msk.f32.gmra.mrb[14].mxu1 %vm2765_vm7, %v4169_v58 }
 0x2ce   :  { %6174 = vmatprep.mubr.msk.f32.mxu1 %vm2765_vm7, %v7656_v63  ;;  %v4862_v63 = vld [vmem:[%s8080_s7] sm:$0xff] }
 0x2d1   :  { %6175 = vmatmul.mubr.msk.f32.gmra.mrb[0].mxu1 %vm2765_vm7, %v7660_v7 }
 0x2d2   :  { %6177 = vmatprep.mubr.msk.f32.mxu1 %vm2765_vm7, %v7664_v8  ;;  %v4854_v8 = vld [vmem:[#allocation2 + $0xb1] sm:$0xff] }
 0x2d4   :  { %v7897_v62 = vpop.f32.mrb[16].mxu0 }
 0x2d5   :  { %v7899_v16 = vpop.f32.mrb[17].mxu0  ;;  %6178 = vmatmul.mubr.msk.f32.gmra.mrb[2].mxu1 %vm2765_vm7, %v7668_v10  ;;  %v4855_v10 = vld [vmem:[#allocation2 + $0xc1] sm:$0xff] }
 0x2d6   :  { %6180 = vmatprep.mubr.msk.f32.mxu1 %vm2765_vm7, %v7672_v50  ;;  %v4856_v50 = vld [vmem:[#allocation2 + $0xd1] sm:$0xff] }
 0x2d8   :  { %v7905_v43 = vpop.f32.mrb[18].mxu0 }
 0x2d9   :  { %v7907_v55 = vpop.f32.mrb[19].mxu0  ;;  %6181 = vmatmul.mubr.msk.f32.gmra.mrb[4].mxu1 %vm2765_vm7, %v7676_v4  ;;  %v4858_v4 = vld [vmem:[#allocation2 + $0xf1] sm:$0xff] }
 0x2da   :  { %6183 = vmatprep.mubr.msk.f32.mxu1 %vm2765_vm7, %v7782_v40 }
 0x2dc   :  { %v7913_v15 = vpop.f32.mrb[20].mxu0 }
 0x2dd   :  { %v7915_v20 = vpop.f32.mrb[21].mxu0  ;;  %6184 = vmatmul.mubr.msk.f32.gmra.mrb[6].mxu1 %vm2765_vm7, %v4177_v59 }
 0x2de   :  { %6190 = vmatprep.mubr.msk.f32.mxu1 %vm2765_vm7, %v7532_v35  ;;  %v4397_v35 = vld [vmem:[#allocation3 + $0x91] sm:$0xff] }
 0x2e0   :  { %v7920_v33 = vpop.f32.mrb[22].mxu0 }
 0x2e1   :  { %v7925_v7 = vpop.f32.mrb[23].mxu0  ;;  %6191 = vmatmul.mubr.msk.f32.vlgmr.msra.gmra.mrb[8].mxu1 %vm2765_vm7, %v7540_v0  ;;  %v4405_v0 = vld [vmem:[#allocation3 + $0x131] sm:$0xff] }
 0x2e2   :  { %6303 = vmatpush3.bf16.msra.mxu1 %v6300_v38  ;;  %6193 = vmatprep.mubr.msk.f32.mxu1 %vm2765_vm7, %v7546_v46  ;;  %v4625_v46 = vld [vmem:[#allocation3 + $0x92] sm:$0xff] }
 0x2e3   :  { %6242 = vmatprep.subr.mxu1 %v4862_v63 }
 0x2e5   :  { %6194 = vmatmul.mubr.msk.f32.gmra.mrb[10].mxu1 %vm2765_vm7, %v7554_v12  ;;  %v4633_v12 = vld [vmem:[#allocation3 + $0x132] sm:$0xff] }
 0x2e6   :  { %6196 = vmatprep.mubr.msk.f32.mxu1 %vm2765_vm7, %v7560_v11  ;;  %v4846_v11 = vld [vmem:[#allocation2 + $0x11] sm:$0xff] }
 0x2e9   :  { %6197 = vmatmul.mubr.msk.f32.gmra.mrb[12].mxu1 %vm2765_vm7, %v7568_v27  ;;  %v4847_v27 = vld [vmem:[#allocation2 + $0x21] sm:$0xff] }
 0x2ea   :  { %6199 = vmatprep.mubr.msk.f32.mxu1 %vm2765_vm7, %v7806_v3 }
 0x2ed   :  { %6200 = vmatmul.mubr.msk.f32.gmra.mrb[14].mxu1 %vm2765_vm7, %v4397_v35 }
 0x2ee   :  { %6202 = vmatprep.mubr.msk.f32.mxu1 %vm2765_vm7, %v7589_v48  ;;  %v4848_v48 = vld [vmem:[#allocation2 + $0x31] sm:$0xff] }
 0x2f1   :  { %6203 = vmatmul.mubr.msk.f32.gmra.mrb[0].mxu1 %vm2765_vm7, %v7595_v51  ;;  %v4849_v51 = vld [vmem:[#allocation2 + $0x41] sm:$0xff] }
 0x2f2   :  { %6205 = vmatprep.mubr.msk.f32.mxu1 %vm2765_vm7, %v7600_v52  ;;  %v4850_v52 = vld [vmem:[#allocation2 + $0x51] sm:$0xff] }
 0x2f5   :  { %6206 = vmatmul.mubr.msk.f32.gmra.mrb[2].mxu1 %vm2765_vm7, %v7604_v6  ;;  %v4851_v6 = vld [vmem:[#allocation2 + $0x61] sm:$0xff] }
 0x2f6   :  { %6208 = vmatprep.mubr.msk.f32.mxu1 %vm2765_vm7, %v7608_v53  ;;  %v4852_v53 = vld [vmem:[#allocation2 + $0x71] sm:$0xff] }
 0x2f9   :  { %6209 = vmatmul.mubr.msk.f32.gmra.mrb[4].mxu1 %vm2765_vm7, %v7612_v57  ;;  %v4853_v57 = vld [vmem:[#allocation2 + $0x81] sm:$0xff] }
 0x2fa   :  { %6211 = vmatprep.mubr.msk.f32.mxu1 %vm2765_vm7, %v7824_v47 }
 0x2fd   :  { %6212 = vmatmul.mubr.msk.f32.gmra.mrb[6].mxu1 %vm2765_vm7, %v4405_v0 }
 0x2fe   :  { %6218 = vmatprep.mubr.msk.f32.mxu1 %vm2765_vm7, %v7691_v18 }
 0x301   :  { %6219 = vmatmul.mubr.msk.f32.vlgmr.msra.gmra.mrb[8].mxu1 %vm2765_vm7, %v7695_v19 }
 0x302   :  { %6243 = vmatpush3.msra.mxu1 %v4862_v63  ;;  %6221 = vmatprep.mubr.msk.f32.mxu1 %vm2765_vm7, %v7699_v21 }
 0x305   :  { %6222 = vmatmul.mubr.msk.f32.gmra.mrb[10].mxu1 %vm2765_vm7, %v7703_v13 }
 0x306   :  { %6224 = vmatprep.mubr.msk.f32.mxu1 %vm2765_vm7, %v7707_v17 }
 0x309   :  { %6225 = vmatmul.mubr.msk.f32.gmra.mrb[12].mxu1 %vm2765_vm7, %v7711_v23 }
 0x30a   :  { %6227 = vmatprep.mubr.msk.f32.mxu1 %vm2765_vm7, %v7848_v14 }
 0x30d   :  { %6228 = vmatmul.mubr.msk.f32.gmra.mrb[14].mxu1 %vm2765_vm7, %v4625_v46 }
 0x30e   :  { %6230 = vmatprep.mubr.msk.f32.mxu1 %vm2765_vm7, %v7720_v24 }
 0x311   :  { %6231 = vmatmul.mubr.msk.f32.gmra.mrb[0].mxu1 %vm2765_vm7, %v7724_v26 }
 0x312   :  { %6233 = vmatprep.mubr.msk.f32.mxu1 %vm2765_vm7, %v7728_v28 }
 0x315   :  { %6234 = vmatmul.mubr.msk.f32.gmra.mrb[2].mxu1 %vm2765_vm7, %v7732_v29 }
 0x316   :  { %6236 = vmatprep.mubr.msk.f32.mxu1 %vm2765_vm7, %v7736_v30 }
 0x319   :  { %6237 = vmatmul.mubr.msk.f32.gmra.mrb[4].mxu1 %vm2765_vm7, %v7740_v32 }
 0x31a   :  { %6239 = vmatprep.mubr.msk.f32.mxu1 %vm2765_vm7, %v7866_v54 }
 0x31d   :  { %6240 = vmatmul.mubr.msk.f32.gmra.mrb[6].mxu1 %vm2765_vm7, %v4633_v12 }
 0x31e   :  { %6244 = vmatprep.mubr.msk.f32.mxu1 %vm29_vm0, %v4846_v11 }
 0x321   :  { %6245 = vmatmul.mubr.msk.f32.vlgmr.msra.gmra.mrb[8].mxu1 %vm29_vm0, %v4847_v27 }
 0x322   :  { %6247 = vmatprep.mubr.msk.f32.mxu1 %vm29_vm0, %v4848_v48 }
 0x325   :  { %6248 = vmatmul.mubr.msk.f32.gmra.mrb[10].mxu1 %vm29_vm0, %v4849_v51 }
 0x326   :  { %6250 = vmatprep.mubr.msk.f32.mxu1 %vm29_vm0, %v4850_v52 }
 0x329   :  { %6251 = vmatmul.mubr.msk.f32.gmra.mrb[12].mxu1 %vm29_vm0, %v4851_v6 }
 0x32a   :  { %6253 = vmatprep.mubr.msk.f32.mxu1 %vm29_vm0, %v4852_v53 }
 0x32d   :  { %6254 = vmatmul.mubr.msk.f32.gmra.mrb[14].mxu1 %vm29_vm0, %v4853_v57 }
 0x32e   :  { %6256 = vmatprep.mubr.msk.f32.mxu1 %vm29_vm0, %v4854_v8 }
 0x331   :  { %6257 = vmatmul.mubr.msk.f32.gmra.mrb[0].mxu1 %vm29_vm0, %v4855_v10 }
 0x332   :  { %6259 = vmatprep.mubr.msk.f32.mxu1 %vm29_vm0, %v4856_v50 }
 0x335   :  { %6260 = vmatmul.mubr.msk.f32.gmra.mrb[2].mxu1 %vm29_vm0, %v4857_v56 }
 0x336   :  { %6262 = vmatprep.mubr.msk.f32.mxu1 %vm29_vm0, %v4858_v4 }
 0x339   :  { %6263 = vmatmul.mubr.msk.f32.gmra.mrb[4].mxu1 %vm29_vm0, %v4859_v5 }
 0x33a   :  { %6265 = vmatprep.mubr.msk.f32.mxu1 %vm29_vm0, %v4860_v31 }
 0x33d   :  { %6266 = vmatmul.mubr.msk.f32.gmra.mrb[6].mxu1 %vm29_vm0, %v4861_v1 }
 0x3f4   :  { %v6246_v61 = vpop.f32.mrb[8].mxu1 }
 0x3f5   :  { %v6306_v18 = vadd.f32 %v6246_v61, %v7897_v62  ;;  %v4977_v19 = vpop.f32.mrb[9].mxu1 }
 0x3f6   :  { %v6307_v21 = vadd.f32 %v4977_v19, %v7899_v16 }
 0x3f7   :  { %5073 = vst.msk [vmem:[%s8081_s8 + $0x8] sm:$0xff] %vm2765_vm7, %v6306_v18 }
 0x3f8   :  { %5072 = vst.msk [vmem:[%s8081_s8] sm:$0xff] %vm2765_vm7, %v6307_v21  ;;  %v6249_v13 = vpop.f32.mrb[10].mxu1 }
 0x3f9   :  { %v6308_v17 = vadd.f32 %v6249_v13, %v7905_v43  ;;  %v4987_v22 = vpop.f32.mrb[11].mxu1 }
 0x3fa   :  { %v6309_v23 = vadd.f32 %v4987_v22, %v7907_v55 }
 0x3fb   :  { %5075 = vst.msk [vmem:[%s8081_s8 + $0x18] sm:$0xff] %vm2765_vm7, %v6308_v17 }
 0x3fc   :  { %5074 = vst.msk [vmem:[%s8081_s8 + $0x10] sm:$0xff] %vm2765_vm7, %v6309_v23  ;;  %v6252_v2 = vpop.f32.mrb[12].mxu1 }
 0x3fd   :  { %v6310_v24 = vadd.f32 %v6252_v2, %v7913_v15  ;;  %v4997_v26 = vpop.f32.mrb[13].mxu1 }
 0x3fe   :  { %v6311_v28 = vadd.f32 %v4997_v26, %v7915_v20 }
 0x3ff   :  { %5077 = vst.msk [vmem:[%s8081_s8 + $0x28] sm:$0xff] %vm2765_vm7, %v6310_v24 }
 0x400   :  { %5076 = vst.msk [vmem:[%s8081_s8 + $0x20] sm:$0xff] %vm2765_vm7, %v6311_v28  ;;  %v6255_v29 = vpop.f32.mrb[14].mxu1 }
 0x401   :  { %v6312_v30 = vadd.f32 %v6255_v29, %v7920_v33  ;;  %v5007_v32 = vpop.f32.mrb[15].mxu1 }
 0x402   :  { %v6313_v34 = vadd.f32 %v5007_v32, %v7925_v7 }
 0x403   :  { %5079 = vst.msk [vmem:[%s8081_s8 + $0x38] sm:$0xff] %vm2765_vm7, %v6312_v30 }
 0x404   :  { %5078 = vst.msk [vmem:[%s8081_s8 + $0x30] sm:$0xff] %vm2765_vm7, %v6313_v34  ;;  %v6258_v36 = vpop.f32.mrb[0].mxu1 }
 0x405   :  { %5081 = vst.msk [vmem:[%s8081_s8 + $0x48] sm:$0xff] %vm2765_vm7, %v6258_v36  ;;  %v5017_v37 = vpop.f32.mrb[1].mxu1 }
 0x406   :  { %5080 = vst.msk [vmem:[%s8081_s8 + $0x40] sm:$0xff] %vm2765_vm7, %v5017_v37 }
 0x408   :  { %v6261_v39 = vpop.f32.mrb[2].mxu1 }
 0x409   :  { %5083 = vst.msk [vmem:[%s8081_s8 + $0x58] sm:$0xff] %vm2765_vm7, %v6261_v39  ;;  %v5027_v40 = vpop.f32.mrb[3].mxu1 }
 0x40a   :  { %5082 = vst.msk [vmem:[%s8081_s8 + $0x50] sm:$0xff] %vm2765_vm7, %v5027_v40 }
 0x40c   :  { %v6264_v41 = vpop.f32.mrb[4].mxu1 }
 0x40d   :  { %5085 = vst.msk [vmem:[%s8081_s8 + $0x68] sm:$0xff] %vm2765_vm7, %v6264_v41  ;;  %v5037_v42 = vpop.f32.mrb[5].mxu1 }
 0x40e   :  { %5084 = vst.msk [vmem:[%s8081_s8 + $0x60] sm:$0xff] %vm2765_vm7, %v5037_v42 }
 0x410   :  { %v6267_v44 = vpop.f32.mrb[6].mxu1 }
 0x411   :  { %5087 = vst.msk [vmem:[%s8081_s8 + $0x78] sm:$0xff] %vm2765_vm7, %v6267_v44  ;;  %v5047_v3 = vpop.f32.mrb[7].mxu1 }
 0x412   :  { %5086 = vst.msk [vmem:[%s8081_s8 + $0x70] sm:$0xff] %vm2765_vm7, %v5047_v3 }

</bundles_post_ra>
